<compile_context>
chip_gen: v6e
topology: v6e:2x2x1
jax: 0.10.0
libtpu: 0.0.40
codegen_flags: <defaults>
</compile_context>

<pallas_src>
import jax
import jax.numpy as jnp
from jax.experimental import pallas as pl
from jax.experimental.pallas import tpu as pltpu


def cnn_block_forward(x, weight, gamma, beta, eps=1e-5):
    """CNNBlock forward.

    x:      (N, Cin, D, H, W) f32
    weight: (Cout, Cin, 3, 3, 3) f32 (no bias)
    gamma/beta: (Cout,) f32 (BatchNorm3d affine)
    Returns (N, Cout, D, H, W) f32.
    """
    N, Cin, D, H, W = x.shape
    Cout, _, kd, kh, kw = weight.shape
    assert (kd, kh, kw) == (3, 3, 3)
    Dp, Hp, Wp = D + 2, H + 2, W + 2
    P = Dp * Hp * Wp                      # padded, flattened spatial size
    SP = D * Hp * Wp                      # output columns incl. H/W halo garbage
    n_taps = kd * kh * kw
    offsets = [a * Hp * Wp + b * Wp + c
               for a in range(kd) for b in range(kh) for c in range(kw)]
    extra = offsets[-1] + SP - P          # tail pad so every shifted slice is in-bounds
    Ptot = P + extra

    # ---- cheap XLA prep: spatial zero-pad (padding=1), flatten, cast to bf16 ----
    xp = jnp.pad(x, ((0, 0), (0, 0), (1, 1), (1, 1), (1, 1)))
    xflat = xp.reshape(N, Cin, P).astype(jnp.bfloat16)
    xflat = jnp.pad(xflat, ((0, 0), (0, 0), (0, extra)))
    # weight -> per-tap (Cout, Cin) matrices, tap index = a*9 + b*3 + c
    wt = jnp.transpose(weight, (2, 3, 4, 0, 1)).reshape(n_taps, Cout, Cin)
    wt = wt.astype(jnp.bfloat16)
    # 0/1 mask of valid (non-halo) output columns along the SP axis
    pidx = jnp.arange(SP)
    hh = (pidx % (Hp * Wp)) // Wp
    ww = pidx % Wp
    mask = ((hh < H) & (ww < W)).astype(jnp.float32).reshape(1, SP)

    # shared conv body: 27 statically shifted (Cout,Cin)x(Cin,SP) MXU dots, f32 acc
    def conv_taps(x_ref, w_ref):
        acc = jnp.zeros((Cout, SP), jnp.float32)
        for t in range(n_taps):
            off = offsets[t]
            xs = x_ref[0, :, off:off + SP]                # (Cin, SP) bf16
            acc += jnp.dot(w_ref[t], xs,
                           preferred_element_type=jnp.float32)
        return acc

    # ---- pass 1: per-sample partial BN statistics (no conv writeback to HBM) ----
    def stats_kernel(x_ref, w_ref, m_ref, sum_ref, sq_ref):
        acc = conv_taps(x_ref, w_ref)
        am = acc * m_ref[...]                             # zero halo columns
        sum_ref[...] = jnp.sum(am, axis=1, keepdims=True)[None]
        sq_ref[...] = jnp.sum(am * acc, axis=1, keepdims=True)[None]

    psum, psq = pl.pallas_call(
        stats_kernel,
        out_shape=(jax.ShapeDtypeStruct((N, Cout, 1), jnp.float32),
                   jax.ShapeDtypeStruct((N, Cout, 1), jnp.float32)),
        grid_spec=pltpu.PrefetchScalarGridSpec(
            num_scalar_prefetch=0,
            grid=(N,),
            in_specs=[pl.BlockSpec((1, Cin, Ptot), lambda n: (n, 0, 0)),
                      pl.BlockSpec((n_taps, Cout, Cin), lambda n: (0, 0, 0)),
                      pl.BlockSpec((1, SP), lambda n: (0, 0))],
            out_specs=[pl.BlockSpec((1, Cout, 1), lambda n: (n, 0, 0)),
                       pl.BlockSpec((1, Cout, 1), lambda n: (n, 0, 0))]),
        compiler_params=pltpu.CompilerParams(
            dimension_semantics=("parallel",)),
    )(xflat, wt, mask)

    # ---- tiny XLA scalar math: training-mode BN stats (biased variance) ----
    count = float(N * D * H * W)
    csum = jnp.sum(psum, axis=(0, 2))
    csq = jnp.sum(psq, axis=(0, 2))
    mean = csum / count
    var = csq / count - mean * mean       # E[x^2]-E[x]^2; fine at these magnitudes
    scale = gamma.astype(jnp.float32) * jax.lax.rsqrt(var + eps)
    shift = beta.astype(jnp.float32) - mean * scale
    scale3 = scale.reshape(1, Cout, 1)
    shift3 = shift.reshape(1, Cout, 1)

    # ---- pass 2: recompute conv (MXU-cheap) fused with BN affine + ReLU ----
    def conv_bn_relu_kernel(x_ref, w_ref, sc_ref, sh_ref, o_ref):
        acc = conv_taps(x_ref, w_ref)
        o_ref[0] = jnp.maximum(acc * sc_ref[0] + sh_ref[0], 0.0)

    y = pl.pallas_call(
        conv_bn_relu_kernel,
        out_shape=jax.ShapeDtypeStruct((N, Cout, SP), jnp.float32),
        grid_spec=pltpu.PrefetchScalarGridSpec(
            num_scalar_prefetch=0,
            grid=(N,),
            in_specs=[pl.BlockSpec((1, Cin, Ptot), lambda n: (n, 0, 0)),
                      pl.BlockSpec((n_taps, Cout, Cin), lambda n: (0, 0, 0)),
                      pl.BlockSpec((1, Cout, 1), lambda n: (0, 0, 0)),
                      pl.BlockSpec((1, Cout, 1), lambda n: (0, 0, 0))],
            out_specs=pl.BlockSpec((1, Cout, SP), lambda n: (n, 0, 0))),
        compiler_params=pltpu.CompilerParams(
            dimension_semantics=("parallel",)),
    )(xflat, wt, scale3, shift3)

    # drop H/W halo columns; output is already (N, Cout, D, H, W)
    y = y.reshape(N, Cout, D, Hp, Wp)[:, :, :, :H, :W]
    return y


if __name__ == "__main__":
    # Shapes consistent with Conv3d(in=4, out=8, k=3, s=1, p=1)
    N, Cin, Cout, D, H, W = 2, 4, 8, 8, 8, 8
    key = jax.random.PRNGKey(0)
    kx, kw_ = jax.random.split(key)
    x = jax.random.normal(kx, (N, Cin, D, H, W), dtype=jnp.float32)
    weight = 0.1 * jax.random.normal(kw_, (Cout, Cin, 3, 3, 3), dtype=jnp.float32)
    gamma = jnp.ones((Cout,), jnp.float32)   # BatchNorm3d default weight
    beta = jnp.zeros((Cout,), jnp.float32)   # BatchNorm3d default bias

    fwd = jax.jit(cnn_block_forward)
    out = fwd(x, weight, gamma, beta)
    out = jax.block_until_ready(out)

    # Pure-JAX reference (conv3d + training-mode BN + ReLU)
    ref_conv = jax.lax.conv_general_dilated(
        x, weight, window_strides=(1, 1, 1),
        padding=((1, 1), (1, 1), (1, 1)),
        dimension_numbers=("NCDHW", "OIDHW", "NCDHW"))
    m = ref_conv.mean(axis=(0, 2, 3, 4), keepdims=True)
    v = ref_conv.var(axis=(0, 2, 3, 4), keepdims=True)   # biased, BN training mode
    ref = jnp.maximum(gamma.reshape(1, -1, 1, 1, 1) *
                      (ref_conv - m) * jax.lax.rsqrt(v + 1e-5) +
                      beta.reshape(1, -1, 1, 1, 1), 0.0)

    assert out.shape == (N, Cout, D, H, W)
    # tolerance sized for bf16 MXU operands (reference runs in f32)
    assert jnp.allclose(out, ref, atol=3e-2, rtol=3e-2)
    print("KERNEL_OK")
</pallas_src>

<mosaic_0001>
module attributes {stable_mosaic.version = 11 : i64} {
  func.func @stats_kernel(%arg0: i32, %arg1: memref<1x4x1022xbf16, #tpu.memory_space<vmem>>, %arg2: memref<27x8x4xbf16, #tpu.memory_space<vmem>>, %arg3: memref<1x800xf32, #tpu.memory_space<vmem>>, %arg4: memref<1x8x1xf32, #tpu.memory_space<vmem>>, %arg5: memref<1x8x1xf32, #tpu.memory_space<vmem>>) attributes {dimension_semantics = [#tpu.dimension_semantics<parallel>], iteration_bounds = array<i64: 2>, scalar_prefetch = 0 : i64, scratch_operands = 0 : i64, tpu.core_type = #tpu.core_type<tc>, window_params = [{transform_indices = @transform_0, window_bounds = array<i64: 1, 4, 1022>}, {pipeline_mode = #tpu.pipeline_mode<synchronous>, transform_indices = @transform_1, window_bounds = array<i64: 27, 8, 4>}, {pipeline_mode = #tpu.pipeline_mode<synchronous>, transform_indices = @transform_2, window_bounds = array<i64: 1, 800>}, {transform_indices = @transform_3, window_bounds = array<i64: 1, 8, 1>}, {transform_indices = @transform_4, window_bounds = array<i64: 1, 8, 1>}]} {
    %cst = arith.constant 0.000000e+00 : f32
    %0 = vector.broadcast %cst : f32 to vector<8x800xf32>
    %c0 = arith.constant 0 : index
    %c0_0 = arith.constant 0 : index
    %c0_1 = arith.constant 0 : index
    %1 = vector.load %arg1[%c0, %c0_0, %c0_1] : memref<1x4x1022xbf16, #tpu.memory_space<vmem>>, vector<1x4x800xbf16>
    %2 = vector.shape_cast %1 : vector<1x4x800xbf16> to vector<4x800xbf16>
    %c0_2 = arith.constant 0 : index
    %c0_3 = arith.constant 0 : index
    %c0_4 = arith.constant 0 : index
    %3 = vector.load %arg2[%c0_2, %c0_3, %c0_4] : memref<27x8x4xbf16, #tpu.memory_space<vmem>>, vector<1x8x4xbf16>
    %4 = vector.shape_cast %3 : vector<1x8x4xbf16> to vector<8x4xbf16>
    %cst_5 = arith.constant dense<0.000000e+00> : vector<8x800xf32>
    %5 = tpu.matmul %4, %2, %cst_5 {dimension_numbers = #tpu.dot_dimension_numbers<[1], [0], [0], [1], [0, 0, 1, 1], [], []>} : vector<8x4xbf16>, vector<4x800xbf16>, vector<8x800xf32> -> vector<8x800xf32>
    %6 = arith.addf %0, %5 : vector<8x800xf32>
    %c0_6 = arith.constant 0 : index
    %c0_7 = arith.constant 0 : index
    %c1 = arith.constant 1 : index
    %7 = vector.load %arg1[%c0_6, %c0_7, %c1] : memref<1x4x1022xbf16, #tpu.memory_space<vmem>>, vector<1x4x800xbf16>
    %8 = vector.shape_cast %7 : vector<1x4x800xbf16> to vector<4x800xbf16>
    %c1_8 = arith.constant 1 : index
    %c0_9 = arith.constant 0 : index
    %c0_10 = arith.constant 0 : index
    %9 = vector.load %arg2[%c1_8, %c0_9, %c0_10] : memref<27x8x4xbf16, #tpu.memory_space<vmem>>, vector<1x8x4xbf16>
    %10 = vector.shape_cast %9 : vector<1x8x4xbf16> to vector<8x4xbf16>
    %cst_11 = arith.constant dense<0.000000e+00> : vector<8x800xf32>
    %11 = tpu.matmul %10, %8, %cst_11 {dimension_numbers = #tpu.dot_dimension_numbers<[1], [0], [0], [1], [0, 0, 1, 1], [], []>} : vector<8x4xbf16>, vector<4x800xbf16>, vector<8x800xf32> -> vector<8x800xf32>
    %12 = arith.addf %6, %11 : vector<8x800xf32>
    %c0_12 = arith.constant 0 : index
    %c0_13 = arith.constant 0 : index
    %c2 = arith.constant 2 : index
    %13 = vector.load %arg1[%c0_12, %c0_13, %c2] : memref<1x4x1022xbf16, #tpu.memory_space<vmem>>, vector<1x4x800xbf16>
    %14 = vector.shape_cast %13 : vector<1x4x800xbf16> to vector<4x800xbf16>
    %c2_14 = arith.constant 2 : index
    %c0_15 = arith.constant 0 : index
    %c0_16 = arith.constant 0 : index
    %15 = vector.load %arg2[%c2_14, %c0_15, %c0_16] : memref<27x8x4xbf16, #tpu.memory_space<vmem>>, vector<1x8x4xbf16>
    %16 = vector.shape_cast %15 : vector<1x8x4xbf16> to vector<8x4xbf16>
    %cst_17 = arith.constant dense<0.000000e+00> : vector<8x800xf32>
    %17 = tpu.matmul %16, %14, %cst_17 {dimension_numbers = #tpu.dot_dimension_numbers<[1], [0], [0], [1], [0, 0, 1, 1], [], []>} : vector<8x4xbf16>, vector<4x800xbf16>, vector<8x800xf32> -> vector<8x800xf32>
    %18 = arith.addf %12, %17 : vector<8x800xf32>
    %c0_18 = arith.constant 0 : index
    %c0_19 = arith.constant 0 : index
    %c10 = arith.constant 10 : index
    %19 = vector.load %arg1[%c0_18, %c0_19, %c10] : memref<1x4x1022xbf16, #tpu.memory_space<vmem>>, vector<1x4x800xbf16>
    %20 = vector.shape_cast %19 : vector<1x4x800xbf16> to vector<4x800xbf16>
    %c3 = arith.constant 3 : index
    %c0_20 = arith.constant 0 : index
    %c0_21 = arith.constant 0 : index
    %21 = vector.load %arg2[%c3, %c0_20, %c0_21] : memref<27x8x4xbf16, #tpu.memory_space<vmem>>, vector<1x8x4xbf16>
    %22 = vector.shape_cast %21 : vector<1x8x4xbf16> to vector<8x4xbf16>
    %cst_22 = arith.constant dense<0.000000e+00> : vector<8x800xf32>
    %23 = tpu.matmul %22, %20, %cst_22 {dimension_numbers = #tpu.dot_dimension_numbers<[1], [0], [0], [1], [0, 0, 1, 1], [], []>} : vector<8x4xbf16>, vector<4x800xbf16>, vector<8x800xf32> -> vector<8x800xf32>
    %24 = arith.addf %18, %23 : vector<8x800xf32>
    %c0_23 = arith.constant 0 : index
    %c0_24 = arith.constant 0 : index
    %c11 = arith.constant 11 : index
    %25 = vector.load %arg1[%c0_23, %c0_24, %c11] : memref<1x4x1022xbf16, #tpu.memory_space<vmem>>, vector<1x4x800xbf16>
    %26 = vector.shape_cast %25 : vector<1x4x800xbf16> to vector<4x800xbf16>
    %c4 = arith.constant 4 : index
    %c0_25 = arith.constant 0 : index
    %c0_26 = arith.constant 0 : index
    %27 = vector.load %arg2[%c4, %c0_25, %c0_26] : memref<27x8x4xbf16, #tpu.memory_space<vmem>>, vector<1x8x4xbf16>
    %28 = vector.shape_cast %27 : vector<1x8x4xbf16> to vector<8x4xbf16>
    %cst_27 = arith.constant dense<0.000000e+00> : vector<8x800xf32>
    %29 = tpu.matmul %28, %26, %cst_27 {dimension_numbers = #tpu.dot_dimension_numbers<[1], [0], [0], [1], [0, 0, 1, 1], [], []>} : vector<8x4xbf16>, vector<4x800xbf16>, vector<8x800xf32> -> vector<8x800xf32>
    %30 = arith.addf %24, %29 : vector<8x800xf32>
    %c0_28 = arith.constant 0 : index
    %c0_29 = arith.constant 0 : index
    %c12 = arith.constant 12 : index
    %31 = vector.load %arg1[%c0_28, %c0_29, %c12] : memref<1x4x1022xbf16, #tpu.memory_space<vmem>>, vector<1x4x800xbf16>
    %32 = vector.shape_cast %31 : vector<1x4x800xbf16> to vector<4x800xbf16>
    %c5 = arith.constant 5 : index
    %c0_30 = arith.constant 0 : index
    %c0_31 = arith.constant 0 : index
    %33 = vector.load %arg2[%c5, %c0_30, %c0_31] : memref<27x8x4xbf16, #tpu.memory_space<vmem>>, vector<1x8x4xbf16>
    %34 = vector.shape_cast %33 : vector<1x8x4xbf16> to vector<8x4xbf16>
    %cst_32 = arith.constant dense<0.000000e+00> : vector<8x800xf32>
    %35 = tpu.matmul %34, %32, %cst_32 {dimension_numbers = #tpu.dot_dimension_numbers<[1], [0], [0], [1], [0, 0, 1, 1], [], []>} : vector<8x4xbf16>, vector<4x800xbf16>, vector<8x800xf32> -> vector<8x800xf32>
    %36 = arith.addf %30, %35 : vector<8x800xf32>
    %c0_33 = arith.constant 0 : index
    %c0_34 = arith.constant 0 : index
    %c20 = arith.constant 20 : index
    %37 = vector.load %arg1[%c0_33, %c0_34, %c20] : memref<1x4x1022xbf16, #tpu.memory_space<vmem>>, vector<1x4x800xbf16>
    %38 = vector.shape_cast %37 : vector<1x4x800xbf16> to vector<4x800xbf16>
    %c6 = arith.constant 6 : index
    %c0_35 = arith.constant 0 : index
    %c0_36 = arith.constant 0 : index
    %39 = vector.load %arg2[%c6, %c0_35, %c0_36] : memref<27x8x4xbf16, #tpu.memory_space<vmem>>, vector<1x8x4xbf16>
    %40 = vector.shape_cast %39 : vector<1x8x4xbf16> to vector<8x4xbf16>
    %cst_37 = arith.constant dense<0.000000e+00> : vector<8x800xf32>
    %41 = tpu.matmul %40, %38, %cst_37 {dimension_numbers = #tpu.dot_dimension_numbers<[1], [0], [0], [1], [0, 0, 1, 1], [], []>} : vector<8x4xbf16>, vector<4x800xbf16>, vector<8x800xf32> -> vector<8x800xf32>
    %42 = arith.addf %36, %41 : vector<8x800xf32>
    %c0_38 = arith.constant 0 : index
    %c0_39 = arith.constant 0 : index
    %c21 = arith.constant 21 : index
    %43 = vector.load %arg1[%c0_38, %c0_39, %c21] : memref<1x4x1022xbf16, #tpu.memory_space<vmem>>, vector<1x4x800xbf16>
    %44 = vector.shape_cast %43 : vector<1x4x800xbf16> to vector<4x800xbf16>
    %c7 = arith.constant 7 : index
    %c0_40 = arith.constant 0 : index
    %c0_41 = arith.constant 0 : index
    %45 = vector.load %arg2[%c7, %c0_40, %c0_41] : memref<27x8x4xbf16, #tpu.memory_space<vmem>>, vector<1x8x4xbf16>
    %46 = vector.shape_cast %45 : vector<1x8x4xbf16> to vector<8x4xbf16>
    %cst_42 = arith.constant dense<0.000000e+00> : vector<8x800xf32>
    %47 = tpu.matmul %46, %44, %cst_42 {dimension_numbers = #tpu.dot_dimension_numbers<[1], [0], [0], [1], [0, 0, 1, 1], [], []>} : vector<8x4xbf16>, vector<4x800xbf16>, vector<8x800xf32> -> vector<8x800xf32>
    %48 = arith.addf %42, %47 : vector<8x800xf32>
    %c0_43 = arith.constant 0 : index
    %c0_44 = arith.constant 0 : index
    %c22 = arith.constant 22 : index
    %49 = vector.load %arg1[%c0_43, %c0_44, %c22] : memref<1x4x1022xbf16, #tpu.memory_space<vmem>>, vector<1x4x800xbf16>
    %50 = vector.shape_cast %49 : vector<1x4x800xbf16> to vector<4x800xbf16>
    %c8 = arith.constant 8 : index
    %c0_45 = arith.constant 0 : index
    %c0_46 = arith.constant 0 : index
    %51 = vector.load %arg2[%c8, %c0_45, %c0_46] : memref<27x8x4xbf16, #tpu.memory_space<vmem>>, vector<1x8x4xbf16>
    %52 = vector.shape_cast %51 : vector<1x8x4xbf16> to vector<8x4xbf16>
    %cst_47 = arith.constant dense<0.000000e+00> : vector<8x800xf32>
    %53 = tpu.matmul %52, %50, %cst_47 {dimension_numbers = #tpu.dot_dimension_numbers<[1], [0], [0], [1], [0, 0, 1, 1], [], []>} : vector<8x4xbf16>, vector<4x800xbf16>, vector<8x800xf32> -> vector<8x800xf32>
    %54 = arith.addf %48, %53 : vector<8x800xf32>
    %c0_48 = arith.constant 0 : index
    %c0_49 = arith.constant 0 : index
    %c100 = arith.constant 100 : index
    %55 = vector.load %arg1[%c0_48, %c0_49, %c100] : memref<1x4x1022xbf16, #tpu.memory_space<vmem>>, vector<1x4x800xbf16>
    %56 = vector.shape_cast %55 : vector<1x4x800xbf16> to vector<4x800xbf16>
    %c9 = arith.constant 9 : index
    %c0_50 = arith.constant 0 : index
    %c0_51 = arith.constant 0 : index
    %57 = vector.load %arg2[%c9, %c0_50, %c0_51] : memref<27x8x4xbf16, #tpu.memory_space<vmem>>, vector<1x8x4xbf16>
    %58 = vector.shape_cast %57 : vector<1x8x4xbf16> to vector<8x4xbf16>
    %cst_52 = arith.constant dense<0.000000e+00> : vector<8x800xf32>
    %59 = tpu.matmul %58, %56, %cst_52 {dimension_numbers = #tpu.dot_dimension_numbers<[1], [0], [0], [1], [0, 0, 1, 1], [], []>} : vector<8x4xbf16>, vector<4x800xbf16>, vector<8x800xf32> -> vector<8x800xf32>
    %60 = arith.addf %54, %59 : vector<8x800xf32>
    %c0_53 = arith.constant 0 : index
    %c0_54 = arith.constant 0 : index
    %c101 = arith.constant 101 : index
    %61 = vector.load %arg1[%c0_53, %c0_54, %c101] : memref<1x4x1022xbf16, #tpu.memory_space<vmem>>, vector<1x4x800xbf16>
    %62 = vector.shape_cast %61 : vector<1x4x800xbf16> to vector<4x800xbf16>
    %c10_55 = arith.constant 10 : index
    %c0_56 = arith.constant 0 : index
    %c0_57 = arith.constant 0 : index
    %63 = vector.load %arg2[%c10_55, %c0_56, %c0_57] : memref<27x8x4xbf16, #tpu.memory_space<vmem>>, vector<1x8x4xbf16>
    %64 = vector.shape_cast %63 : vector<1x8x4xbf16> to vector<8x4xbf16>
    %cst_58 = arith.constant dense<0.000000e+00> : vector<8x800xf32>
    %65 = tpu.matmul %64, %62, %cst_58 {dimension_numbers = #tpu.dot_dimension_numbers<[1], [0], [0], [1], [0, 0, 1, 1], [], []>} : vector<8x4xbf16>, vector<4x800xbf16>, vector<8x800xf32> -> vector<8x800xf32>
    %66 = arith.addf %60, %65 : vector<8x800xf32>
    %c0_59 = arith.constant 0 : index
    %c0_60 = arith.constant 0 : index
    %c102 = arith.constant 102 : index
    %67 = vector.load %arg1[%c0_59, %c0_60, %c102] : memref<1x4x1022xbf16, #tpu.memory_space<vmem>>, vector<1x4x800xbf16>
    %68 = vector.shape_cast %67 : vector<1x4x800xbf16> to vector<4x800xbf16>
    %c11_61 = arith.constant 11 : index
    %c0_62 = arith.constant 0 : index
    %c0_63 = arith.constant 0 : index
    %69 = vector.load %arg2[%c11_61, %c0_62, %c0_63] : memref<27x8x4xbf16, #tpu.memory_space<vmem>>, vector<1x8x4xbf16>
    %70 = vector.shape_cast %69 : vector<1x8x4xbf16> to vector<8x4xbf16>
    %cst_64 = arith.constant dense<0.000000e+00> : vector<8x800xf32>
    %71 = tpu.matmul %70, %68, %cst_64 {dimension_numbers = #tpu.dot_dimension_numbers<[1], [0], [0], [1], [0, 0, 1, 1], [], []>} : vector<8x4xbf16>, vector<4x800xbf16>, vector<8x800xf32> -> vector<8x800xf32>
    %72 = arith.addf %66, %71 : vector<8x800xf32>
    %c0_65 = arith.constant 0 : index
    %c0_66 = arith.constant 0 : index
    %c110 = arith.constant 110 : index
    %73 = vector.load %arg1[%c0_65, %c0_66, %c110] : memref<1x4x1022xbf16, #tpu.memory_space<vmem>>, vector<1x4x800xbf16>
    %74 = vector.shape_cast %73 : vector<1x4x800xbf16> to vector<4x800xbf16>
    %c12_67 = arith.constant 12 : index
    %c0_68 = arith.constant 0 : index
    %c0_69 = arith.constant 0 : index
    %75 = vector.load %arg2[%c12_67, %c0_68, %c0_69] : memref<27x8x4xbf16, #tpu.memory_space<vmem>>, vector<1x8x4xbf16>
    %76 = vector.shape_cast %75 : vector<1x8x4xbf16> to vector<8x4xbf16>
    %cst_70 = arith.constant dense<0.000000e+00> : vector<8x800xf32>
    %77 = tpu.matmul %76, %74, %cst_70 {dimension_numbers = #tpu.dot_dimension_numbers<[1], [0], [0], [1], [0, 0, 1, 1], [], []>} : vector<8x4xbf16>, vector<4x800xbf16>, vector<8x800xf32> -> vector<8x800xf32>
    %78 = arith.addf %72, %77 : vector<8x800xf32>
    %c0_71 = arith.constant 0 : index
    %c0_72 = arith.constant 0 : index
    %c111 = arith.constant 111 : index
    %79 = vector.load %arg1[%c0_71, %c0_72, %c111] : memref<1x4x1022xbf16, #tpu.memory_space<vmem>>, vector<1x4x800xbf16>
    %80 = vector.shape_cast %79 : vector<1x4x800xbf16> to vector<4x800xbf16>
    %c13 = arith.constant 13 : index
    %c0_73 = arith.constant 0 : index
    %c0_74 = arith.constant 0 : index
    %81 = vector.load %arg2[%c13, %c0_73, %c0_74] : memref<27x8x4xbf16, #tpu.memory_space<vmem>>, vector<1x8x4xbf16>
    %82 = vector.shape_cast %81 : vector<1x8x4xbf16> to vector<8x4xbf16>
    %cst_75 = arith.constant dense<0.000000e+00> : vector<8x800xf32>
    %83 = tpu.matmul %82, %80, %cst_75 {dimension_numbers = #tpu.dot_dimension_numbers<[1], [0], [0], [1], [0, 0, 1, 1], [], []>} : vector<8x4xbf16>, vector<4x800xbf16>, vector<8x800xf32> -> vector<8x800xf32>
    %84 = arith.addf %78, %83 : vector<8x800xf32>
    %c0_76 = arith.constant 0 : index
    %c0_77 = arith.constant 0 : index
    %c112 = arith.constant 112 : index
    %85 = vector.load %arg1[%c0_76, %c0_77, %c112] : memref<1x4x1022xbf16, #tpu.memory_space<vmem>>, vector<1x4x800xbf16>
    %86 = vector.shape_cast %85 : vector<1x4x800xbf16> to vector<4x800xbf16>
    %c14 = arith.constant 14 : index
    %c0_78 = arith.constant 0 : index
    %c0_79 = arith.constant 0 : index
    %87 = vector.load %arg2[%c14, %c0_78, %c0_79] : memref<27x8x4xbf16, #tpu.memory_space<vmem>>, vector<1x8x4xbf16>
    %88 = vector.shape_cast %87 : vector<1x8x4xbf16> to vector<8x4xbf16>
    %cst_80 = arith.constant dense<0.000000e+00> : vector<8x800xf32>
    %89 = tpu.matmul %88, %86, %cst_80 {dimension_numbers = #tpu.dot_dimension_numbers<[1], [0], [0], [1], [0, 0, 1, 1], [], []>} : vector<8x4xbf16>, vector<4x800xbf16>, vector<8x800xf32> -> vector<8x800xf32>
    %90 = arith.addf %84, %89 : vector<8x800xf32>
    %c0_81 = arith.constant 0 : index
    %c0_82 = arith.constant 0 : index
    %c120 = arith.constant 120 : index
    %91 = vector.load %arg1[%c0_81, %c0_82, %c120] : memref<1x4x1022xbf16, #tpu.memory_space<vmem>>, vector<1x4x800xbf16>
    %92 = vector.shape_cast %91 : vector<1x4x800xbf16> to vector<4x800xbf16>
    %c15 = arith.constant 15 : index
    %c0_83 = arith.constant 0 : index
    %c0_84 = arith.constant 0 : index
    %93 = vector.load %arg2[%c15, %c0_83, %c0_84] : memref<27x8x4xbf16, #tpu.memory_space<vmem>>, vector<1x8x4xbf16>
    %94 = vector.shape_cast %93 : vector<1x8x4xbf16> to vector<8x4xbf16>
    %cst_85 = arith.constant dense<0.000000e+00> : vector<8x800xf32>
    %95 = tpu.matmul %94, %92, %cst_85 {dimension_numbers = #tpu.dot_dimension_numbers<[1], [0], [0], [1], [0, 0, 1, 1], [], []>} : vector<8x4xbf16>, vector<4x800xbf16>, vector<8x800xf32> -> vector<8x800xf32>
    %96 = arith.addf %90, %95 : vector<8x800xf32>
    %c0_86 = arith.constant 0 : index
    %c0_87 = arith.constant 0 : index
    %c121 = arith.constant 121 : index
    %97 = vector.load %arg1[%c0_86, %c0_87, %c121] : memref<1x4x1022xbf16, #tpu.memory_space<vmem>>, vector<1x4x800xbf16>
    %98 = vector.shape_cast %97 : vector<1x4x800xbf16> to vector<4x800xbf16>
    %c16 = arith.constant 16 : index
    %c0_88 = arith.constant 0 : index
    %c0_89 = arith.constant 0 : index
    %99 = vector.load %arg2[%c16, %c0_88, %c0_89] : memref<27x8x4xbf16, #tpu.memory_space<vmem>>, vector<1x8x4xbf16>
    %100 = vector.shape_cast %99 : vector<1x8x4xbf16> to vector<8x4xbf16>
    %cst_90 = arith.constant dense<0.000000e+00> : vector<8x800xf32>
    %101 = tpu.matmul %100, %98, %cst_90 {dimension_numbers = #tpu.dot_dimension_numbers<[1], [0], [0], [1], [0, 0, 1, 1], [], []>} : vector<8x4xbf16>, vector<4x800xbf16>, vector<8x800xf32> -> vector<8x800xf32>
    %102 = arith.addf %96, %101 : vector<8x800xf32>
    %c0_91 = arith.constant 0 : index
    %c0_92 = arith.constant 0 : index
    %c122 = arith.constant 122 : index
    %103 = vector.load %arg1[%c0_91, %c0_92, %c122] : memref<1x4x1022xbf16, #tpu.memory_space<vmem>>, vector<1x4x800xbf16>
    %104 = vector.shape_cast %103 : vector<1x4x800xbf16> to vector<4x800xbf16>
    %c17 = arith.constant 17 : index
    %c0_93 = arith.constant 0 : index
    %c0_94 = arith.constant 0 : index
    %105 = vector.load %arg2[%c17, %c0_93, %c0_94] : memref<27x8x4xbf16, #tpu.memory_space<vmem>>, vector<1x8x4xbf16>
    %106 = vector.shape_cast %105 : vector<1x8x4xbf16> to vector<8x4xbf16>
    %cst_95 = arith.constant dense<0.000000e+00> : vector<8x800xf32>
    %107 = tpu.matmul %106, %104, %cst_95 {dimension_numbers = #tpu.dot_dimension_numbers<[1], [0], [0], [1], [0, 0, 1, 1], [], []>} : vector<8x4xbf16>, vector<4x800xbf16>, vector<8x800xf32> -> vector<8x800xf32>
    %108 = arith.addf %102, %107 : vector<8x800xf32>
    %c0_96 = arith.constant 0 : index
    %c0_97 = arith.constant 0 : index
    %c200 = arith.constant 200 : index
    %109 = vector.load %arg1[%c0_96, %c0_97, %c200] : memref<1x4x1022xbf16, #tpu.memory_space<vmem>>, vector<1x4x800xbf16>
    %110 = vector.shape_cast %109 : vector<1x4x800xbf16> to vector<4x800xbf16>
    %c18 = arith.constant 18 : index
    %c0_98 = arith.constant 0 : index
    %c0_99 = arith.constant 0 : index
    %111 = vector.load %arg2[%c18, %c0_98, %c0_99] : memref<27x8x4xbf16, #tpu.memory_space<vmem>>, vector<1x8x4xbf16>
    %112 = vector.shape_cast %111 : vector<1x8x4xbf16> to vector<8x4xbf16>
    %cst_100 = arith.constant dense<0.000000e+00> : vector<8x800xf32>
    %113 = tpu.matmul %112, %110, %cst_100 {dimension_numbers = #tpu.dot_dimension_numbers<[1], [0], [0], [1], [0, 0, 1, 1], [], []>} : vector<8x4xbf16>, vector<4x800xbf16>, vector<8x800xf32> -> vector<8x800xf32>
    %114 = arith.addf %108, %113 : vector<8x800xf32>
    %c0_101 = arith.constant 0 : index
    %c0_102 = arith.constant 0 : index
    %c201 = arith.constant 201 : index
    %115 = vector.load %arg1[%c0_101, %c0_102, %c201] : memref<1x4x1022xbf16, #tpu.memory_space<vmem>>, vector<1x4x800xbf16>
    %116 = vector.shape_cast %115 : vector<1x4x800xbf16> to vector<4x800xbf16>
    %c19 = arith.constant 19 : index
    %c0_103 = arith.constant 0 : index
    %c0_104 = arith.constant 0 : index
    %117 = vector.load %arg2[%c19, %c0_103, %c0_104] : memref<27x8x4xbf16, #tpu.memory_space<vmem>>, vector<1x8x4xbf16>
    %118 = vector.shape_cast %117 : vector<1x8x4xbf16> to vector<8x4xbf16>
    %cst_105 = arith.constant dense<0.000000e+00> : vector<8x800xf32>
    %119 = tpu.matmul %118, %116, %cst_105 {dimension_numbers = #tpu.dot_dimension_numbers<[1], [0], [0], [1], [0, 0, 1, 1], [], []>} : vector<8x4xbf16>, vector<4x800xbf16>, vector<8x800xf32> -> vector<8x800xf32>
    %120 = arith.addf %114, %119 : vector<8x800xf32>
    %c0_106 = arith.constant 0 : index
    %c0_107 = arith.constant 0 : index
    %c202 = arith.constant 202 : index
    %121 = vector.load %arg1[%c0_106, %c0_107, %c202] : memref<1x4x1022xbf16, #tpu.memory_space<vmem>>, vector<1x4x800xbf16>
    %122 = vector.shape_cast %121 : vector<1x4x800xbf16> to vector<4x800xbf16>
    %c20_108 = arith.constant 20 : index
    %c0_109 = arith.constant 0 : index
    %c0_110 = arith.constant 0 : index
    %123 = vector.load %arg2[%c20_108, %c0_109, %c0_110] : memref<27x8x4xbf16, #tpu.memory_space<vmem>>, vector<1x8x4xbf16>
    %124 = vector.shape_cast %123 : vector<1x8x4xbf16> to vector<8x4xbf16>
    %cst_111 = arith.constant dense<0.000000e+00> : vector<8x800xf32>
    %125 = tpu.matmul %124, %122, %cst_111 {dimension_numbers = #tpu.dot_dimension_numbers<[1], [0], [0], [1], [0, 0, 1, 1], [], []>} : vector<8x4xbf16>, vector<4x800xbf16>, vector<8x800xf32> -> vector<8x800xf32>
    %126 = arith.addf %120, %125 : vector<8x800xf32>
    %c0_112 = arith.constant 0 : index
    %c0_113 = arith.constant 0 : index
    %c210 = arith.constant 210 : index
    %127 = vector.load %arg1[%c0_112, %c0_113, %c210] : memref<1x4x1022xbf16, #tpu.memory_space<vmem>>, vector<1x4x800xbf16>
    %128 = vector.shape_cast %127 : vector<1x4x800xbf16> to vector<4x800xbf16>
    %c21_114 = arith.constant 21 : index
    %c0_115 = arith.constant 0 : index
    %c0_116 = arith.constant 0 : index
    %129 = vector.load %arg2[%c21_114, %c0_115, %c0_116] : memref<27x8x4xbf16, #tpu.memory_space<vmem>>, vector<1x8x4xbf16>
    %130 = vector.shape_cast %129 : vector<1x8x4xbf16> to vector<8x4xbf16>
    %cst_117 = arith.constant dense<0.000000e+00> : vector<8x800xf32>
    %131 = tpu.matmul %130, %128, %cst_117 {dimension_numbers = #tpu.dot_dimension_numbers<[1], [0], [0], [1], [0, 0, 1, 1], [], []>} : vector<8x4xbf16>, vector<4x800xbf16>, vector<8x800xf32> -> vector<8x800xf32>
    %132 = arith.addf %126, %131 : vector<8x800xf32>
    %c0_118 = arith.constant 0 : index
    %c0_119 = arith.constant 0 : index
    %c211 = arith.constant 211 : index
    %133 = vector.load %arg1[%c0_118, %c0_119, %c211] : memref<1x4x1022xbf16, #tpu.memory_space<vmem>>, vector<1x4x800xbf16>
    %134 = vector.shape_cast %133 : vector<1x4x800xbf16> to vector<4x800xbf16>
    %c22_120 = arith.constant 22 : index
    %c0_121 = arith.constant 0 : index
    %c0_122 = arith.constant 0 : index
    %135 = vector.load %arg2[%c22_120, %c0_121, %c0_122] : memref<27x8x4xbf16, #tpu.memory_space<vmem>>, vector<1x8x4xbf16>
    %136 = vector.shape_cast %135 : vector<1x8x4xbf16> to vector<8x4xbf16>
    %cst_123 = arith.constant dense<0.000000e+00> : vector<8x800xf32>
    %137 = tpu.matmul %136, %134, %cst_123 {dimension_numbers = #tpu.dot_dimension_numbers<[1], [0], [0], [1], [0, 0, 1, 1], [], []>} : vector<8x4xbf16>, vector<4x800xbf16>, vector<8x800xf32> -> vector<8x800xf32>
    %138 = arith.addf %132, %137 : vector<8x800xf32>
    %c0_124 = arith.constant 0 : index
    %c0_125 = arith.constant 0 : index
    %c212 = arith.constant 212 : index
    %139 = vector.load %arg1[%c0_124, %c0_125, %c212] : memref<1x4x1022xbf16, #tpu.memory_space<vmem>>, vector<1x4x800xbf16>
    %140 = vector.shape_cast %139 : vector<1x4x800xbf16> to vector<4x800xbf16>
    %c23 = arith.constant 23 : index
    %c0_126 = arith.constant 0 : index
    %c0_127 = arith.constant 0 : index
    %141 = vector.load %arg2[%c23, %c0_126, %c0_127] : memref<27x8x4xbf16, #tpu.memory_space<vmem>>, vector<1x8x4xbf16>
    %142 = vector.shape_cast %141 : vector<1x8x4xbf16> to vector<8x4xbf16>
    %cst_128 = arith.constant dense<0.000000e+00> : vector<8x800xf32>
    %143 = tpu.matmul %142, %140, %cst_128 {dimension_numbers = #tpu.dot_dimension_numbers<[1], [0], [0], [1], [0, 0, 1, 1], [], []>} : vector<8x4xbf16>, vector<4x800xbf16>, vector<8x800xf32> -> vector<8x800xf32>
    %144 = arith.addf %138, %143 : vector<8x800xf32>
    %c0_129 = arith.constant 0 : index
    %c0_130 = arith.constant 0 : index
    %c220 = arith.constant 220 : index
    %145 = vector.load %arg1[%c0_129, %c0_130, %c220] : memref<1x4x1022xbf16, #tpu.memory_space<vmem>>, vector<1x4x800xbf16>
    %146 = vector.shape_cast %145 : vector<1x4x800xbf16> to vector<4x800xbf16>
    %c24 = arith.constant 24 : index
    %c0_131 = arith.constant 0 : index
    %c0_132 = arith.constant 0 : index
    %147 = vector.load %arg2[%c24, %c0_131, %c0_132] : memref<27x8x4xbf16, #tpu.memory_space<vmem>>, vector<1x8x4xbf16>
    %148 = vector.shape_cast %147 : vector<1x8x4xbf16> to vector<8x4xbf16>
    %cst_133 = arith.constant dense<0.000000e+00> : vector<8x800xf32>
    %149 = tpu.matmul %148, %146, %cst_133 {dimension_numbers = #tpu.dot_dimension_numbers<[1], [0], [0], [1], [0, 0, 1, 1], [], []>} : vector<8x4xbf16>, vector<4x800xbf16>, vector<8x800xf32> -> vector<8x800xf32>
    %150 = arith.addf %144, %149 : vector<8x800xf32>
    %c0_134 = arith.constant 0 : index
    %c0_135 = arith.constant 0 : index
    %c221 = arith.constant 221 : index
    %151 = vector.load %arg1[%c0_134, %c0_135, %c221] : memref<1x4x1022xbf16, #tpu.memory_space<vmem>>, vector<1x4x800xbf16>
    %152 = vector.shape_cast %151 : vector<1x4x800xbf16> to vector<4x800xbf16>
    %c25 = arith.constant 25 : index
    %c0_136 = arith.constant 0 : index
    %c0_137 = arith.constant 0 : index
    %153 = vector.load %arg2[%c25, %c0_136, %c0_137] : memref<27x8x4xbf16, #tpu.memory_space<vmem>>, vector<1x8x4xbf16>
    %154 = vector.shape_cast %153 : vector<1x8x4xbf16> to vector<8x4xbf16>
    %cst_138 = arith.constant dense<0.000000e+00> : vector<8x800xf32>
    %155 = tpu.matmul %154, %152, %cst_138 {dimension_numbers = #tpu.dot_dimension_numbers<[1], [0], [0], [1], [0, 0, 1, 1], [], []>} : vector<8x4xbf16>, vector<4x800xbf16>, vector<8x800xf32> -> vector<8x800xf32>
    %156 = arith.addf %150, %155 : vector<8x800xf32>
    %c0_139 = arith.constant 0 : index
    %c0_140 = arith.constant 0 : index
    %c222 = arith.constant 222 : index
    %157 = vector.load %arg1[%c0_139, %c0_140, %c222] : memref<1x4x1022xbf16, #tpu.memory_space<vmem>>, vector<1x4x800xbf16>
    %158 = vector.shape_cast %157 : vector<1x4x800xbf16> to vector<4x800xbf16>
    %c26 = arith.constant 26 : index
    %c0_141 = arith.constant 0 : index
    %c0_142 = arith.constant 0 : index
    %159 = vector.load %arg2[%c26, %c0_141, %c0_142] : memref<27x8x4xbf16, #tpu.memory_space<vmem>>, vector<1x8x4xbf16>
    %160 = vector.shape_cast %159 : vector<1x8x4xbf16> to vector<8x4xbf16>
    %cst_143 = arith.constant dense<0.000000e+00> : vector<8x800xf32>
    %161 = tpu.matmul %160, %158, %cst_143 {dimension_numbers = #tpu.dot_dimension_numbers<[1], [0], [0], [1], [0, 0, 1, 1], [], []>} : vector<8x4xbf16>, vector<4x800xbf16>, vector<8x800xf32> -> vector<8x800xf32>
    %162 = arith.addf %156, %161 : vector<8x800xf32>
    %c0_144 = arith.constant 0 : index
    %c0_145 = arith.constant 0 : index
    %163 = vector.load %arg3[%c0_144, %c0_145] : memref<1x800xf32, #tpu.memory_space<vmem>>, vector<1x800xf32>
    %164 = vector.broadcast %163 : vector<1x800xf32> to vector<8x800xf32>
    %165 = arith.mulf %162, %164 : vector<8x800xf32>
    %cst_146 = arith.constant dense<0.000000e+00> : vector<8xf32>
    %166 = vector.multi_reduction <add>, %165, %cst_146 [1] : vector<8x800xf32> to vector<8xf32>
    %167 = vector.shape_cast %166 : vector<8xf32> to vector<8x1xf32>
    %168 = vector.shape_cast %167 : vector<8x1xf32> to vector<1x8x1xf32>
    %c0_147 = arith.constant 0 : index
    %c0_148 = arith.constant 0 : index
    %c0_149 = arith.constant 0 : index
    %169 = vector.load %arg4[%c0_147, %c0_148, %c0_149] : memref<1x8x1xf32, #tpu.memory_space<vmem>>, vector<1x8x1xf32>
    tpu.vector_store %arg4[%c0_147, %c0_148, %c0_149], %168 {strides = array<i32>} : memref<1x8x1xf32, #tpu.memory_space<vmem>>, vector<1x8x1xf32>,
    %170 = arith.mulf %165, %162 : vector<8x800xf32>
    %cst_150 = arith.constant dense<0.000000e+00> : vector<8xf32>
    %171 = vector.multi_reduction <add>, %170, %cst_150 [1] : vector<8x800xf32> to vector<8xf32>
    %172 = vector.shape_cast %171 : vector<8xf32> to vector<8x1xf32>
    %173 = vector.shape_cast %172 : vector<8x1xf32> to vector<1x8x1xf32>
    %c0_151 = arith.constant 0 : index
    %c0_152 = arith.constant 0 : index
    %c0_153 = arith.constant 0 : index
    %174 = vector.load %arg5[%c0_151, %c0_152, %c0_153] : memref<1x8x1xf32, #tpu.memory_space<vmem>>, vector<1x8x1xf32>
    tpu.vector_store %arg5[%c0_151, %c0_152, %c0_153], %173 {strides = array<i32>} : memref<1x8x1xf32, #tpu.memory_space<vmem>>, vector<1x8x1xf32>,
    return
  }
  func.func @transform_0(%arg0: i32) -> (i32, i32, i32) {
    %c0_i32 = arith.constant 0 : i32
    %c0_i32_0 = arith.constant 0 : i32
    %c0_i32_1 = arith.constant 0 : i32
    return %arg0, %c0_i32, %c0_i32_0 : i32, i32, i32
  }
  func.func @transform_1(%arg0: i32) -> (i32, i32, i32) {
    %c0_i32 = arith.constant 0 : i32
    %c0_i32_0 = arith.constant 0 : i32
    %c0_i32_1 = arith.constant 0 : i32
    %c0_i32_2 = arith.constant 0 : i32
    return %c0_i32, %c0_i32_0, %c0_i32_1 : i32, i32, i32
  }
  func.func @transform_2(%arg0: i32) -> (i32, i32) {
    %c0_i32 = arith.constant 0 : i32
    %c0_i32_0 = arith.constant 0 : i32
    %c0_i32_1 = arith.constant 0 : i32
    return %c0_i32, %c0_i32_0 : i32, i32
  }
  func.func @transform_3(%arg0: i32) -> (i32, i32, i32) {
    %c0_i32 = arith.constant 0 : i32
    %c0_i32_0 = arith.constant 0 : i32
    %c0_i32_1 = arith.constant 0 : i32
    return %arg0, %c0_i32, %c0_i32_0 : i32, i32, i32
  }
  func.func @transform_4(%arg0: i32) -> (i32, i32, i32) {
    %c0_i32 = arith.constant 0 : i32
    %c0_i32_0 = arith.constant 0 : i32
    %c0_i32_1 = arith.constant 0 : i32
    return %arg0, %c0_i32, %c0_i32_0 : i32, i32, i32
  }
}

module attributes {stable_mosaic.version = 11 : i64} {
  func.func @conv_bn_relu_kernel(%arg0: i32, %arg1: memref<1x4x1022xbf16, #tpu.memory_space<vmem>>, %arg2: memref<27x8x4xbf16, #tpu.memory_space<vmem>>, %arg3: memref<1x8x1xf32, #tpu.memory_space<vmem>>, %arg4: memref<1x8x1xf32, #tpu.memory_space<vmem>>, %arg5: memref<1x8x800xf32, #tpu.memory_space<vmem>>) attributes {dimension_semantics = [#tpu.dimension_semantics<parallel>], iteration_bounds = array<i64: 2>, scalar_prefetch = 0 : i64, scratch_operands = 0 : i64, tpu.core_type = #tpu.core_type<tc>, window_params = [{transform_indices = @transform_0, window_bounds = array<i64: 1, 4, 1022>}, {pipeline_mode = #tpu.pipeline_mode<synchronous>, transform_indices = @transform_1, window_bounds = array<i64: 27, 8, 4>}, {pipeline_mode = #tpu.pipeline_mode<synchronous>, transform_indices = @transform_2, window_bounds = array<i64: 1, 8, 1>}, {pipeline_mode = #tpu.pipeline_mode<synchronous>, transform_indices = @transform_3, window_bounds = array<i64: 1, 8, 1>}, {transform_indices = @transform_4, window_bounds = array<i64: 1, 8, 800>}]} {
    %cst = arith.constant 0.000000e+00 : f32
    %0 = vector.broadcast %cst : f32 to vector<8x800xf32>
    %c0 = arith.constant 0 : index
    %c0_0 = arith.constant 0 : index
    %c0_1 = arith.constant 0 : index
    %1 = vector.load %arg1[%c0, %c0_0, %c0_1] : memref<1x4x1022xbf16, #tpu.memory_space<vmem>>, vector<1x4x800xbf16>
    %2 = vector.shape_cast %1 : vector<1x4x800xbf16> to vector<4x800xbf16>
    %c0_2 = arith.constant 0 : index
    %c0_3 = arith.constant 0 : index
    %c0_4 = arith.constant 0 : index
    %3 = vector.load %arg2[%c0_2, %c0_3, %c0_4] : memref<27x8x4xbf16, #tpu.memory_space<vmem>>, vector<1x8x4xbf16>
    %4 = vector.shape_cast %3 : vector<1x8x4xbf16> to vector<8x4xbf16>
    %cst_5 = arith.constant dense<0.000000e+00> : vector<8x800xf32>
    %5 = tpu.matmul %4, %2, %cst_5 {dimension_numbers = #tpu.dot_dimension_numbers<[1], [0], [0], [1], [0, 0, 1, 1], [], []>} : vector<8x4xbf16>, vector<4x800xbf16>, vector<8x800xf32> -> vector<8x800xf32>
    %6 = arith.addf %0, %5 : vector<8x800xf32>
    %c0_6 = arith.constant 0 : index
    %c0_7 = arith.constant 0 : index
    %c1 = arith.constant 1 : index
    %7 = vector.load %arg1[%c0_6, %c0_7, %c1] : memref<1x4x1022xbf16, #tpu.memory_space<vmem>>, vector<1x4x800xbf16>
    %8 = vector.shape_cast %7 : vector<1x4x800xbf16> to vector<4x800xbf16>
    %c1_8 = arith.constant 1 : index
    %c0_9 = arith.constant 0 : index
    %c0_10 = arith.constant 0 : index
    %9 = vector.load %arg2[%c1_8, %c0_9, %c0_10] : memref<27x8x4xbf16, #tpu.memory_space<vmem>>, vector<1x8x4xbf16>
    %10 = vector.shape_cast %9 : vector<1x8x4xbf16> to vector<8x4xbf16>
    %cst_11 = arith.constant dense<0.000000e+00> : vector<8x800xf32>
    %11 = tpu.matmul %10, %8, %cst_11 {dimension_numbers = #tpu.dot_dimension_numbers<[1], [0], [0], [1], [0, 0, 1, 1], [], []>} : vector<8x4xbf16>, vector<4x800xbf16>, vector<8x800xf32> -> vector<8x800xf32>
    %12 = arith.addf %6, %11 : vector<8x800xf32>
    %c0_12 = arith.constant 0 : index
    %c0_13 = arith.constant 0 : index
    %c2 = arith.constant 2 : index
    %13 = vector.load %arg1[%c0_12, %c0_13, %c2] : memref<1x4x1022xbf16, #tpu.memory_space<vmem>>, vector<1x4x800xbf16>
    %14 = vector.shape_cast %13 : vector<1x4x800xbf16> to vector<4x800xbf16>
    %c2_14 = arith.constant 2 : index
    %c0_15 = arith.constant 0 : index
    %c0_16 = arith.constant 0 : index
    %15 = vector.load %arg2[%c2_14, %c0_15, %c0_16] : memref<27x8x4xbf16, #tpu.memory_space<vmem>>, vector<1x8x4xbf16>
    %16 = vector.shape_cast %15 : vector<1x8x4xbf16> to vector<8x4xbf16>
    %cst_17 = arith.constant dense<0.000000e+00> : vector<8x800xf32>
    %17 = tpu.matmul %16, %14, %cst_17 {dimension_numbers = #tpu.dot_dimension_numbers<[1], [0], [0], [1], [0, 0, 1, 1], [], []>} : vector<8x4xbf16>, vector<4x800xbf16>, vector<8x800xf32> -> vector<8x800xf32>
    %18 = arith.addf %12, %17 : vector<8x800xf32>
    %c0_18 = arith.constant 0 : index
    %c0_19 = arith.constant 0 : index
    %c10 = arith.constant 10 : index
    %19 = vector.load %arg1[%c0_18, %c0_19, %c10] : memref<1x4x1022xbf16, #tpu.memory_space<vmem>>, vector<1x4x800xbf16>
    %20 = vector.shape_cast %19 : vector<1x4x800xbf16> to vector<4x800xbf16>
    %c3 = arith.constant 3 : index
    %c0_20 = arith.constant 0 : index
    %c0_21 = arith.constant 0 : index
    %21 = vector.load %arg2[%c3, %c0_20, %c0_21] : memref<27x8x4xbf16, #tpu.memory_space<vmem>>, vector<1x8x4xbf16>
    %22 = vector.shape_cast %21 : vector<1x8x4xbf16> to vector<8x4xbf16>
    %cst_22 = arith.constant dense<0.000000e+00> : vector<8x800xf32>
    %23 = tpu.matmul %22, %20, %cst_22 {dimension_numbers = #tpu.dot_dimension_numbers<[1], [0], [0], [1], [0, 0, 1, 1], [], []>} : vector<8x4xbf16>, vector<4x800xbf16>, vector<8x800xf32> -> vector<8x800xf32>
    %24 = arith.addf %18, %23 : vector<8x800xf32>
    %c0_23 = arith.constant 0 : index
    %c0_24 = arith.constant 0 : index
    %c11 = arith.constant 11 : index
    %25 = vector.load %arg1[%c0_23, %c0_24, %c11] : memref<1x4x1022xbf16, #tpu.memory_space<vmem>>, vector<1x4x800xbf16>
    %26 = vector.shape_cast %25 : vector<1x4x800xbf16> to vector<4x800xbf16>
    %c4 = arith.constant 4 : index
    %c0_25 = arith.constant 0 : index
    %c0_26 = arith.constant 0 : index
    %27 = vector.load %arg2[%c4, %c0_25, %c0_26] : memref<27x8x4xbf16, #tpu.memory_space<vmem>>, vector<1x8x4xbf16>
    %28 = vector.shape_cast %27 : vector<1x8x4xbf16> to vector<8x4xbf16>
    %cst_27 = arith.constant dense<0.000000e+00> : vector<8x800xf32>
    %29 = tpu.matmul %28, %26, %cst_27 {dimension_numbers = #tpu.dot_dimension_numbers<[1], [0], [0], [1], [0, 0, 1, 1], [], []>} : vector<8x4xbf16>, vector<4x800xbf16>, vector<8x800xf32> -> vector<8x800xf32>
    %30 = arith.addf %24, %29 : vector<8x800xf32>
    %c0_28 = arith.constant 0 : index
    %c0_29 = arith.constant 0 : index
    %c12 = arith.constant 12 : index
    %31 = vector.load %arg1[%c0_28, %c0_29, %c12] : memref<1x4x1022xbf16, #tpu.memory_space<vmem>>, vector<1x4x800xbf16>
    %32 = vector.shape_cast %31 : vector<1x4x800xbf16> to vector<4x800xbf16>
    %c5 = arith.constant 5 : index
    %c0_30 = arith.constant 0 : index
    %c0_31 = arith.constant 0 : index
    %33 = vector.load %arg2[%c5, %c0_30, %c0_31] : memref<27x8x4xbf16, #tpu.memory_space<vmem>>, vector<1x8x4xbf16>
    %34 = vector.shape_cast %33 : vector<1x8x4xbf16> to vector<8x4xbf16>
    %cst_32 = arith.constant dense<0.000000e+00> : vector<8x800xf32>
    %35 = tpu.matmul %34, %32, %cst_32 {dimension_numbers = #tpu.dot_dimension_numbers<[1], [0], [0], [1], [0, 0, 1, 1], [], []>} : vector<8x4xbf16>, vector<4x800xbf16>, vector<8x800xf32> -> vector<8x800xf32>
    %36 = arith.addf %30, %35 : vector<8x800xf32>
    %c0_33 = arith.constant 0 : index
    %c0_34 = arith.constant 0 : index
    %c20 = arith.constant 20 : index
    %37 = vector.load %arg1[%c0_33, %c0_34, %c20] : memref<1x4x1022xbf16, #tpu.memory_space<vmem>>, vector<1x4x800xbf16>
    %38 = vector.shape_cast %37 : vector<1x4x800xbf16> to vector<4x800xbf16>
    %c6 = arith.constant 6 : index
    %c0_35 = arith.constant 0 : index
    %c0_36 = arith.constant 0 : index
    %39 = vector.load %arg2[%c6, %c0_35, %c0_36] : memref<27x8x4xbf16, #tpu.memory_space<vmem>>, vector<1x8x4xbf16>
    %40 = vector.shape_cast %39 : vector<1x8x4xbf16> to vector<8x4xbf16>
    %cst_37 = arith.constant dense<0.000000e+00> : vector<8x800xf32>
    %41 = tpu.matmul %40, %38, %cst_37 {dimension_numbers = #tpu.dot_dimension_numbers<[1], [0], [0], [1], [0, 0, 1, 1], [], []>} : vector<8x4xbf16>, vector<4x800xbf16>, vector<8x800xf32> -> vector<8x800xf32>
    %42 = arith.addf %36, %41 : vector<8x800xf32>
    %c0_38 = arith.constant 0 : index
    %c0_39 = arith.constant 0 : index
    %c21 = arith.constant 21 : index
    %43 = vector.load %arg1[%c0_38, %c0_39, %c21] : memref<1x4x1022xbf16, #tpu.memory_space<vmem>>, vector<1x4x800xbf16>
    %44 = vector.shape_cast %43 : vector<1x4x800xbf16> to vector<4x800xbf16>
    %c7 = arith.constant 7 : index
    %c0_40 = arith.constant 0 : index
    %c0_41 = arith.constant 0 : index
    %45 = vector.load %arg2[%c7, %c0_40, %c0_41] : memref<27x8x4xbf16, #tpu.memory_space<vmem>>, vector<1x8x4xbf16>
    %46 = vector.shape_cast %45 : vector<1x8x4xbf16> to vector<8x4xbf16>
    %cst_42 = arith.constant dense<0.000000e+00> : vector<8x800xf32>
    %47 = tpu.matmul %46, %44, %cst_42 {dimension_numbers = #tpu.dot_dimension_numbers<[1], [0], [0], [1], [0, 0, 1, 1], [], []>} : vector<8x4xbf16>, vector<4x800xbf16>, vector<8x800xf32> -> vector<8x800xf32>
    %48 = arith.addf %42, %47 : vector<8x800xf32>
    %c0_43 = arith.constant 0 : index
    %c0_44 = arith.constant 0 : index
    %c22 = arith.constant 22 : index
    %49 = vector.load %arg1[%c0_43, %c0_44, %c22] : memref<1x4x1022xbf16, #tpu.memory_space<vmem>>, vector<1x4x800xbf16>
    %50 = vector.shape_cast %49 : vector<1x4x800xbf16> to vector<4x800xbf16>
    %c8 = arith.constant 8 : index
    %c0_45 = arith.constant 0 : index
    %c0_46 = arith.constant 0 : index
    %51 = vector.load %arg2[%c8, %c0_45, %c0_46] : memref<27x8x4xbf16, #tpu.memory_space<vmem>>, vector<1x8x4xbf16>
    %52 = vector.shape_cast %51 : vector<1x8x4xbf16> to vector<8x4xbf16>
    %cst_47 = arith.constant dense<0.000000e+00> : vector<8x800xf32>
    %53 = tpu.matmul %52, %50, %cst_47 {dimension_numbers = #tpu.dot_dimension_numbers<[1], [0], [0], [1], [0, 0, 1, 1], [], []>} : vector<8x4xbf16>, vector<4x800xbf16>, vector<8x800xf32> -> vector<8x800xf32>
    %54 = arith.addf %48, %53 : vector<8x800xf32>
    %c0_48 = arith.constant 0 : index
    %c0_49 = arith.constant 0 : index
    %c100 = arith.constant 100 : index
    %55 = vector.load %arg1[%c0_48, %c0_49, %c100] : memref<1x4x1022xbf16, #tpu.memory_space<vmem>>, vector<1x4x800xbf16>
    %56 = vector.shape_cast %55 : vector<1x4x800xbf16> to vector<4x800xbf16>
    %c9 = arith.constant 9 : index
    %c0_50 = arith.constant 0 : index
    %c0_51 = arith.constant 0 : index
    %57 = vector.load %arg2[%c9, %c0_50, %c0_51] : memref<27x8x4xbf16, #tpu.memory_space<vmem>>, vector<1x8x4xbf16>
    %58 = vector.shape_cast %57 : vector<1x8x4xbf16> to vector<8x4xbf16>
    %cst_52 = arith.constant dense<0.000000e+00> : vector<8x800xf32>
    %59 = tpu.matmul %58, %56, %cst_52 {dimension_numbers = #tpu.dot_dimension_numbers<[1], [0], [0], [1], [0, 0, 1, 1], [], []>} : vector<8x4xbf16>, vector<4x800xbf16>, vector<8x800xf32> -> vector<8x800xf32>
    %60 = arith.addf %54, %59 : vector<8x800xf32>
    %c0_53 = arith.constant 0 : index
    %c0_54 = arith.constant 0 : index
    %c101 = arith.constant 101 : index
    %61 = vector.load %arg1[%c0_53, %c0_54, %c101] : memref<1x4x1022xbf16, #tpu.memory_space<vmem>>, vector<1x4x800xbf16>
    %62 = vector.shape_cast %61 : vector<1x4x800xbf16> to vector<4x800xbf16>
    %c10_55 = arith.constant 10 : index
    %c0_56 = arith.constant 0 : index
    %c0_57 = arith.constant 0 : index
    %63 = vector.load %arg2[%c10_55, %c0_56, %c0_57] : memref<27x8x4xbf16, #tpu.memory_space<vmem>>, vector<1x8x4xbf16>
    %64 = vector.shape_cast %63 : vector<1x8x4xbf16> to vector<8x4xbf16>
    %cst_58 = arith.constant dense<0.000000e+00> : vector<8x800xf32>
    %65 = tpu.matmul %64, %62, %cst_58 {dimension_numbers = #tpu.dot_dimension_numbers<[1], [0], [0], [1], [0, 0, 1, 1], [], []>} : vector<8x4xbf16>, vector<4x800xbf16>, vector<8x800xf32> -> vector<8x800xf32>
    %66 = arith.addf %60, %65 : vector<8x800xf32>
    %c0_59 = arith.constant 0 : index
    %c0_60 = arith.constant 0 : index
    %c102 = arith.constant 102 : index
    %67 = vector.load %arg1[%c0_59, %c0_60, %c102] : memref<1x4x1022xbf16, #tpu.memory_space<vmem>>, vector<1x4x800xbf16>
    %68 = vector.shape_cast %67 : vector<1x4x800xbf16> to vector<4x800xbf16>
    %c11_61 = arith.constant 11 : index
    %c0_62 = arith.constant 0 : index
    %c0_63 = arith.constant 0 : index
    %69 = vector.load %arg2[%c11_61, %c0_62, %c0_63] : memref<27x8x4xbf16, #tpu.memory_space<vmem>>, vector<1x8x4xbf16>
    %70 = vector.shape_cast %69 : vector<1x8x4xbf16> to vector<8x4xbf16>
    %cst_64 = arith.constant dense<0.000000e+00> : vector<8x800xf32>
    %71 = tpu.matmul %70, %68, %cst_64 {dimension_numbers = #tpu.dot_dimension_numbers<[1], [0], [0], [1], [0, 0, 1, 1], [], []>} : vector<8x4xbf16>, vector<4x800xbf16>, vector<8x800xf32> -> vector<8x800xf32>
    %72 = arith.addf %66, %71 : vector<8x800xf32>
    %c0_65 = arith.constant 0 : index
    %c0_66 = arith.constant 0 : index
    %c110 = arith.constant 110 : index
    %73 = vector.load %arg1[%c0_65, %c0_66, %c110] : memref<1x4x1022xbf16, #tpu.memory_space<vmem>>, vector<1x4x800xbf16>
    %74 = vector.shape_cast %73 : vector<1x4x800xbf16> to vector<4x800xbf16>
    %c12_67 = arith.constant 12 : index
    %c0_68 = arith.constant 0 : index
    %c0_69 = arith.constant 0 : index
    %75 = vector.load %arg2[%c12_67, %c0_68, %c0_69] : memref<27x8x4xbf16, #tpu.memory_space<vmem>>, vector<1x8x4xbf16>
    %76 = vector.shape_cast %75 : vector<1x8x4xbf16> to vector<8x4xbf16>
    %cst_70 = arith.constant dense<0.000000e+00> : vector<8x800xf32>
    %77 = tpu.matmul %76, %74, %cst_70 {dimension_numbers = #tpu.dot_dimension_numbers<[1], [0], [0], [1], [0, 0, 1, 1], [], []>} : vector<8x4xbf16>, vector<4x800xbf16>, vector<8x800xf32> -> vector<8x800xf32>
    %78 = arith.addf %72, %77 : vector<8x800xf32>
    %c0_71 = arith.constant 0 : index
    %c0_72 = arith.constant 0 : index
    %c111 = arith.constant 111 : index
    %79 = vector.load %arg1[%c0_71, %c0_72, %c111] : memref<1x4x1022xbf16, #tpu.memory_space<vmem>>, vector<1x4x800xbf16>
    %80 = vector.shape_cast %79 : vector<1x4x800xbf16> to vector<4x800xbf16>
    %c13 = arith.constant 13 : index
    %c0_73 = arith.constant 0 : index
    %c0_74 = arith.constant 0 : index
    %81 = vector.load %arg2[%c13, %c0_73, %c0_74] : memref<27x8x4xbf16, #tpu.memory_space<vmem>>, vector<1x8x4xbf16>
    %82 = vector.shape_cast %81 : vector<1x8x4xbf16> to vector<8x4xbf16>
    %cst_75 = arith.constant dense<0.000000e+00> : vector<8x800xf32>
    %83 = tpu.matmul %82, %80, %cst_75 {dimension_numbers = #tpu.dot_dimension_numbers<[1], [0], [0], [1], [0, 0, 1, 1], [], []>} : vector<8x4xbf16>, vector<4x800xbf16>, vector<8x800xf32> -> vector<8x800xf32>
    %84 = arith.addf %78, %83 : vector<8x800xf32>
    %c0_76 = arith.constant 0 : index
    %c0_77 = arith.constant 0 : index
    %c112 = arith.constant 112 : index
    %85 = vector.load %arg1[%c0_76, %c0_77, %c112] : memref<1x4x1022xbf16, #tpu.memory_space<vmem>>, vector<1x4x800xbf16>
    %86 = vector.shape_cast %85 : vector<1x4x800xbf16> to vector<4x800xbf16>
    %c14 = arith.constant 14 : index
    %c0_78 = arith.constant 0 : index
    %c0_79 = arith.constant 0 : index
    %87 = vector.load %arg2[%c14, %c0_78, %c0_79] : memref<27x8x4xbf16, #tpu.memory_space<vmem>>, vector<1x8x4xbf16>
    %88 = vector.shape_cast %87 : vector<1x8x4xbf16> to vector<8x4xbf16>
    %cst_80 = arith.constant dense<0.000000e+00> : vector<8x800xf32>
    %89 = tpu.matmul %88, %86, %cst_80 {dimension_numbers = #tpu.dot_dimension_numbers<[1], [0], [0], [1], [0, 0, 1, 1], [], []>} : vector<8x4xbf16>, vector<4x800xbf16>, vector<8x800xf32> -> vector<8x800xf32>
    %90 = arith.addf %84, %89 : vector<8x800xf32>
    %c0_81 = arith.constant 0 : index
    %c0_82 = arith.constant 0 : index
    %c120 = arith.constant 120 : index
    %91 = vector.load %arg1[%c0_81, %c0_82, %c120] : memref<1x4x1022xbf16, #tpu.memory_space<vmem>>, vector<1x4x800xbf16>
    %92 = vector.shape_cast %91 : vector<1x4x800xbf16> to vector<4x800xbf16>
    %c15 = arith.constant 15 : index
    %c0_83 = arith.constant 0 : index
    %c0_84 = arith.constant 0 : index
    %93 = vector.load %arg2[%c15, %c0_83, %c0_84] : memref<27x8x4xbf16, #tpu.memory_space<vmem>>, vector<1x8x4xbf16>
    %94 = vector.shape_cast %93 : vector<1x8x4xbf16> to vector<8x4xbf16>
    %cst_85 = arith.constant dense<0.000000e+00> : vector<8x800xf32>
    %95 = tpu.matmul %94, %92, %cst_85 {dimension_numbers = #tpu.dot_dimension_numbers<[1], [0], [0], [1], [0, 0, 1, 1], [], []>} : vector<8x4xbf16>, vector<4x800xbf16>, vector<8x800xf32> -> vector<8x800xf32>
    %96 = arith.addf %90, %95 : vector<8x800xf32>
    %c0_86 = arith.constant 0 : index
    %c0_87 = arith.constant 0 : index
    %c121 = arith.constant 121 : index
    %97 = vector.load %arg1[%c0_86, %c0_87, %c121] : memref<1x4x1022xbf16, #tpu.memory_space<vmem>>, vector<1x4x800xbf16>
    %98 = vector.shape_cast %97 : vector<1x4x800xbf16> to vector<4x800xbf16>
    %c16 = arith.constant 16 : index
    %c0_88 = arith.constant 0 : index
    %c0_89 = arith.constant 0 : index
    %99 = vector.load %arg2[%c16, %c0_88, %c0_89] : memref<27x8x4xbf16, #tpu.memory_space<vmem>>, vector<1x8x4xbf16>
    %100 = vector.shape_cast %99 : vector<1x8x4xbf16> to vector<8x4xbf16>
    %cst_90 = arith.constant dense<0.000000e+00> : vector<8x800xf32>
    %101 = tpu.matmul %100, %98, %cst_90 {dimension_numbers = #tpu.dot_dimension_numbers<[1], [0], [0], [1], [0, 0, 1, 1], [], []>} : vector<8x4xbf16>, vector<4x800xbf16>, vector<8x800xf32> -> vector<8x800xf32>
    %102 = arith.addf %96, %101 : vector<8x800xf32>
    %c0_91 = arith.constant 0 : index
    %c0_92 = arith.constant 0 : index
    %c122 = arith.constant 122 : index
    %103 = vector.load %arg1[%c0_91, %c0_92, %c122] : memref<1x4x1022xbf16, #tpu.memory_space<vmem>>, vector<1x4x800xbf16>
    %104 = vector.shape_cast %103 : vector<1x4x800xbf16> to vector<4x800xbf16>
    %c17 = arith.constant 17 : index
    %c0_93 = arith.constant 0 : index
    %c0_94 = arith.constant 0 : index
    %105 = vector.load %arg2[%c17, %c0_93, %c0_94] : memref<27x8x4xbf16, #tpu.memory_space<vmem>>, vector<1x8x4xbf16>
    %106 = vector.shape_cast %105 : vector<1x8x4xbf16> to vector<8x4xbf16>
    %cst_95 = arith.constant dense<0.000000e+00> : vector<8x800xf32>
    %107 = tpu.matmul %106, %104, %cst_95 {dimension_numbers = #tpu.dot_dimension_numbers<[1], [0], [0], [1], [0, 0, 1, 1], [], []>} : vector<8x4xbf16>, vector<4x800xbf16>, vector<8x800xf32> -> vector<8x800xf32>
    %108 = arith.addf %102, %107 : vector<8x800xf32>
    %c0_96 = arith.constant 0 : index
    %c0_97 = arith.constant 0 : index
    %c200 = arith.constant 200 : index
    %109 = vector.load %arg1[%c0_96, %c0_97, %c200] : memref<1x4x1022xbf16, #tpu.memory_space<vmem>>, vector<1x4x800xbf16>
    %110 = vector.shape_cast %109 : vector<1x4x800xbf16> to vector<4x800xbf16>
    %c18 = arith.constant 18 : index
    %c0_98 = arith.constant 0 : index
    %c0_99 = arith.constant 0 : index
    %111 = vector.load %arg2[%c18, %c0_98, %c0_99] : memref<27x8x4xbf16, #tpu.memory_space<vmem>>, vector<1x8x4xbf16>
    %112 = vector.shape_cast %111 : vector<1x8x4xbf16> to vector<8x4xbf16>
    %cst_100 = arith.constant dense<0.000000e+00> : vector<8x800xf32>
    %113 = tpu.matmul %112, %110, %cst_100 {dimension_numbers = #tpu.dot_dimension_numbers<[1], [0], [0], [1], [0, 0, 1, 1], [], []>} : vector<8x4xbf16>, vector<4x800xbf16>, vector<8x800xf32> -> vector<8x800xf32>
    %114 = arith.addf %108, %113 : vector<8x800xf32>
    %c0_101 = arith.constant 0 : index
    %c0_102 = arith.constant 0 : index
    %c201 = arith.constant 201 : index
    %115 = vector.load %arg1[%c0_101, %c0_102, %c201] : memref<1x4x1022xbf16, #tpu.memory_space<vmem>>, vector<1x4x800xbf16>
    %116 = vector.shape_cast %115 : vector<1x4x800xbf16> to vector<4x800xbf16>
    %c19 = arith.constant 19 : index
    %c0_103 = arith.constant 0 : index
    %c0_104 = arith.constant 0 : index
    %117 = vector.load %arg2[%c19, %c0_103, %c0_104] : memref<27x8x4xbf16, #tpu.memory_space<vmem>>, vector<1x8x4xbf16>
    %118 = vector.shape_cast %117 : vector<1x8x4xbf16> to vector<8x4xbf16>
    %cst_105 = arith.constant dense<0.000000e+00> : vector<8x800xf32>
    %119 = tpu.matmul %118, %116, %cst_105 {dimension_numbers = #tpu.dot_dimension_numbers<[1], [0], [0], [1], [0, 0, 1, 1], [], []>} : vector<8x4xbf16>, vector<4x800xbf16>, vector<8x800xf32> -> vector<8x800xf32>
    %120 = arith.addf %114, %119 : vector<8x800xf32>
    %c0_106 = arith.constant 0 : index
    %c0_107 = arith.constant 0 : index
    %c202 = arith.constant 202 : index
    %121 = vector.load %arg1[%c0_106, %c0_107, %c202] : memref<1x4x1022xbf16, #tpu.memory_space<vmem>>, vector<1x4x800xbf16>
    %122 = vector.shape_cast %121 : vector<1x4x800xbf16> to vector<4x800xbf16>
    %c20_108 = arith.constant 20 : index
    %c0_109 = arith.constant 0 : index
    %c0_110 = arith.constant 0 : index
    %123 = vector.load %arg2[%c20_108, %c0_109, %c0_110] : memref<27x8x4xbf16, #tpu.memory_space<vmem>>, vector<1x8x4xbf16>
    %124 = vector.shape_cast %123 : vector<1x8x4xbf16> to vector<8x4xbf16>
    %cst_111 = arith.constant dense<0.000000e+00> : vector<8x800xf32>
    %125 = tpu.matmul %124, %122, %cst_111 {dimension_numbers = #tpu.dot_dimension_numbers<[1], [0], [0], [1], [0, 0, 1, 1], [], []>} : vector<8x4xbf16>, vector<4x800xbf16>, vector<8x800xf32> -> vector<8x800xf32>
    %126 = arith.addf %120, %125 : vector<8x800xf32>
    %c0_112 = arith.constant 0 : index
    %c0_113 = arith.constant 0 : index
    %c210 = arith.constant 210 : index
    %127 = vector.load %arg1[%c0_112, %c0_113, %c210] : memref<1x4x1022xbf16, #tpu.memory_space<vmem>>, vector<1x4x800xbf16>
    %128 = vector.shape_cast %127 : vector<1x4x800xbf16> to vector<4x800xbf16>
    %c21_114 = arith.constant 21 : index
    %c0_115 = arith.constant 0 : index
    %c0_116 = arith.constant 0 : index
    %129 = vector.load %arg2[%c21_114, %c0_115, %c0_116] : memref<27x8x4xbf16, #tpu.memory_space<vmem>>, vector<1x8x4xbf16>
    %130 = vector.shape_cast %129 : vector<1x8x4xbf16> to vector<8x4xbf16>
    %cst_117 = arith.constant dense<0.000000e+00> : vector<8x800xf32>
    %131 = tpu.matmul %130, %128, %cst_117 {dimension_numbers = #tpu.dot_dimension_numbers<[1], [0], [0], [1], [0, 0, 1, 1], [], []>} : vector<8x4xbf16>, vector<4x800xbf16>, vector<8x800xf32> -> vector<8x800xf32>
    %132 = arith.addf %126, %131 : vector<8x800xf32>
    %c0_118 = arith.constant 0 : index
    %c0_119 = arith.constant 0 : index
    %c211 = arith.constant 211 : index
    %133 = vector.load %arg1[%c0_118, %c0_119, %c211] : memref<1x4x1022xbf16, #tpu.memory_space<vmem>>, vector<1x4x800xbf16>
    %134 = vector.shape_cast %133 : vector<1x4x800xbf16> to vector<4x800xbf16>
    %c22_120 = arith.constant 22 : index
    %c0_121 = arith.constant 0 : index
    %c0_122 = arith.constant 0 : index
    %135 = vector.load %arg2[%c22_120, %c0_121, %c0_122] : memref<27x8x4xbf16, #tpu.memory_space<vmem>>, vector<1x8x4xbf16>
    %136 = vector.shape_cast %135 : vector<1x8x4xbf16> to vector<8x4xbf16>
    %cst_123 = arith.constant dense<0.000000e+00> : vector<8x800xf32>
    %137 = tpu.matmul %136, %134, %cst_123 {dimension_numbers = #tpu.dot_dimension_numbers<[1], [0], [0], [1], [0, 0, 1, 1], [], []>} : vector<8x4xbf16>, vector<4x800xbf16>, vector<8x800xf32> -> vector<8x800xf32>
    %138 = arith.addf %132, %137 : vector<8x800xf32>
    %c0_124 = arith.constant 0 : index
    %c0_125 = arith.constant 0 : index
    %c212 = arith.constant 212 : index
    %139 = vector.load %arg1[%c0_124, %c0_125, %c212] : memref<1x4x1022xbf16, #tpu.memory_space<vmem>>, vector<1x4x800xbf16>
    %140 = vector.shape_cast %139 : vector<1x4x800xbf16> to vector<4x800xbf16>
    %c23 = arith.constant 23 : index
    %c0_126 = arith.constant 0 : index
    %c0_127 = arith.constant 0 : index
    %141 = vector.load %arg2[%c23, %c0_126, %c0_127] : memref<27x8x4xbf16, #tpu.memory_space<vmem>>, vector<1x8x4xbf16>
    %142 = vector.shape_cast %141 : vector<1x8x4xbf16> to vector<8x4xbf16>
    %cst_128 = arith.constant dense<0.000000e+00> : vector<8x800xf32>
    %143 = tpu.matmul %142, %140, %cst_128 {dimension_numbers = #tpu.dot_dimension_numbers<[1], [0], [0], [1], [0, 0, 1, 1], [], []>} : vector<8x4xbf16>, vector<4x800xbf16>, vector<8x800xf32> -> vector<8x800xf32>
    %144 = arith.addf %138, %143 : vector<8x800xf32>
    %c0_129 = arith.constant 0 : index
    %c0_130 = arith.constant 0 : index
    %c220 = arith.constant 220 : index
    %145 = vector.load %arg1[%c0_129, %c0_130, %c220] : memref<1x4x1022xbf16, #tpu.memory_space<vmem>>, vector<1x4x800xbf16>
    %146 = vector.shape_cast %145 : vector<1x4x800xbf16> to vector<4x800xbf16>
    %c24 = arith.constant 24 : index
    %c0_131 = arith.constant 0 : index
    %c0_132 = arith.constant 0 : index
    %147 = vector.load %arg2[%c24, %c0_131, %c0_132] : memref<27x8x4xbf16, #tpu.memory_space<vmem>>, vector<1x8x4xbf16>
    %148 = vector.shape_cast %147 : vector<1x8x4xbf16> to vector<8x4xbf16>
    %cst_133 = arith.constant dense<0.000000e+00> : vector<8x800xf32>
    %149 = tpu.matmul %148, %146, %cst_133 {dimension_numbers = #tpu.dot_dimension_numbers<[1], [0], [0], [1], [0, 0, 1, 1], [], []>} : vector<8x4xbf16>, vector<4x800xbf16>, vector<8x800xf32> -> vector<8x800xf32>
    %150 = arith.addf %144, %149 : vector<8x800xf32>
    %c0_134 = arith.constant 0 : index
    %c0_135 = arith.constant 0 : index
    %c221 = arith.constant 221 : index
    %151 = vector.load %arg1[%c0_134, %c0_135, %c221] : memref<1x4x1022xbf16, #tpu.memory_space<vmem>>, vector<1x4x800xbf16>
    %152 = vector.shape_cast %151 : vector<1x4x800xbf16> to vector<4x800xbf16>
    %c25 = arith.constant 25 : index
    %c0_136 = arith.constant 0 : index
    %c0_137 = arith.constant 0 : index
    %153 = vector.load %arg2[%c25, %c0_136, %c0_137] : memref<27x8x4xbf16, #tpu.memory_space<vmem>>, vector<1x8x4xbf16>
    %154 = vector.shape_cast %153 : vector<1x8x4xbf16> to vector<8x4xbf16>
    %cst_138 = arith.constant dense<0.000000e+00> : vector<8x800xf32>
    %155 = tpu.matmul %154, %152, %cst_138 {dimension_numbers = #tpu.dot_dimension_numbers<[1], [0], [0], [1], [0, 0, 1, 1], [], []>} : vector<8x4xbf16>, vector<4x800xbf16>, vector<8x800xf32> -> vector<8x800xf32>
    %156 = arith.addf %150, %155 : vector<8x800xf32>
    %c0_139 = arith.constant 0 : index
    %c0_140 = arith.constant 0 : index
    %c222 = arith.constant 222 : index
    %157 = vector.load %arg1[%c0_139, %c0_140, %c222] : memref<1x4x1022xbf16, #tpu.memory_space<vmem>>, vector<1x4x800xbf16>
    %158 = vector.shape_cast %157 : vector<1x4x800xbf16> to vector<4x800xbf16>
    %c26 = arith.constant 26 : index
    %c0_141 = arith.constant 0 : index
    %c0_142 = arith.constant 0 : index
    %159 = vector.load %arg2[%c26, %c0_141, %c0_142] : memref<27x8x4xbf16, #tpu.memory_space<vmem>>, vector<1x8x4xbf16>
    %160 = vector.shape_cast %159 : vector<1x8x4xbf16> to vector<8x4xbf16>
    %cst_143 = arith.constant dense<0.000000e+00> : vector<8x800xf32>
    %161 = tpu.matmul %160, %158, %cst_143 {dimension_numbers = #tpu.dot_dimension_numbers<[1], [0], [0], [1], [0, 0, 1, 1], [], []>} : vector<8x4xbf16>, vector<4x800xbf16>, vector<8x800xf32> -> vector<8x800xf32>
    %162 = arith.addf %156, %161 : vector<8x800xf32>
    %c0_144 = arith.constant 0 : index
    %c0_145 = arith.constant 0 : index
    %c0_146 = arith.constant 0 : index
    %163 = vector.load %arg3[%c0_144, %c0_145, %c0_146] : memref<1x8x1xf32, #tpu.memory_space<vmem>>, vector<1x8x1xf32>
    %164 = vector.shape_cast %163 : vector<1x8x1xf32> to vector<8x1xf32>
    %165 = vector.broadcast %164 : vector<8x1xf32> to vector<8x800xf32>
    %166 = arith.mulf %162, %165 : vector<8x800xf32>
    %c0_147 = arith.constant 0 : index
    %c0_148 = arith.constant 0 : index
    %c0_149 = arith.constant 0 : index
    %167 = vector.load %arg4[%c0_147, %c0_148, %c0_149] : memref<1x8x1xf32, #tpu.memory_space<vmem>>, vector<1x8x1xf32>
    %168 = vector.shape_cast %167 : vector<1x8x1xf32> to vector<8x1xf32>
    %169 = vector.broadcast %168 : vector<8x1xf32> to vector<8x800xf32>
    %170 = arith.addf %166, %169 : vector<8x800xf32>
    %cst_150 = arith.constant 0.000000e+00 : f32
    %171 = vector.broadcast %cst_150 : f32 to vector<8x800xf32>
    %172 = arith.maximumf %170, %171 : vector<8x800xf32>
    %c0_151 = arith.constant 0 : index
    %c0_152 = arith.constant 0 : index
    %c0_153 = arith.constant 0 : index
    %173 = vector.load %arg5[%c0_151, %c0_152, %c0_153] : memref<1x8x800xf32, #tpu.memory_space<vmem>>, vector<1x8x800xf32>
    %174 = vector.shape_cast %173 : vector<1x8x800xf32> to vector<8x800xf32>
    %175 = vector.shape_cast %172 : vector<8x800xf32> to vector<1x8x800xf32>
    tpu.vector_store %arg5[%c0_151, %c0_152, %c0_153], %175 {strides = array<i32>} : memref<1x8x800xf32, #tpu.memory_space<vmem>>, vector<1x8x800xf32>,
    return
  }
  func.func @transform_0(%arg0: i32) -> (i32, i32, i32) {
    %c0_i32 = arith.constant 0 : i32
    %c0_i32_0 = arith.constant 0 : i32
    %c0_i32_1 = arith.constant 0 : i32
    return %arg0, %c0_i32, %c0_i32_0 : i32, i32, i32
  }
  func.func @transform_1(%arg0: i32) -> (i32, i32, i32) {
    %c0_i32 = arith.constant 0 : i32
    %c0_i32_0 = arith.constant 0 : i32
    %c0_i32_1 = arith.constant 0 : i32
    %c0_i32_2 = arith.constant 0 : i32
    return %c0_i32, %c0_i32_0, %c0_i32_1 : i32, i32, i32
  }
  func.func @transform_2(%arg0: i32) -> (i32, i32, i32) {
    %c0_i32 = arith.constant 0 : i32
    %c0_i32_0 = arith.constant 0 : i32
    %c0_i32_1 = arith.constant 0 : i32
    %c0_i32_2 = arith.constant 0 : i32
    return %c0_i32, %c0_i32_0, %c0_i32_1 : i32, i32, i32
  }
  func.func @transform_3(%arg0: i32) -> (i32, i32, i32) {
    %c0_i32 = arith.constant 0 : i32
    %c0_i32_0 = arith.constant 0 : i32
    %c0_i32_1 = arith.constant 0 : i32
    %c0_i32_2 = arith.constant 0 : i32
    return %c0_i32, %c0_i32_0, %c0_i32_1 : i32, i32, i32
  }
  func.func @transform_4(%arg0: i32) -> (i32, i32, i32) {
    %c0_i32 = arith.constant 0 : i32
    %c0_i32_0 = arith.constant 0 : i32
    %c0_i32_1 = arith.constant 0 : i32
    return %arg0, %c0_i32, %c0_i32_0 : i32, i32, i32
  }
}

</mosaic_0001>

<bundles_post_ra>
// kernel: cnn_block_forward.2
= control target key start
LH: loop header
LB: loop body
LE: loop exit
PB: predicated region body
PF: predicated region fallthrough
CT: control target
= control target key end

     0   :  { %s7754_s15 = smov 0   ;;  %s9624_s0 = inlined_call_operand.vmem [shape: bf16[2,4,1022], index: 0, kind: input, shape index: {}]   ;;  %s9625_s1 = inlined_call_operand.vmem [shape: bf16[27,8,4], index: 1, kind: input, shape index: {}]   ;;  %s9626_s2 = inlined_call_operand.vmem [shape: f32[1,800], index: 2, kind: input, shape index: {}]   ;;  %s9627_s3 = inlined_call_operand.vmem [shape: f32[2,8,1], index: 3, kind: output, shape index: {0}]   ;;  %s9628_s4 = inlined_call_operand.vmem [shape: f32[2,8,1], index: 4, kind: output, shape index: {1}]  }
   0x1 LB: > { %s7188_s16 = sadd.s32 4294967295, %s7697_s15   ;;  %p7192_p0 = scmp.ge.s32.totalorder %s7697_s15, 1  ;;  %s7697_s15 = sphi %s7754_s15, %s15_s15  }
   0x2   : > { %p165_p1 = scmp.lt.s32.totalorder %s7697_s15, 3 }
   0x4   : > { %p166_p2 = pnand %p7192_p0, %p165_p1 }
   0x5   : > { %p194_p3 = scmp.lt.s32.totalorder (!%p166_p2), %s7188_s16, 1  ;;  %s7701_s21 = smov (!%p166_p2), 127  }
   0x6   : > { %169 = sbr.rel (%p166_p2) target bundleno = 913 (0x391), region = 32  ;;  %s7702_s22 = smov (!%p166_p2), 126  }
   0x7   : > { %s7703_s23 = smov (!%p166_p2), 118   ;;  %s7704_s24 = smov (!%p166_p2), 117  }
   0x8   : > { %s7705_s25 = smov (!%p166_p2), 116   ;;  %s7706_s26 = smov (!%p166_p2), 108  }
   0x9   : > { %s7707_s27 = smov (!%p166_p2), 107   ;;  %s7708_s28 = smov (!%p166_p2), 106  }
   0xa   : > { %s7709_s29 = smov (!%p166_p2), 28   ;;  %s7712_s6 = smov (!%p166_p2), 27  }
   0xb   : > { %v219_v0 = vlaneseq  ;;  %v7699_v1 = vmov 1983009808   ;;  %s9630_s16 = smov (!%p194_p3, %s7188_s16), 1  ;;  %v7700_v5 = vmov 0   ;;  %vm262_vm0 = vcmask 1039360   ;;  %s7713_s9 = smov 26  }
   0xc   : > { %v217_v2 = vunpack.c.l.s4 %v7699_v1  ;;  %s7414_s17 = sshll.u32 %s9630_s16, 4  ;;  %327 = vmatprep.mubr.bf16.mxu0 %v7700_v5  ;;  %368 = vmatprep.mubr.bf16.mxu1 %v7700_v5  ;;  %vm273_vm1 = vcmask 1041408   ;;  %vm269_vm2 = vcmask 31744   ;;  %vm7711_vm3 = vmmov 0   ;;  %s7714_s12 = smov 18  }
   0xd   : > { %v7764_v3 = vshrl.u32 %v219_v0, 7  ;;  %s7772_s20 = scalar_lea.vmem %s9624_s0, %s7414_s17  ;;  %v7197_v0 = vld [vmem:[%s9625_s1 + $0x4] sm:$0xf]  ;;  %vm698_vm4 = vcmask 1031168   ;;  %vm952_vm5 = vcmask 965632   ;;  %vm1206_vm6 = vcmask 957440  }
   0xe   : > { %v218_v4 = vunpack.c.0.s8 %v217_v2  ;;  %v208_v7 = vld [vmem:[%s7772_s20] sm:$0xff]  ;;  %v209_v10 = vld [vmem:[%s7772_s20 + $0x8] sm:$0x3f]  ;;  %s7715_s17 = smov 17   ;;  %vm1460_vm7 = vcmask 949248   ;;  %vm1714_vm8 = vcmask 883712  }
   0xf   : > { %v215_v9 = vcombine.high %v208_v7, %v208_v7  ;;  %v232_v15 = vcombine.high %v209_v10, %v209_v10  ;;  %v646_v18 = vld [vmem:[%s7772_s20 + $0x8] sm:$0x3f]  ;;  %vm1968_vm9 = vcmask 875520   ;;  %vm2222_vm10 = vcmask 867328   ;;  %s7719_s30 = smov 6   ;;  %s7720_s7 = smov 56  }
  0x10   : > { %v7775_v6 = vsub.s32 %v218_v4, %v7764_v3  ;;  %v668_v20 = vcombine.high %v646_v18, %v646_v18  ;;  %v900_v23 = vld [vmem:[%s7772_s20 + $0x8] sm:$0x3f]  ;;  %vm2479_vm11 = vcmask 228352   ;;  %vm2737_vm12 = vcmask 220160   ;;  %s7721_s10 = smov 55   ;;  %s7722_s13 = smov 54  }
  0x11   : > { %v922_v25 = vcombine.high %v900_v23, %v900_v23  ;;  %v1154_v28 = vld [vmem:[%s7772_s20 + $0x8] sm:$0x3f]  ;;  %vm2995_vm13 = vcmask 211968   ;;  %vm3253_vm14 = vcmask 146432   ;;  %s7723_s18 = smov 46   ;;  %vm3511_vm15 = vcmask 138240  }
  0x12   : > { %v7779_v8 = vrot.slane %v208_v7, %v7775_v6  ;;  %v7784_v11 = vrot.slane %v215_v9, %v7775_v6  ;;  %v7796_v14 = vrot.slane %v209_v10, %v7775_v6  ;;  %v7806_v17 = vrot.slane %v232_v15, %v7775_v6  ;;  %v1408_v33 = vld [vmem:[%s7772_s20 + $0x8] sm:$0x3f] }
  0x13   : > { %v675_v19 = vrot.slane %v646_v18, %v7775_v6  ;;  %v682_v22 = vrot.slane %v668_v20, %v7775_v6  ;;  %v929_v24 = vrot.slane %v900_v23, %v7775_v6  ;;  %v936_v27 = vrot.slane %v922_v25, %v7775_v6  ;;  %v1662_v38 = vld [vmem:[%s7772_s20 + $0x8] sm:$0x3f] }
  0x14   : > { %248 = vrot.lane.b32.xlu0 %v7779_v8, %s7701_s21  ;;  %v7788_v12 = vcombine.high %v7779_v8, %v7779_v8  ;;  %252 = vrot.lane.b32.xlu1 %v7784_v11, %s7701_s21  ;;  %v7793_v13 = vcombine.high %v7784_v11, %v7784_v11  ;;  %v7802_v16 = vcombine.high %v7796_v14, %v7796_v14  ;;  %v1916_v43 = vld [vmem:[%s7772_s20 + $0x8] sm:$0x3f]  ;;  %v7710_v20 = vmov 0.0  }
  0x15   : > { %v683_v21 = vcombine.high %v675_v19, %v675_v19  ;;  %v937_v26 = vcombine.high %v929_v24, %v929_v24  ;;  %v1183_v29 = vrot.slane %v1154_v28, %v7775_v6  ;;  %v1176_v30 = vcombine.high %v1154_v28, %v1154_v28  ;;  %v2170_v48 = vld [vmem:[%s7772_s20 + $0x8] sm:$0x3f] }
  0x16   : > { %v1437_v34 = vrot.slane %v1408_v33, %v7775_v6  ;;  %v1430_v35 = vcombine.high %v1408_v33, %v1408_v33  ;;  %v1691_v39 = vrot.slane %v1662_v38, %v7775_v6  ;;  %v1684_v40 = vcombine.high %v1662_v38, %v1662_v38  ;;  %v2424_v53 = vld [vmem:[%s7772_s20 + $0x8] sm:$0xff] }
  0x17   : > { %v1191_v31 = vcombine.high %v1183_v29, %v1183_v29  ;;  %v1190_v32 = vrot.slane %v1176_v30, %v7775_v6  ;;  %v1945_v44 = vrot.slane %v1916_v43, %v7775_v6  ;;  %v1938_v45 = vcombine.high %v1916_v43, %v1916_v43 }
  0x18   : > { %250 = vrot.lane.b32.xlu0 %v7788_v12, %s7701_s21  ;;  %254 = vrot.lane.b32.xlu1 %v7793_v13, %s7701_s21  ;;  %v1445_v36 = vcombine.high %v1437_v34, %v1437_v34  ;;  %v1444_v37 = vrot.slane %v1430_v35, %v7775_v6  ;;  %v1699_v41 = vcombine.high %v1691_v39, %v1691_v39  ;;  %v462_v25 = vsel %vm273_vm1, %v7779_v8, 0 }
  0x19   : > { %v1698_v42 = vrot.slane %v1684_v40, %v7775_v6  ;;  %v1953_v46 = vcombine.high %v1945_v44, %v1945_v44  ;;  %v1952_v47 = vrot.slane %v1938_v45, %v7775_v6  ;;  %v2199_v49 = vrot.slane %v2170_v48, %v7775_v6 }
  0x1a   : > { %v2192_v50 = vcombine.high %v2170_v48, %v2170_v48  ;;  %v7867_v56 = vrot.slane %v2424_v53, %v7775_v6  ;;  %v2446_v57 = vcombine.high %v2424_v53, %v2424_v53  ;;  %v468_v28 = vsel %vm273_vm1, %v7784_v11, 0 }
  0x1b   : > { %v2207_v51 = vcombine.high %v2199_v49, %v2199_v49 }
  0x1c   : > { %256 = vrot.lane.b32.xlu0 %v7796_v14, %s7701_s21  ;;  %258 = vrot.lane.b32.xlu1 %v7802_v16, %s7701_s21  ;;  %v2206_v52 = vrot.slane %v2192_v50, %v7775_v6  ;;  %v7873_v59 = vcombine.high %v7867_v56, %v7867_v56  ;;  %v7886_v2 = vrot.slane %v2446_v57, %v7775_v6 }
  0x1e   : > { %v7893_v9 = vcombine.high %v7886_v2, %v7886_v2 }
  0x20   : > { %260 = vrot.lane.b32.xlu0 %v7806_v17, %s7701_s21  ;;  %684 = vrot.lane.b32.xlu1 %v7779_v8, %s7702_s22  ;;  %s7716_s21 = smov 16  }
  0x24   : > { %686 = vrot.lane.b32.xlu0 %v7788_v12, %s7702_s22  ;;  %688 = vrot.lane.b32.xlu1 %v7784_v11, %s7702_s22 }
  0x28   : > { %690 = vrot.lane.b32.xlu0 %v7793_v13, %s7702_s22  ;;  %692 = vrot.lane.b32.xlu1 %v675_v19, %s7702_s22 }
  0x2c   : > { %694 = vrot.lane.b32.xlu0 %v683_v21, %s7702_s22  ;;  %696 = vrot.lane.b32.xlu1 %v682_v22, %s7702_s22  ;;  %s7724_s22 = smov 45  }
  0x30   : > { %938 = vrot.lane.b32.xlu0 %v7779_v8, %s7703_s23  ;;  %940 = vrot.lane.b32.xlu1 %v7788_v12, %s7703_s23 }
  0x34   : > { %942 = vrot.lane.b32.xlu0 %v7784_v11, %s7703_s23  ;;  %944 = vrot.lane.b32.xlu1 %v7793_v13, %s7703_s23 }
  0x38   : > { %946 = vrot.lane.b32.xlu0 %v929_v24, %s7703_s23  ;;  %948 = vrot.lane.b32.xlu1 %v937_v26, %s7703_s23 }
  0x3c   : > { %950 = vrot.lane.b32.xlu0 %v936_v27, %s7703_s23  ;;  %1192 = vrot.lane.b32.xlu1 %v7779_v8, %s7704_s24  ;;  %s7725_s23 = smov 44  }
  0x40   : > { %1194 = vrot.lane.b32.xlu0 %v7788_v12, %s7704_s24  ;;  %1196 = vrot.lane.b32.xlu1 %v7784_v11, %s7704_s24 }
  0x44   : > { %1198 = vrot.lane.b32.xlu0 %v7793_v13, %s7704_s24  ;;  %1200 = vrot.lane.b32.xlu1 %v1183_v29, %s7704_s24 }
  0x48   : > { %1202 = vrot.lane.b32.xlu0 %v1191_v31, %s7704_s24  ;;  %1204 = vrot.lane.b32.xlu1 %v1190_v32, %s7704_s24  ;;  %v210_v31 = vld [vmem:[%s9625_s1] sm:$0xf]  ;;  %s7717_s24 = smov 8  }
  0x4c   : > { %1446 = vrot.lane.b32.xlu0 %v7779_v8, %s7705_s25  ;;  %1448 = vrot.lane.b32.xlu1 %v7788_v12, %s7705_s25 }
  0x50   : > { %1450 = vrot.lane.b32.xlu0 %v7784_v11, %s7705_s25  ;;  %1452 = vrot.lane.b32.xlu1 %v7793_v13, %s7705_s25 }
  0x54   : > { %1454 = vrot.lane.b32.xlu0 %v1437_v34, %s7705_s25  ;;  %1456 = vrot.lane.b32.xlu1 %v1445_v36, %s7705_s25 }
  0x58   : > { %1458 = vrot.lane.b32.xlu0 %v1444_v37, %s7705_s25  ;;  %1700 = vrot.lane.b32.xlu1 %v7779_v8, %s7706_s26 }
  0x5c   : > { %1702 = vrot.lane.b32.xlu0 %v7788_v12, %s7706_s26  ;;  %1704 = vrot.lane.b32.xlu1 %v7784_v11, %s7706_s26 }
  0x60   : > { %1706 = vrot.lane.b32.xlu0 %v7793_v13, %s7706_s26  ;;  %1708 = vrot.lane.b32.xlu1 %v1691_v39, %s7706_s26 }
  0x64   : > { %1710 = vrot.lane.b32.xlu0 %v1699_v41, %s7706_s26  ;;  %1712 = vrot.lane.b32.xlu1 %v1698_v42, %s7706_s26  ;;  %s7726_s26 = smov 36  }
  0x68   : > { %1954 = vrot.lane.b32.xlu0 %v7779_v8, %s7707_s27  ;;  %1956 = vrot.lane.b32.xlu1 %v7788_v12, %s7707_s27 }
  0x6c   : > { %1958 = vrot.lane.b32.xlu0 %v7784_v11, %s7707_s27  ;;  %1960 = vrot.lane.b32.xlu1 %v7793_v13, %s7707_s27 }
  0x70   : > { %1962 = vrot.lane.b32.xlu0 %v1945_v44, %s7707_s27  ;;  %1964 = vrot.lane.b32.xlu1 %v1953_v46, %s7707_s27 }
  0x74   : > { %1966 = vrot.lane.b32.xlu0 %v1952_v47, %s7707_s27  ;;  %2208 = vrot.lane.b32.xlu1 %v7779_v8, %s7708_s28  ;;  %v7212_v47 = vld [vmem:[%s9625_s1 + $0x8] sm:$0xf]  ;;  %s7718_s27 = smov 7  }
  0x78   : > { %2210 = vrot.lane.b32.xlu0 %v7788_v12, %s7708_s28  ;;  %2212 = vrot.lane.b32.xlu1 %v7784_v11, %s7708_s28 }
  0x7c   : > { %2214 = vrot.lane.b32.xlu0 %v7793_v13, %s7708_s28  ;;  %2216 = vrot.lane.b32.xlu1 %v2199_v49, %s7708_s28 }
  0x80   : > { %2218 = vrot.lane.b32.xlu0 %v2207_v51, %s7708_s28  ;;  %2220 = vrot.lane.b32.xlu1 %v2206_v52, %s7708_s28 }
  0x84   : > { %2463 = vrot.lane.b32.xlu0 %v7779_v8, %s7709_s29  ;;  %2465 = vrot.lane.b32.xlu1 %v7788_v12, %s7709_s29 }
  0x86   : > { %v249_v54 = vpop.permute.xlu0 %248  ;;  %v253_v55 = vpop.permute.xlu1 %252 }
  0x88   : > { %2467 = vrot.lane.b32.xlu0 %v7784_v11, %s7709_s29  ;;  %2469 = vrot.lane.b32.xlu1 %v7793_v13, %s7709_s29 }
  0x8a   : > { %v251_v58 = vpop.permute.xlu0 %250  ;;  %v255_v62 = vpop.permute.xlu1 %254 }
  0x8b   : > { %v264_v60 = vsel %vm262_vm0, %v251_v58, %v253_v55  ;;  %v263_v61 = vsel %vm262_vm0, %v249_v54, %v251_v58  ;;  %v265_v1 = vsel %vm262_vm0, %v253_v55, %v255_v62 }
  0x8c   : > { %7198 = vmatprep.subr.msk.bf16.mxu0 %vm273_vm1, %v264_v60  ;;  %v275_v63 = vsel %vm273_vm1, %v263_v61, 0  ;;  %2471 = vrot.lane.b32.xlu0 %v7867_v56, %s7709_s29  ;;  %v281_v15 = vsel %vm273_vm1, %v265_v1, 0 }
  0x8d   : > { %310 = vmatpush1.bf16.msra.mxu0 %v275_v63  ;;  %2473 = vrot.lane.b32.xlu1 %v7873_v59, %s7709_s29 }
  0x8e   : > { %v257_v4 = vpop.permute.xlu0 %256  ;;  %v259_v10 = vpop.permute.xlu1 %258 }
  0x8f   : > { %v266_v7 = vsel %vm262_vm0, %v255_v62, %v257_v4  ;;  %v267_v18 = vsel %vm262_vm0, %v257_v4, %v259_v10 }
  0x90   : > { %7199 = vmatmul.mubr.msk.bf16.vlgmr.msra.gmra.mxu0 %vm269_vm2, %v7197_v0  ;;  %7200 = vmatprep.subr.msk.bf16.mxu1 %vm273_vm1, %v266_v7  ;;  %v287_v23 = vsel %vm273_vm1, %v267_v18, 0 }
  0x91   : > { %351 = vmatpush1.bf16.msra.mxu1 %v281_v15  ;;  %409 = vmatprep.mubr.bf16.mxu0 %v7700_v5 }
  0x92   : > { %v261_v19 = vpop.permute.xlu0 %260  ;;  %7469 = vmatprep.subr.bf16.mxu1 %v7710_v20  ;;  %2475 = vrot.lane.b32.xlu0 %v7886_v2, %s7709_s29  ;;  %v685_v24 = vpop.permute.xlu1 %684 }
  0x93   : > { %v268_v21 = vsel %vm262_vm0, %v259_v10, %v261_v19  ;;  %v293_v22 = vsel %vm273_vm1, %v261_v19, 0  ;;  %2477 = vrot.lane.b32.xlu1 %v7893_v9, %s7709_s29  ;;  %v7220_v10 = vld [vmem:[%s9625_s1 + $0xc] sm:$0xf]  ;;  %vm3769_vm0 = vcmask 130048   ;;  %s7727_s29 = smov 35  }
  0x94   : > { %7201 = vmatmul.mubr.msk.bf16.vlgmr.msra.gmra.mxu1 %vm269_vm2, %v7197_v0  ;;  %7202 = vmatprep.subr.msk.bf16.mxu0 %vm273_vm1, %v268_v21 }
  0x95   : > { %392 = vmatpush1.bf16.msra.mxu0 %v287_v23  ;;  %7470 = vmatpush3.bf16.msra.mxu1 %v293_v22 }
  0x96   : > { %7471 = vmatprep.mubr.msk.bf16.mxu1 %vm7711_vm3, %v7710_v20  ;;  %7205 = vmatprep.subr.msk.bf16.mxu0 %vm273_vm1, %v7788_v12  ;;  %v687_v26 = vpop.permute.xlu0 %686  ;;  %v689_v27 = vpop.permute.xlu1 %688 }
  0x97   : > { %7207 = vmatprep.subr.msk.bf16.mxu1 %vm273_vm1, %v7793_v13  ;;  %2721 = vrot.lane.b32.xlu0 %v7779_v8, %s7712_s6  ;;  %v700_v33 = vsel %vm698_vm4, %v687_v26, %v689_v27  ;;  %v699_v36 = vsel %vm698_vm4, %v685_v24, %v687_v26 }
  0x98   : > { %7203 = vmatmul.mubr.msk.bf16.vlgmr.msra.gmra.mxu0 %vm269_vm2, %v7197_v0  ;;  %2723 = vrot.lane.b32.xlu1 %v7788_v12, %s7712_s6 }
  0x99   : > { %497 = vmatpush1.bf16.msra.mxu0 %v462_v25  ;;  %514 = vmatprep.mubr.bf16.mxu0 %v7700_v5 }
  0x9a   : > { %7209 = vmatprep.subr.msk.bf16.mxu0 %vm273_vm1, %v7802_v16  ;;  %v691_v29 = vpop.permute.xlu0 %690  ;;  %v693_v30 = vpop.permute.xlu1 %692  ;;  %v474_v16 = vsel %vm273_vm1, %v7796_v14, 0  ;;  %v480_v14 = vsel %vm273_vm1, %v7806_v17, 0  ;;  %v709_v17 = vsel %vm273_vm1, %v699_v36, 0 }
  0x9b   : > { %2725 = vrot.lane.b32.xlu0 %v7784_v11, %s7712_s6  ;;  %v702_v37 = vsel %vm698_vm4, %v691_v29, %v693_v30  ;;  %v701_v40 = vsel %vm698_vm4, %v689_v27, %v691_v29 }
  0x9c   : > { %7472 = vmatmul.mubr.msk.bf16.vlgmr.msra.gmra.mxu1 %vm269_vm2, %v7197_v0  ;;  %2727 = vrot.lane.b32.xlu1 %v7793_v13, %s7712_s6  ;;  %v715_v43 = vsel %vm273_vm1, %v701_v40, 0 }
  0x9d   : > { %538 = vmatpush1.bf16.msra.mxu1 %v468_v28  ;;  %555 = vmatprep.mubr.bf16.mxu1 %v7700_v5 }
  0x9e   : > { %7475 = vmatprep.subr.bf16.mxu1 %v7710_v20  ;;  %v695_v32 = vpop.permute.xlu0 %694  ;;  %v697_v34 = vpop.permute.xlu1 %696 }
  0x9f   : > { %2729 = vrot.lane.b32.xlu0 %v7867_v56, %s7712_s6  ;;  %v704_v41 = vsel %vm698_vm4, %v695_v32, %v697_v34  ;;  %v703_v45 = vsel %vm698_vm4, %v693_v30, %v695_v32  ;;  %v727_v52 = vsel %vm273_vm1, %v697_v34, 0  ;;  %vm4027_vm4 = vcmask 64512  }
  0xa0   : > { %7206 = vmatmul.mubr.msk.bf16.vlgmr.msra.gmra.mxu0 %vm269_vm2, %v210_v31  ;;  %2731 = vrot.lane.b32.xlu1 %v7873_v59, %s7712_s6  ;;  %v721_v48 = vsel %vm273_vm1, %v703_v45, 0 }
  0xa1   : > { %579 = vmatpush1.bf16.msra.mxu0 %v474_v16  ;;  %596 = vmatprep.mubr.bf16.mxu0 %v7700_v5 }
  0xa2   : > { %7213 = vmatprep.subr.msk.bf16.mxu0 %vm273_vm1, %v700_v33  ;;  %v939_v35 = vpop.permute.xlu0 %938  ;;  %v941_v38 = vpop.permute.xlu1 %940 }
  0xa3   : > { %2733 = vrot.lane.b32.xlu0 %v7886_v2, %s7712_s6  ;;  %v953_v54 = vsel %vm952_vm5, %v939_v35, %v941_v38 }
  0xa4   : > { %7208 = vmatmul.mubr.msk.bf16.vlgmr.msra.gmra.mxu1 %vm269_vm2, %v210_v31  ;;  %2735 = vrot.lane.b32.xlu1 %v7893_v9, %s7712_s6  ;;  %v963_v58 = vsel %vm273_vm1, %v953_v54, 0  ;;  %s7728_s6 = smov 34  }
  0xa5   : > { %7476 = vmatpush3.bf16.msra.mxu1 %v480_v14  ;;  %7477 = vmatprep.mubr.msk.bf16.mxu1 %vm7711_vm3, %v7710_v20  ;;  %v7228_v14 = vld [vmem:[%s9625_s1 + $0x10] sm:$0xf] }
  0xa6   : > { %7215 = vmatprep.subr.msk.bf16.mxu1 %vm273_vm1, %v702_v37  ;;  %v943_v39 = vpop.permute.xlu0 %942  ;;  %v945_v42 = vpop.permute.xlu1 %944 }
  0xa7   : > { %2979 = vrot.lane.b32.xlu0 %v7779_v8, %s7713_s9  ;;  %v954_v50 = vsel %vm952_vm5, %v941_v38, %v943_v39  ;;  %v955_v61 = vsel %vm952_vm5, %v943_v39, %v945_v42 }
  0xa8   : > { %7210 = vmatmul.mubr.msk.bf16.vlgmr.msra.gmra.mxu0 %vm269_vm2, %v210_v31  ;;  %2981 = vrot.lane.b32.xlu1 %v7788_v12, %s7713_s9  ;;  %v969_v0 = vsel %vm273_vm1, %v955_v61, 0 }
  0xa9   : > { %744 = vmatpush1.bf16.msra.mxu0 %v709_v17  ;;  %761 = vmatprep.mubr.bf16.mxu0 %v7700_v5 }
  0xaa   : > { %7217 = vmatprep.subr.msk.bf16.mxu0 %vm273_vm1, %v704_v41  ;;  %v947_v44 = vpop.permute.xlu0 %946  ;;  %v949_v46 = vpop.permute.xlu1 %948 }
  0xab   : > { %2983 = vrot.lane.b32.xlu0 %v7784_v11, %s7713_s9  ;;  %v956_v55 = vsel %vm952_vm5, %v945_v42, %v947_v44  ;;  %v957_v4 = vsel %vm952_vm5, %v947_v44, %v949_v46 }
  0xac   : > { %7478 = vmatmul.mubr.msk.bf16.vlgmr.msra.gmra.mxu1 %vm269_vm2, %v210_v31  ;;  %2985 = vrot.lane.b32.xlu1 %v7793_v13, %s7713_s9  ;;  %v975_v15 = vsel %vm273_vm1, %v957_v4, 0 }
  0xad   : > { %785 = vmatpush1.bf16.msra.mxu1 %v715_v43  ;;  %802 = vmatprep.mubr.bf16.mxu1 %v7700_v5 }
  0xae   : > { %7481 = vmatprep.subr.bf16.mxu1 %v7710_v20  ;;  %v951_v49 = vpop.permute.xlu0 %950  ;;  %v1193_v51 = vpop.permute.xlu1 %1192 }
  0xaf   : > { %2987 = vrot.lane.b32.xlu0 %v7867_v56, %s7713_s9  ;;  %v958_v62 = vsel %vm952_vm5, %v949_v46, %v951_v49  ;;  %v981_v22 = vsel %vm273_vm1, %v951_v49, 0  ;;  %vm4285_vm5 = vcmask 56320  }
  0xb0   : > { %7214 = vmatmul.mubr.msk.bf16.vlgmr.msra.gmra.mxu0 %vm269_vm2, %v7212_v47  ;;  %2989 = vrot.lane.b32.xlu1 %v7873_v59, %s7713_s9 }
  0xb1   : > { %826 = vmatpush1.bf16.msra.mxu0 %v721_v48  ;;  %843 = vmatprep.mubr.bf16.mxu0 %v7700_v5 }
  0xb2   : > { %7221 = vmatprep.subr.msk.bf16.mxu0 %vm273_vm1, %v954_v50  ;;  %v1195_v53 = vpop.permute.xlu0 %1194  ;;  %v1197_v57 = vpop.permute.xlu1 %1196 }
  0xb3   : > { %2991 = vrot.lane.b32.xlu0 %v7886_v2, %s7713_s9  ;;  %v1208_v19 = vsel %vm1206_vm6, %v1195_v53, %v1197_v57  ;;  %v1207_v24 = vsel %vm1206_vm6, %v1193_v51, %v1195_v53 }
  0xb4   : > { %7216 = vmatmul.mubr.msk.bf16.vlgmr.msra.gmra.mxu1 %vm269_vm2, %v7212_v47  ;;  %2993 = vrot.lane.b32.xlu1 %v7893_v9, %s7713_s9  ;;  %v1217_v27 = vsel %vm273_vm1, %v1207_v24, 0  ;;  %v7244_v24 = vld [vmem:[%s9625_s1 + $0x18] sm:$0xf] }
  0xb5   : > { %7482 = vmatpush3.bf16.msra.mxu1 %v727_v52  ;;  %7483 = vmatprep.mubr.msk.bf16.mxu1 %vm7711_vm3, %v7710_v20 }
  0xb6   : > { %7223 = vmatprep.subr.msk.bf16.mxu1 %vm273_vm1, %v956_v55  ;;  %v1199_v60 = vpop.permute.xlu0 %1198  ;;  %v1201_v63 = vpop.permute.xlu1 %1200 }
  0xb7   : > { %3237 = vrot.lane.b32.xlu0 %v7779_v8, %s7714_s12  ;;  %v1210_v25 = vsel %vm1206_vm6, %v1199_v60, %v1201_v63  ;;  %v1209_v29 = vsel %vm1206_vm6, %v1197_v57, %v1199_v60 }
  0xb8   : > { %7218 = vmatmul.mubr.msk.bf16.vlgmr.msra.gmra.mxu0 %vm269_vm2, %v7212_v47  ;;  %3239 = vrot.lane.b32.xlu1 %v7788_v12, %s7714_s12  ;;  %v1223_v16 = vsel %vm273_vm1, %v1209_v29, 0 }
  0xb9   : > { %998 = vmatpush1.bf16.msra.mxu0 %v963_v58  ;;  %1015 = vmatprep.mubr.bf16.mxu0 %v7700_v5 }
  0xba   : > { %7225 = vmatprep.subr.msk.bf16.mxu0 %vm273_vm1, %v958_v62  ;;  %v1203_v1 = vpop.permute.xlu0 %1202  ;;  %v1205_v7 = vpop.permute.xlu1 %1204 }
  0xbb   : > { %3241 = vrot.lane.b32.xlu0 %v7784_v11, %s7714_s12  ;;  %v1212_v30 = vsel %vm1206_vm6, %v1203_v1, %v1205_v7  ;;  %v1211_v33 = vsel %vm1206_vm6, %v1201_v63, %v1203_v1  ;;  %v1235_v17 = vsel %vm273_vm1, %v1205_v7, 0  ;;  %vm4543_vm6 = vcmask 48128  }
  0xbc   : > { %7484 = vmatmul.mubr.msk.bf16.vlgmr.msra.gmra.mxu1 %vm269_vm2, %v7212_v47  ;;  %3243 = vrot.lane.b32.xlu1 %v7793_v13, %s7714_s12  ;;  %v1229_v35 = vsel %vm273_vm1, %v1211_v33, 0 }
  0xbd   : > { %1039 = vmatpush1.bf16.msra.mxu1 %v969_v0  ;;  %1056 = vmatprep.mubr.bf16.mxu1 %v7700_v5 }
  0xbe   : > { %7487 = vmatprep.subr.bf16.mxu1 %v7710_v20  ;;  %v1447_v18 = vpop.permute.xlu0 %1446  ;;  %v1449_v21 = vpop.permute.xlu1 %1448 }
  0xbf   : > { %3245 = vrot.lane.b32.xlu0 %v7867_v56, %s7714_s12  ;;  %v1461_v40 = vsel %vm1460_vm7, %v1447_v18, %v1449_v21 }
  0xc0   : > { %7222 = vmatmul.mubr.msk.bf16.vlgmr.msra.gmra.mxu0 %vm269_vm2, %v7220_v10  ;;  %3247 = vrot.lane.b32.xlu1 %v7873_v59, %s7714_s12  ;;  %v1471_v43 = vsel %vm273_vm1, %v1461_v40, 0  ;;  %v7252_v40 = vld [vmem:[%s9625_s1 + $0x1c] sm:$0xf] }
  0xc1   : > { %1080 = vmatpush1.bf16.msra.mxu0 %v975_v15  ;;  %1097 = vmatprep.mubr.bf16.mxu0 %v7700_v5 }
  0xc2   : > { %7229 = vmatprep.subr.msk.bf16.mxu0 %vm273_vm1, %v1208_v19  ;;  %v1451_v23 = vpop.permute.xlu0 %1450  ;;  %v1453_v26 = vpop.permute.xlu1 %1452 }
  0xc3   : > { %3249 = vrot.lane.b32.xlu0 %v7886_v2, %s7714_s12  ;;  %v1462_v37 = vsel %vm1460_vm7, %v1449_v21, %v1451_v23  ;;  %v1463_v45 = vsel %vm1460_vm7, %v1451_v23, %v1453_v26 }
  0xc4   : > { %7224 = vmatmul.mubr.msk.bf16.vlgmr.msra.gmra.mxu1 %vm269_vm2, %v7220_v10  ;;  %3251 = vrot.lane.b32.xlu1 %v7893_v9, %s7714_s12  ;;  %v1477_v48 = vsel %vm273_vm1, %v1463_v45, 0 }
  0xc5   : > { %7488 = vmatpush3.bf16.msra.mxu1 %v981_v22  ;;  %7489 = vmatprep.mubr.msk.bf16.mxu1 %vm7711_vm3, %v7710_v20 }
  0xc6   : > { %7231 = vmatprep.subr.msk.bf16.mxu1 %vm273_vm1, %v1210_v25  ;;  %v1455_v28 = vpop.permute.xlu0 %1454  ;;  %v1457_v31 = vpop.permute.xlu1 %1456 }
  0xc7   : > { %3495 = vrot.lane.b32.xlu0 %v7779_v8, %s7715_s17  ;;  %v1464_v41 = vsel %vm1460_vm7, %v1453_v26, %v1455_v28  ;;  %v1465_v50 = vsel %vm1460_vm7, %v1455_v28, %v1457_v31 }
  0xc8   : > { %7226 = vmatmul.mubr.msk.bf16.vlgmr.msra.gmra.mxu0 %vm269_vm2, %v7220_v10  ;;  %3497 = vrot.lane.b32.xlu1 %v7788_v12, %s7715_s17  ;;  %v1483_v51 = vsel %vm273_vm1, %v1465_v50, 0 }
  0xc9   : > { %1252 = vmatpush1.bf16.msra.mxu0 %v1217_v27  ;;  %1269 = vmatprep.mubr.bf16.mxu0 %v7700_v5 }
  0xca   : > { %7233 = vmatprep.subr.msk.bf16.mxu0 %vm273_vm1, %v1212_v30  ;;  %v8055_v32 = vpop.permute.xlu0 %1458  ;;  %v8061_v34 = vpop.permute.xlu1 %1700 }
  0xcb   : > { %3499 = vrot.lane.b32.xlu0 %v7784_v11, %s7715_s17  ;;  %v1466_v46 = vsel %vm1460_vm7, %v1457_v31, %v8055_v32  ;;  %v1489_v54 = vsel %vm273_vm1, %v8055_v32, 0  ;;  %vm4798_vm7 = vcmask 457728  }
  0xcc   : > { %7490 = vmatmul.mubr.msk.bf16.vlgmr.msra.gmra.mxu1 %vm269_vm2, %v7220_v10  ;;  %3501 = vrot.lane.b32.xlu1 %v7793_v13, %s7715_s17 }
  0xcd   : > { %1293 = vmatpush1.bf16.msra.mxu1 %v1223_v16  ;;  %1310 = vmatprep.mubr.bf16.mxu1 %v7700_v5 }
  0xce   : > { %7493 = vmatprep.subr.bf16.mxu1 %v7710_v20  ;;  %v1703_v36 = vpop.permute.xlu0 %1702  ;;  %v8075_v38 = vpop.permute.xlu1 %1704 }
  0xcf   : > { %3503 = vrot.lane.b32.xlu0 %v7867_v56, %s7715_s17  ;;  %v1716_v52 = vsel %vm1714_vm8, %v1703_v36, %v8075_v38  ;;  %v1715_v60 = vsel %vm1714_vm8, %v8061_v34, %v1703_v36 }
  0xd0   : > { %7230 = vmatmul.mubr.msk.bf16.vlgmr.msra.gmra.mxu0 %vm269_vm2, %v7228_v14  ;;  %3505 = vrot.lane.b32.xlu1 %v7873_v59, %s7715_s17  ;;  %v1725_v0 = vsel %vm273_vm1, %v1715_v60, 0  ;;  %v4745_v60 = vld [vmem:[%s7772_s20 + $0x2] sm:$0xff] }
  0xd1   : > { %1334 = vmatpush1.bf16.msra.mxu0 %v1229_v35  ;;  %1351 = vmatprep.mubr.bf16.mxu0 %v7700_v5 }
  0xd2   : > { %7237 = vmatprep.subr.msk.bf16.mxu0 %vm273_vm1, %v1462_v37  ;;  %v8082_v39 = vpop.permute.xlu0 %1706  ;;  %v8089_v42 = vpop.permute.xlu1 %1708 }
  0xd3   : > { %3507 = vrot.lane.b32.xlu0 %v7886_v2, %s7715_s17  ;;  %v1718_v61 = vsel %vm1714_vm8, %v8082_v39, %v8089_v42  ;;  %v1717_v7 = vsel %vm1714_vm8, %v8075_v38, %v8082_v39 }
  0xd4   : > { %7232 = vmatmul.mubr.msk.bf16.vlgmr.msra.gmra.mxu1 %vm269_vm2, %v7228_v14  ;;  %3509 = vrot.lane.b32.xlu1 %v7893_v9, %s7715_s17  ;;  %v1731_v19 = vsel %vm273_vm1, %v1717_v7, 0 }
  0xd5   : > { %7494 = vmatpush3.bf16.msra.mxu1 %v1235_v17  ;;  %7495 = vmatprep.mubr.msk.bf16.mxu1 %vm7711_vm3, %v7710_v20 }
  0xd6   : > { %7239 = vmatprep.subr.msk.bf16.mxu1 %vm273_vm1, %v1464_v41  ;;  %v8097_v44 = vpop.permute.xlu0 %1710  ;;  %v8105_v47 = vpop.permute.xlu1 %1712 }
  0xd7   : > { %3753 = vrot.lane.b32.xlu0 %v7779_v8, %s7716_s21  ;;  %v1720_v10 = vsel %vm1714_vm8, %v8097_v44, %v8105_v47  ;;  %v1719_v22 = vsel %vm1714_vm8, %v8089_v42, %v8097_v44  ;;  %v1743_v29 = vsel %vm273_vm1, %v8105_v47, 0  ;;  %vm5052_vm8 = vcmask 449536  }
  0xd8   : > { %7234 = vmatmul.mubr.msk.bf16.vlgmr.msra.gmra.mxu0 %vm269_vm2, %v7228_v14  ;;  %3755 = vrot.lane.b32.xlu1 %v7788_v12, %s7716_s21  ;;  %v7236_v12 = vld [vmem:[%s9625_s1 + $0x14] sm:$0xf]  ;;  %v1737_v25 = vsel %vm273_vm1, %v1719_v22, 0 }
  0xd9   : > { %1506 = vmatpush1.bf16.msra.mxu0 %v1471_v43  ;;  %1523 = vmatprep.mubr.bf16.mxu0 %v7700_v5 }
  0xda   : > { %7241 = vmatprep.subr.msk.bf16.mxu0 %vm273_vm1, %v1466_v46  ;;  %v8112_v49 = vpop.permute.xlu0 %1954  ;;  %v8118_v8 = vpop.permute.xlu1 %1956 }
  0xdb   : > { %3757 = vrot.lane.b32.xlu0 %v7784_v11, %s7716_s21  ;;  %v1969_v31 = vsel %vm1968_vm9, %v8112_v49, %v8118_v8 }
  0xdc   : > { %7496 = vmatmul.mubr.msk.bf16.vlgmr.msra.gmra.mxu1 %vm269_vm2, %v7228_v14  ;;  %3759 = vrot.lane.b32.xlu1 %v7793_v13, %s7716_s21  ;;  %v3971_v13 = vld [vmem:[%s7772_s20] sm:$0xff]  ;;  %v1979_v33 = vsel %vm273_vm1, %v1969_v31, 0 }
  0xdd   : > { %1547 = vmatpush1.bf16.msra.mxu1 %v1477_v48  ;;  %1564 = vmatprep.mubr.bf16.mxu1 %v7700_v5  ;;  %v8147_v57 = vrot.slane %v3971_v13, %v7775_v6  ;;  %v3977_v58 = vcombine.high %v3971_v13, %v3971_v13 }
  0xde   : > { %7499 = vmatprep.subr.bf16.mxu1 %v7710_v20  ;;  %v8128_v11 = vpop.permute.xlu0 %1958  ;;  %v8136_v53 = vpop.permute.xlu1 %1960 }
  0xdf   : > { %3761 = vrot.lane.b32.xlu0 %v7867_v56, %s7716_s21  ;;  %v8163_v63 = vcombine.high %v8147_v57, %v8147_v57  ;;  %v8172_v4 = vrot.slane %v3977_v58, %v7775_v6  ;;  %v1970_v27 = vsel %vm1968_vm9, %v8118_v8, %v8128_v11  ;;  %v1971_v14 = vsel %vm1968_vm9, %v8128_v11, %v8136_v53 }
  0xe0   : > { %7238 = vmatmul.mubr.msk.bf16.vlgmr.msra.gmra.mxu0 %vm269_vm2, %v7236_v12  ;;  %3763 = vrot.lane.b32.xlu1 %v7873_v59, %s7716_s21  ;;  %v1985_v37 = vsel %vm273_vm1, %v1971_v14, 0 }
  0xe1   : > { %1588 = vmatpush1.bf16.msra.mxu0 %v1483_v51  ;;  %1605 = vmatprep.mubr.bf16.mxu0 %v7700_v5  ;;  %v8189_v18 = vcombine.high %v8172_v4, %v8172_v4 }
  0xe2   : > { %7245 = vmatprep.subr.msk.bf16.mxu0 %vm273_vm1, %v1716_v52  ;;  %v8144_v55 = vpop.permute.xlu0 %1962  ;;  %v8157_v62 = vpop.permute.xlu1 %1964 }
  0xe3   : > { %3765 = vrot.lane.b32.xlu0 %v7886_v2, %s7716_s21  ;;  %v1972_v16 = vsel %vm1968_vm9, %v8136_v53, %v8144_v55  ;;  %v1973_v17 = vsel %vm1968_vm9, %v8144_v55, %v8157_v62  ;;  %v7260_v53 = vld [vmem:[%s9625_s1 + $0x20] sm:$0xf] }
  0xe4   : > { %7240 = vmatmul.mubr.msk.bf16.vlgmr.msra.gmra.mxu1 %vm269_vm2, %v7236_v12  ;;  %3767 = vrot.lane.b32.xlu1 %v7893_v9, %s7716_s21  ;;  %v1991_v41 = vsel %vm273_vm1, %v1973_v17, 0 }
  0xe5   : > { %7500 = vmatpush3.bf16.msra.mxu1 %v1489_v54  ;;  %7501 = vmatprep.mubr.msk.bf16.mxu1 %vm7711_vm3, %v7710_v20 }
  0xe6   : > { %7247 = vmatprep.subr.msk.bf16.mxu1 %vm273_vm1, %v1718_v61  ;;  %v8169_v1 = vpop.permute.xlu0 %1966  ;;  %v8183_v15 = vpop.permute.xlu1 %2208 }
  0xe7   : > { %4011 = vrot.lane.b32.xlu0 %v8147_v57, %s7717_s24  ;;  %v1974_v35 = vsel %vm1968_vm9, %v8157_v62, %v8169_v1  ;;  %v1997_v45 = vsel %vm273_vm1, %v8169_v1, 0  ;;  %vm5306_vm9 = vcmask 441344  }
  0xe8   : > { %7242 = vmatmul.mubr.msk.bf16.vlgmr.msra.gmra.mxu0 %vm269_vm2, %v7236_v12  ;;  %4013 = vrot.lane.b32.xlu1 %v8163_v63, %s7717_s24 }
  0xe9   : > { %1760 = vmatpush1.bf16.msra.mxu0 %v1725_v0  ;;  %1777 = vmatprep.mubr.bf16.mxu0 %v7700_v5  ;;  %v4751_v0 = vcombine.high %v4745_v60, %v4745_v60 }
  0xea   : > { %7249 = vmatprep.subr.msk.bf16.mxu0 %vm273_vm1, %v1720_v10  ;;  %v8194_v21 = vpop.permute.xlu0 %2210  ;;  %v8202_v23 = vpop.permute.xlu1 %2212 }
  0xeb   : > { %4015 = vrot.lane.b32.xlu0 %v8172_v4, %s7717_s24  ;;  %v2224_v43 = vsel %vm2222_vm10, %v8194_v21, %v8202_v23  ;;  %v2223_v46 = vsel %vm2222_vm10, %v8183_v15, %v8194_v21  ;;  %v8398_v15 = vrot.slane %v4751_v0, %v7775_v6 }
  0xec   : > { %7502 = vmatmul.mubr.msk.bf16.vlgmr.msra.gmra.mxu1 %vm269_vm2, %v7236_v12  ;;  %4017 = vrot.lane.b32.xlu1 %v8189_v18, %s7717_s24  ;;  %v2233_v50 = vsel %vm273_vm1, %v2223_v46, 0 }
  0xed   : > { %1801 = vmatpush1.bf16.msra.mxu1 %v1731_v19  ;;  %1818 = vmatprep.mubr.bf16.mxu1 %v7700_v5  ;;  %v4746_v19 = vld [vmem:[%s7772_s20 + $0xa] sm:$0x3f]  ;;  %v8414_v21 = vcombine.high %v8398_v15, %v8398_v15 }
  0xee   : > { %7505 = vmatprep.subr.bf16.mxu1 %v7710_v20  ;;  %v8212_v26 = vpop.permute.xlu0 %2214  ;;  %v8220_v28 = vpop.permute.xlu1 %2216 }
  0xef   : > { %4019 = vrot.lane.b32.xlu0 %v7867_v56, %s7717_s24  ;;  %v2226_v47 = vsel %vm2222_vm10, %v8212_v26, %v8220_v28  ;;  %v2225_v8 = vsel %vm2222_vm10, %v8202_v23, %v8212_v26 }
  0xf0   : > { %7246 = vmatmul.mubr.msk.bf16.vlgmr.msra.gmra.mxu0 %vm269_vm2, %v7244_v24  ;;  %4021 = vrot.lane.b32.xlu1 %v7873_v59, %s7717_s24  ;;  %v2239_v11 = vsel %vm273_vm1, %v2225_v8, 0 }
  0xf1   : > { %1842 = vmatpush1.bf16.msra.mxu0 %v1737_v25  ;;  %1859 = vmatprep.mubr.bf16.mxu0 %v7700_v5  ;;  %v4775_v25 = vrot.slane %v4746_v19, %v7775_v6 }
  0xf2   : > { %7253 = vmatprep.subr.msk.bf16.mxu0 %vm273_vm1, %v1970_v27  ;;  %v8228_v30 = vpop.permute.xlu0 %2218  ;;  %v8239_v32 = vpop.permute.xlu1 %2220  ;;  %v4768_v27 = vcombine.high %v4746_v19, %v4746_v19 }
  0xf3   : > { %4023 = vrot.lane.b32.xlu0 %v7886_v2, %s7717_s24  ;;  %v2228_v12 = vsel %vm2222_vm10, %v8228_v30, %v8239_v32  ;;  %v2227_v13 = vsel %vm2222_vm10, %v8220_v28, %v8228_v30  ;;  %v2251_v62 = vsel %vm273_vm1, %v8239_v32, 0  ;;  %v4783_v28 = vcombine.high %v4775_v25, %v4775_v25 }
  0xf4   : > { %7248 = vmatmul.mubr.msk.bf16.vlgmr.msra.gmra.mxu1 %vm269_vm2, %v7244_v24  ;;  %4025 = vrot.lane.b32.xlu1 %v7893_v9, %s7717_s24  ;;  %v2245_v55 = vsel %vm273_vm1, %v2227_v13, 0  ;;  %vm5560_vm10 = vcmask 375808  }
  0xf5   : > { %7506 = vmatpush3.bf16.msra.mxu1 %v1743_v29  ;;  %7507 = vmatprep.mubr.msk.bf16.mxu1 %vm7711_vm3, %v7710_v20  ;;  %v7268_v29 = vld [vmem:[%s9625_s1 + $0x24] sm:$0xf] }
  0xf6   : > { %7255 = vmatprep.subr.msk.bf16.mxu1 %vm273_vm1, %v1972_v16  ;;  %v8247_v34 = vpop.permute.xlu0 %2463  ;;  %v8260_v36 = vpop.permute.xlu1 %2465 }
  0xf7   : > { %4269 = vrot.lane.b32.xlu0 %v8147_v57, %s7718_s27 }
  0xf8   : > { %7250 = vmatmul.mubr.msk.bf16.vlgmr.msra.gmra.mxu0 %vm269_vm2, %v7244_v24  ;;  %4271 = vrot.lane.b32.xlu1 %v8163_v63, %s7718_s27 }
  0xf9   : > { %2014 = vmatpush1.bf16.msra.mxu0 %v1979_v33  ;;  %2031 = vmatprep.mubr.bf16.mxu0 %v7700_v5 }
  0xfa   : > { %7257 = vmatprep.subr.msk.bf16.mxu0 %vm273_vm1, %v1974_v35  ;;  %v8265_v38 = vpop.permute.xlu0 %2467  ;;  %v8275_v39 = vpop.permute.xlu1 %2469 }
  0xfb   : > { %4273 = vrot.lane.b32.xlu0 %v8172_v4, %s7718_s27  ;;  %v2481_v58 = vsel %vm2479_vm11, %v8260_v36, %v8265_v38 }
  0xfc   : > { %7508 = vmatmul.mubr.msk.bf16.vlgmr.msra.gmra.mxu1 %vm269_vm2, %v7244_v24  ;;  %4275 = vrot.lane.b32.xlu1 %v8189_v18, %s7718_s27 }
  0xfd   : > { %2055 = vmatpush1.bf16.msra.mxu1 %v1985_v37  ;;  %2072 = vmatprep.mubr.bf16.mxu1 %v7700_v5 }
  0xfe   : > { %7511 = vmatprep.subr.bf16.mxu1 %v7710_v20  ;;  %v8283_v42 = vpop.permute.xlu0 %2471 }
  0xff   : > { %4277 = vrot.lane.b32.xlu0 %v7867_v56, %s7718_s27  ;;  %v8293_v44 = vpop.permute.xlu1 %2473  ;;  %v2483_v1 = vsel %vm2479_vm11, %v8275_v39, %v8283_v42 }
 0x100   : > { %7254 = vmatmul.mubr.msk.bf16.vlgmr.msra.gmra.mxu0 %vm269_vm2, %v7252_v40  ;;  %4279 = vrot.lane.b32.xlu1 %v7873_v59, %s7718_s27  ;;  %v2484_v26 = vsel %vm2479_vm11, %v8283_v42, %v8293_v44 }
 0x101   : > { %2096 = vmatpush1.bf16.msra.mxu0 %v1991_v41  ;;  %2113 = vmatprep.mubr.bf16.mxu0 %v7700_v5  ;;  %v2503_v31 = vsel %vm273_vm1, %v2484_v26, 0 }
 0x102   : > { %7261 = vmatprep.subr.msk.bf16.mxu0 %vm273_vm1, %v2224_v43 }
 0x103   : > { %4281 = vrot.lane.b32.xlu0 %v7886_v2, %s7718_s27 }
 0x104   : > { %7256 = vmatmul.mubr.msk.bf16.vlgmr.msra.gmra.mxu1 %vm269_vm2, %v7252_v40  ;;  %v8308_v48 = vpop.permute.xlu0 %2475  ;;  %4283 = vrot.lane.b32.xlu1 %v7893_v9, %s7718_s27 }
 0x105   : > { %7512 = vmatpush3.bf16.msra.mxu1 %v1997_v45  ;;  %7513 = vmatprep.mubr.msk.bf16.mxu1 %vm7711_vm3, %v7710_v20  ;;  %v8314_v49 = vpop.permute.xlu1 %2477 }
 0x106   : > { %7263 = vmatprep.subr.msk.bf16.mxu1 %vm273_vm1, %v2226_v47  ;;  %v2486_v32 = vsel %vm2479_vm11, %v8308_v48, %v8314_v49 }
 0x107   : > { %4527 = vrot.lane.b32.xlu0 %v8147_v57, %s7719_s30  ;;  %v2509_v35 = vsel %vm273_vm1, %v2486_v32, 0 }
 0x108   : > { %7258 = vmatmul.mubr.msk.bf16.vlgmr.msra.gmra.mxu0 %vm269_vm2, %v7252_v40  ;;  %4529 = vrot.lane.b32.xlu1 %v8163_v63, %s7719_s30 }
 0x109   : > { %2268 = vmatpush1.bf16.msra.mxu0 %v2233_v50  ;;  %2285 = vmatprep.mubr.bf16.mxu0 %v7700_v5  ;;  %v8330_v51 = vpop.permute.xlu0 %2721 }
 0x10a   : > { %7265 = vmatprep.subr.msk.bf16.mxu0 %vm273_vm1, %v2228_v12  ;;  %v8334_v52 = vpop.permute.xlu1 %2723  ;;  %v7276_v12 = vld [vmem:[%s9625_s1 + $0x28] sm:$0xf] }
 0x10b   : > { %4531 = vrot.lane.b32.xlu0 %v8172_v4, %s7719_s30  ;;  %v2738_v37 = vsel %vm2737_vm12, %v8330_v51, %v8334_v52 }
 0x10c   : > { %7514 = vmatmul.mubr.msk.bf16.vlgmr.msra.gmra.mxu1 %vm269_vm2, %v7252_v40  ;;  %4533 = vrot.lane.b32.xlu1 %v8189_v18, %s7719_s30  ;;  %v2485_v18 = vsel %vm2479_vm11, %v8293_v44, %v8308_v48  ;;  %v2749_v40 = vsel %vm273_vm1, %v2738_v37, 0 }
 0x10d   : > { %2309 = vmatpush1.bf16.msra.mxu1 %v2239_v11  ;;  %2326 = vmatprep.mubr.bf16.mxu1 %v7700_v5  ;;  %v8348_v54 = vpop.permute.xlu0 %2725 }
 0x10e   : > { %7517 = vmatprep.subr.bf16.mxu1 %v7710_v20  ;;  %v8352_v57 = vpop.permute.xlu1 %2727  ;;  %v2739_v33 = vsel %vm2737_vm12, %v8334_v52, %v8348_v54 }
 0x10f   : > { %4535 = vrot.lane.b32.xlu0 %v7867_v56, %s7719_s30  ;;  %v8372_v56 = vrot.slane %v4745_v60, %v7775_v6  ;;  %v2740_v42 = vsel %vm2737_vm12, %v8348_v54, %v8352_v57 }
 0x110   : > { %7262 = vmatmul.mubr.msk.bf16.vlgmr.msra.gmra.mxu0 %vm269_vm2, %v7260_v53  ;;  %4537 = vrot.lane.b32.xlu1 %v7873_v59, %s7719_s30  ;;  %v2480_v59 = vsel %vm2479_vm11, %v8247_v34, %v8260_v36  ;;  %v4782_v34 = vrot.slane %v4768_v27, %v7775_v6  ;;  %v2755_v47 = vsel %vm273_vm1, %v2740_v42, 0 }
 0x111   : > { %2350 = vmatpush1.bf16.msra.mxu0 %v2245_v55  ;;  %2367 = vmatprep.mubr.bf16.mxu0 %v7700_v5  ;;  %v8364_v61 = vpop.permute.xlu0 %2729  ;;  %v8387_v4 = vcombine.high %v8372_v56, %v8372_v56  ;;  %v2491_v10 = vsel %vm273_vm1, %v2480_v59, 0 }
 0x112   : > { %7269 = vmatprep.subr.msk.bf16.mxu0 %vm273_vm1, %v2481_v58  ;;  %v8369_v63 = vpop.permute.xlu1 %2731 }
 0x113   : > { %4539 = vrot.lane.b32.xlu0 %v7886_v2, %s7719_s30  ;;  %v2742_v49 = vsel %vm2737_vm12, %v8364_v61, %v8369_v63 }
 0x114   : > { %7264 = vmatmul.mubr.msk.bf16.vlgmr.msra.gmra.mxu1 %vm269_vm2, %v7260_v53  ;;  %4541 = vrot.lane.b32.xlu1 %v7893_v9, %s7719_s30  ;;  %v2482_v9 = vsel %vm2479_vm11, %v8265_v38, %v8275_v39  ;;  %v2741_v38 = vsel %vm2737_vm12, %v8352_v57, %v8364_v61  ;;  %v5000_v39 = vld [vmem:[%s7772_s20 + $0xa] sm:$0x3f]  ;;  %v2761_v11 = vsel %vm273_vm1, %v2742_v49, 0  ;;  %vm5814_vm11 = vcmask 367616  }
 0x115   : > { %7518 = vmatpush3.bf16.msra.mxu1 %v2251_v62  ;;  %7519 = vmatprep.mubr.msk.bf16.mxu1 %vm7711_vm3, %v7710_v20  ;;  %v8391_v7 = vpop.permute.xlu0 %2733  ;;  %v2497_v23 = vsel %vm273_vm1, %v2482_v9, 0  ;;  %v5029_v44 = vrot.slane %v5000_v39, %v7775_v6  ;;  %v5022_v45 = vcombine.high %v5000_v39, %v5000_v39  ;;  %v5254_v61 = vld [vmem:[%s7772_s20 + $0xa] sm:$0x3f] }
 0x116   : > { %7271 = vmatprep.subr.msk.bf16.mxu1 %vm273_vm1, %v2483_v1  ;;  %v8395_v2 = vpop.permute.xlu1 %2735  ;;  %v2743_v43 = vsel %vm2737_vm12, %v8369_v63, %v8391_v7  ;;  %v5283_v59 = vrot.slane %v5254_v61, %v7775_v6 }
 0x117   : > { %4784 = vrot.lane.b32.xlu0 %v8372_v56, %s7720_s7  ;;  %v5037_v50 = vcombine.high %v5029_v44, %v5029_v44  ;;  %v5036_v8 = vrot.slane %v5022_v45, %v7775_v6  ;;  %v2744_v13 = vsel %vm2737_vm12, %v8391_v7, %v8395_v2  ;;  %vm6068_vm12 = vcmask 359424  }
 0x118   : > { %7266 = vmatmul.mubr.msk.bf16.vlgmr.msra.gmra.mxu0 %vm269_vm2, %v7260_v53  ;;  %4786 = vrot.lane.b32.xlu1 %v8387_v4, %s7720_s7  ;;  %v2767_v55 = vsel %vm273_vm1, %v2744_v13, 0  ;;  %v5291_v2 = vcombine.high %v5283_v59, %v5283_v59 }
 0x119   : > { %2526 = vmatpush1.bf16.msra.mxu0 %v2491_v10  ;;  %2543 = vmatprep.mubr.bf16.mxu0 %v7700_v5  ;;  %v8417_v22 = vpop.permute.xlu0 %2979  ;;  %v5276_v10 = vcombine.high %v5254_v61, %v5254_v61 }
 0x11a   : > { %7273 = vmatprep.subr.msk.bf16.mxu0 %vm273_vm1, %v2485_v18  ;;  %v8421_v24 = vpop.permute.xlu1 %2981 }
 0x11b   : > { %4788 = vrot.lane.b32.xlu0 %v8398_v15, %s7720_s7  ;;  %v2996_v58 = vsel %vm2995_vm13, %v8417_v22, %v8421_v24 }
 0x11c   : > { %7520 = vmatmul.mubr.msk.bf16.vlgmr.msra.gmra.mxu1 %vm269_vm2, %v7260_v53  ;;  %4790 = vrot.lane.b32.xlu1 %v8414_v21, %s7720_s7  ;;  %v3007_v63 = vsel %vm273_vm1, %v2996_v58, 0 }
 0x11d   : > { %2567 = vmatpush1.bf16.msra.mxu1 %v2497_v23  ;;  %2584 = vmatprep.mubr.bf16.mxu1 %v7700_v5  ;;  %v8436_v30 = vpop.permute.xlu0 %2983  ;;  %v5290_v23 = vrot.slane %v5276_v10, %v7775_v6 }
 0x11e   : > { %7523 = vmatprep.subr.bf16.mxu1 %v7710_v20  ;;  %v8440_v16 = vpop.permute.xlu1 %2985  ;;  %v2997_v53 = vsel %vm2995_vm13, %v8421_v24, %v8436_v30  ;;  %v7284_v24 = vld [vmem:[%s9625_s1 + $0x2c] sm:$0xf] }
 0x11f   : > { %4792 = vrot.lane.b32.xlu0 %v4775_v25, %s7720_s7  ;;  %v2998_v1 = vsel %vm2995_vm13, %v8436_v30, %v8440_v16 }
 0x120   : > { %7270 = vmatmul.mubr.msk.bf16.vlgmr.msra.gmra.mxu0 %vm269_vm2, %v7268_v29  ;;  %4794 = vrot.lane.b32.xlu1 %v4783_v28, %s7720_s7  ;;  %v3013_v18 = vsel %vm273_vm1, %v2998_v1, 0 }
 0x121   : > { %2608 = vmatpush1.bf16.msra.mxu0 %v2503_v31  ;;  %2625 = vmatprep.mubr.bf16.mxu0 %v7700_v5  ;;  %v8453_v14 = vpop.permute.xlu0 %2987  ;;  %v5508_v31 = vld [vmem:[%s7772_s20 + $0xa] sm:$0x3f] }
 0x122   : > { %7277 = vmatprep.subr.msk.bf16.mxu0 %vm273_vm1, %v2739_v33  ;;  %v8457_v36 = vpop.permute.xlu1 %2989  ;;  %v2999_v60 = vsel %vm2995_vm13, %v8440_v16, %v8453_v14 }
 0x123   : > { %4796 = vrot.lane.b32.xlu0 %v4782_v34, %s7720_s7  ;;  %v3000_v22 = vsel %vm2995_vm13, %v8453_v14, %v8457_v36  ;;  %v5537_v14 = vrot.slane %v5508_v31, %v7775_v6 }
 0x124   : > { %7272 = vmatmul.mubr.msk.bf16.vlgmr.msra.gmra.mxu1 %vm269_vm2, %v7268_v29  ;;  %5038 = vrot.lane.b32.xlu1 %v8372_v56, %s7721_s10  ;;  %v3019_v26 = vsel %vm273_vm1, %v3000_v22, 0 }
 0x125   : > { %7524 = vmatpush3.bf16.msra.mxu1 %v2509_v35  ;;  %7525 = vmatprep.mubr.msk.bf16.mxu1 %vm7711_vm3, %v7710_v20  ;;  %v8471_v17 = vpop.permute.xlu0 %2991  ;;  %v5530_v35 = vcombine.high %v5508_v31, %v5508_v31  ;;  %v8739_v31 = vld [vmem:[%s9625_s1 + $0x34] sm:$0xf] }
 0x126   : > { %7279 = vmatprep.subr.msk.bf16.mxu1 %vm273_vm1, %v2741_v38  ;;  %v8476_v41 = vpop.permute.xlu1 %2993  ;;  %v3001_v7 = vsel %vm2995_vm13, %v8457_v36, %v8471_v17 }
 0x127   : > { %5040 = vrot.lane.b32.xlu0 %v8387_v4, %s7721_s10  ;;  %v3002_v28 = vsel %vm2995_vm13, %v8471_v17, %v8476_v41  ;;  %v5544_v41 = vrot.slane %v5530_v35, %v7775_v6  ;;  %vm6322_vm13 = vcmask 293888  }
 0x128   : > { %7274 = vmatmul.mubr.msk.bf16.vlgmr.msra.gmra.mxu0 %vm269_vm2, %v7268_v29  ;;  %5042 = vrot.lane.b32.xlu1 %v8398_v15, %s7721_s10  ;;  %v3025_v16 = vsel %vm273_vm1, %v3002_v28, 0 }
 0x129   : > { %2784 = vmatpush1.bf16.msra.mxu0 %v2749_v40  ;;  %2801 = vmatprep.mubr.bf16.mxu0 %v7700_v5  ;;  %v8491_v46 = vpop.permute.xlu0 %3237  ;;  %v5545_v40 = vcombine.high %v5537_v14, %v5537_v14 }
 0x12a   : > { %7281 = vmatprep.subr.msk.bf16.mxu0 %vm273_vm1, %v2743_v43  ;;  %v8495_v48 = vpop.permute.xlu1 %3239 }
 0x12b   : > { %5044 = vrot.lane.b32.xlu0 %v8414_v21, %s7721_s10  ;;  %v3254_v33 = vsel %vm3253_vm14, %v8491_v46, %v8495_v48  ;;  %v7292_v46 = vld [vmem:[%s9625_s1 + $0x30] sm:$0xf] }
 0x12c   : > { %7526 = vmatmul.mubr.msk.bf16.vlgmr.msra.gmra.mxu1 %vm269_vm2, %v7268_v29  ;;  %5046 = vrot.lane.b32.xlu1 %v5029_v44, %s7721_s10  ;;  %v3265_v37 = vsel %vm273_vm1, %v3254_v33, 0 }
 0x12d   : > { %2825 = vmatpush1.bf16.msra.mxu1 %v2755_v47  ;;  %2842 = vmatprep.mubr.bf16.mxu1 %v7700_v5  ;;  %v8509_v51 = vpop.permute.xlu0 %3241 }
 0x12e   : > { %7529 = vmatprep.subr.bf16.mxu1 %v7710_v20  ;;  %v8513_v52 = vpop.permute.xlu1 %3243  ;;  %v3255_v29 = vsel %vm3253_vm14, %v8495_v48, %v8509_v51 }
 0x12f   : > { %5048 = vrot.lane.b32.xlu0 %v5037_v50, %s7721_s10  ;;  %v3256_v17 = vsel %vm3253_vm14, %v8509_v51, %v8513_v52 }
 0x130   : > { %7278 = vmatmul.mubr.msk.bf16.vlgmr.msra.gmra.mxu0 %vm269_vm2, %v7276_v12  ;;  %5050 = vrot.lane.b32.xlu1 %v5036_v8, %s7721_s10  ;;  %v3271_v43 = vsel %vm273_vm1, %v3256_v17, 0 }
 0x131   : > { %2866 = vmatpush1.bf16.msra.mxu0 %v2761_v11  ;;  %2883 = vmatprep.mubr.bf16.mxu0 %v7700_v5  ;;  %v8525_v54 = vpop.permute.xlu0 %3245 }
 0x132   : > { %7285 = vmatprep.subr.msk.bf16.mxu0 %vm273_vm1, %v2997_v53  ;;  %v8529_v57 = vpop.permute.xlu1 %3247  ;;  %v3257_v34 = vsel %vm3253_vm14, %v8513_v52, %v8525_v54 }
 0x133   : > { %5292 = vrot.lane.b32.xlu0 %v8372_v56, %s7722_s13  ;;  %v3258_v45 = vsel %vm3253_vm14, %v8525_v54, %v8529_v57 }
 0x134   : > { %7280 = vmatmul.mubr.msk.bf16.vlgmr.msra.gmra.mxu1 %vm269_vm2, %v7276_v12  ;;  %5294 = vrot.lane.b32.xlu1 %v8387_v4, %s7722_s13  ;;  %v3277_v48 = vsel %vm273_vm1, %v3258_v45, 0 }
 0x135   : > { %7530 = vmatpush3.bf16.msra.mxu1 %v2767_v55  ;;  %7531 = vmatprep.mubr.msk.bf16.mxu1 %vm7711_vm3, %v7710_v20  ;;  %v8545_v62 = vpop.permute.xlu0 %3249 }
 0x136   : > { %7287 = vmatprep.subr.msk.bf16.mxu1 %vm273_vm1, %v2999_v60  ;;  %v8549_v0 = vpop.permute.xlu1 %3251  ;;  %v3259_v39 = vsel %vm3253_vm14, %v8529_v57, %v8545_v62 }
 0x137   : > { %5296 = vrot.lane.b32.xlu0 %v8398_v15, %s7722_s13  ;;  %v3260_v50 = vsel %vm3253_vm14, %v8545_v62, %v8549_v0  ;;  %vm6576_vm14 = vcmask 285696  }
 0x138   : > { %7282 = vmatmul.mubr.msk.bf16.vlgmr.msra.gmra.mxu0 %vm269_vm2, %v7276_v12  ;;  %5298 = vrot.lane.b32.xlu1 %v8414_v21, %s7722_s13  ;;  %v3283_v52 = vsel %vm273_vm1, %v3260_v50, 0 }
 0x139   : > { %3042 = vmatpush1.bf16.msra.mxu0 %v3007_v63  ;;  %3059 = vmatprep.mubr.bf16.mxu0 %v7700_v5  ;;  %v8564_v9 = vpop.permute.xlu0 %3495 }
 0x13a   : > { %7289 = vmatprep.subr.msk.bf16.mxu0 %vm273_vm1, %v3001_v7  ;;  %v8568_v19 = vpop.permute.xlu1 %3497 }
 0x13b   : > { %5300 = vrot.lane.b32.xlu0 %v5283_v59, %s7722_s13  ;;  %v3512_v55 = vsel %vm3511_vm15, %v8564_v9, %v8568_v19 }
 0x13c   : > { %7532 = vmatmul.mubr.msk.bf16.vlgmr.msra.gmra.mxu1 %vm269_vm2, %v7276_v12  ;;  %5302 = vrot.lane.b32.xlu1 %v5291_v2, %s7722_s13  ;;  %v5762_v12 = vld [vmem:[%s7772_s20 + $0xa] sm:$0x3f]  ;;  %v3523_v1 = vsel %vm273_vm1, %v3512_v55, 0 }
 0x13d   : > { %3083 = vmatpush1.bf16.msra.mxu1 %v3013_v18  ;;  %3100 = vmatprep.mubr.bf16.mxu1 %v7700_v5  ;;  %v8581_v25 = vpop.permute.xlu0 %3499  ;;  %v5791_v54 = vrot.slane %v5762_v12, %v7775_v6  ;;  %v5784_v58 = vcombine.high %v5762_v12, %v5762_v12 }
 0x13e   : > { %7535 = vmatprep.subr.bf16.mxu1 %v7710_v20  ;;  %v8585_v27 = vpop.permute.xlu1 %3501  ;;  %v3513_v8 = vsel %vm3511_vm15, %v8568_v19, %v8581_v25 }
 0x13f   : > { %5304 = vrot.lane.b32.xlu0 %v5290_v23, %s7722_s13  ;;  %v5799_v62 = vcombine.high %v5791_v54, %v5791_v54  ;;  %v3514_v7 = vsel %vm3511_vm15, %v8581_v25, %v8585_v27  ;;  %v5798_v9 = vrot.slane %v5784_v58, %v7775_v6 }
 0x140   : > { %7286 = vmatmul.mubr.msk.bf16.vlgmr.msra.gmra.mxu0 %vm269_vm2, %v7284_v24  ;;  %5546 = vrot.lane.b32.xlu1 %v8372_v56, %s7723_s18  ;;  %v3529_v25 = vsel %vm273_vm1, %v3514_v7, 0 }
 0x141   : > { %3124 = vmatpush1.bf16.msra.mxu0 %v3019_v26  ;;  %3141 = vmatprep.mubr.bf16.mxu0 %v7700_v5  ;;  %v8598_v30 = vpop.permute.xlu0 %3503 }
 0x142   : > { %7293 = vmatprep.subr.msk.bf16.mxu0 %vm273_vm1, %v3255_v29  ;;  %v8603_v32 = vpop.permute.xlu1 %3505  ;;  %v3515_v57 = vsel %vm3511_vm15, %v8585_v27, %v8598_v30 }
 0x143   : > { %5548 = vrot.lane.b32.xlu0 %v8387_v4, %s7723_s18  ;;  %v3516_v26 = vsel %vm3511_vm15, %v8598_v30, %v8603_v32 }
 0x144   : > { %7288 = vmatmul.mubr.msk.bf16.vlgmr.msra.gmra.mxu1 %vm269_vm2, %v7284_v24  ;;  %5550 = vrot.lane.b32.xlu1 %v8398_v15, %s7723_s18 }
 0x145   : > { %7536 = vmatpush3.bf16.msra.mxu1 %v3025_v16  ;;  %7537 = vmatprep.mubr.msk.bf16.mxu1 %vm7711_vm3, %v7710_v20  ;;  %v8619_v36 = vpop.permute.xlu0 %3507  ;;  %v6016_v16 = vld [vmem:[%s7772_s20 + $0xa] sm:$0x3f] }
 0x146   : > { %7295 = vmatprep.subr.msk.bf16.mxu1 %vm273_vm1, %v3257_v34  ;;  %v8623_v38 = vpop.permute.xlu1 %3509  ;;  %v3517_v10 = vsel %vm3511_vm15, %v8603_v32, %v8619_v36  ;;  %v3535_v34 = vsel %vm273_vm1, %v3516_v26, 0 }
 0x147   : > { %5552 = vrot.lane.b32.xlu0 %v8414_v21, %s7723_s18 }
 0x148   : > { %7290 = vmatmul.mubr.msk.bf16.vlgmr.msra.gmra.mxu0 %vm269_vm2, %v7284_v24  ;;  %5554 = vrot.lane.b32.xlu1 %v5537_v14, %s7723_s18  ;;  %v3518_v14 = vsel %vm3511_vm15, %v8619_v36, %v8623_v38  ;;  %v6038_v36 = vcombine.high %v6016_v16, %v6016_v16  ;;  %vm6830_vm15 = vcmask 277504  }
 0x149   : > { %3300 = vmatpush1.bf16.msra.mxu0 %v3265_v37  ;;  %3317 = vmatprep.mubr.bf16.mxu0 %v7700_v5  ;;  %v8637_v42 = vpop.permute.xlu0 %3753 }
 0x14a   : > { %7297 = vmatprep.subr.msk.bf16.mxu0 %vm273_vm1, %v3259_v39  ;;  %v8641_v44 = vpop.permute.xlu1 %3755 }
 0x14b   : > { %5556 = vrot.lane.b32.xlu0 %v5545_v40, %s7723_s18  ;;  %v6045_v40 = vrot.slane %v6016_v16, %v7775_v6  ;;  %v3770_v50 = vsel %vm3769_vm0, %v8637_v42, %v8641_v44 }
 0x14c   : > { %7538 = vmatmul.mubr.msk.bf16.vlgmr.msra.gmra.mxu1 %vm269_vm2, %v7284_v24  ;;  %5558 = vrot.lane.b32.xlu1 %v5544_v41, %s7723_s18  ;;  %v3781_v55 = vsel %vm273_vm1, %v3770_v50, 0 }
 0x14d   : > { %3341 = vmatpush1.bf16.msra.mxu1 %v3271_v43  ;;  %3358 = vmatprep.mubr.bf16.mxu1 %v7700_v5  ;;  %v8653_v47 = vpop.permute.xlu0 %3757  ;;  %v3541_v43 = vsel %vm273_vm1, %v3518_v14, 0 }
 0x14e   : > { %7541 = vmatprep.subr.bf16.mxu1 %v7710_v20  ;;  %v8657_v49 = vpop.permute.xlu1 %3759  ;;  %v3771_v35 = vsel %vm3769_vm0, %v8641_v44, %v8653_v47 }
 0x14f   : > { %5800 = vrot.lane.b32.xlu0 %v8372_v56, %s7724_s22 }
 0x150   : > { %v8668_v51 = vpop.f32.mrf.mxu0  ;;  %7294 = vmatmul.mubr.msk.bf16.vlgmr.msra.gmra.mxu0 %vm269_vm2, %v7292_v46  ;;  %5802 = vrot.lane.b32.xlu1 %v8387_v4, %s7724_s22 }
 0x151   : > { %3382 = vmatpush1.bf16.msra.mxu0 %v3277_v48  ;;  %3399 = vmatprep.mubr.bf16.mxu0 %v7700_v5  ;;  %v8674_v11 = vpop.permute.xlu0 %3761 }
 0x152   : > { %v8677_v13 = vpop.f32.mrf.mxu0  ;;  %7301 = vmatprep.subr.msk.bf16.mxu0 %vm273_vm1, %v3513_v8  ;;  %v8680_v53 = vpop.permute.xlu1 %3763  ;;  %v3773_v8 = vsel %vm3769_vm0, %v8657_v49, %v8674_v11 }
 0x153   : > { %5804 = vrot.lane.b32.xlu0 %v8398_v15, %s7724_s22 }
 0x154   : > { %v333_v60 = vpop.f32.mrf.mxu0  ;;  %v8691_v61 = vpop.f32.mrf.mxu1  ;;  %7296 = vmatmul.mubr.msk.bf16.vlgmr.msra.gmra.mxu1 %vm269_vm2, %v7292_v46  ;;  %5806 = vrot.lane.b32.xlu1 %v8414_v21, %s7724_s22 }
 0x155   : > { %7542 = vmatpush3.bf16.msra.mxu1 %v3283_v52  ;;  %7543 = vmatprep.mubr.msk.bf16.mxu1 %vm7711_vm3, %v7710_v20  ;;  %v8698_v63 = vpop.permute.xlu0 %3765 }
 0x156   : > { %v334_v0 = vpop.f32.mrf.mxu0  ;;  %v8700_v59 = vpop.f32.mrf.mxu1  ;;  %7303 = vmatprep.subr.msk.bf16.mxu1 %vm273_vm1, %v3515_v57 }
 0x157   : > { %v8710_v2 = vpop.permute.xlu1 %3767  ;;  %5808 = vrot.lane.b32.xlu0 %v5791_v54, %s7724_s22 }
 0x158   : > { %v374_v18 = vpop.f32.mrf.mxu1  ;;  %v8714_v19 = vpop.f32.mrf.mxu0  ;;  %7298 = vmatmul.mubr.msk.bf16.vlgmr.msra.gmra.mxu0 %vm269_vm2, %v7292_v46  ;;  %5810 = vrot.lane.b32.xlu1 %v5799_v62, %s7724_s22  ;;  %v3775_v62 = vsel %vm3769_vm0, %v8680_v53, %v8698_v63 }
 0x159   : > { %3558 = vmatpush1.bf16.msra.mxu0 %v3523_v1  ;;  %3575 = vmatprep.mubr.bf16.mxu0 %v7700_v5  ;;  %v8719_v22 = vpop.permute.xlu0 %4011 }
 0x15a   : > { %v375_v23 = vpop.f32.mrf.mxu1  ;;  %v8721_v24 = vpop.f32.mrf.mxu0  ;;  %7305 = vmatprep.subr.msk.bf16.mxu0 %vm273_vm1, %v3517_v10 }
 0x15b   : > { %v8728_v27 = vpop.permute.xlu1 %4013  ;;  %5812 = vrot.lane.b32.xlu0 %v5798_v9, %s7724_s22  ;;  %v3774_v23 = vsel %vm3769_vm0, %v8674_v11, %v8680_v53  ;;  %v8840_v11 = vld [vmem:[%s9625_s1 + $0x38] sm:$0xf] }
 0x15c   : > { %v415_v28 = vpop.f32.mrf.mxu0  ;;  %v8731_v29 = vpop.f32.mrf.mxu1  ;;  %7544 = vmatmul.mubr.msk.bf16.vlgmr.msra.gmra.mxu1 %vm269_vm2, %v7292_v46  ;;  %6054 = vrot.lane.b32.xlu1 %v8372_v56, %s7725_s23  ;;  %v3793_v16 = vsel %vm273_vm1, %v3774_v23, 0  ;;  %v4028_v50 = vsel %vm4027_vm4, %v8719_v22, %v8728_v27 }
 0x15d   : > { %3599 = vmatpush1.bf16.msra.mxu1 %v3529_v25  ;;  %3616 = vmatprep.mubr.bf16.mxu1 %v7700_v5  ;;  %v8742_v30 = vpop.permute.xlu0 %4015  ;;  %v6270_v25 = vld [vmem:[%s7772_s20 + $0xa] sm:$0x3f] }
 0x15e   : > { %v416_v32 = vpop.f32.mrf.mxu0  ;;  %v7473_v33 = vpop.f32.mrf.mxu1  ;;  %7547 = vmatprep.subr.bf16.mxu1 %v7710_v20 }
 0x15f   : > { %v8753_v37 = vpop.permute.xlu1 %4017  ;;  %6056 = vrot.lane.b32.xlu0 %v8387_v4, %s7725_s23  ;;  %v6299_v33 = vrot.slane %v6270_v25, %v7775_v6 }
 0x160   : > { %v455_v17 = vpop.f32.mrf.mxu1  ;;  %v516_v39 = vpop.f32.mrf.mxu0  ;;  %7302 = vmatmul.mubr.msk.bf16.vlgmr.msra.gmra.mxu0 %vm269_vm2, %v8739_v31  ;;  %6058 = vrot.lane.b32.xlu1 %v8398_v15, %s7725_s23 }
 0x161   : > { %v8763_v38 = vadd.f32 %v516_v39, %v8668_v51  ;;  %3640 = vmatpush1.bf16.msra.mxu0 %v3535_v34  ;;  %3657 = vmatprep.mubr.bf16.mxu0 %v7700_v5  ;;  %v8766_v41 = vpop.permute.xlu0 %4019  ;;  %v6053_v51 = vcombine.high %v6045_v40, %v6045_v40  ;;  %v4029_v34 = vsel %vm4027_vm4, %v8728_v27, %v8742_v30  ;;  %v4039_v27 = vsel %vm273_vm1, %v4028_v50, 0 }
 0x162   : > { %v7474_v45 = vpop.f32.mrf.mxu1  ;;  %v518_v46 = vpop.f32.mrf.mxu0  ;;  %7309 = vmatprep.subr.msk.bf16.mxu0 %vm273_vm1, %v3771_v35  ;;  %v6292_v35 = vcombine.high %v6270_v25, %v6270_v25 }
 0x163   : > { %v8771_v48 = vadd.f32 %v518_v46, %v8677_v13  ;;  %v8779_v12 = vpop.permute.xlu1 %4021  ;;  %6060 = vrot.lane.b32.xlu0 %v8414_v21, %s7725_s23  ;;  %v6052_v13 = vrot.slane %v6038_v36, %v7775_v6 }
 0x164   : > { %v520_v52 = vpop.f32.mrf.mxu0  ;;  %v557_v54 = vpop.f32.mrf.mxu1  ;;  %7304 = vmatmul.mubr.msk.bf16.vlgmr.msra.gmra.mxu1 %vm269_vm2, %v8739_v31  ;;  %6062 = vrot.lane.b32.xlu1 %v6045_v40, %s7725_s23  ;;  %v6307_v40 = vcombine.high %v6299_v33, %v6299_v33 }
 0x165   : > { %v8788_v42 = vadd.f32 %v557_v54, %v8691_v61  ;;  %7548 = vmatpush3.bf16.msra.mxu1 %v3541_v43  ;;  %7549 = vmatprep.mubr.msk.bf16.mxu1 %vm7711_vm3, %v7710_v20  ;;  %v8792_v44 = vpop.permute.xlu0 %4023  ;;  %v3772_v61 = vsel %vm3769_vm0, %v8653_v47, %v8657_v49 }
 0x166   : > { %v521_v57 = vpop.f32.mrf.mxu0  ;;  %v559_v58 = vpop.f32.mrf.mxu1  ;;  %7311 = vmatprep.subr.msk.bf16.mxu1 %vm273_vm1, %v3773_v8  ;;  %v3787_v49 = vsel %vm273_vm1, %v3772_v61, 0 }
 0x167   : > { %v8797_v60 = vadd.f32 %v559_v58, %v8700_v59  ;;  %v8805_v0 = vpop.permute.xlu1 %4025  ;;  %6064 = vrot.lane.b32.xlu0 %v6053_v51, %s7725_s23  ;;  %v6306_v51 = vrot.slane %v6292_v35, %v7775_v6  ;;  %v4033_v58 = vsel %vm4027_vm4, %v8779_v12, %v8792_v44 }
 0x168   : > { %v561_v1 = vpop.f32.mrf.mxu1  ;;  %v598_v7 = vpop.f32.mrf.mxu0  ;;  %7306 = vmatmul.mubr.msk.bf16.vlgmr.msra.gmra.mxu0 %vm269_vm2, %v8739_v31  ;;  %6066 = vrot.lane.b32.xlu1 %v6052_v13, %s7725_s23 }
 0x169   : > { %v8812_v59 = vadd.f32 %v598_v7, %v8714_v19  ;;  %3816 = vmatpush1.bf16.msra.mxu0 %v3781_v55  ;;  %3833 = vmatprep.mubr.bf16.mxu0 %v7700_v5  ;;  %v8815_v47 = vpop.permute.xlu0 %4269 }
 0x16a   : > { %v562_v10 = vpop.f32.mrf.mxu1  ;;  %v600_v9 = vpop.f32.mrf.mxu0  ;;  %7313 = vmatprep.subr.msk.bf16.mxu0 %vm273_vm1, %v3775_v62 }
 0x16b   : > { %v8820_v18 = vadd.f32 %v600_v9, %v8721_v24  ;;  %v8825_v19 = vpop.permute.xlu1 %4271  ;;  %6308 = vrot.lane.b32.xlu0 %v8372_v56, %s7726_s26 }
 0x16c   : > { %v602_v26 = vpop.f32.mrf.mxu0  ;;  %v639_v28 = vpop.f32.mrf.mxu1  ;;  %7550 = vmatmul.mubr.msk.bf16.vlgmr.msra.gmra.mxu1 %vm269_vm2, %v8739_v31  ;;  %6310 = vrot.lane.b32.xlu1 %v8387_v4, %s7726_s26 }
 0x16d   : > { %v8835_v24 = vadd.f32 %v639_v28, %v8731_v29  ;;  %3857 = vmatpush1.bf16.msra.mxu1 %v3787_v49  ;;  %3874 = vmatprep.mubr.bf16.mxu1 %v7700_v5  ;;  %v8843_v53 = vpop.permute.xlu0 %4273  ;;  %v3776_v29 = vsel %vm3769_vm0, %v8698_v63, %v8710_v2 }
 0x16e   : > { %v603_v31 = vpop.f32.mrf.mxu0  ;;  %v7479_v32 = vpop.f32.mrf.mxu1  ;;  %7553 = vmatprep.subr.bf16.mxu1 %v7710_v20  ;;  %v3799_v36 = vsel %vm273_vm1, %v3776_v29, 0 }
 0x16f   : > { %v8854_v14 = vpop.permute.xlu1 %4275  ;;  %6312 = vrot.lane.b32.xlu0 %v8398_v15, %s7726_s26 }
 0x170   : > { %v642_v17 = vpop.f32.mrf.mxu1  ;;  %v763_v39 = vpop.f32.mrf.mxu0  ;;  %7310 = vmatmul.mubr.msk.bf16.vlgmr.msra.gmra.mxu0 %vm269_vm2, %v8840_v11  ;;  %6314 = vrot.lane.b32.xlu1 %v8414_v21, %s7726_s26 }
 0x171   : > { %v8863_v63 = vadd.f32 %v763_v39, %v8763_v38  ;;  %3898 = vmatpush1.bf16.msra.mxu0 %v3793_v16  ;;  %3915 = vmatprep.mubr.bf16.mxu0 %v7700_v5  ;;  %v8866_v2 = vpop.permute.xlu0 %4277  ;;  %v4031_v38 = vsel %vm4027_vm4, %v8753_v37, %v8766_v41  ;;  %v4287_v16 = vsel %vm4285_vm5, %v8825_v19, %v8843_v53 }
 0x172   : > { %v7480_v43 = vpop.f32.mrf.mxu1  ;;  %v765_v45 = vpop.f32.mrf.mxu0  ;;  %7317 = vmatprep.subr.msk.bf16.mxu0 %vm273_vm1, %v4029_v34 }
 0x173   : > { %v8871_v46 = vadd.f32 %v765_v45, %v8771_v48  ;;  %v8879_v8 = vpop.permute.xlu1 %4279  ;;  %6316 = vrot.lane.b32.xlu0 %v6299_v33, %s7726_s26  ;;  %v6777_v33 = vld [vmem:[%s7772_s20 + $0x2] sm:$0xff]  ;;  %v4289_v45 = vsel %vm4285_vm5, %v8854_v14, %v8866_v2 }
 0x174   : > { %v767_v52 = vpop.f32.mrf.mxu0  ;;  %v804_v54 = vpop.f32.mrf.mxu1  ;;  %7312 = vmatmul.mubr.msk.bf16.vlgmr.msra.gmra.mxu1 %vm269_vm2, %v8840_v11  ;;  %6318 = vrot.lane.b32.xlu1 %v6307_v40, %s7726_s26  ;;  %v6790_v40 = vrot.slane %v6777_v33, %v7775_v6 }
 0x175   : > { %v8887_v48 = vadd.f32 %v804_v54, %v8788_v42  ;;  %7554 = vmatpush3.bf16.msra.mxu1 %v3799_v36  ;;  %7555 = vmatprep.mubr.msk.bf16.mxu1 %vm7711_vm3, %v7710_v20  ;;  %v8891_v22 = vpop.permute.xlu0 %4281  ;;  %v4030_v42 = vsel %vm4027_vm4, %v8742_v30, %v8753_v37  ;;  %v6524_v37 = vld [vmem:[%s7772_s20 + $0xa] sm:$0x3f]  ;;  %v6783_v36 = vcombine.high %v6777_v33, %v6777_v33 }
 0x176   : > { %v768_v13 = vpop.f32.mrf.mxu0  ;;  %v806_v55 = vpop.f32.mrf.mxu1  ;;  %7319 = vmatprep.subr.msk.bf16.mxu1 %vm273_vm1, %v4031_v38  ;;  %v4045_v7 = vsel %vm273_vm1, %v4030_v42, 0  ;;  %v6546_v26 = vcombine.high %v6524_v37, %v6524_v37  ;;  %v4291_v42 = vsel %vm4285_vm5, %v8879_v8, %v8891_v22 }
 0x177   : > { %v8896_v57 = vadd.f32 %v806_v55, %v8797_v60  ;;  %v8904_v61 = vpop.permute.xlu1 %4283  ;;  %6320 = vrot.lane.b32.xlu0 %v6306_v51, %s7726_s26  ;;  %v6797_v13 = vrot.slane %v6783_v36, %v7775_v6 }
 0x178   : > { %v808_v62 = vpop.f32.mrf.mxu1  ;;  %v845_v1 = vpop.f32.mrf.mxu0  ;;  %7314 = vmatmul.mubr.msk.bf16.vlgmr.msra.gmra.mxu0 %vm269_vm2, %v8840_v11  ;;  %6562 = vrot.lane.b32.xlu1 %v8372_v56, %s7727_s29  ;;  %v4032_v56 = vsel %vm4027_vm4, %v8766_v41, %v8779_v12 }
 0x179   : > { %v8912_v60 = vadd.f32 %v845_v1, %v8812_v59  ;;  %4074 = vmatpush1.bf16.msra.mxu0 %v4039_v27  ;;  %4091 = vmatprep.mubr.bf16.mxu0 %v7700_v5  ;;  %v8915_v30 = vpop.permute.xlu0 %4527  ;;  %v4051_v28 = vsel %vm273_vm1, %v4032_v56, 0  ;;  %v6778_v62 = vld [vmem:[%s7772_s20 + $0xa] sm:$0x3f]  ;;  %s7195_s20 = sshll.u32 %s9630_s16, 3 }
 0x17a   : > { %v809_v49 = vpop.f32.mrf.mxu1  ;;  %v847_v10 = vpop.f32.mrf.mxu0  ;;  %7321 = vmatprep.subr.msk.bf16.mxu0 %vm273_vm1, %v4033_v58  ;;  %v6807_v56 = vrot.slane %v6778_v62, %v7775_v6  ;;  %s202_s9 = scalar_lea.vmem %s9627_s3, %s7195_s20  ;;  %s206_s12 = scalar_lea.vmem %s9628_s4, %s7195_s20 }
 0x17b   : > { %v8921_v9 = vadd.f32 %v847_v10, %v8820_v18  ;;  %v8926_v59 = vpop.permute.xlu1 %4529  ;;  %6564 = vrot.lane.b32.xlu0 %v8387_v4, %s7727_s29  ;;  %v6553_v18 = vrot.slane %v6524_v37, %v7775_v6  ;;  %v8941_v4 = vld [vmem:[%s9625_s1 + $0x3c] sm:$0xf] }
 0x17c   : > { %v849_v23 = vpop.f32.mrf.mxu0  ;;  %v886_v25 = vpop.f32.mrf.mxu1  ;;  %7556 = vmatmul.mubr.msk.bf16.vlgmr.msra.gmra.mxu1 %vm269_vm2, %v8840_v11  ;;  %6566 = vrot.lane.b32.xlu1 %v8398_v15, %s7727_s29 }
 0x17d   : > { %v8936_v41 = vadd.f32 %v886_v25, %v8835_v24  ;;  %4115 = vmatpush1.bf16.msra.mxu1 %v4045_v7  ;;  %4132 = vmatprep.mubr.bf16.mxu1 %v7700_v5  ;;  %v8944_v12 = vpop.permute.xlu0 %4531  ;;  %v4034_v24 = vsel %vm4027_vm4, %v8792_v44, %v8805_v0  ;;  %v6561_v32 = vcombine.high %v6553_v18, %v6553_v18 }
 0x17e   : > { %v850_v15 = vpop.f32.mrf.mxu0  ;;  %v7485_v11 = vpop.f32.mrf.mxu1  ;;  %7559 = vmatprep.subr.bf16.mxu1 %v7710_v20  ;;  %v6560_v44 = vrot.slane %v6546_v26, %v7775_v6 }
 0x17f   : > { %v8954_v31 = vpop.permute.xlu1 %4533  ;;  %6568 = vrot.lane.b32.xlu0 %v8414_v21, %s7727_s29  ;;  %v4057_v21 = vsel %vm273_vm1, %v4034_v24, 0  ;;  %v6815_v15 = vcombine.high %v6807_v56, %v6807_v56 }
 0x180   : > { %v889_v29 = vpop.f32.mrf.mxu1  ;;  %v1017_v34 = vpop.f32.mrf.mxu0  ;;  %7318 = vmatmul.mubr.msk.bf16.vlgmr.msra.gmra.mxu0 %vm269_vm2, %v8941_v4  ;;  %6570 = vrot.lane.b32.xlu1 %v6553_v18, %s7727_s29  ;;  %v6800_v18 = vcombine.high %v6778_v62, %v6778_v62 }
 0x181   : > { %v8964_v0 = vadd.f32 %v1017_v34, %v8863_v63  ;;  %4156 = vmatpush1.bf16.msra.mxu0 %v4051_v28  ;;  %4173 = vmatprep.mubr.bf16.mxu0 %v7700_v5  ;;  %v8967_v35 = vpop.permute.xlu0 %4535  ;;  %v4286_v63 = vsel %vm4285_vm5, %v8815_v47, %v8825_v19 }
 0x182   : > { %v7486_v17 = vpop.f32.mrf.mxu1  ;;  %v1019_v39 = vpop.f32.mrf.mxu0  ;;  %7325 = vmatprep.subr.msk.bf16.mxu0 %vm273_vm1, %v4287_v16  ;;  %v4297_v19 = vsel %vm273_vm1, %v4286_v63, 0  ;;  %v4545_v16 = vsel %vm4543_vm6, %v8926_v59, %v8944_v12  ;;  %v6814_v33 = vrot.slane %v6800_v18, %v7775_v6 }
 0x183   : > { %v8973_v43 = vadd.f32 %v1019_v39, %v8871_v46  ;;  %v8981_v50 = vpop.permute.xlu1 %4537  ;;  %6572 = vrot.lane.b32.xlu0 %v6561_v32, %s7727_s29  ;;  %v6798_v46 = vcombine.high %v6790_v40, %v6790_v40  ;;  %v4544_v39 = vsel %vm4543_vm6, %v8915_v30, %v8926_v59 }
 0x184   : > { %v1021_v38 = vpop.f32.mrf.mxu0  ;;  %v1058_v51 = vpop.f32.mrf.mxu1  ;;  %7320 = vmatmul.mubr.msk.bf16.vlgmr.msra.gmra.mxu1 %vm269_vm2, %v8941_v4  ;;  %6574 = vrot.lane.b32.xlu1 %v6560_v44, %s7727_s29  ;;  %v4555_v30 = vsel %vm273_vm1, %v4544_v39, 0  ;;  %v4548_v62 = vsel %vm4543_vm6, %v8967_v35, %v8981_v50 }
 0x185   : > { %v8988_v52 = vadd.f32 %v1058_v51, %v8887_v48  ;;  %7560 = vmatpush3.bf16.msra.mxu1 %v4057_v21  ;;  %7561 = vmatprep.mubr.msk.bf16.mxu1 %vm7711_vm3, %v7710_v20  ;;  %v8992_v47 = vpop.permute.xlu0 %4539  ;;  %v4288_v48 = vsel %vm4285_vm5, %v8843_v53, %v8854_v14 }
 0x186   : > { %v1022_v54 = vpop.f32.mrf.mxu0  ;;  %v1060_v27 = vpop.f32.mrf.mxu1  ;;  %7327 = vmatprep.subr.msk.bf16.mxu1 %vm273_vm1, %v4289_v45  ;;  %v4303_v7 = vsel %vm273_vm1, %v4288_v48, 0 }
 0x187   : > { %v8998_v55 = vadd.f32 %v1060_v27, %v8896_v57  ;;  %v9006_v58 = vpop.permute.xlu1 %4541  ;;  %6816 = vrot.lane.b32.xlu0 %v6790_v40, %s7728_s6  ;;  %v6799_v57 = vcombine.high %v6797_v13, %v6797_v13 }
 0x188   : > { %v1062_v1 = vpop.f32.mrf.mxu1  ;;  %v1099_v37 = vpop.f32.mrf.mxu0  ;;  %7322 = vmatmul.mubr.msk.bf16.vlgmr.msra.gmra.mxu0 %vm269_vm2, %v8941_v4  ;;  %6818 = vrot.lane.b32.xlu1 %v6798_v46, %s7728_s6  ;;  %v4546_v46 = vsel %vm4543_vm6, %v8944_v12, %v8954_v31 }
 0x189   : > { %v9014_v53 = vadd.f32 %v1099_v37, %v8912_v60  ;;  %4332 = vmatpush1.bf16.msra.mxu0 %v4297_v19  ;;  %4349 = vmatprep.mubr.bf16.mxu0 %v7700_v5  ;;  %v9017_v14 = vpop.permute.xlu0 %4784  ;;  %v4290_v60 = vsel %vm4285_vm5, %v8866_v2, %v8879_v8  ;;  %v7324_v2 = vld [vmem:[%s9625_s1 + $0x40] sm:$0xf]  ;;  %v4561_v48 = vsel %vm273_vm1, %v4546_v46, 0 }
 0x18a   : > { %v1063_v49 = vpop.f32.mrf.mxu1  ;;  %v1101_v10 = vpop.f32.mrf.mxu0  ;;  %7329 = vmatprep.subr.msk.bf16.mxu0 %vm273_vm1, %v4291_v42  ;;  %v4309_v11 = vsel %vm273_vm1, %v4290_v60, 0 }
 0x18b   : > { %v9023_v23 = vadd.f32 %v1101_v10, %v8921_v9  ;;  %v9028_v25 = vpop.permute.xlu1 %4786  ;;  %6820 = vrot.lane.b32.xlu0 %v6797_v13, %s7728_s6 }
 0x18c   : > { %v1103_v26 = vpop.f32.mrf.mxu0  ;;  %v1140_v28 = vpop.f32.mrf.mxu1  ;;  %7562 = vmatmul.mubr.msk.bf16.vlgmr.msra.gmra.mxu1 %vm269_vm2, %v8941_v4  ;;  %6822 = vrot.lane.b32.xlu1 %v6799_v57, %s7728_s6 }
 0x18d   : > { %v9035_v9 = vadd.f32 %v1140_v28, %v8936_v41  ;;  %4373 = vmatpush1.bf16.msra.mxu1 %v4303_v7  ;;  %4390 = vmatprep.mubr.bf16.mxu1 %v7700_v5  ;;  %v9041_v8 = vpop.permute.xlu0 %4788  ;;  %v4292_v41 = vsel %vm4285_vm5, %v8891_v22, %v8904_v61  ;;  %v7332_v7 = vld [vmem:[%s9625_s1 + $0x44] sm:$0xf] }
 0x18e   : > { %v1104_v24 = vpop.f32.mrf.mxu0  ;;  %v7491_v4 = vpop.f32.mrf.mxu1  ;;  %7565 = vmatprep.subr.bf16.mxu1 %v7710_v20  ;;  %v4315_v61 = vsel %vm273_vm1, %v4292_v41, 0 }
 0x18f   : > { %v9051_v32 = vpop.permute.xlu1 %4790  ;;  %6824 = vrot.lane.b32.xlu0 %v6807_v56, %s7728_s6  ;;  %v4550_v56 = vsel %vm4543_vm6, %v8992_v47, %v9006_v58 }
 0x190   : > { %v1143_v29 = vpop.f32.mrf.mxu1  ;;  %v1271_v34 = vpop.f32.mrf.mxu0  ;;  %7326 = vmatmul.mubr.msk.bf16.vlgmr.msra.gmra.mxu0 %vm269_vm2, %v7324_v2  ;;  %6826 = vrot.lane.b32.xlu1 %v6815_v15, %s7728_s6 }
 0x191   : > { %v1400_v44 = vadd.f32 %v1271_v34, %v8964_v0  ;;  %4414 = vmatpush1.bf16.msra.mxu0 %v4309_v11  ;;  %4431 = vmatprep.mubr.bf16.mxu0 %v7700_v5  ;;  %v9059_v22 = vpop.permute.xlu0 %4792  ;;  %v4547_v0 = vsel %vm4543_vm6, %v8954_v31, %v8967_v35  ;;  %v4567_v35 = vsel %vm273_vm1, %v4548_v62, 0  ;;  %v4799_v11 = vsel %vm4798_vm7, %v9017_v14, %v9028_v25 }
 0x192   : > { %v7492_v21 = vpop.f32.mrf.mxu1  ;;  %v1273_v17 = vpop.f32.mrf.mxu0  ;;  %7333 = vmatprep.subr.msk.bf16.mxu0 %vm273_vm1, %v4545_v16  ;;  %v4802_v24 = vsel %vm4798_vm7, %v9051_v32, %v9059_v22  ;;  %v4809_v34 = vsel %vm273_vm1, %v4799_v11, 0 }
 0x193   : > { %v1401_v6 = vadd.f32 %v1273_v17, %v8973_v43  ;;  %v9070_v40 = vpop.permute.xlu1 %4794  ;;  %6828 = vrot.lane.b32.xlu0 %v6814_v33, %s7728_s6 }
 0x194   : > { %v1275_v36 = vpop.f32.mrf.mxu0  ;;  %v1312_v63 = vpop.f32.mrf.mxu1  ;;  %7328 = vmatmul.mubr.msk.bf16.vlgmr.msra.gmra.mxu1 %vm269_vm2, %v7324_v2 }
 0x195   : > { %v1402_v45 = vadd.f32 %v1312_v63, %v8988_v52  ;;  %7566 = vmatpush3.bf16.msra.mxu1 %v4315_v61  ;;  %7567 = vmatprep.mubr.msk.bf16.mxu1 %vm7711_vm3, %v7710_v20  ;;  %v9077_v43 = vpop.permute.xlu0 %4796  ;;  %v4549_v52 = vsel %vm4543_vm6, %v8981_v50, %v8992_v47  ;;  %v4801_v61 = vsel %vm4798_vm7, %v9041_v8, %v9051_v32 }
 0x196   : > { %v1276_v59 = vpop.f32.mrf.mxu0  ;;  %v1314_v38 = vpop.f32.mrf.mxu1  ;;  %7335 = vmatprep.subr.msk.bf16.mxu1 %vm273_vm1, %v4547_v0  ;;  %v4804_v21 = vsel %vm4798_vm7, %v9070_v40, %v9077_v43  ;;  %v4815_v63 = vsel %vm273_vm1, %v4801_v61, 0  ;;  %v7348_v61 = vld [vmem:[%s9625_s1 + $0x4c] sm:$0xf] }
 0x197   : > { %v1403_v51 = vadd.f32 %v1314_v38, %v8998_v55  ;;  %v9088_v19 = vpop.permute.xlu1 %5038 }
 0x198   : > { %v1316_v54 = vpop.f32.mrf.mxu1  ;;  %v1353_v27 = vpop.f32.mrf.mxu0  ;;  %7330 = vmatmul.mubr.msk.bf16.vlgmr.msra.gmra.mxu0 %vm269_vm2, %v7324_v2 }
 0x199   : > { %v1404_v13 = vadd.f32 %v1353_v27, %v9014_v53  ;;  %4590 = vmatpush1.bf16.msra.mxu0 %v4555_v30  ;;  %4607 = vmatprep.mubr.bf16.mxu0 %v7700_v5  ;;  %v9093_v55 = vpop.permute.xlu0 %5040  ;;  %v4803_v30 = vsel %vm4798_vm7, %v9059_v22, %v9070_v40 }
 0x19a   : > { %v1317_v12 = vpop.f32.mrf.mxu1  ;;  %v1355_v31 = vpop.f32.mrf.mxu0  ;;  %7337 = vmatprep.subr.msk.bf16.mxu0 %vm273_vm1, %v4549_v52  ;;  %v7340_v52 = vld [vmem:[%s9625_s1 + $0x48] sm:$0xf]  ;;  %v4821_v27 = vsel %vm273_vm1, %v4803_v30, 0 }
 0x19b   : > { %v1405_v42 = vadd.f32 %v1355_v31, %v9023_v23  ;;  %v9101_v1 = vpop.permute.xlu1 %5042  ;;  %v4800_v23 = vsel %vm4798_vm7, %v9028_v25, %v9041_v8 }
 0x19c   : > { %v1357_v37 = vpop.f32.mrf.mxu0  ;;  %v1394_v57 = vpop.f32.mrf.mxu1  ;;  %7568 = vmatmul.mubr.msk.bf16.vlgmr.msra.gmra.mxu1 %vm269_vm2, %v7324_v2 }
 0x19d   : > { %v1406_v53 = vadd.f32 %v1394_v57, %v9035_v9  ;;  %4631 = vmatpush1.bf16.msra.mxu1 %v4561_v48  ;;  %4648 = vmatprep.mubr.bf16.mxu1 %v7700_v5  ;;  %v9109_v49 = vpop.permute.xlu0 %5044  ;;  %v4573_v9 = vsel %vm273_vm1, %v4550_v56, 0  ;;  %v4827_v37 = vsel %vm273_vm1, %v9077_v43, 0 }
 0x19e   : > { %v1358_v50 = vpop.f32.mrf.mxu0  ;;  %v7497_v10 = vpop.f32.mrf.mxu1  ;;  %7571 = vmatprep.subr.bf16.mxu1 %v7710_v20 }
 0x19f   : > { %v9119_v60 = vpop.permute.xlu1 %5046 }
 0x1a0   : > { %v1397_v18 = vpop.f32.mrf.mxu1  ;;  %v1525_v26 = vpop.f32.mrf.mxu0  ;;  %7334 = vmatmul.mubr.msk.bf16.vlgmr.msra.gmra.mxu0 %vm269_vm2, %v7332_v7  ;;  %v5056_v50 = vsel %vm5052_vm8, %v9109_v49, %v9119_v60 }
 0x1a1   : > { %v1654_v28 = vadd.f32 %v1525_v26, %v1400_v44  ;;  %4672 = vmatpush1.bf16.msra.mxu0 %v4567_v35  ;;  %4689 = vmatprep.mubr.bf16.mxu0 %v7700_v5  ;;  %v9123_v15 = vpop.permute.xlu0 %5048  ;;  %v5053_v35 = vsel %vm5052_vm8, %v9088_v19, %v9093_v55 }
 0x1a2   : > { %v7498_v2 = vpop.f32.mrf.mxu1  ;;  %v1527_v47 = vpop.f32.mrf.mxu0  ;;  %7341 = vmatprep.subr.msk.bf16.mxu0 %vm273_vm1, %v4800_v23  ;;  %v5063_v26 = vsel %vm273_vm1, %v5053_v35, 0 }
 0x1a3   : > { %v1655_v58 = vadd.f32 %v1527_v47, %v1401_v6  ;;  %v9133_v4 = vpop.permute.xlu1 %5050 }
 0x1a4   : > { %v1529_v41 = vpop.f32.mrf.mxu0  ;;  %v1566_v16 = vpop.f32.mrf.mxu1  ;;  %7336 = vmatmul.mubr.msk.bf16.vlgmr.msra.gmra.mxu1 %vm269_vm2, %v7332_v7  ;;  %v5058_v2 = vsel %vm5052_vm8, %v9123_v15, %v9133_v4  ;;  %v5081_v30 = vsel %vm273_vm1, %v9133_v4, 0 }
 0x1a5   : > { %v1656_v33 = vadd.f32 %v1566_v16, %v1402_v45  ;;  %7572 = vmatpush3.bf16.msra.mxu1 %v4573_v9  ;;  %7573 = vmatprep.mubr.msk.bf16.mxu1 %vm7711_vm3, %v7710_v20  ;;  %v9138_v29 = vpop.permute.xlu0 %5292  ;;  %v5055_v9 = vsel %vm5052_vm8, %v9101_v1, %v9109_v49 }
 0x1a6   : > { %v1530_v14 = vpop.f32.mrf.mxu0  ;;  %v1568_v25 = vpop.f32.mrf.mxu1  ;;  %7343 = vmatprep.subr.msk.bf16.mxu1 %vm273_vm1, %v4802_v24  ;;  %v5069_v16 = vsel %vm273_vm1, %v5055_v9, 0 }
 0x1a7   : > { %v1657_v44 = vadd.f32 %v1568_v25, %v1403_v51  ;;  %v9148_v17 = vpop.permute.xlu1 %5294 }
 0x1a8   : > { %v1570_v6 = vpop.f32.mrf.mxu1  ;;  %v1607_v39 = vpop.f32.mrf.mxu0  ;;  %7338 = vmatmul.mubr.msk.bf16.vlgmr.msra.gmra.mxu0 %vm269_vm2, %v7332_v7 }
 0x1a9   : > { %v1658_v0 = vadd.f32 %v1607_v39, %v1404_v13  ;;  %4844 = vmatpush1.bf16.msra.mxu0 %v4809_v34  ;;  %4861 = vmatprep.mubr.bf16.mxu0 %v7700_v5  ;;  %v9152_v36 = vpop.permute.xlu0 %5296  ;;  %v5054_v13 = vsel %vm5052_vm8, %v9093_v55, %v9101_v1  ;;  %v5057_v34 = vsel %vm5052_vm8, %v9119_v60, %v9123_v15 }
 0x1aa   : > { %v1571_v45 = vpop.f32.mrf.mxu1  ;;  %v1609_v8 = vpop.f32.mrf.mxu0  ;;  %7345 = vmatprep.subr.msk.bf16.mxu0 %vm273_vm1, %v4804_v21  ;;  %v5075_v39 = vsel %vm273_vm1, %v5057_v34, 0 }
 0x1ab   : > { %v1659_v32 = vadd.f32 %v1609_v8, %v1405_v42  ;;  %v9159_v59 = vpop.permute.xlu1 %5298 }
 0x1ac   : > { %v1611_v38 = vpop.f32.mrf.mxu0  ;;  %v1648_v51 = vpop.f32.mrf.mxu1  ;;  %7574 = vmatmul.mubr.msk.bf16.vlgmr.msra.gmra.mxu1 %vm269_vm2, %v7332_v7 }
 0x1ad   : > { %v1660_v46 = vadd.f32 %v1648_v51, %v1406_v53  ;;  %4885 = vmatpush1.bf16.msra.mxu1 %v4815_v63  ;;  %4902 = vmatprep.mubr.bf16.mxu1 %v7700_v5  ;;  %v9166_v54 = vpop.permute.xlu0 %5300 }
 0x1ae   : > { %v1612_v22 = vpop.f32.mrf.mxu0  ;;  %v7503_v40 = vpop.f32.mrf.mxu1  ;;  %7577 = vmatprep.subr.bf16.mxu1 %v7710_v20 }
 0x1af   : > { %v9173_v48 = vpop.permute.xlu1 %5302 }
 0x1b0   : > { %v1651_v12 = vpop.f32.mrf.mxu1  ;;  %v1779_v31 = vpop.f32.mrf.mxu0  ;;  %7342 = vmatmul.mubr.msk.bf16.vlgmr.msra.gmra.mxu0 %vm269_vm2, %v7340_v52 }
 0x1b1   : > { %v1908_v42 = vadd.f32 %v1779_v31, %v1654_v28  ;;  %4926 = vmatpush1.bf16.msra.mxu0 %v4821_v27  ;;  %4943 = vmatprep.mubr.bf16.mxu0 %v7700_v5  ;;  %v9177_v62 = vpop.permute.xlu0 %5304  ;;  %v5310_v27 = vsel %vm5306_vm9, %v9159_v59, %v9166_v54 }
 0x1b2   : > { %v7504_v57 = vpop.f32.mrf.mxu1  ;;  %v1781_v53 = vpop.f32.mrf.mxu0  ;;  %7349 = vmatprep.subr.msk.bf16.mxu0 %vm273_vm1, %v5054_v13 }
 0x1b3   : > { %v1909_v7 = vadd.f32 %v1781_v53, %v1655_v58  ;;  %v9188_v10 = vpop.permute.xlu1 %5546 }
 0x1b4   : > { %v1783_v56 = vpop.f32.mrf.mxu0  ;;  %v1820_v23 = vpop.f32.mrf.mxu1  ;;  %7344 = vmatmul.mubr.msk.bf16.vlgmr.msra.gmra.mxu1 %vm269_vm2, %v7340_v52 }
 0x1b5   : > { %v1910_v43 = vadd.f32 %v1820_v23, %v1656_v33  ;;  %7578 = vmatpush3.bf16.msra.mxu1 %v4827_v37  ;;  %7579 = vmatprep.mubr.msk.bf16.mxu1 %vm7711_vm3, %v7710_v20  ;;  %v9193_v18 = vpop.permute.xlu0 %5548  ;;  %v5312_v37 = vsel %vm5306_vm9, %v9173_v48, %v9177_v62 }
 0x1b6   : > { %v1784_v19 = vpop.f32.mrf.mxu0  ;;  %v1822_v55 = vpop.f32.mrf.mxu1  ;;  %7351 = vmatprep.subr.msk.bf16.mxu1 %vm273_vm1, %v5056_v50 }
 0x1b7   : > { %v1911_v28 = vadd.f32 %v1822_v55, %v1657_v44  ;;  %v9203_v47 = vpop.permute.xlu1 %5550 }
 0x1b8   : > { %v1824_v58 = vpop.f32.mrf.mxu1  ;;  %v1861_v11 = vpop.f32.mrf.mxu0  ;;  %7346 = vmatmul.mubr.msk.bf16.vlgmr.msra.gmra.mxu0 %vm269_vm2, %v7340_v52 }
 0x1b9   : > { %v1912_v24 = vadd.f32 %v1861_v11, %v1658_v0  ;;  %5098 = vmatpush1.bf16.msra.mxu0 %v5063_v26  ;;  %5115 = vmatprep.mubr.bf16.mxu0 %v7700_v5  ;;  %v9207_v41 = vpop.permute.xlu0 %5552  ;;  %v5308_v0 = vsel %vm5306_vm9, %v9148_v17, %v9152_v36  ;;  %v5562_v11 = vsel %vm5560_vm10, %v9193_v18, %v9203_v47 }
 0x1ba   : > { %v1825_v33 = vpop.f32.mrf.mxu1  ;;  %v1863_v1 = vpop.f32.mrf.mxu0  ;;  %7353 = vmatprep.subr.msk.bf16.mxu0 %vm273_vm1, %v5058_v2 }
 0x1bb   : > { %v1913_v49 = vadd.f32 %v1863_v1, %v1659_v32  ;;  %v9219_v21 = vpop.permute.xlu1 %5554  ;;  %v5335_v1 = vsel %vm273_vm1, %v9177_v62, 0 }
 0x1bc   : > { %v1865_v14 = vpop.f32.mrf.mxu0  ;;  %v1902_v25 = vpop.f32.mrf.mxu1  ;;  %7580 = vmatmul.mubr.msk.bf16.vlgmr.msra.gmra.mxu1 %vm269_vm2, %v7340_v52  ;;  %v5307_v52 = vsel %vm5306_vm9, %v9138_v29, %v9148_v17  ;;  %v5309_v17 = vsel %vm5306_vm9, %v9152_v36, %v9159_v59 }
 0x1bd   : > { %v1914_v44 = vadd.f32 %v1902_v25, %v1660_v46  ;;  %5139 = vmatpush1.bf16.msra.mxu1 %v5069_v16  ;;  %5156 = vmatprep.mubr.bf16.mxu1 %v7700_v5  ;;  %v9221_v6 = vpop.permute.xlu0 %5556  ;;  %v5317_v12 = vsel %vm273_vm1, %v5307_v52, 0  ;;  %v5323_v56 = vsel %vm273_vm1, %v5309_v17, 0  ;;  %v5561_v25 = vsel %vm5560_vm10, %v9188_v10, %v9193_v18 }
 0x1be   : > { %v1866_v60 = vpop.f32.mrf.mxu0  ;;  %v7509_v15 = vpop.f32.mrf.mxu1  ;;  %7583 = vmatprep.subr.bf16.mxu1 %v7710_v20 }
 0x1bf   : > { %v9241_v22 = vpop.permute.xlu1 %5558 }
 0x1c0   : > { %v1905_v63 = vpop.f32.mrf.mxu1  ;;  %v2033_v45 = vpop.f32.mrf.mxu0  ;;  %7350 = vmatmul.mubr.msk.bf16.vlgmr.msra.gmra.mxu0 %vm269_vm2, %v7348_v61 }
 0x1c1   : > { %v2162_v8 = vadd.f32 %v2033_v45, %v1908_v42  ;;  %5180 = vmatpush1.bf16.msra.mxu0 %v5075_v39  ;;  %5197 = vmatprep.mubr.bf16.mxu0 %v7700_v5  ;;  %v9230_v32 = vpop.permute.xlu0 %5800  ;;  %v5563_v45 = vsel %vm5560_vm10, %v9203_v47, %v9207_v41 }
 0x1c2   : > { %v7510_v38 = vpop.f32.mrf.mxu1  ;;  %v2035_v51 = vpop.f32.mrf.mxu0  ;;  %7357 = vmatprep.subr.msk.bf16.mxu0 %vm273_vm1, %v5308_v0  ;;  %v5571_v0 = vsel %vm273_vm1, %v5561_v25, 0 }
 0x1c3   : > { %v2163_v46 = vadd.f32 %v2035_v51, %v1909_v7  ;;  %v9256_v53 = vpop.permute.xlu1 %5802 }
 0x1c4   : > { %v2037_v40 = vpop.f32.mrf.mxu0  ;;  %v2074_v13 = vpop.f32.mrf.mxu1  ;;  %7352 = vmatmul.mubr.msk.bf16.vlgmr.msra.gmra.mxu1 %vm269_vm2, %v7348_v61 }
 0x1c5   : > { %v2164_v4 = vadd.f32 %v2074_v13, %v1910_v43  ;;  %7584 = vmatpush3.bf16.msra.mxu1 %v5081_v30  ;;  %7585 = vmatprep.mubr.msk.bf16.mxu1 %vm7711_vm3, %v7710_v20  ;;  %v9254_v57 = vpop.permute.xlu0 %5804  ;;  %v5311_v43 = vsel %vm5306_vm9, %v9166_v54, %v9173_v48  ;;  %v5565_v13 = vsel %vm5560_vm10, %v9219_v21, %v9221_v6 }
 0x1c6   : > { %v2038_v31 = vpop.f32.mrf.mxu0  ;;  %v2076_v42 = vpop.f32.mrf.mxu1  ;;  %7359 = vmatprep.subr.msk.bf16.mxu1 %vm273_vm1, %v5310_v27  ;;  %v5329_v58 = vsel %vm273_vm1, %v5311_v43, 0  ;;  %v5577_v27 = vsel %vm273_vm1, %v5563_v45, 0  ;;  %v5583_v17 = vsel %vm273_vm1, %v5565_v13, 0 }
 0x1c7   : > { %v2165_v29 = vadd.f32 %v2076_v42, %v1911_v28  ;;  %v7356_v28 = vld [vmem:[%s9625_s1 + $0x50] sm:$0xf]  ;;  %v9272_v2 = vpop.permute.xlu1 %5806  ;;  %v7364_v42 = vld [vmem:[%s9625_s1 + $0x54] sm:$0xf] }
 0x1c8   : > { %v2078_v7 = vpop.f32.mrf.mxu1  ;;  %v2115_v35 = vpop.f32.mrf.mxu0  ;;  %7354 = vmatmul.mubr.msk.bf16.vlgmr.msra.gmra.mxu0 %vm269_vm2, %v7348_v61 }
 0x1c9   : > { %v2166_v50 = vadd.f32 %v2115_v35, %v1912_v24  ;;  %5352 = vmatpush1.bf16.msra.mxu0 %v5317_v12  ;;  %5369 = vmatprep.mubr.bf16.mxu0 %v7700_v5  ;;  %v9270_v9 = vpop.permute.xlu0 %5808 }
 0x1ca   : > { %v2079_v23 = vpop.f32.mrf.mxu1  ;;  %v2117_v36 = vpop.f32.mrf.mxu0  ;;  %7361 = vmatprep.subr.msk.bf16.mxu0 %vm273_vm1, %v5312_v37 }
 0x1cb   : > { %v2167_v59 = vadd.f32 %v2117_v36, %v1913_v49  ;;  %v9292_v39 = vpop.permute.xlu1 %5810  ;;  %v5589_v23 = vsel %vm273_vm1, %v9241_v22, 0 }
 0x1cc   : > { %v2119_v26 = vpop.f32.mrf.mxu0  ;;  %v2156_v19 = vpop.f32.mrf.mxu1  ;;  %7586 = vmatmul.mubr.msk.bf16.vlgmr.msra.gmra.mxu1 %vm269_vm2, %v7348_v61 }
 0x1cd   : > { %v2168_v55 = vadd.f32 %v2156_v19, %v1914_v44  ;;  %5393 = vmatpush1.bf16.msra.mxu1 %v5323_v56  ;;  %5410 = vmatprep.mubr.bf16.mxu1 %v7700_v5  ;;  %v5564_v44 = vsel %vm5560_vm10, %v9207_v41, %v9219_v21  ;;  %v9290_v61 = vpop.permute.xlu0 %5812  ;;  %v5816_v21 = vsel %vm5814_vm11, %v9256_v53, %v9254_v57 }
 0x1ce   : > { %v2120_v54 = vpop.f32.mrf.mxu0  ;;  %v7515_v48 = vpop.f32.mrf.mxu1  ;;  %7589 = vmatprep.subr.bf16.mxu1 %v7710_v20  ;;  %v5815_v26 = vsel %vm5814_vm11, %v9230_v32, %v9256_v53  ;;  %v5818_v19 = vsel %vm5814_vm11, %v9272_v2, %v9270_v9 }
 0x1cf   : > { %v9309_v52 = vpop.permute.xlu1 %6054  ;;  %v5825_v48 = vsel %vm273_vm1, %v5815_v26, 0 }
 0x1d0   : > { %v2159_v24 = vpop.f32.mrf.mxu1  ;;  %v2287_v16 = vpop.f32.mrf.mxu0  ;;  %7358 = vmatmul.mubr.msk.bf16.vlgmr.msra.gmra.mxu0 %vm269_vm2, %v7356_v28 }
 0x1d1   : > { %v2416_v33 = vadd.f32 %v2287_v16, %v2162_v8  ;;  %5434 = vmatpush1.bf16.msra.mxu0 %v5329_v58  ;;  %5451 = vmatprep.mubr.bf16.mxu0 %v7700_v5  ;;  %v5566_v8 = vsel %vm5560_vm10, %v9221_v6, %v9241_v22  ;;  %v9305_v30 = vpop.permute.xlu0 %6056  ;;  %v5817_v24 = vsel %vm5814_vm11, %v9254_v57, %v9272_v2 }
 0x1d2   : > { %v7516_v49 = vpop.f32.mrf.mxu1  ;;  %v2289_v34 = vpop.f32.mrf.mxu0  ;;  %7365 = vmatprep.subr.msk.bf16.mxu0 %vm273_vm1, %v5562_v11  ;;  %v5820_v16 = vsel %vm5814_vm11, %v9292_v39, %v9290_v61  ;;  %v5819_v2 = vsel %vm5814_vm11, %v9270_v9, %v9292_v39  ;;  %v6069_v13 = vsel %vm6068_vm12, %v9309_v52, %v9305_v30 }
 0x1d3   : > { %v2417_v14 = vadd.f32 %v2289_v34, %v2163_v46  ;;  %v9328_v6 = vpop.permute.xlu1 %6058 }
 0x1d4   : > { %v2291_v60 = vpop.f32.mrf.mxu0  ;;  %v2328_v15 = vpop.f32.mrf.mxu1  ;;  %7360 = vmatmul.mubr.msk.bf16.vlgmr.msra.gmra.mxu1 %vm269_vm2, %v7356_v28  ;;  %v6070_v9 = vsel %vm6068_vm12, %v9305_v30, %v9328_v6 }
 0x1d5   : > { %v2418_v62 = vadd.f32 %v2328_v15, %v2164_v4  ;;  %7590 = vmatpush3.bf16.msra.mxu1 %v5335_v1  ;;  %7591 = vmatprep.mubr.msk.bf16.mxu1 %vm7711_vm3, %v7710_v20 }
 0x1d6   : > { %v2292_v10 = vpop.f32.mrf.mxu0  ;;  %v2330_v18 = vpop.f32.mrf.mxu1  ;;  %7367 = vmatprep.subr.msk.bf16.mxu1 %vm273_vm1, %v5564_v44 }
 0x1d7   : > { %v2419_v63 = vadd.f32 %v2330_v18, %v2165_v29  ;;  %v9321_v29 = vpop.permute.xlu0 %6060  ;;  %v9346_v54 = vpop.permute.xlu1 %6062  ;;  %v7372_v10 = vld [vmem:[%s9625_s1 + $0x58] sm:$0xf]  ;;  %v5837_v18 = vsel %vm273_vm1, %v5819_v2, 0 }
 0x1d8   : > { %v2332_v38 = vpop.f32.mrf.mxu1  ;;  %v2369_v51 = vpop.f32.mrf.mxu0  ;;  %7362 = vmatmul.mubr.msk.bf16.vlgmr.msra.gmra.mxu0 %vm269_vm2, %v7356_v28 }
 0x1d9   : > { %v2420_v46 = vadd.f32 %v2369_v51, %v2166_v50  ;;  %5606 = vmatpush1.bf16.msra.mxu0 %v5571_v0  ;;  %5623 = vmatprep.mubr.bf16.mxu0 %v7700_v5 }
 0x1da   : > { %v2333_v40 = vpop.f32.mrf.mxu1  ;;  %v2371_v47 = vpop.f32.mrf.mxu0  ;;  %7369 = vmatprep.subr.msk.bf16.mxu0 %vm273_vm1, %v5566_v8 }
 0x1db   : > { %v2421_v41 = vadd.f32 %v2371_v47, %v2167_v59  ;;  %v9365_v60 = vpop.permute.xlu1 %6066 }
 0x1dc   : > { %v2373_v4 = vpop.f32.mrf.mxu0  ;;  %v2410_v12 = vpop.f32.mrf.mxu1  ;;  %7592 = vmatmul.mubr.msk.bf16.vlgmr.msra.gmra.mxu1 %vm269_vm2, %v7356_v28 }
 0x1dd   : > { %v2422_v31 = vadd.f32 %v2410_v12, %v2168_v55  ;;  %5647 = vmatpush1.bf16.msra.mxu1 %v5577_v27  ;;  %5664 = vmatprep.mubr.bf16.mxu1 %v7700_v5  ;;  %v9341_v55 = vpop.permute.xlu0 %6064  ;;  %v5843_v27 = vsel %vm273_vm1, %v9290_v61, 0  ;;  %v6072_v4 = vsel %vm6068_vm12, %v9321_v29, %v9346_v54 }
 0x1de   : > { %v2374_v37 = vpop.f32.mrf.mxu0  ;;  %v7521_v7 = vpop.f32.mrf.mxu1  ;;  %7595 = vmatprep.subr.bf16.mxu1 %v7710_v20 }
 0x1df   : > { %v9379_v8 = vpop.permute.xlu1 %6310  ;;  %v6079_v37 = vsel %vm273_vm1, %v6069_v13, 0 }
 0x1e0   : > { %v2413_v35 = vpop.f32.mrf.mxu1  ;;  %v2545_v50 = vpop.f32.mrf.mxu0  ;;  %7366 = vmatmul.mubr.msk.bf16.vlgmr.msra.gmra.mxu0 %vm269_vm2, %v7364_v42 }
 0x1e1   : > { %v2674_v56 = vadd.f32 %v2545_v50, %v2416_v33  ;;  %5688 = vmatpush1.bf16.msra.mxu0 %v5583_v17  ;;  %5705 = vmatprep.mubr.bf16.mxu0 %v7700_v5  ;;  %v9358_v34 = vpop.permute.xlu0 %6308  ;;  %v6074_v35 = vsel %vm6068_vm12, %v9341_v55, %v9365_v60 }
 0x1e2   : > { %v7522_v36 = vpop.f32.mrf.mxu1  ;;  %v2547_v59 = vpop.f32.mrf.mxu0  ;;  %7373 = vmatprep.subr.msk.bf16.mxu0 %vm273_vm1, %v5816_v21  ;;  %v6071_v21 = vsel %vm6068_vm12, %v9328_v6, %v9321_v29  ;;  %v6073_v29 = vsel %vm6068_vm12, %v9346_v54, %v9341_v55 }
 0x1e3   : > { %v2675_v43 = vadd.f32 %v2547_v59, %v2417_v14  ;;  %v5831_v14 = vsel %vm273_vm1, %v5817_v24, 0  ;;  %v9397_v17 = vpop.permute.xlu1 %6314  ;;  %v6085_v36 = vsel %vm273_vm1, %v6071_v21, 0 }
 0x1e4   : > { %v2549_v28 = vpop.f32.mrf.mxu0  ;;  %v2586_v58 = vpop.f32.mrf.mxu1  ;;  %7368 = vmatmul.mubr.msk.bf16.vlgmr.msra.gmra.mxu1 %vm269_vm2, %v7364_v42 }
 0x1e5   : > { %v2676_v22 = vadd.f32 %v2586_v58, %v2418_v62  ;;  %7596 = vmatpush3.bf16.msra.mxu1 %v5589_v23  ;;  %7597 = vmatprep.mubr.msk.bf16.mxu1 %vm7711_vm3, %v7710_v20  ;;  %v9377_v39 = vpop.permute.xlu0 %6312 }
 0x1e6   : > { %v2550_v32 = vpop.f32.mrf.mxu0  ;;  %v2588_v53 = vpop.f32.mrf.mxu1  ;;  %7375 = vmatprep.subr.msk.bf16.mxu1 %vm273_vm1, %v5818_v19  ;;  %v6324_v54 = vsel %vm6322_vm13, %v9379_v8, %v9377_v39 }
 0x1e7   : > { %v2677_v11 = vadd.f32 %v2588_v53, %v2419_v63  ;;  %v6319_v19 = vpop.permute.xlu1 %6318  ;;  %v6091_v32 = vsel %vm273_vm1, %v6073_v29, 0 }
 0x1e8   : > { %v2590_v33 = vpop.f32.mrf.mxu1  ;;  %v2627_v1 = vpop.f32.mrf.mxu0  ;;  %7370 = vmatmul.mubr.msk.bf16.vlgmr.msra.gmra.mxu0 %vm269_vm2, %v7364_v42 }
 0x1e9   : > { %v2678_v49 = vadd.f32 %v2627_v1, %v2420_v46  ;;  %5860 = vmatpush1.bf16.msra.mxu0 %v5825_v48  ;;  %5877 = vmatprep.mubr.bf16.mxu0 %v7700_v5  ;;  %v9395_v61 = vpop.permute.xlu0 %6316  ;;  %v7380_v48 = vld [vmem:[%s9625_s1 + $0x5c] sm:$0xf] }
 0x1ea   : > { %v2591_v25 = vpop.f32.mrf.mxu1  ;;  %v2629_v44 = vpop.f32.mrf.mxu0  ;;  %7377 = vmatprep.subr.msk.bf16.mxu0 %vm273_vm1, %v5820_v16  ;;  %v6326_v2 = vsel %vm6322_vm13, %v9397_v17, %v9395_v61 }
 0x1eb   : > { %v2679_v57 = vadd.f32 %v2629_v44, %v2421_v41  ;;  %v9430_v1 = vpop.permute.xlu1 %6562 }
 0x1ec   : > { %v2631_v15 = vpop.f32.mrf.mxu0  ;;  %v2668_v62 = vpop.f32.mrf.mxu1  ;;  %7598 = vmatmul.mubr.msk.bf16.vlgmr.msra.gmra.mxu1 %vm269_vm2, %v7364_v42 }
 0x1ed   : > { %v2680_v0 = vadd.f32 %v2668_v62, %v2422_v31  ;;  %5901 = vmatpush1.bf16.msra.mxu1 %v5831_v14  ;;  %5918 = vmatprep.mubr.bf16.mxu1 %v7700_v5  ;;  %v9414_v6 = vpop.permute.xlu0 %6320 }
 0x1ee   : > { %v2632_v63 = vpop.f32.mrf.mxu0  ;;  %v7527_v45 = vpop.f32.mrf.mxu1  ;;  %7601 = vmatprep.subr.bf16.mxu1 %v7710_v20 }
 0x1ef   : > { %v6325_v45 = vsel %vm6322_vm13, %v9377_v39, %v9397_v17  ;;  %v6327_v39 = vsel %vm6322_vm13, %v9395_v61, %v6319_v19 }
 0x1f0   : > { %v2671_v38 = vpop.f32.mrf.mxu1  ;;  %v2803_v51 = vpop.f32.mrf.mxu0  ;;  %7374 = vmatmul.mubr.msk.bf16.vlgmr.msra.gmra.mxu0 %vm269_vm2, %v7372_v10 }
 0x1f1   : > { %v2932_v46 = vadd.f32 %v2803_v51, %v2674_v56  ;;  %5942 = vmatpush1.bf16.msra.mxu0 %v5837_v18  ;;  %5959 = vmatprep.mubr.bf16.mxu0 %v7700_v5 }
 0x1f2   : > { %v7528_v40 = vpop.f32.mrf.mxu1  ;;  %v2805_v47 = vpop.f32.mrf.mxu0  ;;  %7381 = vmatprep.subr.msk.bf16.mxu0 %vm273_vm1, %v6070_v9  ;;  %v6328_v9 = vsel %vm6322_vm13, %v6319_v19, %v9414_v6 }
 0x1f3   : > { %v2933_v41 = vadd.f32 %v2805_v47, %v2675_v43 }
 0x1f4   : > { %v2807_v12 = vpop.f32.mrf.mxu0  ;;  %v2844_v31 = vpop.f32.mrf.mxu1  ;;  %7376 = vmatmul.mubr.msk.bf16.vlgmr.msra.gmra.mxu1 %vm269_vm2, %v7372_v10 }
 0x1f5   : > { %v2934_v42 = vadd.f32 %v2844_v31, %v2676_v22  ;;  %7602 = vmatpush3.bf16.msra.mxu1 %v5843_v27  ;;  %7603 = vmatprep.mubr.msk.bf16.mxu1 %vm7711_vm3, %v7710_v20  ;;  %v6339_v27 = vsel %vm273_vm1, %v6325_v45, 0 }
 0x1f6   : > { %v2808_v30 = vpop.f32.mrf.mxu0  ;;  %v2846_v52 = vpop.f32.mrf.mxu1  ;;  %7383 = vmatprep.subr.msk.bf16.mxu1 %vm273_vm1, %v6072_v4 }
 0x1f7   : > { %v2935_v7 = vadd.f32 %v2846_v52, %v2677_v11  ;;  %v9426_v11 = vpop.permute.xlu0 %6564 }
 0x1f8   : > { %v2848_v50 = vpop.f32.mrf.mxu1  ;;  %v2885_v56 = vpop.f32.mrf.mxu0  ;;  %7378 = vmatmul.mubr.msk.bf16.vlgmr.msra.gmra.mxu0 %vm269_vm2, %v7372_v10 }
 0x1f9   : > { %v2936_v23 = vadd.f32 %v2885_v56, %v2678_v49  ;;  %6114 = vmatpush1.bf16.msra.mxu0 %v6079_v37  ;;  %6131 = vmatprep.mubr.bf16.mxu0 %v7700_v5  ;;  %v6097_v49 = vsel %vm273_vm1, %v9365_v60, 0  ;;  %v6345_v37 = vsel %vm273_vm1, %v6327_v39, 0  ;;  %v6351_v56 = vsel %vm273_vm1, %v9414_v6, 0 }
 0x1fa   : > { %v2849_v59 = vpop.f32.mrf.mxu1  ;;  %v2887_v43 = vpop.f32.mrf.mxu0  ;;  %7385 = vmatprep.subr.msk.bf16.mxu0 %vm273_vm1, %v6074_v35 }
 0x1fb   : > { %v2937_v26 = vadd.f32 %v2887_v43, %v2679_v57  ;;  %v6323_v57 = vsel %vm6322_vm13, %v9358_v34, %v9379_v8  ;;  %v9444_v60 = vpop.permute.xlu0 %6568  ;;  %v6567_v8 = vpop.permute.xlu1 %6566  ;;  %v6577_v43 = vsel %vm6576_vm14, %v9430_v1, %v9426_v11 }
 0x1fc   : > { %v2889_v28 = vpop.f32.mrf.mxu0  ;;  %v2926_v58 = vpop.f32.mrf.mxu1  ;;  %7604 = vmatmul.mubr.msk.bf16.vlgmr.msra.gmra.mxu1 %vm269_vm2, %v7372_v10  ;;  %v6333_v10 = vsel %vm273_vm1, %v6323_v57, 0  ;;  %v6578_v61 = vsel %vm6576_vm14, %v9426_v11, %v6567_v8  ;;  %v6587_v6 = vsel %vm273_vm1, %v6577_v43, 0 }
 0x1fd   : > { %v2938_v22 = vadd.f32 %v2926_v58, %v2680_v0  ;;  %6155 = vmatpush1.bf16.msra.mxu1 %v6085_v36  ;;  %6172 = vmatprep.mubr.bf16.mxu1 %v7700_v5 }
 0x1fe   : > { %v2890_v53 = vpop.f32.mrf.mxu0  ;;  %v7533_v55 = vpop.f32.mrf.mxu1  ;;  %7607 = vmatprep.subr.bf16.mxu1 %v7710_v20 }
 0x1ff   : > { %v6573_v13 = vpop.permute.xlu0 %6572  ;;  %v6571_v17 = vpop.permute.xlu1 %6570  ;;  %v6579_v53 = vsel %vm6576_vm14, %v6567_v8, %v9444_v60 }
 0x200   : > { %v2929_v24 = vpop.f32.mrf.mxu1  ;;  %v3061_v16 = vpop.f32.mrf.mxu0  ;;  %7382 = vmatmul.mubr.msk.bf16.vlgmr.msra.gmra.mxu0 %vm269_vm2, %v7380_v48  ;;  %v6593_v1 = vsel %vm273_vm1, %v6579_v53, 0 }
 0x201   : > { %v3190_v33 = vadd.f32 %v3061_v16, %v2932_v46  ;;  %6196 = vmatpush1.bf16.msra.mxu0 %v6091_v32  ;;  %6213 = vmatprep.mubr.bf16.mxu0 %v7700_v5 }
 0x202   : > { %v7534_v14 = vpop.f32.mrf.mxu1  ;;  %v3063_v25 = vpop.f32.mrf.mxu0  ;;  %7389 = vmatprep.subr.msk.bf16.mxu0 %vm273_vm1, %v6324_v54 }
 0x203   : > { %v3191_v44 = vadd.f32 %v3063_v25, %v2933_v41  ;;  %v9470_v50 = vpop.permute.xlu0 %6816  ;;  %v6575_v29 = vpop.permute.xlu1 %6574 }
 0x204   : > { %v3065_v15 = vpop.f32.mrf.mxu0  ;;  %v3102_v62 = vpop.f32.mrf.mxu1  ;;  %7384 = vmatmul.mubr.msk.bf16.vlgmr.msra.gmra.mxu1 %vm269_vm2, %v7380_v48  ;;  %v6582_v55 = vsel %vm6576_vm14, %v6573_v13, %v6575_v29 }
 0x205   : > { %v3192_v0 = vadd.f32 %v3102_v62, %v2934_v42  ;;  %7608 = vmatpush3.bf16.msra.mxu1 %v6097_v49  ;;  %7609 = vmatprep.mubr.msk.bf16.mxu1 %vm7711_vm3, %v7710_v20  ;;  %v7388_v42 = vld [vmem:[%s9625_s1 + $0x60] sm:$0xf]  ;;  %v7396_v62 = vld [vmem:[%s9625_s1 + $0x64] sm:$0xf] }
 0x206   : > { %v3066_v18 = vpop.f32.mrf.mxu0  ;;  %v3104_v63 = vpop.f32.mrf.mxu1  ;;  %7391 = vmatprep.subr.msk.bf16.mxu1 %vm273_vm1, %v6326_v2 }
 0x207   : > { %v3193_v34 = vadd.f32 %v3104_v63, %v2935_v7  ;;  %v6821_v54 = vpop.permute.xlu0 %6820  ;;  %v6819_v11 = vpop.permute.xlu1 %6818 }
 0x208   : > { %v3106_v38 = vpop.f32.mrf.mxu1  ;;  %v3143_v51 = vpop.f32.mrf.mxu0  ;;  %7386 = vmatmul.mubr.msk.bf16.vlgmr.msra.gmra.mxu0 %vm269_vm2, %v7380_v48 }
 0x209   : > { %v3194_v46 = vadd.f32 %v3143_v51, %v2936_v23  ;;  %6368 = vmatpush1.bf16.msra.mxu0 %v6333_v10  ;;  %6385 = vmatprep.mubr.bf16.mxu0 %v7700_v5  ;;  %v6605_v38 = vsel %vm273_vm1, %v6575_v29, 0  ;;  %v7404_v29 = vld [vmem:[%s9625_s1 + $0x68] sm:$0xf] }
 0x20a   : > { %v3107_v40 = vpop.f32.mrf.mxu1  ;;  %v3145_v47 = vpop.f32.mrf.mxu0  ;;  %7393 = vmatprep.subr.msk.bf16.mxu0 %vm273_vm1, %v6328_v9 }
 0x20b   : > { %v3195_v41 = vadd.f32 %v3145_v47, %v2937_v26  ;;  %v6580_v26 = vsel %vm6576_vm14, %v9444_v60, %v6571_v17  ;;  %v6823_v60 = vpop.permute.xlu1 %6822  ;;  %v6831_v40 = vsel %vm6830_vm15, %v9470_v50, %v6819_v11 }
 0x20c   : > { %v3147_v4 = vpop.f32.mrf.mxu0  ;;  %v3184_v12 = vpop.f32.mrf.mxu1  ;;  %7610 = vmatmul.mubr.msk.bf16.vlgmr.msra.gmra.mxu1 %vm269_vm2, %v7380_v48 }
 0x20d   : > { %v3196_v31 = vadd.f32 %v3184_v12, %v2938_v22  ;;  %6409 = vmatpush1.bf16.msra.mxu1 %v6339_v27  ;;  %6426 = vmatprep.mubr.bf16.mxu1 %v7700_v5 }
 0x20e   : > { %v3148_v30 = vpop.f32.mrf.mxu0  ;;  %v7539_v52 = vpop.f32.mrf.mxu1  ;;  %7613 = vmatprep.subr.bf16.mxu1 %v7710_v20 }
 0x20f   : > { %v6827_v39 = vpop.permute.xlu1 %6826  ;;  %v6833_v30 = vsel %vm6830_vm15, %v6821_v54, %v6823_v60 }
 0x210   : > { %v3187_v7 = vpop.f32.mrf.mxu1  ;;  %v3319_v21 = vpop.f32.mrf.mxu0  ;;  %7390 = vmatmul.mubr.msk.bf16.vlgmr.msra.gmra.mxu0 %vm269_vm2, %v7388_v42 }
 0x211   : > { %v3448_v35 = vadd.f32 %v3319_v21, %v3190_v33  ;;  %6450 = vmatpush1.bf16.msra.mxu0 %v6345_v37  ;;  %6467 = vmatprep.mubr.bf16.mxu0 %v7700_v5 }
 0x212   : > { %v7540_v23 = vpop.f32.mrf.mxu1  ;;  %v3321_v36 = vpop.f32.mrf.mxu0  ;;  %7397 = vmatprep.subr.msk.bf16.mxu0 %vm273_vm1, %v6578_v61 }
 0x213   : > { %v3449_v59 = vadd.f32 %v3321_v36, %v3191_v44  ;;  %v6581_v44 = vsel %vm6576_vm14, %v6571_v17, %v6573_v13 }
 0x214   : > { %v3323_v19 = vpop.f32.mrf.mxu0  ;;  %v3360_v28 = vpop.f32.mrf.mxu1  ;;  %7392 = vmatmul.mubr.msk.bf16.vlgmr.msra.gmra.mxu1 %vm269_vm2, %v7388_v42  ;;  %v6599_v10 = vsel %vm273_vm1, %v6581_v44, 0 }
 0x215   : > { %v3450_v58 = vadd.f32 %v3360_v28, %v3192_v0  ;;  %7614 = vmatpush3.bf16.msra.mxu1 %v6351_v56  ;;  %7615 = vmatprep.mubr.msk.bf16.mxu1 %vm7711_vm3, %v7710_v20  ;;  %v6825_v0 = vpop.permute.xlu0 %6824 }
 0x216   : > { %v3324_v22 = vpop.f32.mrf.mxu0  ;;  %v3362_v48 = vpop.f32.mrf.mxu1  ;;  %7399 = vmatprep.subr.msk.bf16.mxu1 %vm273_vm1, %v6580_v26  ;;  %v6834_v47 = vsel %vm6830_vm15, %v6823_v60, %v6825_v0  ;;  %v6835_v36 = vsel %vm6830_vm15, %v6825_v0, %v6827_v39 }
 0x217   : > { %v3451_v32 = vadd.f32 %v3362_v48, %v3193_v34  ;;  %v6832_v34 = vsel %vm6830_vm15, %v6819_v11, %v6821_v54  ;;  %v6853_v19 = vsel %vm273_vm1, %v6835_v36, 0 }
 0x218   : > { %v3364_v24 = vpop.f32.mrf.mxu1  ;;  %v3401_v16 = vpop.f32.mrf.mxu0  ;;  %7394 = vmatmul.mubr.msk.bf16.vlgmr.msra.gmra.mxu0 %vm269_vm2, %v7388_v42 }
 0x219   : > { %v3452_v33 = vadd.f32 %v3401_v16, %v3194_v46  ;;  %6622 = vmatpush1.bf16.msra.mxu0 %v6587_v6  ;;  %6639 = vmatprep.mubr.bf16.mxu0 %v7700_v5 }
 0x21a   : > { %v3365_v49 = vpop.f32.mrf.mxu1  ;;  %v3403_v14 = vpop.f32.mrf.mxu0  ;;  %7401 = vmatprep.subr.msk.bf16.mxu0 %vm273_vm1, %v6582_v55 }
 0x21b   : > { %v3453_v25 = vadd.f32 %v3403_v14, %v3195_v41  ;;  %v6829_v41 = vpop.permute.xlu0 %6828 }
 0x21c   : > { %v3405_v57 = vpop.f32.mrf.mxu0  ;;  %v3442_v2 = vpop.f32.mrf.mxu1  ;;  %7616 = vmatmul.mubr.msk.bf16.vlgmr.msra.gmra.mxu1 %vm269_vm2, %v7388_v42  ;;  %v6836_v52 = vsel %vm6830_vm15, %v6827_v39, %v6829_v41 }
 0x21d   : > { %v3454_v15 = vadd.f32 %v3442_v2, %v3196_v31  ;;  %6663 = vmatpush1.bf16.msra.mxu1 %v6593_v1  ;;  %6680 = vmatprep.mubr.bf16.mxu1 %v7700_v5  ;;  %v6841_v31 = vsel %vm273_vm1, %v6831_v40, 0 }
 0x21e   : > { %v3406_v18 = vpop.f32.mrf.mxu0  ;;  %v7545_v63 = vpop.f32.mrf.mxu1  ;;  %7619 = vmatprep.subr.bf16.mxu1 %v7710_v20 }
 0x220   : > { %v3445_v45 = vpop.f32.mrf.mxu1  ;;  %v3577_v9 = vpop.f32.mrf.mxu0  ;;  %7398 = vmatmul.mubr.msk.bf16.vlgmr.msra.gmra.mxu0 %vm269_vm2, %v7396_v62 }
 0x221   : > { %v3706_v8 = vadd.f32 %v3577_v9, %v3448_v35  ;;  %6704 = vmatpush1.bf16.msra.mxu0 %v6599_v10  ;;  %6721 = vmatprep.mubr.bf16.mxu0 %v7700_v5  ;;  %v6847_v35 = vsel %vm273_vm1, %v6833_v30, 0 }
 0x222   : > { %v7546_v51 = vpop.f32.mrf.mxu1  ;;  %v3579_v46 = vpop.f32.mrf.mxu0  ;;  %7405 = vmatprep.subr.msk.bf16.mxu0 %vm273_vm1, %v6832_v34 }
 0x223   : > { %v3707_v27 = vadd.f32 %v3579_v46, %v3449_v59 }
 0x224   : > { %v3581_v13 = vpop.f32.mrf.mxu0  ;;  %v3618_v4 = vpop.f32.mrf.mxu1  ;;  %7400 = vmatmul.mubr.msk.bf16.vlgmr.msra.gmra.mxu1 %vm269_vm2, %v7396_v62 }
 0x225   : > { %v3708_v12 = vadd.f32 %v3618_v4, %v3450_v58  ;;  %7620 = vmatpush3.bf16.msra.mxu1 %v6605_v38  ;;  %7621 = vmatprep.mubr.msk.bf16.mxu1 %vm7711_vm3, %v7710_v20 }
 0x226   : > { %v3582_v42 = vpop.f32.mrf.mxu0  ;;  %v3620_v17 = vpop.f32.mrf.mxu1  ;;  %7407 = vmatprep.subr.msk.bf16.mxu1 %vm273_vm1, %v6834_v47 }
 0x227   : > { %v3709_v37 = vadd.f32 %v3620_v17, %v3451_v32  ;;  %v6859_v32 = vsel %vm273_vm1, %v6829_v41, 0 }
 0x228   : > { %v3622_v61 = vpop.f32.mrf.mxu1  ;;  %v3659_v7 = vpop.f32.mrf.mxu0  ;;  %7402 = vmatmul.mubr.msk.bf16.vlgmr.msra.gmra.mxu0 %vm269_vm2, %v7396_v62 }
 0x229   : > { %v3710_v21 = vadd.f32 %v3659_v7, %v3452_v33  ;;  %6876 = vmatpush1.bf16.msra.mxu0 %v6841_v31  ;;  %6893 = vmatprep.mubr.bf16.mxu0 %v7700_v5 }
 0x22a   : > { %v3623_v50 = vpop.f32.mrf.mxu1  ;;  %v3661_v56 = vpop.f32.mrf.mxu0  ;;  %7409 = vmatprep.subr.msk.bf16.mxu0 %vm273_vm1, %v6836_v52  ;;  %vm7080_vm1 = vcmask 261120  }
 0x22b   : > { %v3711_v23 = vadd.f32 %v3661_v56, %v3453_v25 }
 0x22c   : > { %v3663_v59 = vpop.f32.mrf.mxu0  ;;  %v3700_v43 = vpop.f32.mrf.mxu1  ;;  %7622 = vmatmul.mubr.msk.bf16.vlgmr.msra.gmra.mxu1 %vm269_vm2, %v7396_v62 }
 0x22d   : > { %v3712_v26 = vadd.f32 %v3700_v43, %v3454_v15  ;;  %6917 = vmatpush1.bf16.msra.mxu1 %v6847_v35  ;;  %6934 = vmatprep.mubr.bf16.mxu1 %v7700_v5 }
 0x22e   : > { %v3664_v28 = vpop.f32.mrf.mxu0  ;;  %v7551_v58 = vpop.f32.mrf.mxu1  ;;  %7625 = vmatprep.subr.bf16.mxu1 %v7710_v20 }
 0x230   : > { %v3703_v6 = vpop.f32.mrf.mxu1  ;;  %v3835_v22 = vpop.f32.mrf.mxu0  ;;  %7406 = vmatmul.mubr.msk.bf16.vlgmr.msra.gmra.mxu0 %vm269_vm2, %v7404_v29 }
 0x231   : > { %v3964_v48 = vadd.f32 %v3835_v22, %v3706_v8  ;;  %6958 = vmatpush1.bf16.msra.mxu0 %v6853_v19  ;;  %6975 = vmatprep.mubr.bf16.mxu0 %v7700_v5 }
 0x232   : > { %v7552_v53 = vpop.f32.mrf.mxu1  ;;  %v3837_v55 = vpop.f32.mrf.mxu0 }
 0x233   : > { %v3965_v54 = vadd.f32 %v3837_v55, %v3707_v27 }
 0x234   : > { %v3839_v11 = vpop.f32.mrf.mxu0  ;;  %v3876_v24 = vpop.f32.mrf.mxu1  ;;  %7408 = vmatmul.mubr.msk.bf16.vlgmr.msra.gmra.mxu1 %vm269_vm2, %v7404_v29 }
 0x235   : > { %v3966_v16 = vadd.f32 %v3876_v24, %v3708_v12  ;;  %7626 = vmatpush3.bf16.msra.mxu1 %v6859_v32  ;;  %7627 = vmatprep.mubr.msk.bf16.mxu1 %vm7711_vm3, %v7710_v20 }
 0x236   : > { %v3840_v33 = vpop.f32.mrf.mxu0  ;;  %v3878_v1 = vpop.f32.mrf.mxu1 }
 0x237   : > { %v3967_v49 = vadd.f32 %v3878_v1, %v3709_v37 }
 0x238   : > { %v3880_v14 = vpop.f32.mrf.mxu1  ;;  %v3917_v25 = vpop.f32.mrf.mxu0  ;;  %7410 = vmatmul.mubr.msk.bf16.vlgmr.msra.gmra.mxu0 %vm269_vm2, %v7404_v29 }
 0x239   : > { %v3968_v5 = vadd.f32 %v3917_v25, %v3710_v21 }
 0x23a   : > { %v3881_v44 = vpop.f32.mrf.mxu1  ;;  %v3919_v57 = vpop.f32.mrf.mxu0 }
 0x23b   : > { %v3969_v2 = vadd.f32 %v3919_v57, %v3711_v23 }
 0x23c   : > { %v3921_v15 = vpop.f32.mrf.mxu0  ;;  %v3958_v62 = vpop.f32.mrf.mxu1  ;;  %7628 = vmatmul.mubr.msk.bf16.vlgmr.msra.gmra.mxu1 %vm269_vm2, %v7404_v29  ;;  %vm7085_vm2 = vcmask 7168  }
 0x23d   : > { %v3970_v0 = vadd.f32 %v3958_v62, %v3712_v26 }
 0x23e   : > { %v3922_v60 = vpop.f32.mrf.mxu0  ;;  %v7557_v10 = vpop.f32.mrf.mxu1 }
 0x240   : > { %v3961_v18 = vpop.f32.mrf.mxu1  ;;  %v4093_v20 = vpop.f32.mrf.mxu0 }
 0x241   : > { %v4222_v63 = vadd.f32 %v4093_v20, %v3964_v48 }
 0x242   : > { %v7558_v34 = vpop.f32.mrf.mxu1  ;;  %v4095_v45 = vpop.f32.mrf.mxu0 }
 0x243   : > { %v4223_v9 = vadd.f32 %v4095_v45, %v3965_v54 }
 0x244   : > { %v4097_v8 = vpop.f32.mrf.mxu0  ;;  %v4134_v38 = vpop.f32.mrf.mxu1 }
 0x245   : > { %v4224_v51 = vadd.f32 %v4134_v38, %v3966_v16 }
 0x246   : > { %v4098_v46 = vpop.f32.mrf.mxu0  ;;  %v4136_v27 = vpop.f32.mrf.mxu1 }
 0x247   : > { %v4225_v40 = vadd.f32 %v4136_v27, %v3967_v49 }
 0x248   : > { %v4138_v47 = vpop.f32.mrf.mxu1  ;;  %v4175_v41 = vpop.f32.mrf.mxu0 }
 0x249   : > { %v4226_v39 = vadd.f32 %v4175_v41, %v3968_v5 }
 0x24a   : > { %v4139_v13 = vpop.f32.mrf.mxu1  ;;  %v4177_v4 = vpop.f32.mrf.mxu0 }
 0x24b   : > { %v4227_v12 = vadd.f32 %v4177_v4, %v3969_v2 }
 0x24c   : > { %v4179_v31 = vpop.f32.mrf.mxu0  ;;  %v4216_v42 = vpop.f32.mrf.mxu1 }
 0x24d   : > { %v4228_v17 = vadd.f32 %v4216_v42, %v3970_v0 }
 0x24e   : > { %v4180_v37 = vpop.f32.mrf.mxu0  ;;  %v7563_v30 = vpop.f32.mrf.mxu1 }
 0x250   : > { %v4219_v52 = vpop.f32.mrf.mxu1  ;;  %v4351_v61 = vpop.f32.mrf.mxu0 }
 0x251   : > { %v4480_v7 = vadd.f32 %v4351_v61, %v4222_v63 }
 0x252   : > { %v7564_v21 = vpop.f32.mrf.mxu1  ;;  %v4353_v35 = vpop.f32.mrf.mxu0 }
 0x253   : > { %v4481_v50 = vadd.f32 %v4353_v35, %v4223_v9 }
 0x254   : > { %v4355_v56 = vpop.f32.mrf.mxu0  ;;  %v4392_v23 = vpop.f32.mrf.mxu1 }
 0x255   : > { %v4482_v36 = vadd.f32 %v4392_v23, %v4224_v51 }
 0x256   : > { %v4356_v59 = vpop.f32.mrf.mxu0  ;;  %v4394_v43 = vpop.f32.mrf.mxu1 }
 0x257   : > { %v4483_v26 = vadd.f32 %v4394_v43, %v4225_v40 }
 0x258   : > { %v4396_v29 = vpop.f32.mrf.mxu1  ;;  %v4433_v19 = vpop.f32.mrf.mxu0 }
 0x259   : > { %v4484_v28 = vadd.f32 %v4433_v19, %v4226_v39 }
 0x25a   : > { %v4397_v58 = vpop.f32.mrf.mxu1  ;;  %v4435_v6 = vpop.f32.mrf.mxu0 }
 0x25b   : > { %v4485_v22 = vadd.f32 %v4435_v6, %v4227_v12 }
 0x25c   : > { %v4437_v48 = vpop.f32.mrf.mxu0  ;;  %v4474_v32 = vpop.f32.mrf.mxu1 }
 0x25d   : > { %v4486_v53 = vadd.f32 %v4474_v32, %v4228_v17 }
 0x25e   : > { %v4438_v55 = vpop.f32.mrf.mxu0  ;;  %v7569_v54 = vpop.f32.mrf.mxu1 }
 0x260   : > { %v4477_v11 = vpop.f32.mrf.mxu1  ;;  %v4609_v24 = vpop.f32.mrf.mxu0 }
 0x261   : > { %v4738_v16 = vadd.f32 %v4609_v24, %v4480_v7 }
 0x262   : > { %v7570_v33 = vpop.f32.mrf.mxu1  ;;  %v4611_v1 = vpop.f32.mrf.mxu0 }
 0x263   : > { %v4739_v49 = vadd.f32 %v4611_v1, %v4481_v50 }
 0x264   : > { %v4613_v14 = vpop.f32.mrf.mxu0  ;;  %v4650_v25 = vpop.f32.mrf.mxu1 }
 0x265   : > { %v4740_v5 = vadd.f32 %v4650_v25, %v4482_v36 }
 0x266   : > { %v4614_v44 = vpop.f32.mrf.mxu0  ;;  %v4652_v57 = vpop.f32.mrf.mxu1 }
 0x267   : > { %v4741_v2 = vadd.f32 %v4652_v57, %v4483_v26 }
 0x268   : > { %v4654_v15 = vpop.f32.mrf.mxu1  ;;  %v4691_v62 = vpop.f32.mrf.mxu0 }
 0x269   : > { %v4742_v0 = vadd.f32 %v4691_v62, %v4484_v28 }
 0x26a   : > { %v4655_v60 = vpop.f32.mrf.mxu1  ;;  %v4693_v10 = vpop.f32.mrf.mxu0 }
 0x26b   : > { %v4743_v18 = vadd.f32 %v4693_v10, %v4485_v22 }
 0x26c   : > { %v4695_v20 = vpop.f32.mrf.mxu0  ;;  %v4732_v63 = vpop.f32.mrf.mxu1 }
 0x26d   : > { %v4744_v34 = vadd.f32 %v4732_v63, %v4486_v53 }
 0x26e   : > { %v4696_v45 = vpop.f32.mrf.mxu0  ;;  %v7575_v9 = vpop.f32.mrf.mxu1 }
 0x270   : > { %v4735_v8 = vpop.f32.mrf.mxu1  ;;  %v4863_v38 = vpop.f32.mrf.mxu0 }
 0x271   : > { %v4992_v51 = vadd.f32 %v4863_v38, %v4738_v16 }
 0x272   : > { %v7576_v46 = vpop.f32.mrf.mxu1  ;;  %v4865_v27 = vpop.f32.mrf.mxu0 }
 0x273   : > { %v4993_v40 = vadd.f32 %v4865_v27, %v4739_v49 }
 0x274   : > { %v4867_v47 = vpop.f32.mrf.mxu0  ;;  %v4904_v41 = vpop.f32.mrf.mxu1 }
 0x275   : > { %v4994_v39 = vadd.f32 %v4904_v41, %v4740_v5 }
 0x276   : > { %v4868_v13 = vpop.f32.mrf.mxu0  ;;  %v4906_v4 = vpop.f32.mrf.mxu1 }
 0x277   : > { %v4995_v12 = vadd.f32 %v4906_v4, %v4741_v2 }
 0x278   : > { %v4908_v31 = vpop.f32.mrf.mxu1  ;;  %v4945_v42 = vpop.f32.mrf.mxu0 }
 0x279   : > { %v4996_v17 = vadd.f32 %v4945_v42, %v4742_v0 }
 0x27a   : > { %v4909_v37 = vpop.f32.mrf.mxu1  ;;  %v4947_v30 = vpop.f32.mrf.mxu0 }
 0x27b   : > { %v4997_v52 = vadd.f32 %v4947_v30, %v4743_v18 }
 0x27c   : > { %v4949_v61 = vpop.f32.mrf.mxu0  ;;  %v4986_v7 = vpop.f32.mrf.mxu1 }
 0x27d   : > { %v4998_v21 = vadd.f32 %v4986_v7, %v4744_v34 }
 0x27e   : > { %v4950_v35 = vpop.f32.mrf.mxu0  ;;  %v7581_v50 = vpop.f32.mrf.mxu1 }
 0x280   : > { %v4989_v56 = vpop.f32.mrf.mxu1  ;;  %v5117_v23 = vpop.f32.mrf.mxu0 }
 0x281   : > { %v5246_v36 = vadd.f32 %v5117_v23, %v4992_v51 }
 0x282   : > { %v7582_v59 = vpop.f32.mrf.mxu1  ;;  %v5119_v43 = vpop.f32.mrf.mxu0 }
 0x283   : > { %v5247_v26 = vadd.f32 %v5119_v43, %v4993_v40 }
 0x284   : > { %v5121_v29 = vpop.f32.mrf.mxu0  ;;  %v5158_v19 = vpop.f32.mrf.mxu1 }
 0x285   : > { %v5248_v28 = vadd.f32 %v5158_v19, %v4994_v39 }
 0x286   : > { %v5122_v58 = vpop.f32.mrf.mxu0  ;;  %v5160_v6 = vpop.f32.mrf.mxu1 }
 0x287   : > { %v5249_v22 = vadd.f32 %v5160_v6, %v4995_v12 }
 0x288   : > { %v5162_v48 = vpop.f32.mrf.mxu1  ;;  %v5199_v32 = vpop.f32.mrf.mxu0 }
 0x289   : > { %v5250_v53 = vadd.f32 %v5199_v32, %v4996_v17 }
 0x28a   : > { %v5163_v55 = vpop.f32.mrf.mxu1  ;;  %v5201_v54 = vpop.f32.mrf.mxu0 }
 0x28b   : > { %v5251_v11 = vadd.f32 %v5201_v54, %v4997_v52 }
 0x28c   : > { %v5203_v24 = vpop.f32.mrf.mxu0  ;;  %v5240_v16 = vpop.f32.mrf.mxu1 }
 0x28d   : > { %v5252_v33 = vadd.f32 %v5240_v16, %v4998_v21 }
 0x28e   : > { %v5204_v1 = vpop.f32.mrf.mxu0  ;;  %v7587_v49 = vpop.f32.mrf.mxu1 }
 0x290   : > { %v5243_v14 = vpop.f32.mrf.mxu1  ;;  %v5371_v25 = vpop.f32.mrf.mxu0 }
 0x291   : > { %v5500_v5 = vadd.f32 %v5371_v25, %v5246_v36 }
 0x292   : > { %v7588_v44 = vpop.f32.mrf.mxu1  ;;  %v5373_v57 = vpop.f32.mrf.mxu0 }
 0x293   : > { %v5501_v2 = vadd.f32 %v5373_v57, %v5247_v26 }
 0x294   : > { %v5375_v15 = vpop.f32.mrf.mxu0  ;;  %v5412_v62 = vpop.f32.mrf.mxu1 }
 0x295   : > { %v5502_v0 = vadd.f32 %v5412_v62, %v5248_v28 }
 0x296   : > { %v5376_v60 = vpop.f32.mrf.mxu0  ;;  %v5414_v10 = vpop.f32.mrf.mxu1 }
 0x297   : > { %v5503_v18 = vadd.f32 %v5414_v10, %v5249_v22 }
 0x298   : > { %v5416_v20 = vpop.f32.mrf.mxu1  ;;  %v5453_v63 = vpop.f32.mrf.mxu0 }
 0x299   : > { %v5504_v34 = vadd.f32 %v5453_v63, %v5250_v53 }
 0x29a   : > { %v5417_v45 = vpop.f32.mrf.mxu1  ;;  %v5455_v9 = vpop.f32.mrf.mxu0 }
 0x29b   : > { %v5505_v8 = vadd.f32 %v5455_v9, %v5251_v11 }
 0x29c   : > { %v5457_v38 = vpop.f32.mrf.mxu0  ;;  %v5494_v51 = vpop.f32.mrf.mxu1 }
 0x29d   : > { %v5506_v46 = vadd.f32 %v5494_v51, %v5252_v33 }
 0x29e   : > { %v5458_v27 = vpop.f32.mrf.mxu0  ;;  %v7593_v40 = vpop.f32.mrf.mxu1 }
 0x2a0   : > { %v5497_v47 = vpop.f32.mrf.mxu1  ;;  %v5625_v41 = vpop.f32.mrf.mxu0 }
 0x2a1   : > { %v9535_v39 = vadd.f32 %v5625_v41, %v5500_v5 }
 0x2a2   : > { %v7594_v13 = vpop.f32.mrf.mxu1  ;;  %v5627_v4 = vpop.f32.mrf.mxu0 }
 0x2a3   : > { %v9537_v12 = vadd.f32 %v5627_v4, %v5501_v2 }
 0x2a4   : > { %v5629_v31 = vpop.f32.mrf.mxu0  ;;  %v5666_v42 = vpop.f32.mrf.mxu1 }
 0x2a5   : > { %v9539_v17 = vadd.f32 %v5666_v42, %v5502_v0 }
 0x2a6   : > { %v5630_v37 = vpop.f32.mrf.mxu0  ;;  %v5668_v30 = vpop.f32.mrf.mxu1 }
 0x2a7   : > { %v9541_v52 = vadd.f32 %v5668_v30, %v5503_v18 }
 0x2a8   : > { %v5670_v61 = vpop.f32.mrf.mxu1  ;;  %v5707_v7 = vpop.f32.mrf.mxu0 }
 0x2a9   : > { %v9543_v21 = vadd.f32 %v5707_v7, %v5504_v34 }
 0x2aa   : > { %v5671_v35 = vpop.f32.mrf.mxu1  ;;  %v5709_v50 = vpop.f32.mrf.mxu0 }
 0x2ab   : > { %v9545_v56 = vadd.f32 %v5709_v50, %v5505_v8 }
 0x2ac   : > { %v5711_v23 = vpop.f32.mrf.mxu0  ;;  %v5748_v36 = vpop.f32.mrf.mxu1 }
 0x2ad   : > { %v9547_v59 = vadd.f32 %v5748_v36, %v5506_v46 }
 0x2ae   : > { %v5712_v43 = vpop.f32.mrf.mxu0  ;;  %v7599_v26 = vpop.f32.mrf.mxu1 }
 0x2b0   : > { %v5751_v29 = vpop.f32.mrf.mxu1  ;;  %v5879_v19 = vpop.f32.mrf.mxu0 }
 0x2b2   : > { %v7600_v28 = vpop.f32.mrf.mxu1  ;;  %v5881_v58 = vpop.f32.mrf.mxu0 }
 0x2b4   : > { %v5883_v6 = vpop.f32.mrf.mxu0  ;;  %v9549_v22 = vpop.f32.mrf.mxu1 }
 0x2b5   : > { %v6008_v6 = vadd.f32 %v5879_v19, %v9535_v39  ;;  %v6010_v39 = vadd.f32 %v9549_v22, %v9539_v17 }
 0x2b6   : > { %v5884_v48 = vpop.f32.mrf.mxu0  ;;  %v9551_v32 = vpop.f32.mrf.mxu1 }
 0x2b8   : > { %v5924_v53 = vpop.f32.mrf.mxu1  ;;  %v9553_v55 = vpop.f32.mrf.mxu0 }
 0x2ba   : > { %v5925_v54 = vpop.f32.mrf.mxu1  ;;  %v9555_v11 = vpop.f32.mrf.mxu0 }
 0x2bb   : > { %v7035_v54 = vsub.s32 0, %v7764_v3 }
 0x2bc   : > { %v5965_v24 = vpop.f32.mrf.mxu0  ;;  %v9557_v16 = vpop.f32.mrf.mxu1 }
 0x2bd   : > { %v6009_v24 = vadd.f32 %v5881_v58, %v9537_v12 }
 0x2be   : > { %v5966_v33 = vpop.f32.mrf.mxu0  ;;  %v7605_v1 = vpop.f32.mrf.mxu1 }
 0x2bf   : > { %v9579_v1 = vld [vmem:[%s9626_s2] sm:$0x7f] }
 0x2c0   : > { %v6005_v49 = vpop.f32.mrf.mxu1  ;;  %v6133_v14 = vpop.f32.mrf.mxu0  ;;  %v7036_v58 = vrot.slane %v9579_v1, %v7035_v54 }
 0x2c1   : > { %v6262_v33 = vadd.f32 %v6133_v14, %v6008_v6  ;;  %v7047_v14 = vsub.s32 3, %v7764_v3 }
 0x2c2   : > { %v7606_v25 = vpop.f32.mrf.mxu1  ;;  %v6135_v5 = vpop.f32.mrf.mxu0 }
 0x2c3   : > { %v6263_v19 = vadd.f32 %v6135_v5, %v6009_v24 }
 0x2c4   : > { %v6137_v44 = vpop.f32.mrf.mxu0  ;;  %v6174_v57 = vpop.f32.mrf.mxu1 }
 0x2c5   : > { %v7039_v44 = vsub.s32 1, %v7764_v3 }
 0x2c6   : > { %v6138_v2 = vpop.f32.mrf.mxu0  ;;  %v6176_v15 = vpop.f32.mrf.mxu1 }
 0x2c7   : > { %v7043_v2 = vsub.s32 2, %v7764_v3  ;;  %v7040_v17 = vrot.slane %v9579_v1, %v7039_v44 }
 0x2c8   : > { %v6178_v62 = vpop.f32.mrf.mxu1  ;;  %v9559_v0 = vpop.f32.mrf.mxu0 }
 0x2c9   : > { %v7044_v22 = vrot.slane %v9579_v1, %v7043_v2 }
 0x2ca   : > { %v6179_v60 = vpop.f32.mrf.mxu1  ;;  %v9561_v10 = vpop.f32.mrf.mxu0 }
 0x2cc   : > { %v6219_v18 = vpop.f32.mrf.mxu0  ;;  %v9563_v20 = vpop.f32.mrf.mxu1 }
 0x2cd   : > { %v7051_v18 = vsub.s32 4, %v7764_v3 }
 0x2ce   : > { %v6220_v63 = vpop.f32.mrf.mxu0  ;;  %v7611_v34 = vpop.f32.mrf.mxu1 }
 0x2cf   : > { %v6011_v63 = vadd.f32 %v9551_v32, %v9541_v52  ;;  %v6264_v34 = vadd.f32 %v6174_v57, %v6010_v39  ;;  %v7048_v57 = vrot.slane %v9579_v1, %v7047_v14 }
 0x2d0   : > { %v6259_v45 = vpop.f32.mrf.mxu1  ;;  %v6387_v9 = vpop.f32.mrf.mxu0 }
 0x2d1   : > { %v6516_v62 = vadd.f32 %v6387_v9, %v6262_v33  ;;  %v6265_v5 = vadd.f32 %v6176_v15, %v6011_v63  ;;  %v6014_v15 = vadd.f32 %v9557_v16, %v9547_v59 }
 0x2d2   : > { %v7612_v8 = vpop.f32.mrf.mxu1  ;;  %v6389_v38 = vpop.f32.mrf.mxu0 }
 0x2d3   : > { %v6517_v45 = vadd.f32 %v6389_v38, %v6263_v19  ;;  %v7052_v38 = vrot.slane %v9579_v1, %v7051_v18 }
 0x2d4   : > { %v6391_v51 = vpop.f32.mrf.mxu0  ;;  %v6428_v46 = vpop.f32.mrf.mxu1 }
 0x2d5   : > { %v6518_v9 = vadd.f32 %v6428_v46, %v6264_v34 }
 0x2d6   : > { %v6392_v27 = vpop.f32.mrf.mxu0  ;;  %v6430_v40 = vpop.f32.mrf.mxu1 }
 0x2d8   : > { %v6432_v47 = vpop.f32.mrf.mxu1  ;;  %v9565_v41 = vpop.f32.mrf.mxu0 }
 0x2da   : > { %v6433_v13 = vpop.f32.mrf.mxu1  ;;  %v9567_v4 = vpop.f32.mrf.mxu0 }
 0x2dc   : > { %v6473_v31 = vpop.f32.mrf.mxu0  ;;  %v9569_v42 = vpop.f32.mrf.mxu1 }
 0x2dd   : > { %v6012_v31 = vadd.f32 %v9553_v55, %v9543_v21 }
 0x2de   : > { %v6474_v37 = vpop.f32.mrf.mxu0  ;;  %v7617_v30 = vpop.f32.mrf.mxu1 }
 0x2df   : > { %v6013_v37 = vadd.f32 %v9555_v11, %v9545_v56  ;;  %v6519_v30 = vadd.f32 %v6430_v40, %v6265_v5  ;;  %v6266_v46 = vadd.f32 %v9559_v0, %v6012_v31  ;;  %v7055_v56 = vsub.s32 5, %v7764_v3 }
 0x2e0   : > { %v6513_v61 = vpop.f32.mrf.mxu1  ;;  %v6641_v7 = vpop.f32.mrf.mxu0  ;;  %v6268_v40 = vadd.f32 %v9563_v20, %v6014_v15 }
 0x2e1   : > { %v6770_v8 = vadd.f32 %v6641_v7, %v6516_v62  ;;  %v6267_v21 = vadd.f32 %v9561_v10, %v6013_v37  ;;  %v7056_v20 = vrot.slane %v9579_v1, %v7055_v56 }
 0x2e2   : > { %v7618_v35 = vpop.f32.mrf.mxu1  ;;  %v6643_v50 = vpop.f32.mrf.mxu0  ;;  %v6522_v33 = vadd.f32 %v9569_v42, %v6268_v40 }
 0x2e3   : > { %v6771_v47 = vadd.f32 %v6643_v50, %v6517_v45  ;;  %v6521_v6 = vadd.f32 %v9567_v4, %v6267_v21 }
 0x2e4   : > { %v6645_v23 = vpop.f32.mrf.mxu0  ;;  %v6682_v36 = vpop.f32.mrf.mxu1 }
 0x2e5   : > { %v6772_v61 = vadd.f32 %v6682_v36, %v6518_v9  ;;  %v6520_v36 = vadd.f32 %v9565_v41, %v6266_v46 }
 0x2e6   : > { %v6646_v43 = vpop.f32.mrf.mxu0  ;;  %v6684_v26 = vpop.f32.mrf.mxu1 }
 0x2e7   : > { %v6773_v11 = vadd.f32 %v6684_v26, %v6519_v30 }
 0x2e8   : > { %v6686_v29 = vpop.f32.mrf.mxu1  ;;  %v9571_v28 = vpop.f32.mrf.mxu0 }
 0x2e9   : > { %v7059_v29 = vsub.s32 6, %v7764_v3  ;;  %v6774_v26 = vadd.f32 %v9571_v28, %v6520_v36 }
 0x2ea   : > { %v6687_v48 = vpop.f32.mrf.mxu1  ;;  %v6725_v53 = vpop.f32.mrf.mxu0 }
 0x2ec   : > { %v6727_v49 = vpop.f32.mrf.mxu0  ;;  %v9581_v25 = vpop.f32.mrf.mxu1 }
 0x2ed   : > { %v6775_v49 = vadd.f32 %v6725_v53, %v6521_v6  ;;  %v6776_v19 = vadd.f32 %v9581_v25, %v6522_v33 }
 0x2ee   : > { %v6728_v60 = vpop.f32.mrf.mxu0  ;;  %v7623_v12 = vpop.f32.mrf.mxu1 }
 0x2f0   : > { %v6767_v51 = vpop.f32.mrf.mxu1  ;;  %v6895_v27 = vpop.f32.mrf.mxu0 }
 0x2f1   : > { %v7024_v13 = vadd.f32 %v6895_v27, %v6770_v8 }
 0x2f2   : > { %v7624_v52 = vpop.f32.mrf.mxu1  ;;  %v6897_v32 = vpop.f32.mrf.mxu0 }
 0x2f3   : > { %v7068_v7 = vmul.f32 %v7036_v58, %v7024_v13  ;;  %v7025_v35 = vadd.f32 %v6897_v32, %v6771_v47  ;;  %v7060_v58 = vrot.slane %v9579_v1, %v7059_v29 }
 0x2f4   : > { %v6899_v55 = vpop.f32.mrf.mxu0  ;;  %v6936_v50 = vpop.f32.mrf.mxu1 }
 0x2f5   : > { %v7069_v23 = vmul.f32 %v7040_v17, %v7025_v35  ;;  %v7026_v43 = vadd.f32 %v6936_v50, %v6772_v61  ;;  %v7087_v59 = vmul.f32 %v7068_v7, %v7024_v13 }
 0x2f6   : > { %v6900_v16 = vpop.f32.mrf.mxu0  ;;  %v6938_v0 = vpop.f32.mrf.mxu1 }
 0x2f7   : > { %v7075_v48 = vadd.f32 %v7069_v23, %v7068_v7  ;;  %v7088_v10 = vmul.f32 %v7069_v23, %v7025_v35  ;;  %v7070_v54 = vmul.f32 %v7044_v22, %v7026_v43  ;;  %v7027_v24 = vadd.f32 %v6938_v0, %v6773_v11 }
 0x2f8   : > { %v6940_v44 = vpop.f32.mrf.mxu1  ;;  %v6977_v3 = vpop.f32.mrf.mxu0 }
 0x2f9   : > { %v7094_v2 = vadd.f32 %v7088_v10, %v7087_v59  ;;  %v7076_v41 = vadd.f32 %v7075_v48, %v7070_v54  ;;  %v7089_v39 = vmul.f32 %v7070_v54, %v7026_v43  ;;  %v7071_v4 = vmul.f32 %v7048_v57, %v7027_v24 }
 0x2fa   : > { %v7028_v62 = vadd.f32 %v6977_v3, %v6774_v26  ;;  %v6941_v60 = vpop.f32.mrf.mxu1  ;;  %v6979_v12 = vpop.f32.mrf.mxu0 }
 0x2fb   : > { %v7095_v14 = vadd.f32 %v7094_v2, %v7089_v39  ;;  %v7077_v42 = vadd.f32 %v7076_v41, %v7071_v4  ;;  %v7090_v18 = vmul.f32 %v7071_v4, %v7027_v24  ;;  %v7029_v28 = vadd.f32 %v6979_v12, %v6775_v49 }
 0x2fc   : > { %v7072_v53 = vmul.f32 %v7052_v38, %v7028_v62  ;;  %v6981_v63 = vpop.f32.mrf.mxu0  ;;  %v7018_v34 = vpop.f32.mrf.mxu1 }
 0x2fd   : > { %v7096_v45 = vadd.f32 %v7095_v14, %v7090_v18  ;;  %v7073_v8 = vmul.f32 %v7056_v20, %v7029_v28  ;;  %v7030_v51 = vadd.f32 %v7018_v34, %v6776_v19 }
 0x2fe   : > { %v7078_v27 = vadd.f32 %v7077_v42, %v7072_v53  ;;  %v7091_v17 = vmul.f32 %v7072_v53, %v7028_v62  ;;  %v6982_v22 = vpop.f32.mrf.mxu0  ;;  %v7629_v25 = vpop.f32.mrf.mxu1 }
 0x2ff   : > { %v7092_v5 = vmul.f32 %v7073_v8, %v7029_v28  ;;  %v7074_v9 = vmul.f32 %v7060_v58, %v7030_v51 }
 0x300   : > { %v7097_v47 = vadd.f32 %v7096_v45, %v7091_v17  ;;  %v7079_v1 = vadd.f32 %v7078_v27, %v7073_v8  ;;  %v7021_v13 = vpop.f32.mrf.mxu1 }
 0x301   : > { %v7081_v31 = vsel %vm7080_vm1, %v7074_v9, 0.0  ;;  %v7093_v37 = vmul.f32 %v7074_v9, %v7030_v51 }
 0x302   : > { %v7098_v52 = vadd.f32 %v7097_v47, %v7092_v5  ;;  %v7630_v32 = vpop.f32.mrf.mxu1  ;;  %v7082_v57 = vadd.f32 %v7081_v31, %v7079_v1 }
 0x303   : > { %v7099_v38 = vsel %vm7080_vm1, %v7093_v37, 0.0 }
 0x304   : > { %7083 = vadd.xlane.f32.xlu1 %v7082_v57  ;;  %v7100_v30 = vadd.f32 %v7099_v38, %v7098_v52 }
 0x306   : > { %7101 = vadd.xlane.f32.xlu0 %v7100_v30 }
 0x38d   : > { %v7084_v61 = vpop.xlane.xlu1 %7083 }
 0x38e   : > { %7086 = vst.msk [vmem:[%s202_s9] sm:$0xff] %vm7085_vm2, %v7084_v61 }
 0x38f   : > { %v7102_v7 = vpop.xlane.xlu0 %7101 }
 0x390   : > { %7103 = vst.msk [vmem:[%s206_s12] sm:$0xff] %vm7085_vm2, %v7102_v7 }
 0x391 PF: > { %s15_s15 = sadd.s32 1, %s7697_s15  }
 0x392   : > { %p12_p4 = scmp.ge.s32.totalorder %s15_s15, 4  }
 0x394   :  { %14 = sbr.rel (!%p12_p4) target bundleno = 1 (0x1), region = 100 }

// kernel: cnn_block_forward.3
= control target key start
LH: loop header
LB: loop body
LE: loop exit
PB: predicated region body
PF: predicated region fallthrough
CT: control target
= control target key end

     0   :  { %s7686_s15 = smov 0   ;;  %s9539_s0 = inlined_call_operand.vmem [shape: bf16[2,4,1022], index: 0, kind: input, shape index: {}]   ;;  %s9540_s1 = inlined_call_operand.vmem [shape: bf16[27,8,4], index: 1, kind: input, shape index: {}]   ;;  %s9541_s2 = inlined_call_operand.vmem [shape: f32[1,8,1], index: 2, kind: input, shape index: {}]   ;;  %s9542_s3 = inlined_call_operand.vmem [shape: f32[1,8,1], index: 3, kind: input, shape index: {}]   ;;  %s9543_s4 = inlined_call_operand.vmem [shape: f32[2,8,800], index: 4, kind: output, shape index: {}]  }
   0x1 LB: > { %s7118_s16 = sadd.s32 4294967295, %s7629_s15   ;;  %p7122_p0 = scmp.ge.s32.totalorder %s7629_s15, 1  ;;  %s7629_s15 = sphi %s7686_s15, %s14_s15  }
   0x2   : > { %p162_p1 = scmp.lt.s32.totalorder %s7629_s15, 3 }
   0x4   : > { %p163_p2 = pnand %p7122_p0, %p162_p1 }
   0x5   : > { %p188_p3 = scmp.lt.s32.totalorder (!%p163_p2), %s7118_s16, 1  ;;  %s7633_s21 = smov (!%p163_p2), 127  }
   0x6   : > { %166 = sbr.rel (%p163_p2) target bundleno = 774 (0x306), region = 36  ;;  %s7634_s22 = smov (!%p163_p2), 126  }
   0x7   : > { %s7635_s23 = smov (!%p163_p2), 118   ;;  %s7636_s24 = smov (!%p163_p2), 117  }
   0x8   : > { %s7637_s25 = smov (!%p163_p2), 116   ;;  %s7638_s26 = smov (!%p163_p2), 108  }
   0x9   : > { %s7639_s27 = smov (!%p163_p2), 107   ;;  %s7640_s28 = smov (!%p163_p2), 106  }
   0xa   : > { %s7641_s29 = smov (!%p163_p2), 28   ;;  %s7644_s6 = smov (!%p163_p2), 27  }
   0xb   : > { %v210_v0 = vlaneseq  ;;  %v7631_v1 = vmov 1983009808   ;;  %s9545_s16 = smov (!%p188_p3, %s7118_s16), 1  ;;  %v7632_v5 = vmov 0   ;;  %vm253_vm0 = vcmask 1039360   ;;  %s7645_s9 = smov 26  }
   0xc   : > { %v208_v2 = vunpack.c.l.s4 %v7631_v1  ;;  %s7343_s17 = sshll.u32 %s9545_s16, 4  ;;  %318 = vmatprep.mubr.bf16.mxu0 %v7632_v5  ;;  %359 = vmatprep.mubr.bf16.mxu1 %v7632_v5  ;;  %vm264_vm1 = vcmask 1041408   ;;  %vm260_vm2 = vcmask 31744   ;;  %vm7643_vm3 = vmmov 0   ;;  %s7646_s12 = smov 18  }
   0xd   : > { %v211_v3 = vshrl.u32 %v210_v0, 7  ;;  %s7702_s20 = scalar_lea.vmem %s9539_s0, %s7343_s17  ;;  %7599 = vset.pattern.permute.xlu1 %v7632_v5  ;;  %7600 = vset.pattern.permute.xlu0 %v7632_v5  ;;  %v7126_v0 = vld [vmem:[%s9540_s1 + $0x4] sm:$0xf]  ;;  %vm689_vm4 = vcmask 1031168   ;;  %vm943_vm5 = vcmask 965632   ;;  %vm1197_vm6 = vcmask 957440  }
   0xe   : > { %v209_v4 = vunpack.c.0.s8 %v208_v2  ;;  %v199_v7 = vld [vmem:[%s7702_s20] sm:$0xff]  ;;  %v200_v10 = vld [vmem:[%s7702_s20 + $0x8] sm:$0x3f]  ;;  %s7647_s17 = smov 17   ;;  %vm1451_vm7 = vcmask 949248   ;;  %vm1705_vm8 = vcmask 883712  }
   0xf   : > { %v206_v9 = vcombine.high %v199_v7, %v199_v7  ;;  %v223_v15 = vcombine.high %v200_v10, %v200_v10  ;;  %v637_v18 = vld [vmem:[%s7702_s20 + $0x8] sm:$0x3f]  ;;  %vm1959_vm9 = vcmask 875520   ;;  %vm2213_vm10 = vcmask 867328   ;;  %s7651_s30 = smov 6   ;;  %s7652_s7 = smov 56  }
  0x10   : > { %v7704_v6 = vsub.s32 %v209_v4, %v211_v3  ;;  %v659_v20 = vcombine.high %v637_v18, %v637_v18  ;;  %v891_v23 = vld [vmem:[%s7702_s20 + $0x8] sm:$0x3f]  ;;  %vm2470_vm11 = vcmask 228352   ;;  %vm2728_vm12 = vcmask 220160   ;;  %s7653_s10 = smov 55   ;;  %s7654_s13 = smov 54  }
  0x11   : > { %v913_v25 = vcombine.high %v891_v23, %v891_v23  ;;  %v1145_v28 = vld [vmem:[%s7702_s20 + $0x8] sm:$0x3f]  ;;  %vm2986_vm13 = vcmask 211968   ;;  %vm3244_vm14 = vcmask 146432   ;;  %s7655_s18 = smov 46   ;;  %vm3502_vm15 = vcmask 138240  }
  0x12   : > { %v7710_v8 = vrot.slane %v199_v7, %v7704_v6  ;;  %v7715_v11 = vrot.slane %v206_v9, %v7704_v6  ;;  %v7727_v14 = vrot.slane %v200_v10, %v7704_v6  ;;  %v7737_v17 = vrot.slane %v223_v15, %v7704_v6  ;;  %v1399_v33 = vld [vmem:[%s7702_s20 + $0x8] sm:$0x3f]  ;;  %s7560_s8 = smul.u32 56, %s9545_s16 }
  0x13   : > { %v666_v19 = vrot.slane %v637_v18, %v7704_v6  ;;  %v673_v22 = vrot.slane %v659_v20, %v7704_v6  ;;  %v920_v24 = vrot.slane %v891_v23, %v7704_v6  ;;  %v927_v27 = vrot.slane %v913_v25, %v7704_v6  ;;  %v1653_v38 = vld [vmem:[%s7702_s20 + $0x8] sm:$0x3f] }
  0x14   : > { %239 = vrot.lane.b32.xlu0 %v7710_v8, %s7633_s21  ;;  %v7719_v12 = vcombine.high %v7710_v8, %v7710_v8  ;;  %243 = vrot.lane.b32.xlu1 %v7715_v11, %s7633_s21  ;;  %v7724_v13 = vcombine.high %v7715_v11, %v7715_v11  ;;  %v7733_v16 = vcombine.high %v7727_v14, %v7727_v14  ;;  %v1907_v43 = vld [vmem:[%s7702_s20 + $0x8] sm:$0x3f] }
  0x15   : > { %v674_v21 = vcombine.high %v666_v19, %v666_v19  ;;  %v928_v26 = vcombine.high %v920_v24, %v920_v24  ;;  %v1174_v29 = vrot.slane %v1145_v28, %v7704_v6  ;;  %v1167_v30 = vcombine.high %v1145_v28, %v1145_v28  ;;  %v2161_v48 = vld [vmem:[%s7702_s20 + $0x8] sm:$0x3f] }
  0x16   : > { %v1428_v34 = vrot.slane %v1399_v33, %v7704_v6  ;;  %v1421_v35 = vcombine.high %v1399_v33, %v1399_v33  ;;  %v1682_v39 = vrot.slane %v1653_v38, %v7704_v6  ;;  %v1675_v40 = vcombine.high %v1653_v38, %v1653_v38  ;;  %v2415_v53 = vld [vmem:[%s7702_s20 + $0x8] sm:$0xff] }
  0x17   : > { %v1182_v31 = vcombine.high %v1174_v29, %v1174_v29  ;;  %v1181_v32 = vrot.slane %v1167_v30, %v7704_v6  ;;  %v1936_v44 = vrot.slane %v1907_v43, %v7704_v6  ;;  %v1929_v45 = vcombine.high %v1907_v43, %v1907_v43  ;;  %v201_v30 = vld [vmem:[%s9540_s1] sm:$0xf] }
  0x18   : > { %241 = vrot.lane.b32.xlu0 %v7719_v12, %s7633_s21  ;;  %245 = vrot.lane.b32.xlu1 %v7724_v13, %s7633_s21  ;;  %v1436_v36 = vcombine.high %v1428_v34, %v1428_v34  ;;  %v1435_v37 = vrot.slane %v1421_v35, %v7704_v6  ;;  %v1690_v41 = vcombine.high %v1682_v39, %v1682_v39 }
  0x19   : > { %v1689_v42 = vrot.slane %v1675_v40, %v7704_v6  ;;  %v1944_v46 = vcombine.high %v1936_v44, %v1936_v44  ;;  %v1943_v47 = vrot.slane %v1929_v45, %v7704_v6  ;;  %v2190_v49 = vrot.slane %v2161_v48, %v7704_v6 }
  0x1a   : > { %v2183_v50 = vcombine.high %v2161_v48, %v2161_v48  ;;  %v7798_v56 = vrot.slane %v2415_v53, %v7704_v6  ;;  %v2437_v57 = vcombine.high %v2415_v53, %v2415_v53 }
  0x1b   : > { %v2198_v51 = vcombine.high %v2190_v49, %v2190_v49 }
  0x1c   : > { %247 = vrot.lane.b32.xlu0 %v7727_v14, %s7633_s21  ;;  %249 = vrot.lane.b32.xlu1 %v7733_v16, %s7633_s21  ;;  %v2197_v52 = vrot.slane %v2183_v50, %v7704_v6  ;;  %v7804_v59 = vcombine.high %v7798_v56, %v7798_v56  ;;  %v7817_v2 = vrot.slane %v2437_v57, %v7704_v6 }
  0x1e   : > { %v7824_v7 = vcombine.high %v7817_v2, %v7817_v2 }
  0x20   : > { %251 = vrot.lane.b32.xlu0 %v7737_v17, %s7633_s21  ;;  %675 = vrot.lane.b32.xlu1 %v7710_v8, %s7634_s22  ;;  %s7648_s21 = smov 16  }
  0x24   : > { %677 = vrot.lane.b32.xlu0 %v7719_v12, %s7634_s22  ;;  %679 = vrot.lane.b32.xlu1 %v7715_v11, %s7634_s22 }
  0x28   : > { %681 = vrot.lane.b32.xlu0 %v7724_v13, %s7634_s22  ;;  %683 = vrot.lane.b32.xlu1 %v666_v19, %s7634_s22  ;;  %v7642_v19 = vmov 0.0  }
  0x2c   : > { %685 = vrot.lane.b32.xlu0 %v674_v21, %s7634_s22  ;;  %687 = vrot.lane.b32.xlu1 %v673_v22, %s7634_s22  ;;  %s7656_s22 = smov 45  }
  0x30   : > { %929 = vrot.lane.b32.xlu0 %v7710_v8, %s7635_s23  ;;  %931 = vrot.lane.b32.xlu1 %v7719_v12, %s7635_s23 }
  0x34   : > { %933 = vrot.lane.b32.xlu0 %v7715_v11, %s7635_s23  ;;  %935 = vrot.lane.b32.xlu1 %v7724_v13, %s7635_s23 }
  0x38   : > { %937 = vrot.lane.b32.xlu0 %v920_v24, %s7635_s23  ;;  %939 = vrot.lane.b32.xlu1 %v928_v26, %s7635_s23  ;;  %v453_v24 = vsel %vm264_vm1, %v7710_v8, 0 }
  0x3c   : > { %941 = vrot.lane.b32.xlu0 %v927_v27, %s7635_s23  ;;  %1183 = vrot.lane.b32.xlu1 %v7710_v8, %s7636_s24  ;;  %v459_v27 = vsel %vm264_vm1, %v7715_v11, 0  ;;  %s7657_s23 = smov 44  }
  0x40   : > { %1185 = vrot.lane.b32.xlu0 %v7719_v12, %s7636_s24  ;;  %1187 = vrot.lane.b32.xlu1 %v7715_v11, %s7636_s24 }
  0x44   : > { %1189 = vrot.lane.b32.xlu0 %v7724_v13, %s7636_s24  ;;  %1191 = vrot.lane.b32.xlu1 %v1174_v29, %s7636_s24 }
  0x48   : > { %1193 = vrot.lane.b32.xlu0 %v1182_v31, %s7636_s24  ;;  %1195 = vrot.lane.b32.xlu1 %v1181_v32, %s7636_s24  ;;  %s7649_s24 = smov 8  }
  0x4c   : > { %1437 = vrot.lane.b32.xlu0 %v7710_v8, %s7637_s25  ;;  %1439 = vrot.lane.b32.xlu1 %v7719_v12, %s7637_s25 }
  0x50   : > { %1441 = vrot.lane.b32.xlu0 %v7715_v11, %s7637_s25  ;;  %1443 = vrot.lane.b32.xlu1 %v7724_v13, %s7637_s25 }
  0x54   : > { %1445 = vrot.lane.b32.xlu0 %v1428_v34, %s7637_s25  ;;  %1447 = vrot.lane.b32.xlu1 %v1436_v36, %s7637_s25 }
  0x58   : > { %1449 = vrot.lane.b32.xlu0 %v1435_v37, %s7637_s25  ;;  %1691 = vrot.lane.b32.xlu1 %v7710_v8, %s7638_s26 }
  0x5c   : > { %1693 = vrot.lane.b32.xlu0 %v7719_v12, %s7638_s26  ;;  %1695 = vrot.lane.b32.xlu1 %v7715_v11, %s7638_s26 }
  0x60   : > { %1697 = vrot.lane.b32.xlu0 %v7724_v13, %s7638_s26  ;;  %1699 = vrot.lane.b32.xlu1 %v1682_v39, %s7638_s26 }
  0x64   : > { %1701 = vrot.lane.b32.xlu0 %v1690_v41, %s7638_s26  ;;  %1703 = vrot.lane.b32.xlu1 %v1689_v42, %s7638_s26  ;;  %s7658_s26 = smov 36  }
  0x68   : > { %1945 = vrot.lane.b32.xlu0 %v7710_v8, %s7639_s27  ;;  %1947 = vrot.lane.b32.xlu1 %v7719_v12, %s7639_s27 }
  0x6c   : > { %1949 = vrot.lane.b32.xlu0 %v7715_v11, %s7639_s27  ;;  %1951 = vrot.lane.b32.xlu1 %v7724_v13, %s7639_s27 }
  0x70   : > { %1953 = vrot.lane.b32.xlu0 %v1936_v44, %s7639_s27  ;;  %1955 = vrot.lane.b32.xlu1 %v1944_v46, %s7639_s27  ;;  %v7141_v46 = vld [vmem:[%s9540_s1 + $0x8] sm:$0xf] }
  0x74   : > { %1957 = vrot.lane.b32.xlu0 %v1943_v47, %s7639_s27  ;;  %2199 = vrot.lane.b32.xlu1 %v7710_v8, %s7640_s28  ;;  %s7650_s27 = smov 7  }
  0x78   : > { %2201 = vrot.lane.b32.xlu0 %v7719_v12, %s7640_s28  ;;  %2203 = vrot.lane.b32.xlu1 %v7715_v11, %s7640_s28 }
  0x7c   : > { %2205 = vrot.lane.b32.xlu0 %v7724_v13, %s7640_s28  ;;  %2207 = vrot.lane.b32.xlu1 %v2190_v49, %s7640_s28 }
  0x80   : > { %2209 = vrot.lane.b32.xlu0 %v2198_v51, %s7640_s28  ;;  %2211 = vrot.lane.b32.xlu1 %v2197_v52, %s7640_s28 }
  0x84   : > { %2454 = vrot.lane.b32.xlu0 %v7710_v8, %s7641_s29  ;;  %2456 = vrot.lane.b32.xlu1 %v7719_v12, %s7641_s29 }
  0x86   : > { %v240_v54 = vpop.permute.xlu0 %239  ;;  %v244_v55 = vpop.permute.xlu1 %243 }
  0x88   : > { %2458 = vrot.lane.b32.xlu0 %v7715_v11, %s7641_s29  ;;  %2460 = vrot.lane.b32.xlu1 %v7724_v13, %s7641_s29 }
  0x8a   : > { %v242_v58 = vpop.permute.xlu0 %241  ;;  %v246_v62 = vpop.permute.xlu1 %245 }
  0x8b   : > { %v255_v60 = vsel %vm253_vm0, %v242_v58, %v244_v55  ;;  %v254_v61 = vsel %vm253_vm0, %v240_v54, %v242_v58  ;;  %v256_v1 = vsel %vm253_vm0, %v244_v55, %v246_v62 }
  0x8c   : > { %7127 = vmatprep.subr.msk.bf16.mxu0 %vm264_vm1, %v255_v60  ;;  %v266_v63 = vsel %vm264_vm1, %v254_v61, 0  ;;  %2462 = vrot.lane.b32.xlu0 %v7798_v56, %s7641_s29  ;;  %v272_v10 = vsel %vm264_vm1, %v256_v1, 0 }
  0x8d   : > { %301 = vmatpush1.bf16.msra.mxu0 %v266_v63  ;;  %2464 = vrot.lane.b32.xlu1 %v7804_v59, %s7641_s29 }
  0x8e   : > { %v248_v3 = vpop.permute.xlu0 %247  ;;  %v250_v9 = vpop.permute.xlu1 %249 }
  0x8f   : > { %v257_v4 = vsel %vm253_vm0, %v246_v62, %v248_v3  ;;  %v258_v15 = vsel %vm253_vm0, %v248_v3, %v250_v9 }
  0x90   : > { %7128 = vmatmul.mubr.msk.bf16.vlgmr.msra.gmra.mxu0 %vm260_vm2, %v7126_v0  ;;  %7129 = vmatprep.subr.msk.bf16.mxu1 %vm264_vm1, %v257_v4  ;;  %v278_v22 = vsel %vm264_vm1, %v258_v15, 0  ;;  %v7149_v4 = vld [vmem:[%s9540_s1 + $0xc] sm:$0xf] }
  0x91   : > { %342 = vmatpush1.bf16.msra.mxu1 %v272_v10  ;;  %400 = vmatprep.mubr.bf16.mxu0 %v7632_v5 }
  0x92   : > { %v252_v18 = vpop.permute.xlu0 %251  ;;  %7398 = vmatprep.subr.bf16.mxu1 %v7642_v19  ;;  %2466 = vrot.lane.b32.xlu0 %v7817_v2, %s7641_s29  ;;  %v676_v23 = vpop.permute.xlu1 %675 }
  0x93   : > { %v259_v20 = vsel %vm253_vm0, %v250_v9, %v252_v18  ;;  %v284_v21 = vsel %vm264_vm1, %v252_v18, 0  ;;  %2468 = vrot.lane.b32.xlu1 %v7824_v7, %s7641_s29  ;;  %vm3760_vm0 = vcmask 130048   ;;  %s7659_s29 = smov 35  }
  0x94   : > { %7130 = vmatmul.mubr.msk.bf16.vlgmr.msra.gmra.mxu1 %vm260_vm2, %v7126_v0  ;;  %7131 = vmatprep.subr.msk.bf16.mxu0 %vm264_vm1, %v259_v20 }
  0x95   : > { %383 = vmatpush1.bf16.msra.mxu0 %v278_v22  ;;  %7399 = vmatpush3.bf16.msra.mxu1 %v284_v21 }
  0x96   : > { %7400 = vmatprep.mubr.msk.bf16.mxu1 %vm7643_vm3, %v7642_v19  ;;  %7134 = vmatprep.subr.msk.bf16.mxu0 %vm264_vm1, %v7719_v12  ;;  %v678_v25 = vpop.permute.xlu0 %677  ;;  %v680_v26 = vpop.permute.xlu1 %679 }
  0x97   : > { %7136 = vmatprep.subr.msk.bf16.mxu1 %vm264_vm1, %v7724_v13  ;;  %2712 = vrot.lane.b32.xlu0 %v7710_v8, %s7644_s6  ;;  %v691_v32 = vsel %vm689_vm4, %v678_v25, %v680_v26  ;;  %v690_v35 = vsel %vm689_vm4, %v676_v23, %v678_v25 }
  0x98   : > { %7132 = vmatmul.mubr.msk.bf16.vlgmr.msra.gmra.mxu0 %vm260_vm2, %v7126_v0  ;;  %2714 = vrot.lane.b32.xlu1 %v7719_v12, %s7644_s6 }
  0x99   : > { %488 = vmatpush1.bf16.msra.mxu0 %v453_v24  ;;  %505 = vmatprep.mubr.bf16.mxu0 %v7632_v5 }
  0x9a   : > { %7138 = vmatprep.subr.msk.bf16.mxu0 %vm264_vm1, %v7733_v16  ;;  %v682_v28 = vpop.permute.xlu0 %681  ;;  %v684_v29 = vpop.permute.xlu1 %683  ;;  %v465_v16 = vsel %vm264_vm1, %v7727_v14, 0  ;;  %v471_v14 = vsel %vm264_vm1, %v7737_v17, 0  ;;  %v700_v17 = vsel %vm264_vm1, %v690_v35, 0 }
  0x9b   : > { %2716 = vrot.lane.b32.xlu0 %v7715_v11, %s7644_s6  ;;  %v693_v36 = vsel %vm689_vm4, %v682_v28, %v684_v29  ;;  %v692_v39 = vsel %vm689_vm4, %v680_v26, %v682_v28 }
  0x9c   : > { %7401 = vmatmul.mubr.msk.bf16.vlgmr.msra.gmra.mxu1 %vm260_vm2, %v7126_v0  ;;  %2718 = vrot.lane.b32.xlu1 %v7724_v13, %s7644_s6  ;;  %v706_v42 = vsel %vm264_vm1, %v692_v39, 0 }
  0x9d   : > { %529 = vmatpush1.bf16.msra.mxu1 %v459_v27  ;;  %546 = vmatprep.mubr.bf16.mxu1 %v7632_v5 }
  0x9e   : > { %7404 = vmatprep.subr.bf16.mxu1 %v7642_v19  ;;  %v686_v31 = vpop.permute.xlu0 %685  ;;  %v688_v33 = vpop.permute.xlu1 %687 }
  0x9f   : > { %2720 = vrot.lane.b32.xlu0 %v7798_v56, %s7644_s6  ;;  %v695_v40 = vsel %vm689_vm4, %v686_v31, %v688_v33  ;;  %v694_v44 = vsel %vm689_vm4, %v684_v29, %v686_v31  ;;  %v718_v51 = vsel %vm264_vm1, %v688_v33, 0  ;;  %v7157_v33 = vld [vmem:[%s9540_s1 + $0x10] sm:$0xf]  ;;  %vm4018_vm4 = vcmask 64512  }
  0xa0   : > { %7135 = vmatmul.mubr.msk.bf16.vlgmr.msra.gmra.mxu0 %vm260_vm2, %v201_v30  ;;  %2722 = vrot.lane.b32.xlu1 %v7804_v59, %s7644_s6  ;;  %v712_v47 = vsel %vm264_vm1, %v694_v44, 0 }
  0xa1   : > { %570 = vmatpush1.bf16.msra.mxu0 %v465_v16  ;;  %587 = vmatprep.mubr.bf16.mxu0 %v7632_v5 }
  0xa2   : > { %7142 = vmatprep.subr.msk.bf16.mxu0 %vm264_vm1, %v691_v32  ;;  %v930_v34 = vpop.permute.xlu0 %929  ;;  %v932_v37 = vpop.permute.xlu1 %931 }
  0xa3   : > { %2724 = vrot.lane.b32.xlu0 %v7817_v2, %s7644_s6  ;;  %v944_v53 = vsel %vm943_vm5, %v930_v34, %v932_v37 }
  0xa4   : > { %7137 = vmatmul.mubr.msk.bf16.vlgmr.msra.gmra.mxu1 %vm260_vm2, %v201_v30  ;;  %2726 = vrot.lane.b32.xlu1 %v7824_v7, %s7644_s6  ;;  %v954_v57 = vsel %vm264_vm1, %v944_v53, 0  ;;  %s7660_s6 = smov 34  }
  0xa5   : > { %7405 = vmatpush3.bf16.msra.mxu1 %v471_v14  ;;  %7406 = vmatprep.mubr.msk.bf16.mxu1 %vm7643_vm3, %v7642_v19 }
  0xa6   : > { %7144 = vmatprep.subr.msk.bf16.mxu1 %vm264_vm1, %v693_v36  ;;  %v934_v38 = vpop.permute.xlu0 %933  ;;  %v936_v41 = vpop.permute.xlu1 %935 }
  0xa7   : > { %2970 = vrot.lane.b32.xlu0 %v7710_v8, %s7645_s9  ;;  %v945_v49 = vsel %vm943_vm5, %v932_v37, %v934_v38  ;;  %v946_v60 = vsel %vm943_vm5, %v934_v38, %v936_v41 }
  0xa8   : > { %7139 = vmatmul.mubr.msk.bf16.vlgmr.msra.gmra.mxu0 %vm260_vm2, %v201_v30  ;;  %2972 = vrot.lane.b32.xlu1 %v7719_v12, %s7645_s9  ;;  %v960_v63 = vsel %vm264_vm1, %v946_v60, 0 }
  0xa9   : > { %735 = vmatpush1.bf16.msra.mxu0 %v700_v17  ;;  %752 = vmatprep.mubr.bf16.mxu0 %v7632_v5 }
  0xaa   : > { %7146 = vmatprep.subr.msk.bf16.mxu0 %vm264_vm1, %v695_v40  ;;  %v938_v43 = vpop.permute.xlu0 %937  ;;  %v940_v45 = vpop.permute.xlu1 %939 }
  0xab   : > { %2974 = vrot.lane.b32.xlu0 %v7715_v11, %s7645_s9  ;;  %v947_v54 = vsel %vm943_vm5, %v936_v41, %v938_v43  ;;  %v948_v1 = vsel %vm943_vm5, %v938_v43, %v940_v45 }
  0xac   : > { %7407 = vmatmul.mubr.msk.bf16.vlgmr.msra.gmra.mxu1 %vm260_vm2, %v201_v30  ;;  %2976 = vrot.lane.b32.xlu1 %v7724_v13, %s7645_s9  ;;  %v966_v9 = vsel %vm264_vm1, %v948_v1, 0 }
  0xad   : > { %776 = vmatpush1.bf16.msra.mxu1 %v706_v42  ;;  %793 = vmatprep.mubr.bf16.mxu1 %v7632_v5 }
  0xae   : > { %7410 = vmatprep.subr.bf16.mxu1 %v7642_v19  ;;  %v942_v48 = vpop.permute.xlu0 %941  ;;  %v1184_v50 = vpop.permute.xlu1 %1183 }
  0xaf   : > { %2978 = vrot.lane.b32.xlu0 %v7798_v56, %s7645_s9  ;;  %v949_v61 = vsel %vm943_vm5, %v940_v45, %v942_v48  ;;  %v972_v20 = vsel %vm264_vm1, %v942_v48, 0  ;;  %vm4276_vm5 = vcmask 56320  }
  0xb0   : > { %7143 = vmatmul.mubr.msk.bf16.vlgmr.msra.gmra.mxu0 %vm260_vm2, %v7141_v46  ;;  %2980 = vrot.lane.b32.xlu1 %v7804_v59, %s7645_s9 }
  0xb1   : > { %817 = vmatpush1.bf16.msra.mxu0 %v712_v47  ;;  %834 = vmatprep.mubr.bf16.mxu0 %v7632_v5 }
  0xb2   : > { %7150 = vmatprep.subr.msk.bf16.mxu0 %vm264_vm1, %v945_v49  ;;  %v1186_v52 = vpop.permute.xlu0 %1185  ;;  %v1188_v55 = vpop.permute.xlu1 %1187 }
  0xb3   : > { %2982 = vrot.lane.b32.xlu0 %v7817_v2, %s7645_s9  ;;  %v1199_v15 = vsel %vm1197_vm6, %v1186_v52, %v1188_v55  ;;  %v1198_v22 = vsel %vm1197_vm6, %v1184_v50, %v1186_v52 }
  0xb4   : > { %7145 = vmatmul.mubr.msk.bf16.vlgmr.msra.gmra.mxu1 %vm260_vm2, %v7141_v46  ;;  %2984 = vrot.lane.b32.xlu1 %v7824_v7, %s7645_s9  ;;  %v1208_v25 = vsel %vm264_vm1, %v1198_v22, 0 }
  0xb5   : > { %7411 = vmatpush3.bf16.msra.mxu1 %v718_v51  ;;  %7412 = vmatprep.mubr.msk.bf16.mxu1 %vm7643_vm3, %v7642_v19 }
  0xb6   : > { %7152 = vmatprep.subr.msk.bf16.mxu1 %vm264_vm1, %v947_v54  ;;  %v1190_v58 = vpop.permute.xlu0 %1189  ;;  %v1192_v62 = vpop.permute.xlu1 %1191 }
  0xb7   : > { %3228 = vrot.lane.b32.xlu0 %v7710_v8, %s7646_s12  ;;  %v1201_v23 = vsel %vm1197_vm6, %v1190_v58, %v1192_v62  ;;  %v1200_v27 = vsel %vm1197_vm6, %v1188_v55, %v1190_v58 }
  0xb8   : > { %7147 = vmatmul.mubr.msk.bf16.vlgmr.msra.gmra.mxu0 %vm260_vm2, %v7141_v46  ;;  %3230 = vrot.lane.b32.xlu1 %v7719_v12, %s7646_s12  ;;  %v1214_v30 = vsel %vm264_vm1, %v1200_v27, 0 }
  0xb9   : > { %989 = vmatpush1.bf16.msra.mxu0 %v954_v57  ;;  %1006 = vmatprep.mubr.bf16.mxu0 %v7632_v5 }
  0xba   : > { %7154 = vmatprep.subr.msk.bf16.mxu0 %vm264_vm1, %v949_v61  ;;  %v1194_v0 = vpop.permute.xlu0 %1193  ;;  %v1196_v3 = vpop.permute.xlu1 %1195 }
  0xbb   : > { %3232 = vrot.lane.b32.xlu0 %v7715_v11, %s7646_s12  ;;  %v1203_v28 = vsel %vm1197_vm6, %v1194_v0, %v1196_v3  ;;  %v1202_v31 = vsel %vm1197_vm6, %v1192_v62, %v1194_v0  ;;  %v1226_v37 = vsel %vm264_vm1, %v1196_v3, 0  ;;  %vm4534_vm6 = vcmask 48128  }
  0xbc   : > { %7413 = vmatmul.mubr.msk.bf16.vlgmr.msra.gmra.mxu1 %vm260_vm2, %v7141_v46  ;;  %3234 = vrot.lane.b32.xlu1 %v7724_v13, %s7646_s12  ;;  %v1220_v14 = vsel %vm264_vm1, %v1202_v31, 0 }
  0xbd   : > { %1030 = vmatpush1.bf16.msra.mxu1 %v960_v63  ;;  %1047 = vmatprep.mubr.bf16.mxu1 %v7632_v5 }
  0xbe   : > { %7416 = vmatprep.subr.bf16.mxu1 %v7642_v19  ;;  %v1438_v10 = vpop.permute.xlu0 %1437  ;;  %v1440_v18 = vpop.permute.xlu1 %1439 }
  0xbf   : > { %3236 = vrot.lane.b32.xlu0 %v7798_v56, %s7646_s12  ;;  %v1452_v38 = vsel %vm1451_vm7, %v1438_v10, %v1440_v18 }
  0xc0   : > { %7151 = vmatmul.mubr.msk.bf16.vlgmr.msra.gmra.mxu0 %vm260_vm2, %v7149_v4  ;;  %3238 = vrot.lane.b32.xlu1 %v7804_v59, %s7646_s12  ;;  %v1462_v41 = vsel %vm264_vm1, %v1452_v38, 0 }
  0xc1   : > { %1071 = vmatpush1.bf16.msra.mxu0 %v966_v9  ;;  %1088 = vmatprep.mubr.bf16.mxu0 %v7632_v5 }
  0xc2   : > { %7158 = vmatprep.subr.msk.bf16.mxu0 %vm264_vm1, %v1199_v15  ;;  %v1442_v21 = vpop.permute.xlu0 %1441  ;;  %v1444_v24 = vpop.permute.xlu1 %1443 }
  0xc3   : > { %3240 = vrot.lane.b32.xlu0 %v7817_v2, %s7646_s12  ;;  %v1453_v35 = vsel %vm1451_vm7, %v1440_v18, %v1442_v21  ;;  %v1454_v43 = vsel %vm1451_vm7, %v1442_v21, %v1444_v24  ;;  %v7173_v21 = vld [vmem:[%s9540_s1 + $0x18] sm:$0xf] }
  0xc4   : > { %7153 = vmatmul.mubr.msk.bf16.vlgmr.msra.gmra.mxu1 %vm260_vm2, %v7149_v4  ;;  %3242 = vrot.lane.b32.xlu1 %v7824_v7, %s7646_s12  ;;  %v1468_v46 = vsel %vm264_vm1, %v1454_v43, 0 }
  0xc5   : > { %7417 = vmatpush3.bf16.msra.mxu1 %v972_v20  ;;  %7418 = vmatprep.mubr.msk.bf16.mxu1 %vm7643_vm3, %v7642_v19 }
  0xc6   : > { %7160 = vmatprep.subr.msk.bf16.mxu1 %vm264_vm1, %v1201_v23  ;;  %v1446_v26 = vpop.permute.xlu0 %1445  ;;  %v1448_v29 = vpop.permute.xlu1 %1447 }
  0xc7   : > { %3486 = vrot.lane.b32.xlu0 %v7710_v8, %s7647_s17  ;;  %v1455_v39 = vsel %vm1451_vm7, %v1444_v24, %v1446_v26  ;;  %v1456_v48 = vsel %vm1451_vm7, %v1446_v26, %v1448_v29 }
  0xc8   : > { %7155 = vmatmul.mubr.msk.bf16.vlgmr.msra.gmra.mxu0 %vm260_vm2, %v7149_v4  ;;  %3488 = vrot.lane.b32.xlu1 %v7719_v12, %s7647_s17  ;;  %v1474_v49 = vsel %vm264_vm1, %v1456_v48, 0 }
  0xc9   : > { %1243 = vmatpush1.bf16.msra.mxu0 %v1208_v25  ;;  %1260 = vmatprep.mubr.bf16.mxu0 %v7632_v5 }
  0xca   : > { %7162 = vmatprep.subr.msk.bf16.mxu0 %vm264_vm1, %v1203_v28  ;;  %v7986_v16 = vpop.permute.xlu0 %1449  ;;  %v7992_v32 = vpop.permute.xlu1 %1691 }
  0xcb   : > { %3490 = vrot.lane.b32.xlu0 %v7715_v11, %s7647_s17  ;;  %v1457_v44 = vsel %vm1451_vm7, %v1448_v29, %v7986_v16  ;;  %v1480_v52 = vsel %vm264_vm1, %v7986_v16, 0  ;;  %vm4789_vm7 = vcmask 457728  }
  0xcc   : > { %7419 = vmatmul.mubr.msk.bf16.vlgmr.msra.gmra.mxu1 %vm260_vm2, %v7149_v4  ;;  %3492 = vrot.lane.b32.xlu1 %v7724_v13, %s7647_s17 }
  0xcd   : > { %1284 = vmatpush1.bf16.msra.mxu1 %v1214_v30  ;;  %1301 = vmatprep.mubr.bf16.mxu1 %v7632_v5 }
  0xce   : > { %7422 = vmatprep.subr.bf16.mxu1 %v7642_v19  ;;  %v1694_v34 = vpop.permute.xlu0 %1693  ;;  %v8006_v36 = vpop.permute.xlu1 %1695 }
  0xcf   : > { %3494 = vrot.lane.b32.xlu0 %v7798_v56, %s7647_s17  ;;  %v1707_v50 = vsel %vm1705_vm8, %v1694_v34, %v8006_v36  ;;  %v1706_v57 = vsel %vm1705_vm8, %v7992_v32, %v1694_v34 }
  0xd0   : > { %7159 = vmatmul.mubr.msk.bf16.vlgmr.msra.gmra.mxu0 %vm260_vm2, %v7157_v33  ;;  %3496 = vrot.lane.b32.xlu1 %v7804_v59, %s7647_s17  ;;  %v1716_v62 = vsel %vm264_vm1, %v1706_v57, 0 }
  0xd1   : > { %1325 = vmatpush1.bf16.msra.mxu0 %v1220_v14  ;;  %1342 = vmatprep.mubr.bf16.mxu0 %v7632_v5 }
  0xd2   : > { %7166 = vmatprep.subr.msk.bf16.mxu0 %vm264_vm1, %v1453_v35  ;;  %v8013_v17 = vpop.permute.xlu0 %1697  ;;  %v8020_v40 = vpop.permute.xlu1 %1699 }
  0xd3   : > { %3498 = vrot.lane.b32.xlu0 %v7817_v2, %s7647_s17  ;;  %v1709_v58 = vsel %vm1705_vm8, %v8013_v17, %v8020_v40  ;;  %v1708_v1 = vsel %vm1705_vm8, %v8006_v36, %v8013_v17  ;;  %v7181_v17 = vld [vmem:[%s9540_s1 + $0x1c] sm:$0xf] }
  0xd4   : > { %7161 = vmatmul.mubr.msk.bf16.vlgmr.msra.gmra.mxu1 %vm260_vm2, %v7157_v33  ;;  %3500 = vrot.lane.b32.xlu1 %v7824_v7, %s7647_s17  ;;  %v1722_v10 = vsel %vm264_vm1, %v1708_v1, 0 }
  0xd5   : > { %7423 = vmatpush3.bf16.msra.mxu1 %v1226_v37  ;;  %7424 = vmatprep.mubr.msk.bf16.mxu1 %vm7643_vm3, %v7642_v19 }
  0xd6   : > { %7168 = vmatprep.subr.msk.bf16.mxu1 %vm264_vm1, %v1455_v39  ;;  %v8028_v42 = vpop.permute.xlu0 %1701  ;;  %v8036_v45 = vpop.permute.xlu1 %1703 }
  0xd7   : > { %3744 = vrot.lane.b32.xlu0 %v7710_v8, %s7648_s21  ;;  %v1711_v3 = vsel %vm1705_vm8, %v8028_v42, %v8036_v45  ;;  %v1710_v18 = vsel %vm1705_vm8, %v8020_v40, %v8028_v42  ;;  %v1734_v26 = vsel %vm264_vm1, %v8036_v45, 0  ;;  %vm5043_vm8 = vcmask 449536  }
  0xd8   : > { %7163 = vmatmul.mubr.msk.bf16.vlgmr.msra.gmra.mxu0 %vm260_vm2, %v7157_v33  ;;  %3746 = vrot.lane.b32.xlu1 %v7719_v12, %s7648_s21  ;;  %v7165_v12 = vld [vmem:[%s9540_s1 + $0x14] sm:$0xf]  ;;  %v1728_v22 = vsel %vm264_vm1, %v1710_v18, 0 }
  0xd9   : > { %1497 = vmatpush1.bf16.msra.mxu0 %v1462_v41  ;;  %1514 = vmatprep.mubr.bf16.mxu0 %v7632_v5 }
  0xda   : > { %7170 = vmatprep.subr.msk.bf16.mxu0 %vm264_vm1, %v1457_v44  ;;  %v8043_v47 = vpop.permute.xlu0 %1945  ;;  %v8049_v8 = vpop.permute.xlu1 %1947 }
  0xdb   : > { %3748 = vrot.lane.b32.xlu0 %v7715_v11, %s7648_s21  ;;  %v1960_v28 = vsel %vm1959_vm9, %v8043_v47, %v8049_v8 }
  0xdc   : > { %7425 = vmatmul.mubr.msk.bf16.vlgmr.msra.gmra.mxu1 %vm260_vm2, %v7157_v33  ;;  %3750 = vrot.lane.b32.xlu1 %v7724_v13, %s7648_s21  ;;  %v3962_v13 = vld [vmem:[%s7702_s20] sm:$0xff]  ;;  %v1970_v16 = vsel %vm264_vm1, %v1960_v28, 0 }
  0xdd   : > { %1538 = vmatpush1.bf16.msra.mxu1 %v1468_v46  ;;  %1555 = vmatprep.mubr.bf16.mxu1 %v7632_v5  ;;  %v8078_v54 = vrot.slane %v3962_v13, %v7704_v6  ;;  %v3968_v55 = vcombine.high %v3962_v13, %v3962_v13  ;;  %v7189_v13 = vld [vmem:[%s9540_s1 + $0x20] sm:$0xf] }
  0xde   : > { %7428 = vmatprep.subr.bf16.mxu1 %v7642_v19  ;;  %v8059_v11 = vpop.permute.xlu0 %1949  ;;  %v8067_v51 = vpop.permute.xlu1 %1951 }
  0xdf   : > { %3752 = vrot.lane.b32.xlu0 %v7798_v56, %s7648_s21  ;;  %v8094_v61 = vcombine.high %v8078_v54, %v8078_v54  ;;  %v8103_v0 = vrot.slane %v3968_v55, %v7704_v6  ;;  %v1961_v24 = vsel %vm1959_vm9, %v8049_v8, %v8059_v11  ;;  %v1962_v32 = vsel %vm1959_vm9, %v8059_v11, %v8067_v51  ;;  %v4736_v55 = vld [vmem:[%s7702_s20 + $0x2] sm:$0xff] }
  0xe0   : > { %7167 = vmatmul.mubr.msk.bf16.vlgmr.msra.gmra.mxu0 %vm260_vm2, %v7165_v12  ;;  %3754 = vrot.lane.b32.xlu1 %v7804_v59, %s7648_s21  ;;  %v1976_v34 = vsel %vm264_vm1, %v1962_v32, 0 }
  0xe1   : > { %1579 = vmatpush1.bf16.msra.mxu0 %v1474_v49  ;;  %1596 = vmatprep.mubr.bf16.mxu0 %v7632_v5  ;;  %v8120_v9 = vcombine.high %v8103_v0, %v8103_v0 }
  0xe2   : > { %7174 = vmatprep.subr.msk.bf16.mxu0 %vm264_vm1, %v1707_v50  ;;  %v8075_v53 = vpop.permute.xlu0 %1953  ;;  %v8088_v60 = vpop.permute.xlu1 %1955 }
  0xe3   : > { %3756 = vrot.lane.b32.xlu0 %v7817_v2, %s7648_s21  ;;  %v1963_v29 = vsel %vm1959_vm9, %v8067_v51, %v8075_v53  ;;  %v1964_v36 = vsel %vm1959_vm9, %v8075_v53, %v8088_v60 }
  0xe4   : > { %7169 = vmatmul.mubr.msk.bf16.vlgmr.msra.gmra.mxu1 %vm260_vm2, %v7165_v12  ;;  %3758 = vrot.lane.b32.xlu1 %v7824_v7, %s7648_s21  ;;  %v1982_v38 = vsel %vm264_vm1, %v1964_v36, 0  ;;  %v4991_v36 = vld [vmem:[%s7702_s20 + $0xa] sm:$0x3f] }
  0xe5   : > { %7429 = vmatpush3.bf16.msra.mxu1 %v1480_v52  ;;  %7430 = vmatprep.mubr.msk.bf16.mxu1 %vm7643_vm3, %v7642_v19 }
  0xe6   : > { %7176 = vmatprep.subr.msk.bf16.mxu1 %vm264_vm1, %v1709_v58  ;;  %v8100_v63 = vpop.permute.xlu0 %1957  ;;  %v8114_v4 = vpop.permute.xlu1 %2199 }
  0xe7   : > { %4002 = vrot.lane.b32.xlu0 %v8078_v54, %s7649_s24  ;;  %v1965_v33 = vsel %vm1959_vm9, %v8088_v60, %v8100_v63  ;;  %v1988_v42 = vsel %vm264_vm1, %v8100_v63, 0  ;;  %vm5297_vm9 = vcmask 441344  }
  0xe8   : > { %7171 = vmatmul.mubr.msk.bf16.vlgmr.msra.gmra.mxu0 %vm260_vm2, %v7165_v12  ;;  %4004 = vrot.lane.b32.xlu1 %v8094_v61, %s7649_s24 }
  0xe9   : > { %1751 = vmatpush1.bf16.msra.mxu0 %v1716_v62  ;;  %1768 = vmatprep.mubr.bf16.mxu0 %v7632_v5 }
  0xea   : > { %7178 = vmatprep.subr.msk.bf16.mxu0 %vm264_vm1, %v1711_v3  ;;  %v8125_v15 = vpop.permute.xlu0 %2201  ;;  %v8133_v20 = vpop.permute.xlu1 %2203 }
  0xeb   : > { %4006 = vrot.lane.b32.xlu0 %v8103_v0, %s7649_s24  ;;  %v2215_v40 = vsel %vm2213_vm10, %v8125_v15, %v8133_v20  ;;  %v2214_v43 = vsel %vm2213_vm10, %v8114_v4, %v8125_v15 }
  0xec   : > { %7431 = vmatmul.mubr.msk.bf16.vlgmr.msra.gmra.mxu1 %vm260_vm2, %v7165_v12  ;;  %4008 = vrot.lane.b32.xlu1 %v8120_v9, %s7649_s24  ;;  %v2224_v47 = vsel %vm264_vm1, %v2214_v43, 0 }
  0xed   : > { %1792 = vmatpush1.bf16.msra.mxu1 %v1722_v10  ;;  %1809 = vmatprep.mubr.bf16.mxu1 %v7632_v5 }
  0xee   : > { %7434 = vmatprep.subr.bf16.mxu1 %v7642_v19  ;;  %v8143_v23 = vpop.permute.xlu0 %2205  ;;  %v8151_v25 = vpop.permute.xlu1 %2207 }
  0xef   : > { %4010 = vrot.lane.b32.xlu0 %v7798_v56, %s7649_s24  ;;  %v2217_v44 = vsel %vm2213_vm10, %v8143_v23, %v8151_v25  ;;  %v2216_v48 = vsel %vm2213_vm10, %v8133_v20, %v8143_v23 }
  0xf0   : > { %7175 = vmatmul.mubr.msk.bf16.vlgmr.msra.gmra.mxu0 %vm260_vm2, %v7173_v21  ;;  %4012 = vrot.lane.b32.xlu1 %v7804_v59, %s7649_s24  ;;  %v2230_v49 = vsel %vm264_vm1, %v2216_v48, 0  ;;  %v7205_v48 = vld [vmem:[%s9540_s1 + $0x28] sm:$0xf] }
  0xf1   : > { %1833 = vmatpush1.bf16.msra.mxu0 %v1728_v22  ;;  %1850 = vmatprep.mubr.bf16.mxu0 %v7632_v5 }
  0xf2   : > { %7182 = vmatprep.subr.msk.bf16.mxu0 %vm264_vm1, %v1961_v24  ;;  %v8159_v27 = vpop.permute.xlu0 %2209  ;;  %v8170_v30 = vpop.permute.xlu1 %2211 }
  0xf3   : > { %4014 = vrot.lane.b32.xlu0 %v7817_v2, %s7649_s24  ;;  %v2219_v8 = vsel %vm2213_vm10, %v8159_v27, %v8170_v30  ;;  %v2218_v50 = vsel %vm2213_vm10, %v8151_v25, %v8159_v27  ;;  %v2242_v58 = vsel %vm264_vm1, %v8170_v30, 0  ;;  %v7197_v25 = vld [vmem:[%s9540_s1 + $0x24] sm:$0xf]  ;;  %vm5551_vm10 = vcmask 375808  }
  0xf4   : > { %7177 = vmatmul.mubr.msk.bf16.vlgmr.msra.gmra.mxu1 %vm260_vm2, %v7173_v21  ;;  %4016 = vrot.lane.b32.xlu1 %v7824_v7, %s7649_s24  ;;  %v2236_v52 = vsel %vm264_vm1, %v2218_v50, 0 }
  0xf5   : > { %7435 = vmatpush3.bf16.msra.mxu1 %v1734_v26  ;;  %7436 = vmatprep.mubr.msk.bf16.mxu1 %vm7643_vm3, %v7642_v19 }
  0xf6   : > { %7184 = vmatprep.subr.msk.bf16.mxu1 %vm264_vm1, %v1963_v29  ;;  %v8178_v31 = vpop.permute.xlu0 %2454  ;;  %v8191_v14 = vpop.permute.xlu1 %2456 }
  0xf7   : > { %4260 = vrot.lane.b32.xlu0 %v8078_v54, %s7650_s27 }
  0xf8   : > { %7179 = vmatmul.mubr.msk.bf16.vlgmr.msra.gmra.mxu0 %vm260_vm2, %v7173_v21  ;;  %4262 = vrot.lane.b32.xlu1 %v8094_v61, %s7650_s27 }
  0xf9   : > { %2005 = vmatpush1.bf16.msra.mxu0 %v1970_v16  ;;  %2022 = vmatprep.mubr.bf16.mxu0 %v7632_v5 }
  0xfa   : > { %7186 = vmatprep.subr.msk.bf16.mxu0 %vm264_vm1, %v1965_v33  ;;  %v8196_v35 = vpop.permute.xlu0 %2458  ;;  %v8206_v37 = vpop.permute.xlu1 %2460 }
  0xfb   : > { %4264 = vrot.lane.b32.xlu0 %v8103_v0, %s7650_s27 }
  0xfc   : > { %7437 = vmatmul.mubr.msk.bf16.vlgmr.msra.gmra.mxu1 %vm260_vm2, %v7173_v21  ;;  %4266 = vrot.lane.b32.xlu1 %v8120_v9, %s7650_s27 }
  0xfd   : > { %2046 = vmatpush1.bf16.msra.mxu1 %v1976_v34  ;;  %2063 = vmatprep.mubr.bf16.mxu1 %v7632_v5 }
  0xfe   : > { %7440 = vmatprep.subr.bf16.mxu1 %v7642_v19  ;;  %v8214_v39 = vpop.permute.xlu0 %2462 }
  0xff   : > { %4268 = vrot.lane.b32.xlu0 %v7798_v56, %s7650_s27  ;;  %v8224_v41 = vpop.permute.xlu1 %2464  ;;  %v2474_v62 = vsel %vm2470_vm11, %v8206_v37, %v8214_v39 }
 0x100   : > { %7183 = vmatmul.mubr.msk.bf16.vlgmr.msra.gmra.mxu0 %vm260_vm2, %v7181_v17  ;;  %4270 = vrot.lane.b32.xlu1 %v7804_v59, %s7650_s27  ;;  %v2475_v22 = vsel %vm2470_vm11, %v8214_v39, %v8224_v41 }
 0x101   : > { %2087 = vmatpush1.bf16.msra.mxu0 %v1982_v38  ;;  %2104 = vmatprep.mubr.bf16.mxu0 %v7632_v5  ;;  %v2494_v27 = vsel %vm264_vm1, %v2475_v22, 0 }
 0x102   : > { %7190 = vmatprep.subr.msk.bf16.mxu0 %vm264_vm1, %v2215_v40  ;;  %v5020_v40 = vrot.slane %v4991_v36, %v7704_v6 }
 0x103   : > { %4272 = vrot.lane.b32.xlu0 %v7817_v2, %s7650_s27 }
 0x104   : > { %7185 = vmatmul.mubr.msk.bf16.vlgmr.msra.gmra.mxu1 %vm260_vm2, %v7181_v17  ;;  %v8239_v45 = vpop.permute.xlu0 %2466  ;;  %4274 = vrot.lane.b32.xlu1 %v7824_v7, %s7650_s27 }
 0x105   : > { %7441 = vmatpush3.bf16.msra.mxu1 %v1988_v42  ;;  %7442 = vmatprep.mubr.msk.bf16.mxu1 %vm7643_vm3, %v7642_v19  ;;  %v8245_v46 = vpop.permute.xlu1 %2468  ;;  %v2476_v4 = vsel %vm2470_vm11, %v8224_v41, %v8239_v45  ;;  %v5013_v41 = vcombine.high %v4991_v36, %v4991_v36 }
 0x106   : > { %7192 = vmatprep.subr.msk.bf16.mxu1 %vm264_vm1, %v2217_v44  ;;  %v2477_v29 = vsel %vm2470_vm11, %v8239_v45, %v8245_v46  ;;  %v5028_v46 = vcombine.high %v5020_v40, %v5020_v40 }
 0x107   : > { %4518 = vrot.lane.b32.xlu0 %v8078_v54, %s7651_s30  ;;  %v2472_v54 = vsel %vm2470_vm11, %v8191_v14, %v8196_v35  ;;  %v2500_v32 = vsel %vm264_vm1, %v2477_v29, 0 }
 0x108   : > { %7187 = vmatmul.mubr.msk.bf16.vlgmr.msra.gmra.mxu0 %vm260_vm2, %v7181_v17  ;;  %4520 = vrot.lane.b32.xlu1 %v8094_v61, %s7651_s30  ;;  %v4742_v61 = vcombine.high %v4736_v55, %v4736_v55 }
 0x109   : > { %2259 = vmatpush1.bf16.msra.mxu0 %v2224_v47  ;;  %2276 = vmatprep.mubr.bf16.mxu0 %v7632_v5  ;;  %v8261_v12 = vpop.permute.xlu0 %2712  ;;  %v5027_v47 = vrot.slane %v5013_v41, %v7704_v6  ;;  %v7221_v41 = vld [vmem:[%s9540_s1 + $0x30] sm:$0xf] }
 0x10a   : > { %7194 = vmatprep.subr.msk.bf16.mxu0 %vm264_vm1, %v2219_v8  ;;  %v8265_v11 = vpop.permute.xlu1 %2714  ;;  %v8329_v3 = vrot.slane %v4742_v61, %v7704_v6 }
 0x10b   : > { %4522 = vrot.lane.b32.xlu0 %v8103_v0, %s7651_s30 }
 0x10c   : > { %7443 = vmatmul.mubr.msk.bf16.vlgmr.msra.gmra.mxu1 %vm260_vm2, %v7181_v17  ;;  %4524 = vrot.lane.b32.xlu1 %v8120_v9, %s7651_s30  ;;  %v4737_v9 = vld [vmem:[%s7702_s20 + $0xa] sm:$0x3f]  ;;  %v8345_v10 = vcombine.high %v8329_v3, %v8329_v3 }
 0x10d   : > { %2300 = vmatpush1.bf16.msra.mxu1 %v2230_v49  ;;  %2317 = vmatprep.mubr.bf16.mxu1 %v7632_v5  ;;  %v8279_v51 = vpop.permute.xlu0 %2716  ;;  %v4766_v21 = vrot.slane %v4737_v9, %v7704_v6  ;;  %v4759_v23 = vcombine.high %v4737_v9, %v4737_v9 }
 0x10e   : > { %7446 = vmatprep.subr.bf16.mxu1 %v7642_v19  ;;  %v8283_v53 = vpop.permute.xlu1 %2718  ;;  %v2730_v30 = vsel %vm2728_vm12, %v8265_v11, %v8279_v51 }
 0x10f   : > { %4526 = vrot.lane.b32.xlu0 %v7798_v56, %s7651_s30  ;;  %v8303_v56 = vrot.slane %v4736_v55, %v7704_v6  ;;  %v4774_v24 = vcombine.high %v4766_v21, %v4766_v21  ;;  %v4773_v16 = vrot.slane %v4759_v23, %v7704_v6  ;;  %v2731_v38 = vsel %vm2728_vm12, %v8279_v51, %v8283_v53  ;;  %v5245_v55 = vld [vmem:[%s7702_s20 + $0xa] sm:$0x3f] }
 0x110   : > { %7191 = vmatmul.mubr.msk.bf16.vlgmr.msra.gmra.mxu0 %vm260_vm2, %v7189_v13  ;;  %4528 = vrot.lane.b32.xlu1 %v7804_v59, %s7651_s30  ;;  %v2471_v59 = vsel %vm2470_vm11, %v8178_v31, %v8191_v14  ;;  %v2729_v14 = vsel %vm2728_vm12, %v8261_v12, %v8265_v11  ;;  %v2746_v43 = vsel %vm264_vm1, %v2731_v38, 0  ;;  %v5274_v61 = vrot.slane %v5245_v55, %v7704_v6 }
 0x111   : > { %2341 = vmatpush1.bf16.msra.mxu0 %v2236_v52  ;;  %2358 = vmatprep.mubr.bf16.mxu0 %v7632_v5  ;;  %v8295_v57 = vpop.permute.xlu0 %2720  ;;  %v8318_v63 = vcombine.high %v8303_v56, %v8303_v56  ;;  %v2482_v1 = vsel %vm264_vm1, %v2471_v59, 0 }
 0x112   : > { %7198 = vmatprep.subr.msk.bf16.mxu0 %vm264_vm1, %v2472_v54  ;;  %v8300_v60 = vpop.permute.xlu1 %2722  ;;  %v2732_v34 = vsel %vm2728_vm12, %v8283_v53, %v8295_v57 }
 0x113   : > { %4530 = vrot.lane.b32.xlu0 %v7817_v2, %s7651_s30  ;;  %v2733_v45 = vsel %vm2728_vm12, %v8295_v57, %v8300_v60 }
 0x114   : > { %7193 = vmatmul.mubr.msk.bf16.vlgmr.msra.gmra.mxu1 %vm260_vm2, %v7189_v13  ;;  %4532 = vrot.lane.b32.xlu1 %v7824_v7, %s7651_s30  ;;  %v2473_v7 = vsel %vm2470_vm11, %v8196_v35, %v8206_v37  ;;  %v2740_v37 = vsel %vm264_vm1, %v2729_v14, 0  ;;  %v2752_v12 = vsel %vm264_vm1, %v2733_v45, 0  ;;  %vm5805_vm11 = vcmask 367616  }
 0x115   : > { %7447 = vmatpush3.bf16.msra.mxu1 %v2242_v58  ;;  %7448 = vmatprep.mubr.msk.bf16.mxu1 %vm7643_vm3, %v7642_v19  ;;  %v8322_v0 = vpop.permute.xlu0 %2724  ;;  %v2488_v18 = vsel %vm264_vm1, %v2473_v7, 0 }
 0x116   : > { %7200 = vmatprep.subr.msk.bf16.mxu1 %vm264_vm1, %v2474_v62  ;;  %v8326_v2 = vpop.permute.xlu1 %2726  ;;  %v2734_v39 = vsel %vm2728_vm12, %v8300_v60, %v8322_v0 }
 0x117   : > { %4775 = vrot.lane.b32.xlu0 %v8303_v56, %s7652_s7  ;;  %v2735_v11 = vsel %vm2728_vm12, %v8322_v0, %v8326_v2  ;;  %v5267_v0 = vcombine.high %v5245_v55, %v5245_v55  ;;  %vm6059_vm12 = vcmask 359424  }
 0x118   : > { %7195 = vmatmul.mubr.msk.bf16.vlgmr.msra.gmra.mxu0 %vm260_vm2, %v7189_v13  ;;  %4777 = vrot.lane.b32.xlu1 %v8318_v63, %s7652_s7  ;;  %v2758_v51 = vsel %vm264_vm1, %v2735_v11, 0 }
 0x119   : > { %2517 = vmatpush1.bf16.msra.mxu0 %v2482_v1  ;;  %2534 = vmatprep.mubr.bf16.mxu0 %v7632_v5  ;;  %v8348_v15 = vpop.permute.xlu0 %2970  ;;  %v5282_v1 = vcombine.high %v5274_v61, %v5274_v61 }
 0x11a   : > { %7202 = vmatprep.subr.msk.bf16.mxu0 %vm264_vm1, %v2476_v4  ;;  %v8352_v20 = vpop.permute.xlu1 %2972 }
 0x11b   : > { %4779 = vrot.lane.b32.xlu0 %v8329_v3, %s7652_s7  ;;  %v2987_v53 = vsel %vm2986_vm13, %v8348_v15, %v8352_v20  ;;  %v5281_v15 = vrot.slane %v5267_v0, %v7704_v6 }
 0x11c   : > { %7449 = vmatmul.mubr.msk.bf16.vlgmr.msra.gmra.mxu1 %vm260_vm2, %v7189_v13  ;;  %4781 = vrot.lane.b32.xlu1 %v8345_v10, %s7652_s7  ;;  %v2998_v58 = vsel %vm264_vm1, %v2987_v53, 0 }
 0x11d   : > { %2558 = vmatpush1.bf16.msra.mxu1 %v2488_v18  ;;  %2575 = vmatprep.mubr.bf16.mxu1 %v7632_v5  ;;  %v8367_v26 = vpop.permute.xlu0 %2974  ;;  %v7213_v18 = vld [vmem:[%s9540_s1 + $0x2c] sm:$0xf] }
 0x11e   : > { %7452 = vmatprep.subr.bf16.mxu1 %v7642_v19  ;;  %v8371_v28 = vpop.permute.xlu1 %2976  ;;  %v2988_v50 = vsel %vm2986_vm13, %v8352_v20, %v8367_v26 }
 0x11f   : > { %4783 = vrot.lane.b32.xlu0 %v4766_v21, %s7652_s7  ;;  %v2989_v59 = vsel %vm2986_vm13, %v8367_v26, %v8371_v28  ;;  %v5499_v26 = vld [vmem:[%s7702_s20 + $0xa] sm:$0x3f] }
 0x120   : > { %7199 = vmatmul.mubr.msk.bf16.vlgmr.msra.gmra.mxu0 %vm260_vm2, %v7197_v25  ;;  %4785 = vrot.lane.b32.xlu1 %v4774_v24, %s7652_s7  ;;  %v3004_v7 = vsel %vm264_vm1, %v2989_v59, 0 }
 0x121   : > { %2599 = vmatpush1.bf16.msra.mxu0 %v2494_v27  ;;  %2616 = vmatprep.mubr.bf16.mxu0 %v7632_v5  ;;  %v8384_v31 = vpop.permute.xlu0 %2978 }
 0x122   : > { %7206 = vmatprep.subr.msk.bf16.mxu0 %vm264_vm1, %v2730_v30  ;;  %v8388_v33 = vpop.permute.xlu1 %2980  ;;  %v2990_v54 = vsel %vm2986_vm13, %v8371_v28, %v8384_v31 }
 0x123   : > { %4787 = vrot.lane.b32.xlu0 %v4773_v16, %s7652_s7  ;;  %v2991_v9 = vsel %vm2986_vm13, %v8384_v31, %v8388_v33  ;;  %v5528_v16 = vrot.slane %v5499_v26, %v7704_v6  ;;  %v5521_v31 = vcombine.high %v5499_v26, %v5499_v26  ;;  %v6007_v26 = vld [vmem:[%s7702_s20 + $0xa] sm:$0x3f] }
 0x124   : > { %7201 = vmatmul.mubr.msk.bf16.vlgmr.msra.gmra.mxu1 %vm260_vm2, %v7197_v25  ;;  %5029 = vrot.lane.b32.xlu1 %v8303_v56, %s7653_s10  ;;  %v3010_v21 = vsel %vm264_vm1, %v2991_v9, 0 }
 0x125   : > { %7453 = vmatpush3.bf16.msra.mxu1 %v2500_v32  ;;  %7454 = vmatprep.mubr.msk.bf16.mxu1 %vm7643_vm3, %v7642_v19  ;;  %v8402_v35 = vpop.permute.xlu0 %2982  ;;  %v5536_v36 = vcombine.high %v5528_v16, %v5528_v16 }
 0x126   : > { %7208 = vmatprep.subr.msk.bf16.mxu1 %vm264_vm1, %v2732_v34  ;;  %v8407_v17 = vpop.permute.xlu1 %2984  ;;  %v2992_v62 = vsel %vm2986_vm13, %v8388_v33, %v8402_v35 }
 0x127   : > { %5031 = vrot.lane.b32.xlu0 %v8318_v63, %s7653_s10  ;;  %v2993_v23 = vsel %vm2986_vm13, %v8402_v35, %v8407_v17  ;;  %vm6313_vm13 = vcmask 293888  }
 0x128   : > { %7203 = vmatmul.mubr.msk.bf16.vlgmr.msra.gmra.mxu0 %vm260_vm2, %v7197_v25  ;;  %5033 = vrot.lane.b32.xlu1 %v8329_v3, %s7653_s10  ;;  %v3016_v27 = vsel %vm264_vm1, %v2993_v23, 0 }
 0x129   : > { %2775 = vmatpush1.bf16.msra.mxu0 %v2740_v37  ;;  %2792 = vmatprep.mubr.bf16.mxu0 %v7632_v5  ;;  %v8422_v42 = vpop.permute.xlu0 %3228  ;;  %v5535_v37 = vrot.slane %v5521_v31, %v7704_v6 }
 0x12a   : > { %7210 = vmatprep.subr.msk.bf16.mxu0 %vm264_vm1, %v2734_v39  ;;  %v8426_v44 = vpop.permute.xlu1 %3230 }
 0x12b   : > { %5035 = vrot.lane.b32.xlu0 %v8345_v10, %s7653_s10  ;;  %v3245_v29 = vsel %vm3244_vm14, %v8422_v42, %v8426_v44 }
 0x12c   : > { %7455 = vmatmul.mubr.msk.bf16.vlgmr.msra.gmra.mxu1 %vm260_vm2, %v7197_v25  ;;  %5037 = vrot.lane.b32.xlu1 %v5020_v40, %s7653_s10  ;;  %v3256_v33 = vsel %vm264_vm1, %v3245_v29, 0 }
 0x12d   : > { %2816 = vmatpush1.bf16.msra.mxu1 %v2746_v43  ;;  %2833 = vmatprep.mubr.bf16.mxu1 %v7632_v5  ;;  %v8440_v8 = vpop.permute.xlu0 %3232 }
 0x12e   : > { %7458 = vmatprep.subr.bf16.mxu1 %v7642_v19  ;;  %v8444_v49 = vpop.permute.xlu1 %3234  ;;  %v3246_v24 = vsel %vm3244_vm14, %v8426_v44, %v8440_v8 }
 0x12f   : > { %5039 = vrot.lane.b32.xlu0 %v5028_v46, %s7653_s10  ;;  %v3247_v34 = vsel %vm3244_vm14, %v8440_v8, %v8444_v49 }
 0x130   : > { %7207 = vmatmul.mubr.msk.bf16.vlgmr.msra.gmra.mxu0 %vm260_vm2, %v7205_v48  ;;  %5041 = vrot.lane.b32.xlu1 %v5027_v47, %s7653_s10  ;;  %v3262_v38 = vsel %vm264_vm1, %v3247_v34, 0  ;;  %v5753_v47 = vld [vmem:[%s7702_s20 + $0xa] sm:$0x3f]  ;;  %s9521_s10 = scalar_lea.vmem %s9543_s4, %s7560_s8 }
 0x131   : > { %2857 = vmatpush1.bf16.msra.mxu0 %v2752_v12  ;;  %2874 = vmatprep.mubr.bf16.mxu0 %v7632_v5  ;;  %v8456_v13 = vpop.permute.xlu0 %3236 }
 0x132   : > { %7214 = vmatprep.subr.msk.bf16.mxu0 %vm264_vm1, %v2988_v50  ;;  %v8460_v52 = vpop.permute.xlu1 %3238  ;;  %v3248_v30 = vsel %vm3244_vm14, %v8444_v49, %v8456_v13  ;;  %v5782_v50 = vrot.slane %v5753_v47, %v7704_v6 }
 0x133   : > { %5283 = vrot.lane.b32.xlu0 %v8303_v56, %s7654_s13  ;;  %v3249_v40 = vsel %vm3244_vm14, %v8456_v13, %v8460_v52 }
 0x134   : > { %7209 = vmatmul.mubr.msk.bf16.vlgmr.msra.gmra.mxu1 %vm260_vm2, %v7205_v48  ;;  %5285 = vrot.lane.b32.xlu1 %v8318_v63, %s7654_s13  ;;  %v3268_v43 = vsel %vm264_vm1, %v3249_v40, 0  ;;  %v5790_v55 = vcombine.high %v5782_v50, %v5782_v50 }
 0x135   : > { %7459 = vmatpush3.bf16.msra.mxu1 %v2758_v51  ;;  %7460 = vmatprep.mubr.msk.bf16.mxu1 %vm7643_vm3, %v7642_v19  ;;  %v8476_v57 = vpop.permute.xlu0 %3240 }
 0x136   : > { %7216 = vmatprep.subr.msk.bf16.mxu1 %vm264_vm1, %v2990_v54  ;;  %v8480_v60 = vpop.permute.xlu1 %3242  ;;  %v3250_v35 = vsel %vm3244_vm14, %v8460_v52, %v8476_v57  ;;  %v5775_v52 = vcombine.high %v5753_v47, %v5753_v47 }
 0x137   : > { %5287 = vrot.lane.b32.xlu0 %v8329_v3, %s7654_s13  ;;  %v3251_v45 = vsel %vm3244_vm14, %v8476_v57, %v8480_v60  ;;  %vm6567_vm14 = vcmask 285696  }
 0x138   : > { %7211 = vmatmul.mubr.msk.bf16.vlgmr.msra.gmra.mxu0 %vm260_vm2, %v7205_v48  ;;  %5289 = vrot.lane.b32.xlu1 %v8345_v10, %s7654_s13  ;;  %v3274_v12 = vsel %vm264_vm1, %v3251_v45, 0 }
 0x139   : > { %3033 = vmatpush1.bf16.msra.mxu0 %v2998_v58  ;;  %3050 = vmatprep.mubr.bf16.mxu0 %v7632_v5  ;;  %v8495_v2 = vpop.permute.xlu0 %3486 }
 0x13a   : > { %7218 = vmatprep.subr.msk.bf16.mxu0 %vm264_vm1, %v2992_v62  ;;  %v8499_v4 = vpop.permute.xlu1 %3488 }
 0x13b   : > { %5291 = vrot.lane.b32.xlu0 %v5274_v61, %s7654_s13  ;;  %v3503_v13 = vsel %vm3502_vm15, %v8495_v2, %v8499_v4 }
 0x13c   : > { %7461 = vmatmul.mubr.msk.bf16.vlgmr.msra.gmra.mxu1 %vm260_vm2, %v7205_v48  ;;  %5293 = vrot.lane.b32.xlu1 %v5282_v1, %s7654_s13  ;;  %v3514_v61 = vsel %vm264_vm1, %v3503_v13, 0  ;;  %v5789_v1 = vrot.slane %v5775_v52, %v7704_v6 }
 0x13d   : > { %3074 = vmatpush1.bf16.msra.mxu1 %v3004_v7  ;;  %3091 = vmatprep.mubr.bf16.mxu1 %v7632_v5  ;;  %v8512_v20 = vpop.permute.xlu0 %3490 }
 0x13e   : > { %7464 = vmatprep.subr.bf16.mxu1 %v7642_v19  ;;  %v8516_v22 = vpop.permute.xlu1 %3492  ;;  %v3504_v46 = vsel %vm3502_vm15, %v8499_v4, %v8512_v20 }
 0x13f   : > { %5295 = vrot.lane.b32.xlu0 %v5281_v15, %s7654_s13  ;;  %v3505_v59 = vsel %vm3502_vm15, %v8512_v20, %v8516_v22 }
 0x140   : > { %7215 = vmatmul.mubr.msk.bf16.vlgmr.msra.gmra.mxu0 %vm260_vm2, %v7213_v18  ;;  %5537 = vrot.lane.b32.xlu1 %v8303_v56, %s7655_s18 }
 0x141   : > { %3115 = vmatpush1.bf16.msra.mxu0 %v3010_v21  ;;  %3132 = vmatprep.mubr.bf16.mxu0 %v7632_v5  ;;  %v8529_v25 = vpop.permute.xlu0 %3494 }
 0x142   : > { %7222 = vmatprep.subr.msk.bf16.mxu0 %vm264_vm1, %v3246_v24  ;;  %v8534_v28 = vpop.permute.xlu1 %3496  ;;  %v3506_v51 = vsel %vm3502_vm15, %v8516_v22, %v8529_v25  ;;  %v8670_v24 = vld [vmem:[%s9540_s1 + $0x34] sm:$0xf] }
 0x143   : > { %5539 = vrot.lane.b32.xlu0 %v8318_v63, %s7655_s18  ;;  %v3507_v20 = vsel %vm3502_vm15, %v8529_v25, %v8534_v28 }
 0x144   : > { %7217 = vmatmul.mubr.msk.bf16.vlgmr.msra.gmra.mxu1 %vm260_vm2, %v7213_v18  ;;  %5541 = vrot.lane.b32.xlu1 %v8329_v3, %s7655_s18  ;;  %v3526_v29 = vsel %vm264_vm1, %v3507_v20, 0 }
 0x145   : > { %7465 = vmatpush3.bf16.msra.mxu1 %v3016_v27  ;;  %7466 = vmatprep.mubr.msk.bf16.mxu1 %vm7643_vm3, %v7642_v19  ;;  %v8550_v32 = vpop.permute.xlu0 %3498 }
 0x146   : > { %7224 = vmatprep.subr.msk.bf16.mxu1 %vm264_vm1, %v3248_v30  ;;  %v8554_v14 = vpop.permute.xlu1 %3500  ;;  %v3508_v62 = vsel %vm3502_vm15, %v8534_v28, %v8550_v32 }
 0x147   : > { %5543 = vrot.lane.b32.xlu0 %v8345_v10, %s7655_s18  ;;  %v3509_v30 = vsel %vm3502_vm15, %v8550_v32, %v8554_v14  ;;  %v6029_v32 = vcombine.high %v6007_v26, %v6007_v26  ;;  %vm6821_vm15 = vcmask 277504  }
 0x148   : > { %7219 = vmatmul.mubr.msk.bf16.vlgmr.msra.gmra.mxu0 %vm260_vm2, %v7213_v18  ;;  %5545 = vrot.lane.b32.xlu1 %v5528_v16, %s7655_s18 }
 0x149   : > { %3291 = vmatpush1.bf16.msra.mxu0 %v3256_v33  ;;  %3308 = vmatprep.mubr.bf16.mxu0 %v7632_v5  ;;  %v8568_v17 = vpop.permute.xlu0 %3744 }
 0x14a   : > { %7226 = vmatprep.subr.msk.bf16.mxu0 %vm264_vm1, %v3250_v35  ;;  %v8572_v39 = vpop.permute.xlu1 %3746  ;;  %v6036_v35 = vrot.slane %v6007_v26, %v7704_v6 }
 0x14b   : > { %5547 = vrot.lane.b32.xlu0 %v5536_v36, %s7655_s18 }
 0x14c   : > { %7467 = vmatmul.mubr.msk.bf16.vlgmr.msra.gmra.mxu1 %vm260_vm2, %v7213_v18  ;;  %5549 = vrot.lane.b32.xlu1 %v5535_v37, %s7655_s18  ;;  %v3520_v18 = vsel %vm264_vm1, %v3505_v59, 0  ;;  %v3532_v37 = vsel %vm264_vm1, %v3509_v30, 0  ;;  %v6044_v47 = vcombine.high %v6036_v35, %v6036_v35 }
 0x14d   : > { %3332 = vmatpush1.bf16.msra.mxu1 %v3262_v38  ;;  %3349 = vmatprep.mubr.bf16.mxu1 %v7632_v5  ;;  %v8584_v42 = vpop.permute.xlu0 %3748 }
 0x14e   : > { %7470 = vmatprep.subr.bf16.mxu1 %v7642_v19  ;;  %v8588_v44 = vpop.permute.xlu1 %3750  ;;  %v3762_v16 = vsel %vm3760_vm0, %v8572_v39, %v8584_v42 }
 0x14f   : > { %5791 = vrot.lane.b32.xlu0 %v8303_v56, %s7656_s22 }
 0x150   : > { %v8599_v48 = vpop.f32.mrf.mxu0  ;;  %7223 = vmatmul.mubr.msk.bf16.vlgmr.msra.gmra.mxu0 %vm260_vm2, %v7221_v41  ;;  %5793 = vrot.lane.b32.xlu1 %v8318_v63, %s7656_s22 }
 0x151   : > { %3373 = vmatpush1.bf16.msra.mxu0 %v3268_v43  ;;  %3390 = vmatprep.mubr.bf16.mxu0 %v7632_v5  ;;  %v8605_v8 = vpop.permute.xlu0 %3752  ;;  %v3761_v43 = vsel %vm3760_vm0, %v8568_v17, %v8572_v39 }
 0x152   : > { %v8608_v49 = vpop.f32.mrf.mxu0  ;;  %7230 = vmatprep.subr.msk.bf16.mxu0 %vm264_vm1, %v3504_v46  ;;  %v8611_v11 = vpop.permute.xlu1 %3754  ;;  %v3764_v45 = vsel %vm3760_vm0, %v8588_v44, %v8605_v8 }
 0x153   : > { %5795 = vrot.lane.b32.xlu0 %v8329_v3, %s7656_s22 }
 0x154   : > { %v324_v53 = vpop.f32.mrf.mxu0  ;;  %v8622_v54 = vpop.f32.mrf.mxu1  ;;  %7225 = vmatmul.mubr.msk.bf16.vlgmr.msra.gmra.mxu1 %vm260_vm2, %v7221_v41  ;;  %5797 = vrot.lane.b32.xlu1 %v8345_v10, %s7656_s22 }
 0x155   : > { %7471 = vmatpush3.bf16.msra.mxu1 %v3274_v12  ;;  %7472 = vmatprep.mubr.msk.bf16.mxu1 %vm7643_vm3, %v7642_v19  ;;  %v8629_v57 = vpop.permute.xlu0 %3756  ;;  %v3763_v53 = vsel %vm3760_vm0, %v8584_v42, %v8588_v44 }
 0x156   : > { %v325_v58 = vpop.f32.mrf.mxu0  ;;  %v8631_v60 = vpop.f32.mrf.mxu1  ;;  %7232 = vmatprep.subr.msk.bf16.mxu1 %vm264_vm1, %v3506_v51  ;;  %v3778_v44 = vsel %vm264_vm1, %v3763_v53, 0 }
 0x157   : > { %v8641_v0 = vpop.permute.xlu1 %3758  ;;  %5799 = vrot.lane.b32.xlu0 %v5782_v50, %s7656_s22  ;;  %v3772_v50 = vsel %vm264_vm1, %v3761_v43, 0 }
 0x158   : > { %v365_v2 = vpop.f32.mrf.mxu1  ;;  %v8645_v7 = vpop.f32.mrf.mxu0  ;;  %7227 = vmatmul.mubr.msk.bf16.vlgmr.msra.gmra.mxu0 %vm260_vm2, %v7221_v41  ;;  %5801 = vrot.lane.b32.xlu1 %v5790_v55, %s7656_s22 }
 0x159   : > { %3549 = vmatpush1.bf16.msra.mxu0 %v3514_v61  ;;  %3566 = vmatprep.mubr.bf16.mxu0 %v7632_v5  ;;  %v8650_v4 = vpop.permute.xlu0 %4002  ;;  %v3765_v2 = vsel %vm3760_vm0, %v8605_v8, %v8611_v11  ;;  %v8771_v8 = vld [vmem:[%s9540_s1 + $0x38] sm:$0xf] }
 0x15a   : > { %v366_v9 = vpop.f32.mrf.mxu1  ;;  %v8652_v15 = vpop.f32.mrf.mxu0  ;;  %7234 = vmatprep.subr.msk.bf16.mxu0 %vm264_vm1, %v3508_v62 }
 0x15b   : > { %v8659_v21 = vpop.permute.xlu1 %4004  ;;  %5803 = vrot.lane.b32.xlu0 %v5789_v1, %s7656_s22  ;;  %v6261_v9 = vld [vmem:[%s7702_s20 + $0xa] sm:$0x3f] }
 0x15c   : > { %v406_v22 = vpop.f32.mrf.mxu0  ;;  %v8662_v23 = vpop.f32.mrf.mxu1  ;;  %7473 = vmatmul.mubr.msk.bf16.vlgmr.msra.gmra.mxu1 %vm260_vm2, %v7221_v41  ;;  %6045 = vrot.lane.b32.xlu1 %v8303_v56, %s7657_s23  ;;  %v6283_v30 = vcombine.high %v6261_v9, %v6261_v9 }
 0x15d   : > { %3590 = vmatpush1.bf16.msra.mxu1 %v3520_v18  ;;  %3607 = vmatprep.mubr.bf16.mxu1 %v7632_v5  ;;  %v8673_v25 = vpop.permute.xlu0 %4006  ;;  %v3784_v22 = vsel %vm264_vm1, %v3765_v2, 0 }
 0x15e   : > { %v407_v27 = vpop.f32.mrf.mxu0  ;;  %v7402_v28 = vpop.f32.mrf.mxu1  ;;  %7476 = vmatprep.subr.bf16.mxu1 %v7642_v19 }
 0x15f   : > { %v8684_v31 = vpop.permute.xlu1 %4008  ;;  %6047 = vrot.lane.b32.xlu0 %v8318_v63, %s7657_s23  ;;  %v6290_v27 = vrot.slane %v6261_v9, %v7704_v6  ;;  %v4020_v28 = vsel %vm4018_vm4, %v8659_v21, %v8673_v25 }
 0x160   : > { %v446_v33 = vpop.f32.mrf.mxu1  ;;  %v507_v34 = vpop.f32.mrf.mxu0  ;;  %7231 = vmatmul.mubr.msk.bf16.vlgmr.msra.gmra.mxu0 %vm260_vm2, %v8670_v24  ;;  %6049 = vrot.lane.b32.xlu1 %v8329_v3, %s7657_s23 }
 0x161   : > { %v8694_v14 = vadd.f32 %v507_v34, %v8599_v48  ;;  %3631 = vmatpush1.bf16.msra.mxu0 %v3526_v29  ;;  %3648 = vmatprep.mubr.bf16.mxu0 %v7632_v5  ;;  %v8697_v36 = vpop.permute.xlu0 %4010  ;;  %v6298_v34 = vcombine.high %v6290_v27, %v6290_v27 }
 0x162   : > { %v7403_v38 = vpop.f32.mrf.mxu1  ;;  %v509_v40 = vpop.f32.mrf.mxu0  ;;  %7238 = vmatprep.subr.msk.bf16.mxu0 %vm264_vm1, %v3762_v16 }
 0x163   : > { %v8702_v41 = vadd.f32 %v509_v40, %v8608_v49  ;;  %v8710_v46 = vpop.permute.xlu1 %4012  ;;  %6051 = vrot.lane.b32.xlu0 %v8345_v10, %s7657_s23  ;;  %v6043_v49 = vrot.slane %v6029_v32, %v7704_v6  ;;  %v4019_v40 = vsel %vm4018_vm4, %v8650_v4, %v8659_v21 }
 0x164   : > { %v511_v48 = vpop.f32.mrf.mxu0  ;;  %v548_v12 = vpop.f32.mrf.mxu1  ;;  %7233 = vmatmul.mubr.msk.bf16.vlgmr.msra.gmra.mxu1 %vm260_vm2, %v8670_v24  ;;  %6053 = vrot.lane.b32.xlu1 %v6036_v35, %s7657_s23  ;;  %v4030_v21 = vsel %vm264_vm1, %v4019_v40, 0 }
 0x165   : > { %v8719_v17 = vadd.f32 %v548_v12, %v8622_v54  ;;  %7477 = vmatpush3.bf16.msra.mxu1 %v3532_v37  ;;  %7478 = vmatprep.mubr.msk.bf16.mxu1 %vm7643_vm3, %v7642_v19  ;;  %v8723_v39 = vpop.permute.xlu0 %4014  ;;  %v3766_v54 = vsel %vm3760_vm0, %v8611_v11, %v8629_v57 }
 0x166   : > { %v512_v13 = vpop.f32.mrf.mxu0  ;;  %v550_v51 = vpop.f32.mrf.mxu1  ;;  %7240 = vmatprep.subr.msk.bf16.mxu1 %vm264_vm1, %v3764_v45  ;;  %v6297_v45 = vrot.slane %v6283_v30, %v7704_v6 }
 0x167   : > { %v8728_v52 = vadd.f32 %v550_v51, %v8631_v60  ;;  %v8736_v55 = vpop.permute.xlu1 %4016  ;;  %6055 = vrot.lane.b32.xlu0 %v6044_v47, %s7657_s23  ;;  %v4024_v13 = vsel %vm4018_vm4, %v8710_v46, %v8723_v39 }
 0x168   : > { %v552_v58 = vpop.f32.mrf.mxu1  ;;  %v589_v61 = vpop.f32.mrf.mxu0  ;;  %7235 = vmatmul.mubr.msk.bf16.vlgmr.msra.gmra.mxu0 %vm260_vm2, %v8670_v24  ;;  %6057 = vrot.lane.b32.xlu1 %v6043_v49, %s7657_s23 }
 0x169   : > { %v8743_v60 = vadd.f32 %v589_v61, %v8645_v7  ;;  %3807 = vmatpush1.bf16.msra.mxu0 %v3772_v50  ;;  %3824 = vmatprep.mubr.bf16.mxu0 %v7632_v5  ;;  %v8746_v42 = vpop.permute.xlu0 %4260 }
 0x16a   : > { %v553_v59 = vpop.f32.mrf.mxu1  ;;  %v591_v62 = vpop.f32.mrf.mxu0  ;;  %7242 = vmatprep.subr.msk.bf16.mxu0 %vm264_vm1, %v3766_v54 }
 0x16b   : > { %v8751_v1 = vadd.f32 %v591_v62, %v8652_v15  ;;  %v8756_v7 = vpop.permute.xlu1 %4262  ;;  %6299 = vrot.lane.b32.xlu0 %v8303_v56, %s7658_s26 }
 0x16c   : > { %v593_v18 = vpop.f32.mrf.mxu0  ;;  %v630_v20 = vpop.f32.mrf.mxu1  ;;  %7479 = vmatmul.mubr.msk.bf16.vlgmr.msra.gmra.mxu1 %vm260_vm2, %v8670_v24  ;;  %6301 = vrot.lane.b32.xlu1 %v8318_v63, %s7658_s26 }
 0x16d   : > { %v8766_v15 = vadd.f32 %v630_v20, %v8662_v23  ;;  %3848 = vmatpush1.bf16.msra.mxu1 %v3778_v44  ;;  %3865 = vmatprep.mubr.bf16.mxu1 %v7632_v5  ;;  %v8774_v11 = vpop.permute.xlu0 %4264  ;;  %v3767_v23 = vsel %vm3760_vm0, %v8629_v57, %v8641_v0 }
 0x16e   : > { %v594_v24 = vpop.f32.mrf.mxu0  ;;  %v7408_v26 = vpop.f32.mrf.mxu1  ;;  %7482 = vmatprep.subr.bf16.mxu1 %v7642_v19  ;;  %v3790_v35 = vsel %vm264_vm1, %v3767_v23, 0 }
 0x16f   : > { %v8785_v29 = vpop.permute.xlu1 %4266  ;;  %6303 = vrot.lane.b32.xlu0 %v8329_v3, %s7658_s26  ;;  %v6768_v26 = vld [vmem:[%s7702_s20 + $0x2] sm:$0xff] }
 0x170   : > { %v633_v16 = vpop.f32.mrf.mxu1  ;;  %v754_v33 = vpop.f32.mrf.mxu0  ;;  %7239 = vmatmul.mubr.msk.bf16.vlgmr.msra.gmra.mxu0 %vm260_vm2, %v8771_v8  ;;  %6305 = vrot.lane.b32.xlu1 %v8345_v10, %s7658_s26 }
 0x171   : > { %v8794_v57 = vadd.f32 %v754_v33, %v8694_v14  ;;  %3889 = vmatpush1.bf16.msra.mxu0 %v3784_v22  ;;  %3906 = vmatprep.mubr.bf16.mxu0 %v7632_v5  ;;  %v8797_v0 = vpop.permute.xlu0 %4268  ;;  %v4022_v14 = vsel %vm4018_vm4, %v8684_v31, %v8697_v36  ;;  %v6781_v33 = vrot.slane %v6768_v26, %v7704_v6 }
 0x172   : > { %v7409_v32 = vpop.f32.mrf.mxu1  ;;  %v756_v37 = vpop.f32.mrf.mxu0  ;;  %7246 = vmatprep.subr.msk.bf16.mxu0 %vm264_vm1, %v4020_v28 }
 0x173   : > { %v8802_v38 = vadd.f32 %v756_v37, %v8702_v41  ;;  %v8810_v43 = vpop.permute.xlu1 %4270  ;;  %6307 = vrot.lane.b32.xlu0 %v6290_v27, %s7658_s26  ;;  %v4280_v32 = vsel %vm4276_vm5, %v8785_v29, %v8797_v0 }
 0x174   : > { %v758_v47 = vpop.f32.mrf.mxu0  ;;  %v795_v48 = vpop.f32.mrf.mxu1  ;;  %7241 = vmatmul.mubr.msk.bf16.vlgmr.msra.gmra.mxu1 %vm260_vm2, %v8771_v8  ;;  %6309 = vrot.lane.b32.xlu1 %v6298_v34, %s7658_s26  ;;  %v6774_v34 = vcombine.high %v6768_v26, %v6768_v26 }
 0x175   : > { %v8818_v41 = vadd.f32 %v795_v48, %v8719_v17  ;;  %7483 = vmatpush3.bf16.msra.mxu1 %v3790_v35  ;;  %7484 = vmatprep.mubr.msk.bf16.mxu1 %vm7643_vm3, %v7642_v19  ;;  %v8822_v4 = vpop.permute.xlu0 %4272  ;;  %v4021_v17 = vsel %vm4018_vm4, %v8673_v25, %v8684_v31  ;;  %v6515_v31 = vld [vmem:[%s7702_s20 + $0xa] sm:$0x3f] }
 0x176   : > { %v759_v12 = vpop.f32.mrf.mxu0  ;;  %v797_v49 = vpop.f32.mrf.mxu1  ;;  %7248 = vmatprep.subr.msk.bf16.mxu1 %vm264_vm1, %v4022_v14  ;;  %v4036_v58 = vsel %vm264_vm1, %v4021_v17, 0  ;;  %v6537_v9 = vcombine.high %v6515_v31, %v6515_v31 }
 0x177   : > { %v8827_v50 = vadd.f32 %v797_v49, %v8728_v52  ;;  %v8835_v51 = vpop.permute.xlu1 %4274  ;;  %6311 = vrot.lane.b32.xlu0 %v6297_v45, %s7658_s26  ;;  %v4282_v49 = vsel %vm4276_vm5, %v8810_v43, %v8822_v4 }
 0x178   : > { %v799_v53 = vpop.f32.mrf.mxu1  ;;  %v836_v54 = vpop.f32.mrf.mxu0  ;;  %7243 = vmatmul.mubr.msk.bf16.vlgmr.msra.gmra.mxu0 %vm260_vm2, %v8771_v8  ;;  %6553 = vrot.lane.b32.xlu1 %v8303_v56, %s7659_s29  ;;  %v4023_v56 = vsel %vm4018_vm4, %v8697_v36, %v8710_v46 }
 0x179   : > { %v8843_v52 = vadd.f32 %v836_v54, %v8743_v60  ;;  %4065 = vmatpush1.bf16.msra.mxu0 %v4030_v21  ;;  %4082 = vmatprep.mubr.bf16.mxu0 %v7632_v5  ;;  %v8846_v25 = vpop.permute.xlu0 %4518  ;;  %v4042_v18 = vsel %vm264_vm1, %v4023_v56, 0  ;;  %v6788_v21 = vrot.slane %v6774_v34, %v7704_v6 }
 0x17a   : > { %v800_v61 = vpop.f32.mrf.mxu1  ;;  %v838_v44 = vpop.f32.mrf.mxu0  ;;  %7250 = vmatprep.subr.msk.bf16.mxu0 %vm264_vm1, %v4024_v13  ;;  %v6769_v13 = vld [vmem:[%s7702_s20 + $0xa] sm:$0x3f] }
 0x17b   : > { %v8852_v59 = vadd.f32 %v838_v44, %v8751_v1  ;;  %v8857_v60 = vpop.permute.xlu1 %4520  ;;  %6555 = vrot.lane.b32.xlu0 %v8318_v63, %s7659_s29  ;;  %v6544_v1 = vrot.slane %v6515_v31, %v7704_v6  ;;  %v8872_v63 = vld [vmem:[%s9540_s1 + $0x3c] sm:$0xf]  ;;  %v6798_v44 = vrot.slane %v6769_v13, %v7704_v6 }
 0x17c   : > { %v840_v62 = vpop.f32.mrf.mxu0  ;;  %v877_v2 = vpop.f32.mrf.mxu1  ;;  %7485 = vmatmul.mubr.msk.bf16.vlgmr.msra.gmra.mxu1 %vm260_vm2, %v8771_v8  ;;  %6557 = vrot.lane.b32.xlu1 %v8329_v3, %s7659_s29  ;;  %v4278_v8 = vsel %vm4276_vm5, %v8756_v7, %v8774_v11 }
 0x17d   : > { %v8867_v36 = vadd.f32 %v877_v2, %v8766_v15  ;;  %4106 = vmatpush1.bf16.msra.mxu1 %v4036_v58  ;;  %4123 = vmatprep.mubr.bf16.mxu1 %v7632_v5  ;;  %v8875_v46 = vpop.permute.xlu0 %4522  ;;  %v4025_v15 = vsel %vm4018_vm4, %v8723_v39, %v8736_v55  ;;  %v6552_v24 = vcombine.high %v6544_v1, %v6544_v1 }
 0x17e   : > { %v841_v3 = vpop.f32.mrf.mxu0  ;;  %v7414_v20 = vpop.f32.mrf.mxu1  ;;  %7488 = vmatprep.subr.bf16.mxu1 %v7642_v19  ;;  %v6551_v39 = vrot.slane %v6537_v9, %v7704_v6  ;;  %v6791_v2 = vcombine.high %v6769_v13, %v6769_v13 }
 0x17f   : > { %v8885_v22 = vpop.permute.xlu1 %4524  ;;  %6559 = vrot.lane.b32.xlu0 %v8345_v10, %s7659_s29  ;;  %v4048_v10 = vsel %vm264_vm1, %v4025_v15, 0  ;;  %v4536_v15 = vsel %vm4534_vm6, %v8857_v60, %v8875_v46 }
 0x180   : > { %v880_v27 = vpop.f32.mrf.mxu1  ;;  %v1008_v23 = vpop.f32.mrf.mxu0  ;;  %7247 = vmatmul.mubr.msk.bf16.vlgmr.msra.gmra.mxu0 %vm260_vm2, %v8872_v63  ;;  %6561 = vrot.lane.b32.xlu1 %v6544_v1, %s7659_s29 }
 0x181   : > { %v8895_v55 = vadd.f32 %v1008_v23, %v8794_v57  ;;  %4147 = vmatpush1.bf16.msra.mxu0 %v4042_v18  ;;  %4164 = vmatprep.mubr.bf16.mxu0 %v7632_v5  ;;  %v8898_v28 = vpop.permute.xlu0 %4526  ;;  %v4277_v57 = vsel %vm4276_vm5, %v8746_v42, %v8756_v7  ;;  %v6806_v18 = vcombine.high %v6798_v44, %v6798_v44 }
 0x182   : > { %v7415_v30 = vpop.f32.mrf.mxu1  ;;  %v1010_v16 = vpop.f32.mrf.mxu0  ;;  %7254 = vmatprep.subr.msk.bf16.mxu0 %vm264_vm1, %v4278_v8  ;;  %v4288_v7 = vsel %vm264_vm1, %v4277_v57, 0 }
 0x183   : > { %v8904_v35 = vadd.f32 %v1010_v16, %v8802_v38  ;;  %v8912_v37 = vpop.permute.xlu1 %4528  ;;  %6563 = vrot.lane.b32.xlu0 %v6552_v24, %s7659_s29  ;;  %v6789_v38 = vcombine.high %v6781_v33, %v6781_v33  ;;  %v6805_v24 = vrot.slane %v6791_v2, %v7704_v6  ;;  %v4535_v30 = vsel %vm4534_vm6, %v8846_v25, %v8857_v60 }
 0x184   : > { %v1012_v40 = vpop.f32.mrf.mxu0  ;;  %v1049_v14 = vpop.f32.mrf.mxu1  ;;  %7249 = vmatmul.mubr.msk.bf16.vlgmr.msra.gmra.mxu1 %vm260_vm2, %v8872_v63  ;;  %6565 = vrot.lane.b32.xlu1 %v6551_v39, %s7659_s29  ;;  %v4546_v25 = vsel %vm264_vm1, %v4535_v30, 0 }
 0x185   : > { %v8919_v45 = vadd.f32 %v1049_v14, %v8818_v41  ;;  %7489 = vmatpush3.bf16.msra.mxu1 %v4048_v10  ;;  %7490 = vmatprep.mubr.msk.bf16.mxu1 %vm7643_vm3, %v7642_v19  ;;  %v8923_v42 = vpop.permute.xlu0 %4530  ;;  %v4279_v41 = vsel %vm4276_vm5, %v8774_v11, %v8785_v29  ;;  %v4537_v14 = vsel %vm4534_vm6, %v8875_v46, %v8885_v22 }
 0x186   : > { %v1013_v47 = vpop.f32.mrf.mxu0  ;;  %v1051_v48 = vpop.f32.mrf.mxu1  ;;  %7256 = vmatprep.subr.msk.bf16.mxu1 %vm264_vm1, %v4280_v32  ;;  %v4294_v31 = vsel %vm264_vm1, %v4279_v41, 0 }
 0x187   : > { %v8929_v12 = vadd.f32 %v1051_v48, %v8827_v50  ;;  %v8937_v17 = vpop.permute.xlu1 %4532  ;;  %6807 = vrot.lane.b32.xlu0 %v6781_v33, %s7660_s6  ;;  %v6790_v50 = vcombine.high %v6788_v21, %v6788_v21 }
 0x188   : > { %v1053_v53 = vpop.f32.mrf.mxu1  ;;  %v1090_v54 = vpop.f32.mrf.mxu0  ;;  %7251 = vmatmul.mubr.msk.bf16.vlgmr.msra.gmra.mxu0 %vm260_vm2, %v8872_v63  ;;  %6809 = vrot.lane.b32.xlu1 %v6789_v38, %s7660_s6  ;;  %v4540_v38 = vsel %vm4534_vm6, %v8912_v37, %v8923_v42 }
 0x189   : > { %v8945_v11 = vadd.f32 %v1090_v54, %v8843_v52  ;;  %4323 = vmatpush1.bf16.msra.mxu0 %v4288_v7  ;;  %4340 = vmatprep.mubr.bf16.mxu0 %v7632_v5  ;;  %v8948_v29 = vpop.permute.xlu0 %4775  ;;  %v4281_v52 = vsel %vm4276_vm5, %v8797_v0, %v8810_v43  ;;  %v7253_v0 = vld [vmem:[%s9540_s1 + $0x40] sm:$0xf] }
 0x18a   : > { %v1054_v58 = vpop.f32.mrf.mxu1  ;;  %v1092_v61 = vpop.f32.mrf.mxu0  ;;  %7258 = vmatprep.subr.msk.bf16.mxu0 %vm264_vm1, %v4282_v49  ;;  %v4300_v3 = vsel %vm264_vm1, %v4281_v52, 0  ;;  %v4539_v49 = vsel %vm4534_vm6, %v8898_v28, %v8912_v37 }
 0x18b   : > { %v8954_v56 = vadd.f32 %v1092_v61, %v8852_v59  ;;  %v8959_v62 = vpop.permute.xlu1 %4777  ;;  %6811 = vrot.lane.b32.xlu0 %v6788_v21, %s7660_s6  ;;  %v4541_v61 = vsel %vm4534_vm6, %v8923_v42, %v8937_v17 }
 0x18c   : > { %v1094_v1 = vpop.f32.mrf.mxu0  ;;  %v1131_v9 = vpop.f32.mrf.mxu1  ;;  %7491 = vmatmul.mubr.msk.bf16.vlgmr.msra.gmra.mxu1 %vm260_vm2, %v8872_v63  ;;  %6813 = vrot.lane.b32.xlu1 %v6790_v50, %s7660_s6 }
 0x18d   : > { %v8966_v59 = vadd.f32 %v1131_v9, %v8867_v36  ;;  %4364 = vmatpush1.bf16.msra.mxu1 %v4294_v31  ;;  %4381 = vmatprep.mubr.bf16.mxu1 %v7632_v5  ;;  %v8972_v43 = vpop.permute.xlu0 %4779  ;;  %v4283_v36 = vsel %vm4276_vm5, %v8822_v4, %v8835_v51 }
 0x18e   : > { %v1095_v20 = vpop.f32.mrf.mxu0  ;;  %v7420_v63 = vpop.f32.mrf.mxu1  ;;  %7494 = vmatprep.subr.bf16.mxu1 %v7642_v19  ;;  %v4306_v51 = vsel %vm264_vm1, %v4283_v36, 0 }
 0x18f   : > { %v8982_v8 = vpop.permute.xlu1 %4781  ;;  %6815 = vrot.lane.b32.xlu0 %v6798_v44, %s7660_s6  ;;  %v4791_v44 = vsel %vm4789_vm7, %v8959_v62, %v8972_v43 }
 0x190   : > { %v1134_v26 = vpop.f32.mrf.mxu1  ;;  %v1262_v27 = vpop.f32.mrf.mxu0  ;;  %7255 = vmatmul.mubr.msk.bf16.vlgmr.msra.gmra.mxu0 %vm260_vm2, %v7253_v0  ;;  %6817 = vrot.lane.b32.xlu1 %v6806_v18, %s7660_s6  ;;  %v4564_v18 = vsel %vm264_vm1, %v4541_v61, 0 }
 0x191   : > { %v1391_v23 = vadd.f32 %v1262_v27, %v8895_v55  ;;  %4405 = vmatpush1.bf16.msra.mxu0 %v4300_v3  ;;  %4422 = vmatprep.mubr.bf16.mxu0 %v7632_v5  ;;  %v8990_v4 = vpop.permute.xlu0 %4783  ;;  %v4538_v55 = vsel %vm4534_vm6, %v8885_v22, %v8898_v28  ;;  %v4558_v28 = vsel %vm264_vm1, %v4539_v49, 0 }
 0x192   : > { %v7421_v39 = vpop.f32.mrf.mxu1  ;;  %v1264_v10 = vpop.f32.mrf.mxu0  ;;  %7262 = vmatprep.subr.msk.bf16.mxu0 %vm264_vm1, %v4536_v15  ;;  %v4793_v3 = vsel %vm4789_vm7, %v8982_v8, %v8990_v4 }
 0x193   : > { %v1392_v6 = vadd.f32 %v1264_v10, %v8904_v35  ;;  %v9001_v16 = vpop.permute.xlu1 %4785  ;;  %6819 = vrot.lane.b32.xlu0 %v6805_v24, %s7660_s6 }
 0x194   : > { %v1266_v33 = vpop.f32.mrf.mxu0  ;;  %v1303_v34 = vpop.f32.mrf.mxu1  ;;  %7257 = vmatmul.mubr.msk.bf16.vlgmr.msra.gmra.mxu1 %vm260_vm2, %v7253_v0 }
 0x195   : > { %v1393_v57 = vadd.f32 %v1303_v34, %v8919_v45  ;;  %7495 = vmatpush3.bf16.msra.mxu1 %v4306_v51  ;;  %7496 = vmatprep.mubr.msk.bf16.mxu1 %vm7643_vm3, %v7642_v19  ;;  %v9008_v35 = vpop.permute.xlu0 %4787 }
 0x196   : > { %v1267_v60 = vpop.f32.mrf.mxu0  ;;  %v1305_v32 = vpop.f32.mrf.mxu1  ;;  %7264 = vmatprep.subr.msk.bf16.mxu1 %vm264_vm1, %v4538_v55  ;;  %v4795_v51 = vsel %vm4789_vm7, %v9001_v16, %v9008_v35  ;;  %v4818_v49 = vsel %vm264_vm1, %v9008_v35, 0 }
 0x197   : > { %v1394_v40 = vadd.f32 %v1305_v32, %v8929_v12  ;;  %v9019_v45 = vpop.permute.xlu1 %5029  ;;  %v4552_v12 = vsel %vm264_vm1, %v4537_v14, 0  ;;  %v7269_v14 = vld [vmem:[%s9540_s1 + $0x48] sm:$0xf] }
 0x198   : > { %v1307_v7 = vpop.f32.mrf.mxu1  ;;  %v1344_v47 = vpop.f32.mrf.mxu0  ;;  %7259 = vmatmul.mubr.msk.bf16.vlgmr.msra.gmra.mxu0 %vm260_vm2, %v7253_v0 }
 0x199   : > { %v1395_v48 = vadd.f32 %v1344_v47, %v8945_v11  ;;  %4581 = vmatpush1.bf16.msra.mxu0 %v4546_v25  ;;  %4598 = vmatprep.mubr.bf16.mxu0 %v7632_v5  ;;  %v9024_v21 = vpop.permute.xlu0 %5031  ;;  %v7261_v11 = vld [vmem:[%s9540_s1 + $0x44] sm:$0xf] }
 0x19a   : > { %v1308_v46 = vpop.f32.mrf.mxu1  ;;  %v1346_v22 = vpop.f32.mrf.mxu0  ;;  %7266 = vmatprep.subr.msk.bf16.mxu0 %vm264_vm1, %v4540_v38 }
 0x19b   : > { %v1396_v41 = vadd.f32 %v1346_v22, %v8954_v56  ;;  %v9032_v13 = vpop.permute.xlu1 %5033 }
 0x19c   : > { %v1348_v53 = vpop.f32.mrf.mxu0  ;;  %v1385_v54 = vpop.f32.mrf.mxu1  ;;  %7497 = vmatmul.mubr.msk.bf16.vlgmr.msra.gmra.mxu1 %vm260_vm2, %v7253_v0  ;;  %v4790_v0 = vsel %vm4789_vm7, %v8948_v29, %v8959_v62  ;;  %v5045_v47 = vsel %vm5043_vm8, %v9024_v21, %v9032_v13 }
 0x19d   : > { %v1397_v50 = vadd.f32 %v1385_v54, %v8966_v59  ;;  %4622 = vmatpush1.bf16.msra.mxu1 %v4552_v12  ;;  %4639 = vmatprep.mubr.bf16.mxu1 %v7632_v5  ;;  %v9040_v31 = vpop.permute.xlu0 %5035  ;;  %v4800_v26 = vsel %vm264_vm1, %v4790_v0, 0 }
 0x19e   : > { %v1349_v37 = vpop.f32.mrf.mxu0  ;;  %v7426_v58 = vpop.f32.mrf.mxu1  ;;  %7500 = vmatprep.subr.bf16.mxu1 %v7642_v19 }
 0x19f   : > { %v9050_v56 = vpop.permute.xlu1 %5037 }
 0x1a0   : > { %v1388_v52 = vpop.f32.mrf.mxu1  ;;  %v1516_v2 = vpop.f32.mrf.mxu0  ;;  %7263 = vmatmul.mubr.msk.bf16.vlgmr.msra.gmra.mxu0 %vm260_vm2, %v7261_v11 }
 0x1a1   : > { %v1645_v1 = vadd.f32 %v1516_v2, %v1391_v23  ;;  %4663 = vmatpush1.bf16.msra.mxu0 %v4558_v28  ;;  %4680 = vmatprep.mubr.bf16.mxu0 %v7632_v5  ;;  %v9054_v9 = vpop.permute.xlu0 %5039  ;;  %v4792_v23 = vsel %vm4789_vm7, %v8972_v43, %v8982_v8  ;;  %v5047_v28 = vsel %vm5043_vm8, %v9040_v31, %v9050_v56 }
 0x1a2   : > { %v7427_v59 = vpop.f32.mrf.mxu1  ;;  %v1518_v42 = vpop.f32.mrf.mxu0  ;;  %7270 = vmatprep.subr.msk.bf16.mxu0 %vm264_vm1, %v4791_v44  ;;  %v4806_v33 = vsel %vm264_vm1, %v4792_v23, 0 }
 0x1a3   : > { %v1646_v17 = vadd.f32 %v1518_v42, %v1392_v6  ;;  %v9064_v20 = vpop.permute.xlu1 %5041 }
 0x1a4   : > { %v1520_v63 = vpop.f32.mrf.mxu0  ;;  %v1557_v36 = vpop.f32.mrf.mxu1  ;;  %7265 = vmatmul.mubr.msk.bf16.vlgmr.msra.gmra.mxu1 %vm260_vm2, %v7261_v11 }
 0x1a5   : > { %v1647_v15 = vadd.f32 %v1557_v36, %v1393_v57  ;;  %7501 = vmatpush3.bf16.msra.mxu1 %v4564_v18  ;;  %7502 = vmatprep.mubr.msk.bf16.mxu1 %vm7643_vm3, %v7642_v19  ;;  %v9069_v24 = vpop.permute.xlu0 %5283  ;;  %v4794_v57 = vsel %vm4789_vm7, %v8990_v4, %v9001_v16  ;;  %v5049_v18 = vsel %vm5043_vm8, %v9054_v9, %v9064_v20 }
 0x1a6   : > { %v1521_v29 = vpop.f32.mrf.mxu0  ;;  %v1559_v62 = vpop.f32.mrf.mxu1  ;;  %7272 = vmatprep.subr.msk.bf16.mxu1 %vm264_vm1, %v4793_v3  ;;  %v4812_v7 = vsel %vm264_vm1, %v4794_v57, 0 }
 0x1a7   : > { %v1648_v27 = vadd.f32 %v1559_v62, %v1394_v40  ;;  %v9079_v39 = vpop.permute.xlu1 %5285 }
 0x1a8   : > { %v1561_v10 = vpop.f32.mrf.mxu1  ;;  %v1598_v6 = vpop.f32.mrf.mxu0  ;;  %7267 = vmatmul.mubr.msk.bf16.vlgmr.msra.gmra.mxu0 %vm260_vm2, %v7261_v11 }
 0x1a9   : > { %v1649_v30 = vadd.f32 %v1598_v6, %v1395_v48  ;;  %4835 = vmatpush1.bf16.msra.mxu0 %v4800_v26  ;;  %4852 = vmatprep.mubr.bf16.mxu0 %v7632_v5  ;;  %v9083_v55 = vpop.permute.xlu0 %5287 }
 0x1aa   : > { %v1562_v34 = vpop.f32.mrf.mxu1  ;;  %v1600_v43 = vpop.f32.mrf.mxu0  ;;  %7274 = vmatprep.subr.msk.bf16.mxu0 %vm264_vm1, %v4795_v51  ;;  %v5299_v6 = vsel %vm5297_vm9, %v9079_v39, %v9083_v55 }
 0x1ab   : > { %v1650_v8 = vadd.f32 %v1600_v43, %v1396_v41  ;;  %v9090_v25 = vpop.permute.xlu1 %5289 }
 0x1ac   : > { %v1602_v60 = vpop.f32.mrf.mxu0  ;;  %v1639_v32 = vpop.f32.mrf.mxu1  ;;  %7503 = vmatmul.mubr.msk.bf16.vlgmr.msra.gmra.mxu1 %vm260_vm2, %v7261_v11  ;;  %v5044_v11 = vsel %vm5043_vm8, %v9019_v45, %v9024_v21 }
 0x1ad   : > { %v1651_v40 = vadd.f32 %v1639_v32, %v1397_v50  ;;  %4876 = vmatpush1.bf16.msra.mxu1 %v4806_v33  ;;  %4893 = vmatprep.mubr.bf16.mxu1 %v7632_v5  ;;  %v9097_v38 = vpop.permute.xlu0 %5291  ;;  %v5054_v52 = vsel %vm264_vm1, %v5044_v11, 0 }
 0x1ae   : > { %v1603_v4 = vpop.f32.mrf.mxu0  ;;  %v7432_v16 = vpop.f32.mrf.mxu1  ;;  %7506 = vmatprep.subr.bf16.mxu1 %v7642_v19 }
 0x1af   : > { %v9104_v48 = vpop.permute.xlu1 %5293 }
 0x1b0   : > { %v1642_v12 = vpop.f32.mrf.mxu1  ;;  %v1770_v46 = vpop.f32.mrf.mxu0  ;;  %7271 = vmatmul.mubr.msk.bf16.vlgmr.msra.gmra.mxu0 %vm260_vm2, %v7269_v14 }
 0x1b1   : > { %v1899_v22 = vadd.f32 %v1770_v46, %v1645_v1  ;;  %4917 = vmatpush1.bf16.msra.mxu0 %v4812_v7  ;;  %4934 = vmatprep.mubr.bf16.mxu0 %v7632_v5  ;;  %v9108_v41 = vpop.permute.xlu0 %5295  ;;  %v5046_v1 = vsel %vm5043_vm8, %v9032_v13, %v9040_v31 }
 0x1b2   : > { %v7433_v53 = vpop.f32.mrf.mxu1  ;;  %v1772_v54 = vpop.f32.mrf.mxu0  ;;  %7278 = vmatprep.subr.msk.bf16.mxu0 %vm264_vm1, %v5045_v47  ;;  %v5060_v63 = vsel %vm264_vm1, %v5046_v1, 0 }
 0x1b3   : > { %v1900_v50 = vadd.f32 %v1772_v54, %v1646_v17  ;;  %v9119_v37 = vpop.permute.xlu1 %5537 }
 0x1b4   : > { %v1774_v58 = vpop.f32.mrf.mxu0  ;;  %v1811_v61 = vpop.f32.mrf.mxu1  ;;  %7273 = vmatmul.mubr.msk.bf16.vlgmr.msra.gmra.mxu1 %vm260_vm2, %v7269_v14 }
 0x1b5   : > { %v1901_v35 = vadd.f32 %v1811_v61, %v1647_v15  ;;  %7507 = vmatpush3.bf16.msra.mxu1 %v4818_v49  ;;  %7508 = vmatprep.mubr.msk.bf16.mxu1 %vm7643_vm3, %v7642_v19  ;;  %v9124_v44 = vpop.permute.xlu0 %5539  ;;  %v5048_v15 = vsel %vm5043_vm8, %v9050_v56, %v9054_v9  ;;  %v5302_v61 = vsel %vm5297_vm9, %v9097_v38, %v9104_v48 }
 0x1b6   : > { %v1775_v45 = vpop.f32.mrf.mxu0  ;;  %v1813_v21 = vpop.f32.mrf.mxu1  ;;  %7280 = vmatprep.subr.msk.bf16.mxu1 %vm264_vm1, %v5047_v28  ;;  %v5066_v10 = vsel %vm264_vm1, %v5048_v15, 0 }
 0x1b7   : > { %v1902_v2 = vadd.f32 %v1813_v21, %v1648_v27  ;;  %v9134_v59 = vpop.permute.xlu1 %5541  ;;  %v7277_v27 = vld [vmem:[%s9540_s1 + $0x4c] sm:$0xf]  ;;  %v7285_v21 = vld [vmem:[%s9540_s1 + $0x50] sm:$0xf] }
 0x1b8   : > { %v1815_v42 = vpop.f32.mrf.mxu1  ;;  %v1852_v17 = vpop.f32.mrf.mxu0  ;;  %7275 = vmatmul.mubr.msk.bf16.vlgmr.msra.gmra.mxu0 %vm260_vm2, %v7269_v14 }
 0x1b9   : > { %v1903_v0 = vadd.f32 %v1852_v17, %v1649_v30  ;;  %5089 = vmatpush1.bf16.msra.mxu0 %v5054_v52  ;;  %5106 = vmatprep.mubr.bf16.mxu0 %v7632_v5  ;;  %v9138_v3 = vpop.permute.xlu0 %5543  ;;  %v5553_v42 = vsel %vm5551_vm10, %v9124_v44, %v9134_v59 }
 0x1ba   : > { %v1816_v36 = vpop.f32.mrf.mxu1  ;;  %v1854_v13 = vpop.f32.mrf.mxu0  ;;  %7282 = vmatprep.subr.msk.bf16.mxu0 %vm264_vm1, %v5049_v18  ;;  %v5320_v18 = vsel %vm264_vm1, %v5302_v61, 0 }
 0x1bb   : > { %v1904_v31 = vadd.f32 %v1854_v13, %v1650_v8  ;;  %v9150_v23 = vpop.permute.xlu1 %5545  ;;  %v5072_v8 = vsel %vm264_vm1, %v9064_v20, 0  ;;  %v5326_v36 = vsel %vm264_vm1, %v9108_v41, 0 }
 0x1bc   : > { %v1856_v26 = vpop.f32.mrf.mxu0  ;;  %v1893_v29 = vpop.f32.mrf.mxu1  ;;  %7509 = vmatmul.mubr.msk.bf16.vlgmr.msra.gmra.mxu1 %vm260_vm2, %v7269_v14  ;;  %v5301_v14 = vsel %vm5297_vm9, %v9090_v25, %v9097_v38 }
 0x1bd   : > { %v1905_v62 = vadd.f32 %v1893_v29, %v1651_v40  ;;  %5130 = vmatpush1.bf16.msra.mxu1 %v5060_v63  ;;  %5147 = vmatprep.mubr.bf16.mxu1 %v7632_v5  ;;  %v9152_v51 = vpop.permute.xlu0 %5547  ;;  %v5298_v40 = vsel %vm5297_vm9, %v9069_v24, %v9079_v39  ;;  %v5300_v39 = vsel %vm5297_vm9, %v9083_v55, %v9090_v25 }
 0x1be   : > { %v1857_v56 = vpop.f32.mrf.mxu0  ;;  %v7438_v9 = vpop.f32.mrf.mxu1  ;;  %7512 = vmatprep.subr.bf16.mxu1 %v7642_v19  ;;  %v5308_v47 = vsel %vm264_vm1, %v5298_v40, 0  ;;  %v5314_v28 = vsel %vm264_vm1, %v5300_v39, 0  ;;  %v5552_v26 = vsel %vm5551_vm10, %v9119_v37, %v9124_v44  ;;  %v5555_v29 = vsel %vm5551_vm10, %v9138_v3, %v9150_v23 }
 0x1bf   : > { %v9172_v7 = vpop.permute.xlu1 %5549  ;;  %v5562_v9 = vsel %vm264_vm1, %v5552_v26, 0 }
 0x1c0   : > { %v1896_v30 = vpop.f32.mrf.mxu1  ;;  %v2024_v33 = vpop.f32.mrf.mxu0  ;;  %7279 = vmatmul.mubr.msk.bf16.vlgmr.msra.gmra.mxu0 %vm260_vm2, %v7277_v27 }
 0x1c1   : > { %v2153_v34 = vadd.f32 %v2024_v33, %v1899_v22  ;;  %5171 = vmatpush1.bf16.msra.mxu0 %v5066_v10  ;;  %5188 = vmatprep.mubr.bf16.mxu0 %v7632_v5  ;;  %v9161_v43 = vpop.permute.xlu0 %5791  ;;  %v5303_v22 = vsel %vm5297_vm9, %v9104_v48, %v9108_v41  ;;  %v5554_v30 = vsel %vm5551_vm10, %v9134_v59, %v9138_v3 }
 0x1c2   : > { %v7439_v57 = vpop.f32.mrf.mxu1  ;;  %v2026_v60 = vpop.f32.mrf.mxu0  ;;  %7286 = vmatprep.subr.msk.bf16.mxu0 %vm264_vm1, %v5299_v6  ;;  %v5557_v33 = vsel %vm5551_vm10, %v9152_v51, %v9172_v7  ;;  %v5568_v40 = vsel %vm264_vm1, %v5554_v30, 0 }
 0x1c3   : > { %v2154_v32 = vadd.f32 %v2026_v60, %v1900_v50  ;;  %v9185_v49 = vpop.permute.xlu1 %5793 }
 0x1c4   : > { %v2028_v4 = vpop.f32.mrf.mxu0  ;;  %v2065_v16 = vpop.f32.mrf.mxu1  ;;  %7281 = vmatmul.mubr.msk.bf16.vlgmr.msra.gmra.mxu1 %vm260_vm2, %v7277_v27  ;;  %v5806_v61 = vsel %vm5805_vm11, %v9161_v43, %v9185_v49 }
 0x1c5   : > { %v2155_v20 = vadd.f32 %v2065_v16, %v1901_v35  ;;  %7513 = vmatpush3.bf16.msra.mxu1 %v5072_v8  ;;  %7514 = vmatprep.mubr.msk.bf16.mxu1 %vm7643_vm3, %v7642_v19  ;;  %v9187_v53 = vpop.permute.xlu0 %5795  ;;  %v5556_v4 = vsel %vm5551_vm10, %v9150_v23, %v9152_v51 }
 0x1c6   : > { %v2029_v12 = vpop.f32.mrf.mxu0  ;;  %v2067_v46 = vpop.f32.mrf.mxu1  ;;  %7288 = vmatprep.subr.msk.bf16.mxu1 %vm264_vm1, %v5301_v14  ;;  %v5807_v23 = vsel %vm5805_vm11, %v9185_v49, %v9187_v53 }
 0x1c7   : > { %v2156_v24 = vadd.f32 %v2067_v46, %v1902_v2  ;;  %v9201_v2 = vpop.permute.xlu1 %5797  ;;  %v7293_v12 = vld [vmem:[%s9540_s1 + $0x54] sm:$0xf] }
 0x1c8   : > { %v2069_v54 = vpop.f32.mrf.mxu1  ;;  %v2106_v50 = vpop.f32.mrf.mxu0  ;;  %7283 = vmatmul.mubr.msk.bf16.vlgmr.msra.gmra.mxu0 %vm260_vm2, %v7277_v27 }
 0x1c9   : > { %v2157_v11 = vadd.f32 %v2106_v50, %v1903_v0  ;;  %5343 = vmatpush1.bf16.msra.mxu0 %v5308_v47  ;;  %5360 = vmatprep.mubr.bf16.mxu0 %v7632_v5  ;;  %v9203_v1 = vpop.permute.xlu0 %5799 }
 0x1ca   : > { %v2070_v58 = vpop.f32.mrf.mxu1  ;;  %v2108_v55 = vpop.f32.mrf.mxu0  ;;  %7290 = vmatprep.subr.msk.bf16.mxu0 %vm264_vm1, %v5303_v22 }
 0x1cb   : > { %v2158_v25 = vadd.f32 %v2108_v55, %v1904_v31 }
 0x1cc   : > { %v2110_v35 = vpop.f32.mrf.mxu0  ;;  %v2147_v52 = vpop.f32.mrf.mxu1  ;;  %7515 = vmatmul.mubr.msk.bf16.vlgmr.msra.gmra.mxu1 %vm260_vm2, %v7277_v27 }
 0x1cd   : > { %v2159_v45 = vadd.f32 %v2147_v52, %v1905_v62  ;;  %5384 = vmatpush1.bf16.msra.mxu1 %v5314_v28  ;;  %5401 = vmatprep.mubr.bf16.mxu1 %v7632_v5  ;;  %v9221_v62 = vpop.permute.xlu1 %5801  ;;  %v9223_v27 = vpop.permute.xlu0 %5803  ;;  %v5580_v28 = vsel %vm264_vm1, %v9172_v7, 0  ;;  %v5809_v35 = vsel %vm5805_vm11, %v9201_v2, %v9203_v1 }
 0x1ce   : > { %v2111_v38 = vpop.f32.mrf.mxu0  ;;  %v7444_v48 = vpop.f32.mrf.mxu1  ;;  %7518 = vmatprep.subr.bf16.mxu1 %v7642_v19 }
 0x1cf   : > { %v5816_v38 = vsel %vm264_vm1, %v5806_v61, 0 }
 0x1d0   : > { %v2150_v17 = vpop.f32.mrf.mxu1  ;;  %v2278_v0 = vpop.f32.mrf.mxu0  ;;  %7287 = vmatmul.mubr.msk.bf16.vlgmr.msra.gmra.mxu0 %vm260_vm2, %v7285_v21 }
 0x1d1   : > { %v2407_v63 = vadd.f32 %v2278_v0, %v2153_v34  ;;  %5425 = vmatpush1.bf16.msra.mxu0 %v5320_v18  ;;  %5442 = vmatprep.mubr.bf16.mxu0 %v7632_v5  ;;  %v9236_v34 = vpop.permute.xlu0 %6047  ;;  %v5811_v17 = vsel %vm5805_vm11, %v9221_v62, %v9223_v27 }
 0x1d2   : > { %v7445_v13 = vpop.f32.mrf.mxu1  ;;  %v2280_v31 = vpop.f32.mrf.mxu0  ;;  %7294 = vmatprep.subr.msk.bf16.mxu0 %vm264_vm1, %v5553_v42  ;;  %v5808_v42 = vsel %vm5805_vm11, %v9187_v53, %v9201_v2  ;;  %v5810_v2 = vsel %vm5805_vm11, %v9203_v1, %v9221_v62 }
 0x1d3   : > { %v2408_v15 = vadd.f32 %v2280_v31, %v2154_v32  ;;  %v9240_v32 = vpop.permute.xlu1 %6045  ;;  %v5822_v31 = vsel %vm264_vm1, %v5808_v42, 0 }
 0x1d4   : > { %v2282_v10 = vpop.f32.mrf.mxu0  ;;  %v2319_v56 = vpop.f32.mrf.mxu1  ;;  %7289 = vmatmul.mubr.msk.bf16.vlgmr.msra.gmra.mxu1 %vm260_vm2, %v7285_v21 }
 0x1d5   : > { %v2409_v41 = vadd.f32 %v2319_v56, %v2155_v20  ;;  %7519 = vmatpush3.bf16.msra.mxu1 %v5326_v36  ;;  %7520 = vmatprep.mubr.msk.bf16.mxu1 %vm7643_vm3, %v7642_v19  ;;  %v9252_v46 = vpop.permute.xlu0 %6051 }
 0x1d6   : > { %v2283_v37 = vpop.f32.mrf.mxu0  ;;  %v2321_v44 = vpop.f32.mrf.mxu1  ;;  %7296 = vmatprep.subr.msk.bf16.mxu1 %vm264_vm1, %v5555_v29 }
 0x1d7   : > { %v2410_v6 = vadd.f32 %v2321_v44, %v2156_v24  ;;  %v5574_v24 = vsel %vm264_vm1, %v5556_v4, 0  ;;  %v9259_v51 = vpop.permute.xlu1 %6049  ;;  %v5828_v37 = vsel %vm264_vm1, %v5810_v2, 0 }
 0x1d8   : > { %v2323_v8 = vpop.f32.mrf.mxu1  ;;  %v2360_v57 = vpop.f32.mrf.mxu0  ;;  %7291 = vmatmul.mubr.msk.bf16.vlgmr.msra.gmra.mxu0 %vm260_vm2, %v7285_v21  ;;  %v6061_v1 = vsel %vm6059_vm12, %v9236_v34, %v9259_v51 }
 0x1d9   : > { %v2411_v60 = vadd.f32 %v2360_v57, %v2157_v11  ;;  %5597 = vmatpush1.bf16.msra.mxu0 %v5562_v9  ;;  %5614 = vmatprep.mubr.bf16.mxu0 %v7632_v5  ;;  %v9272_v52 = vpop.permute.xlu0 %6055  ;;  %v7301_v9 = vld [vmem:[%s9540_s1 + $0x58] sm:$0xf] }
 0x1da   : > { %v2324_v14 = vpop.f32.mrf.mxu1  ;;  %v2362_v59 = vpop.f32.mrf.mxu0  ;;  %7298 = vmatprep.subr.msk.bf16.mxu0 %vm264_vm1, %v5557_v33 }
 0x1db   : > { %v2412_v3 = vadd.f32 %v2362_v59, %v2158_v25  ;;  %v9277_v18 = vpop.permute.xlu1 %6053 }
 0x1dc   : > { %v2364_v16 = vpop.f32.mrf.mxu0  ;;  %v2401_v20 = vpop.f32.mrf.mxu1  ;;  %7521 = vmatmul.mubr.msk.bf16.vlgmr.msra.gmra.mxu1 %vm260_vm2, %v7285_v21  ;;  %v6063_v4 = vsel %vm6059_vm12, %v9252_v46, %v9277_v18  ;;  %v6064_v61 = vsel %vm6059_vm12, %v9277_v18, %v9272_v52 }
 0x1dd   : > { %v2413_v47 = vadd.f32 %v2401_v20, %v2159_v45  ;;  %5638 = vmatpush1.bf16.msra.mxu1 %v5568_v40  ;;  %5655 = vmatprep.mubr.bf16.mxu1 %v7632_v5  ;;  %v9289_v13 = vpop.permute.xlu0 %6299 }
 0x1de   : > { %v2365_v39 = vpop.f32.mrf.mxu0  ;;  %v7450_v22 = vpop.f32.mrf.mxu1  ;;  %7524 = vmatprep.subr.bf16.mxu1 %v7642_v19 }
 0x1df   : > { %v9296_v29 = vpop.permute.xlu1 %6057  ;;  %v7022_v39 = vld [vmem:[%s9541_s2] sm:$0xff] }
 0x1e0   : > { %v2404_v54 = vpop.f32.mrf.mxu1  ;;  %v2536_v50 = vpop.f32.mrf.mxu0  ;;  %7295 = vmatmul.mubr.msk.bf16.vlgmr.msra.gmra.mxu0 %vm260_vm2, %v7293_v12  ;;  %7025 = vperm.xlu1 %7599, %v7022_v39  }
 0x1e1   : > { %v2665_v11 = vadd.f32 %v2536_v50, %v2407_v63  ;;  %5679 = vmatpush1.bf16.msra.mxu0 %v5574_v24  ;;  %5696 = vmatprep.mubr.bf16.mxu0 %v7632_v5  ;;  %v9310_v30 = vpop.permute.xlu0 %6303  ;;  %v6065_v54 = vsel %vm6059_vm12, %v9272_v52, %v9296_v29 }
 0x1e2   : > { %v7451_v58 = vpop.f32.mrf.mxu1  ;;  %v2538_v55 = vpop.f32.mrf.mxu0  ;;  %7302 = vmatprep.subr.msk.bf16.mxu0 %vm264_vm1, %v5807_v23  ;;  %v6062_v23 = vsel %vm6059_vm12, %v9259_v51, %v9252_v46 }
 0x1e3   : > { %v2666_v25 = vadd.f32 %v2538_v55, %v2408_v15  ;;  %v9308_v62 = vpop.permute.xlu1 %6301  ;;  %v6076_v55 = vsel %vm264_vm1, %v6062_v23, 0 }
 0x1e4   : > { %v2540_v45 = vpop.f32.mrf.mxu0  ;;  %v2577_v21 = vpop.f32.mrf.mxu1  ;;  %7297 = vmatmul.mubr.msk.bf16.vlgmr.msra.gmra.mxu1 %vm260_vm2, %v7293_v12  ;;  %v6315_v18 = vsel %vm6313_vm13, %v9308_v62, %v9310_v30  ;;  %v6314_v2 = vsel %vm6313_vm13, %v9289_v13, %v9308_v62 }
 0x1e5   : > { %v2667_v7 = vadd.f32 %v2577_v21, %v2409_v41  ;;  %7525 = vmatpush3.bf16.msra.mxu1 %v5580_v28  ;;  %7526 = vmatprep.mubr.msk.bf16.mxu1 %vm7643_vm3, %v7642_v19  ;;  %v7035_v28 = vld [vmem:[%s9542_s3] sm:$0xff] }
 0x1e6   : > { %v2541_v43 = vpop.f32.mrf.mxu0  ;;  %v2579_v49 = vpop.f32.mrf.mxu1  ;;  %7304 = vmatprep.subr.msk.bf16.mxu1 %vm264_vm1, %v5809_v35  ;;  %7038 = vperm.xlu0 %7600, %v7035_v28  }
 0x1e7   : > { %v2668_v48 = vadd.f32 %v2579_v49, %v2410_v6  ;;  %v7309_v43 = vld [vmem:[%s9540_s1 + $0x5c] sm:$0xf]  ;;  %v6082_v49 = vsel %vm264_vm1, %v6064_v61, 0 }
 0x1e8   : > { %v2581_v0 = vpop.f32.mrf.mxu1  ;;  %v2618_v63 = vpop.f32.mrf.mxu0  ;;  %7299 = vmatmul.mubr.msk.bf16.vlgmr.msra.gmra.mxu0 %vm260_vm2, %v7293_v12 }
 0x1e9   : > { %v2669_v36 = vadd.f32 %v2618_v63, %v2411_v60  ;;  %5851 = vmatpush1.bf16.msra.mxu0 %v5816_v38  ;;  %5868 = vmatprep.mubr.bf16.mxu0 %v7632_v5  ;;  %v5834_v60 = vsel %vm264_vm1, %v9223_v27, 0  ;;  %v9326_v27 = vpop.permute.xlu1 %6305 }
 0x1ea   : > { %v2582_v15 = vpop.f32.mrf.mxu1  ;;  %v2620_v26 = vpop.f32.mrf.mxu0  ;;  %7306 = vmatprep.subr.msk.bf16.mxu0 %vm264_vm1, %v5811_v17 }
 0x1eb   : > { %v2670_v53 = vadd.f32 %v2620_v26, %v2412_v3  ;;  %v6060_v3 = vsel %vm6059_vm12, %v9240_v32, %v9236_v34 }
 0x1ec   : > { %v2622_v10 = vpop.f32.mrf.mxu0  ;;  %v2659_v56 = vpop.f32.mrf.mxu1  ;;  %7527 = vmatmul.mubr.msk.bf16.vlgmr.msra.gmra.mxu1 %vm260_vm2, %v7293_v12  ;;  %v6070_v24 = vsel %vm264_vm1, %v6060_v3, 0 }
 0x1ed   : > { %v2671_v41 = vadd.f32 %v2659_v56, %v2413_v47  ;;  %5892 = vmatpush1.bf16.msra.mxu1 %v5822_v31  ;;  %5909 = vmatprep.mubr.bf16.mxu1 %v7632_v5  ;;  %v9328_v12 = vpop.permute.xlu0 %6307  ;;  %v6310_v35 = vpop.permute.xlu1 %6309  ;;  %v6088_v31 = vsel %vm264_vm1, %v9296_v29, 0 }
 0x1ee   : > { %v2623_v44 = vpop.f32.mrf.mxu0  ;;  %v7456_v6 = vpop.f32.mrf.mxu1  ;;  %7530 = vmatprep.subr.bf16.mxu1 %v7642_v19  ;;  %v6317_v10 = vsel %vm6313_vm13, %v9326_v27, %v9328_v12 }
 0x1f0   : > { %v2662_v33 = vpop.f32.mrf.mxu1  ;;  %v2794_v8 = vpop.f32.mrf.mxu0  ;;  %7303 = vmatmul.mubr.msk.bf16.vlgmr.msra.gmra.mxu0 %vm260_vm2, %v7301_v9 }
 0x1f1   : > { %v2923_v57 = vadd.f32 %v2794_v8, %v2665_v11  ;;  %5933 = vmatpush1.bf16.msra.mxu0 %v5828_v37  ;;  %5950 = vmatprep.mubr.bf16.mxu0 %v7632_v5  ;;  %v9351_v45 = vpop.permute.xlu0 %6311  ;;  %v6324_v37 = vsel %vm264_vm1, %v6314_v2, 0 }
 0x1f2   : > { %v7457_v40 = vpop.f32.mrf.mxu1  ;;  %v2796_v14 = vpop.f32.mrf.mxu0  ;;  %7310 = vmatprep.subr.msk.bf16.mxu0 %vm264_vm1, %v6061_v1  ;;  %v6316_v1 = vsel %vm6313_vm13, %v9310_v30, %v9326_v27  ;;  %v6319_v62 = vsel %vm6313_vm13, %v6310_v35, %v9351_v45  ;;  %v6318_v30 = vsel %vm6313_vm13, %v9328_v12, %v6310_v35  ;;  %v7317_v27 = vld [vmem:[%s9540_s1 + $0x60] sm:$0xf] }
 0x1f3   : > { %v2924_v59 = vadd.f32 %v2796_v14, %v2666_v25  ;;  %v6330_v40 = vsel %vm264_vm1, %v6316_v1, 0 }
 0x1f4   : > { %v2798_v16 = vpop.f32.mrf.mxu0  ;;  %v2835_v20 = vpop.f32.mrf.mxu1  ;;  %7305 = vmatmul.mubr.msk.bf16.vlgmr.msra.gmra.mxu1 %vm260_vm2, %v7301_v9 }
 0x1f5   : > { %v2925_v47 = vadd.f32 %v2835_v20, %v2667_v7  ;;  %7531 = vmatpush3.bf16.msra.mxu1 %v5834_v60  ;;  %7532 = vmatprep.mubr.msk.bf16.mxu1 %vm7643_vm3, %v7642_v19  ;;  %v9363_v42 = vpop.permute.xlu0 %6555 }
 0x1f6   : > { %v2799_v34 = vpop.f32.mrf.mxu0  ;;  %v2837_v32 = vpop.f32.mrf.mxu1  ;;  %7312 = vmatprep.subr.msk.bf16.mxu1 %vm264_vm1, %v6063_v4 }
 0x1f7   : > { %v2926_v22 = vadd.f32 %v2837_v32, %v2668_v48  ;;  %v6336_v34 = vsel %vm264_vm1, %v6318_v30, 0 }
 0x1f8   : > { %v2839_v50 = vpop.f32.mrf.mxu1  ;;  %v2876_v11 = vpop.f32.mrf.mxu0  ;;  %7307 = vmatmul.mubr.msk.bf16.vlgmr.msra.gmra.mxu0 %vm260_vm2, %v7301_v9 }
 0x1f9   : > { %v2927_v58 = vadd.f32 %v2876_v11, %v2669_v36  ;;  %6105 = vmatpush1.bf16.msra.mxu0 %v6070_v24  ;;  %6122 = vmatprep.mubr.bf16.mxu0 %v7632_v5  ;;  %v9367_v36 = vpop.permute.xlu1 %6553  ;;  %v9381_v29 = vpop.permute.xlu0 %6559  ;;  %v6342_v11 = vsel %vm264_vm1, %v9351_v45, 0 }
 0x1fa   : > { %v2840_v46 = vpop.f32.mrf.mxu1  ;;  %v2878_v51 = vpop.f32.mrf.mxu0  ;;  %7314 = vmatprep.subr.msk.bf16.mxu0 %vm264_vm1, %v6065_v54 }
 0x1fb   : > { %v2928_v25 = vadd.f32 %v2878_v51, %v2670_v53  ;;  %v6568_v46 = vsel %vm6567_vm14, %v9367_v36, %v9363_v42 }
 0x1fc   : > { %v2880_v21 = vpop.f32.mrf.mxu0  ;;  %v2917_v7 = vpop.f32.mrf.mxu1  ;;  %7533 = vmatmul.mubr.msk.bf16.vlgmr.msra.gmra.mxu1 %vm260_vm2, %v7301_v9  ;;  %v6578_v45 = vsel %vm264_vm1, %v6568_v46, 0 }
 0x1fd   : > { %v2929_v38 = vadd.f32 %v2917_v7, %v2671_v41  ;;  %6146 = vmatpush1.bf16.msra.mxu1 %v6076_v55  ;;  %6163 = vmatprep.mubr.bf16.mxu1 %v7632_v5  ;;  %v6558_v33 = vpop.permute.xlu1 %6557  ;;  %v6564_v4 = vpop.permute.xlu0 %6563 }
 0x1fe   : > { %v2881_v48 = vpop.f32.mrf.mxu0  ;;  %v7462_v52 = vpop.f32.mrf.mxu1  ;;  %7536 = vmatprep.subr.bf16.mxu1 %v7642_v19  ;;  %v6569_v12 = vsel %vm6567_vm14, %v9363_v42, %v6558_v33 }
 0x200   : > { %v2920_v17 = vpop.f32.mrf.mxu1  ;;  %v3052_v0 = vpop.f32.mrf.mxu0  ;;  %7311 = vmatmul.mubr.msk.bf16.vlgmr.msra.gmra.mxu0 %vm260_vm2, %v7309_v43 }
 0x201   : > { %v3181_v63 = vadd.f32 %v3052_v0, %v2923_v57  ;;  %6187 = vmatpush1.bf16.msra.mxu0 %v6082_v49  ;;  %6204 = vmatprep.mubr.bf16.mxu0 %v7632_v5  ;;  %v6562_v24 = vpop.permute.xlu1 %6561  ;;  %v9407_v50 = vpop.permute.xlu0 %6807  ;;  %v6570_v49 = vsel %vm6567_vm14, %v6558_v33, %v9381_v29 }
 0x202   : > { %v7463_v15 = vpop.f32.mrf.mxu1  ;;  %v3054_v26 = vpop.f32.mrf.mxu0  ;;  %7318 = vmatprep.subr.msk.bf16.mxu0 %vm264_vm1, %v6315_v18  ;;  %v6571_v51 = vsel %vm6567_vm14, %v9381_v29, %v6562_v24 }
 0x203   : > { %v3182_v53 = vadd.f32 %v3054_v26, %v2924_v59  ;;  %v6572_v26 = vsel %vm6567_vm14, %v6562_v24, %v6564_v4 }
 0x204   : > { %v3056_v56 = vpop.f32.mrf.mxu0  ;;  %v3093_v41 = vpop.f32.mrf.mxu1  ;;  %7313 = vmatmul.mubr.msk.bf16.vlgmr.msra.gmra.mxu1 %vm260_vm2, %v7309_v43  ;;  %v6590_v29 = vsel %vm264_vm1, %v6572_v26, 0 }
 0x205   : > { %v3183_v9 = vadd.f32 %v3093_v41, %v2925_v47  ;;  %7537 = vmatpush3.bf16.msra.mxu1 %v6088_v31  ;;  %7538 = vmatprep.mubr.msk.bf16.mxu1 %vm7643_vm3, %v7642_v19  ;;  %v6812_v18 = vpop.permute.xlu0 %6811  ;;  %v7325_v56 = vld [vmem:[%s9540_s1 + $0x64] sm:$0xf] }
 0x206   : > { %v3057_v44 = vpop.f32.mrf.mxu0  ;;  %v3095_v6 = vpop.f32.mrf.mxu1  ;;  %7320 = vmatprep.subr.msk.bf16.mxu1 %vm264_vm1, %v6317_v10 }
 0x207   : > { %v3184_v13 = vadd.f32 %v3095_v6, %v2926_v22 }
 0x208   : > { %v3097_v8 = vpop.f32.mrf.mxu1  ;;  %v3134_v57 = vpop.f32.mrf.mxu0  ;;  %7315 = vmatmul.mubr.msk.bf16.vlgmr.msra.gmra.mxu0 %vm260_vm2, %v7309_v43 }
 0x209   : > { %v3185_v60 = vadd.f32 %v3134_v57, %v2927_v58  ;;  %6359 = vmatpush1.bf16.msra.mxu0 %v6324_v37  ;;  %6376 = vmatprep.mubr.bf16.mxu0 %v7632_v5 }
 0x20a   : > { %v3098_v14 = vpop.f32.mrf.mxu1  ;;  %v3136_v59 = vpop.f32.mrf.mxu0  ;;  %7322 = vmatprep.subr.msk.bf16.mxu0 %vm264_vm1, %v6319_v62 }
 0x20b   : > { %v3186_v3 = vadd.f32 %v3136_v59, %v2928_v25  ;;  %v6566_v25 = vpop.permute.xlu1 %6565 }
 0x20c   : > { %v3138_v16 = vpop.f32.mrf.mxu0  ;;  %v3175_v20 = vpop.f32.mrf.mxu1  ;;  %7539 = vmatmul.mubr.msk.bf16.vlgmr.msra.gmra.mxu1 %vm260_vm2, %v7309_v43  ;;  %v6573_v48 = vsel %vm6567_vm14, %v6564_v4, %v6566_v25  ;;  %v6596_v33 = vsel %vm264_vm1, %v6566_v25, 0 }
 0x20d   : > { %v3187_v47 = vadd.f32 %v3175_v20, %v2929_v38  ;;  %6400 = vmatpush1.bf16.msra.mxu1 %v6330_v40  ;;  %6417 = vmatprep.mubr.bf16.mxu1 %v7632_v5 }
 0x20e   : > { %v3139_v32 = vpop.f32.mrf.mxu0  ;;  %v7468_v39 = vpop.f32.mrf.mxu1  ;;  %7542 = vmatprep.subr.bf16.mxu1 %v7642_v19 }
 0x20f   : > { %v6810_v52 = vpop.permute.xlu1 %6809 }
 0x210   : > { %v3178_v22 = vpop.f32.mrf.mxu1  ;;  %v3310_v23 = vpop.f32.mrf.mxu0  ;;  %7319 = vmatmul.mubr.msk.bf16.vlgmr.msra.gmra.mxu0 %vm260_vm2, %v7317_v27  ;;  %v6823_v6 = vsel %vm6821_vm15, %v6810_v52, %v6812_v18  ;;  %v6822_v40 = vsel %vm6821_vm15, %v9407_v50, %v6810_v52 }
 0x211   : > { %v3439_v54 = vadd.f32 %v3310_v23, %v3181_v63  ;;  %6441 = vmatpush1.bf16.msra.mxu0 %v6336_v34  ;;  %6458 = vmatprep.mubr.bf16.mxu0 %v7632_v5  ;;  %v6584_v63 = vsel %vm264_vm1, %v6570_v49, 0  ;;  %v6832_v20 = vsel %vm264_vm1, %v6822_v40, 0 }
 0x212   : > { %v7469_v28 = vpop.f32.mrf.mxu1  ;;  %v3312_v58 = vpop.f32.mrf.mxu0  ;;  %7326 = vmatprep.subr.msk.bf16.mxu0 %vm264_vm1, %v6569_v12 }
 0x213   : > { %v3440_v55 = vadd.f32 %v3312_v58, %v3182_v53  ;;  %v6814_v41 = vpop.permute.xlu1 %6813 }
 0x214   : > { %v3314_v61 = vpop.f32.mrf.mxu0  ;;  %v3351_v35 = vpop.f32.mrf.mxu1  ;;  %7321 = vmatmul.mubr.msk.bf16.vlgmr.msra.gmra.mxu1 %vm260_vm2, %v7317_v27  ;;  %v6824_v34 = vsel %vm6821_vm15, %v6812_v18, %v6814_v41 }
 0x215   : > { %v3441_v21 = vadd.f32 %v3351_v35, %v3183_v9  ;;  %7543 = vmatpush3.bf16.msra.mxu1 %v6342_v11  ;;  %7544 = vmatprep.mubr.msk.bf16.mxu1 %vm7643_vm3, %v7642_v19  ;;  %v6816_v9 = vpop.permute.xlu0 %6815  ;;  %v6838_v23 = vsel %vm264_vm1, %v6824_v34, 0 }
 0x216   : > { %v3315_v7 = vpop.f32.mrf.mxu0  ;;  %v3353_v38 = vpop.f32.mrf.mxu1  ;;  %7328 = vmatprep.subr.msk.bf16.mxu1 %vm264_vm1, %v6571_v51  ;;  %v6825_v14 = vsel %vm6821_vm15, %v6814_v41, %v6816_v9  ;;  %v7333_v51 = vld [vmem:[%s9540_s1 + $0x68] sm:$0xf] }
 0x217   : > { %v3442_v43 = vadd.f32 %v3353_v38, %v3184_v13  ;;  %v6818_v59 = vpop.permute.xlu1 %6817 }
 0x218   : > { %v3355_v42 = vpop.f32.mrf.mxu1  ;;  %v3392_v17 = vpop.f32.mrf.mxu0  ;;  %7323 = vmatmul.mubr.msk.bf16.vlgmr.msra.gmra.mxu0 %vm260_vm2, %v7317_v27  ;;  %v6826_v28 = vsel %vm6821_vm15, %v6816_v9, %v6818_v59 }
 0x219   : > { %v3443_v0 = vadd.f32 %v3392_v17, %v3185_v60  ;;  %6613 = vmatpush1.bf16.msra.mxu0 %v6578_v45  ;;  %6630 = vmatprep.mubr.bf16.mxu0 %v7632_v5  ;;  %v6844_v25 = vsel %vm264_vm1, %v6826_v28, 0 }
 0x21a   : > { %v3356_v36 = vpop.f32.mrf.mxu1  ;;  %v3394_v31 = vpop.f32.mrf.mxu0  ;;  %7330 = vmatprep.subr.msk.bf16.mxu0 %vm264_vm1, %v6573_v48 }
 0x21b   : > { %v3444_v15 = vadd.f32 %v3394_v31, %v3186_v3  ;;  %v6820_v3 = vpop.permute.xlu0 %6819 }
 0x21c   : > { %v3396_v53 = vpop.f32.mrf.mxu0  ;;  %v3433_v2 = vpop.f32.mrf.mxu1  ;;  %7545 = vmatmul.mubr.msk.bf16.vlgmr.msra.gmra.mxu1 %vm260_vm2, %v7317_v27  ;;  %v6827_v32 = vsel %vm6821_vm15, %v6818_v59, %v6820_v3  ;;  %v6850_v38 = vsel %vm264_vm1, %v6820_v3, 0 }
 0x21d   : > { %v3445_v10 = vadd.f32 %v3433_v2, %v3187_v47  ;;  %6654 = vmatpush1.bf16.msra.mxu1 %v6584_v63  ;;  %6671 = vmatprep.mubr.bf16.mxu1 %v7632_v5 }
 0x21e   : > { %v3397_v37 = vpop.f32.mrf.mxu0  ;;  %v7474_v44 = vpop.f32.mrf.mxu1  ;;  %7548 = vmatprep.subr.bf16.mxu1 %v7642_v19 }
 0x220   : > { %v3436_v13 = vpop.f32.mrf.mxu1  ;;  %v3568_v1 = vpop.f32.mrf.mxu0  ;;  %7327 = vmatmul.mubr.msk.bf16.vlgmr.msra.gmra.mxu0 %vm260_vm2, %v7325_v56 }
 0x221   : > { %v3697_v62 = vadd.f32 %v3568_v1, %v3439_v54  ;;  %6695 = vmatpush1.bf16.msra.mxu0 %v6590_v29  ;;  %6712 = vmatprep.mubr.bf16.mxu0 %v7632_v5 }
 0x222   : > { %v7475_v8 = vpop.f32.mrf.mxu1  ;;  %v3570_v57 = vpop.f32.mrf.mxu0  ;;  %7334 = vmatprep.subr.msk.bf16.mxu0 %vm264_vm1, %v6823_v6 }
 0x223   : > { %v3698_v60 = vadd.f32 %v3570_v57, %v3440_v55 }
 0x224   : > { %v3572_v30 = vpop.f32.mrf.mxu0  ;;  %v3609_v4 = vpop.f32.mrf.mxu1  ;;  %7329 = vmatmul.mubr.msk.bf16.vlgmr.msra.gmra.mxu1 %vm260_vm2, %v7325_v56 }
 0x225   : > { %v3699_v16 = vadd.f32 %v3609_v4, %v3441_v21  ;;  %7549 = vmatpush3.bf16.msra.mxu1 %v6596_v33  ;;  %7550 = vmatprep.mubr.msk.bf16.mxu1 %vm7643_vm3, %v7642_v19 }
 0x226   : > { %v3573_v47 = vpop.f32.mrf.mxu0  ;;  %v3611_v27 = vpop.f32.mrf.mxu1  ;;  %7336 = vmatprep.subr.msk.bf16.mxu1 %vm264_vm1, %v6825_v14 }
 0x227   : > { %v3700_v24 = vadd.f32 %v3611_v27, %v3442_v43 }
 0x228   : > { %v3613_v39 = vpop.f32.mrf.mxu1  ;;  %v3650_v12 = vpop.f32.mrf.mxu0  ;;  %7331 = vmatmul.mubr.msk.bf16.vlgmr.msra.gmra.mxu0 %vm260_vm2, %v7325_v56 }
 0x229   : > { %v3701_v22 = vadd.f32 %v3650_v12, %v3443_v0  ;;  %6867 = vmatpush1.bf16.msra.mxu0 %v6832_v20  ;;  %6884 = vmatprep.mubr.bf16.mxu0 %v7632_v5 }
 0x22a   : > { %v3614_v54 = vpop.f32.mrf.mxu1  ;;  %v3652_v50 = vpop.f32.mrf.mxu0  ;;  %7338 = vmatprep.subr.msk.bf16.mxu0 %vm264_vm1, %v6827_v32  ;;  %vm7061_vm1 = vcmask 261120  }
 0x22b   : > { %v3702_v11 = vadd.f32 %v3652_v50, %v3444_v15 }
 0x22c   : > { %v3654_v58 = vpop.f32.mrf.mxu0  ;;  %v3691_v55 = vpop.f32.mrf.mxu1  ;;  %7551 = vmatmul.mubr.msk.bf16.vlgmr.msra.gmra.mxu1 %vm260_vm2, %v7325_v56 }
 0x22d   : > { %v3703_v46 = vadd.f32 %v3691_v55, %v3445_v10  ;;  %6908 = vmatpush1.bf16.msra.mxu1 %v6838_v23  ;;  %6925 = vmatprep.mubr.bf16.mxu1 %v7632_v5 }
 0x22e   : > { %v3655_v61 = vpop.f32.mrf.mxu0  ;;  %v7480_v35 = vpop.f32.mrf.mxu1  ;;  %7554 = vmatprep.subr.bf16.mxu1 %v7642_v19 }
 0x230   : > { %v3694_v21 = vpop.f32.mrf.mxu1  ;;  %v3826_v45 = vpop.f32.mrf.mxu0  ;;  %7335 = vmatmul.mubr.msk.bf16.vlgmr.msra.gmra.mxu0 %vm260_vm2, %v7333_v51 }
 0x231   : > { %v3955_v7 = vadd.f32 %v3826_v45, %v3697_v62  ;;  %6949 = vmatpush1.bf16.msra.mxu0 %v6844_v25  ;;  %6966 = vmatprep.mubr.bf16.mxu0 %v7632_v5 }
 0x232   : > { %v7481_v43 = vpop.f32.mrf.mxu1  ;;  %v3828_v49 = vpop.f32.mrf.mxu0 }
 0x233   : > { %v3956_v48 = vadd.f32 %v3828_v49, %v3698_v60 }
 0x234   : > { %v3830_v52 = vpop.f32.mrf.mxu0  ;;  %v3867_v18 = vpop.f32.mrf.mxu1  ;;  %7337 = vmatmul.mubr.msk.bf16.vlgmr.msra.gmra.mxu1 %vm260_vm2, %v7333_v51 }
 0x235   : > { %v3957_v42 = vadd.f32 %v3867_v18, %v3699_v16  ;;  %7555 = vmatpush3.bf16.msra.mxu1 %v6850_v38  ;;  %7556 = vmatprep.mubr.msk.bf16.mxu1 %vm7643_vm3, %v7642_v19 }
 0x236   : > { %v3831_v17 = vpop.f32.mrf.mxu0  ;;  %v3869_v0 = vpop.f32.mrf.mxu1 }
 0x237   : > { %v3958_v63 = vadd.f32 %v3869_v0, %v3700_v24 }
 0x238   : > { %v3871_v36 = vpop.f32.mrf.mxu1  ;;  %v3908_v31 = vpop.f32.mrf.mxu0  ;;  %7339 = vmatmul.mubr.msk.bf16.vlgmr.msra.gmra.mxu0 %vm260_vm2, %v7333_v51 }
 0x239   : > { %v3959_v5 = vadd.f32 %v3908_v31, %v3701_v22 }
 0x23a   : > { %v3872_v15 = vpop.f32.mrf.mxu1  ;;  %v3910_v26 = vpop.f32.mrf.mxu0 }
 0x23b   : > { %v3960_v53 = vadd.f32 %v3910_v26, %v3702_v11 }
 0x23c   : > { %v3912_v2 = vpop.f32.mrf.mxu0  ;;  %v3949_v10 = vpop.f32.mrf.mxu1  ;;  %7557 = vmatmul.mubr.msk.bf16.vlgmr.msra.gmra.mxu1 %vm260_vm2, %v7333_v51 }
 0x23d   : > { %v3961_v56 = vadd.f32 %v3949_v10, %v3703_v46 }
 0x23e   : > { %v3913_v41 = vpop.f32.mrf.mxu0  ;;  %v7486_v9 = vpop.f32.mrf.mxu1 }
 0x240   : > { %v3952_v29 = vpop.f32.mrf.mxu1  ;;  %v4084_v19 = vpop.f32.mrf.mxu0 }
 0x241   : > { %v4213_v37 = vadd.f32 %v4084_v19, %v3955_v7 }
 0x242   : > { %v7487_v44 = vpop.f32.mrf.mxu1  ;;  %v4086_v6 = vpop.f32.mrf.mxu0 }
 0x243   : > { %v4214_v13 = vadd.f32 %v4086_v6, %v3956_v48 }
 0x244   : > { %v4088_v1 = vpop.f32.mrf.mxu0  ;;  %v4125_v62 = vpop.f32.mrf.mxu1 }
 0x245   : > { %v4215_v33 = vadd.f32 %v4125_v62, %v3957_v42 }
 0x246   : > { %v4089_v8 = vpop.f32.mrf.mxu0  ;;  %v4127_v57 = vpop.f32.mrf.mxu1 }
 0x247   : > { %v4216_v60 = vadd.f32 %v4127_v57, %v3958_v63 }
 0x248   : > { %v4129_v40 = vpop.f32.mrf.mxu1  ;;  %v4166_v14 = vpop.f32.mrf.mxu0 }
 0x249   : > { %v4217_v59 = vadd.f32 %v4166_v14, %v3959_v5 }
 0x24a   : > { %v4130_v3 = vpop.f32.mrf.mxu1  ;;  %v4168_v30 = vpop.f32.mrf.mxu0 }
 0x24b   : > { %v4218_v4 = vadd.f32 %v4168_v30, %v3960_v53 }
 0x24c   : > { %v4170_v16 = vpop.f32.mrf.mxu0  ;;  %v4207_v20 = vpop.f32.mrf.mxu1 }
 0x24d   : > { %v4219_v47 = vadd.f32 %v4207_v20, %v3961_v56 }
 0x24e   : > { %v4171_v27 = vpop.f32.mrf.mxu0  ;;  %v7492_v24 = vpop.f32.mrf.mxu1 }
 0x250   : > { %v4210_v34 = vpop.f32.mrf.mxu1  ;;  %v4342_v32 = vpop.f32.mrf.mxu0 }
 0x251   : > { %v4471_v39 = vadd.f32 %v4342_v32, %v4213_v37 }
 0x252   : > { %v7493_v12 = vpop.f32.mrf.mxu1  ;;  %v4344_v22 = vpop.f32.mrf.mxu0 }
 0x253   : > { %v4472_v23 = vadd.f32 %v4344_v22, %v4214_v13 }
 0x254   : > { %v4346_v54 = vpop.f32.mrf.mxu0  ;;  %v4383_v50 = vpop.f32.mrf.mxu1 }
 0x255   : > { %v4473_v11 = vadd.f32 %v4383_v50, %v4215_v33 }
 0x256   : > { %v4347_v28 = vpop.f32.mrf.mxu0  ;;  %v4385_v58 = vpop.f32.mrf.mxu1 }
 0x257   : > { %v4474_v55 = vadd.f32 %v4385_v58, %v4216_v60 }
 0x258   : > { %v4387_v46 = vpop.f32.mrf.mxu1  ;;  %v4424_v51 = vpop.f32.mrf.mxu0 }
 0x259   : > { %v4475_v25 = vadd.f32 %v4424_v51, %v4217_v59 }
 0x25a   : > { %v4388_v61 = vpop.f32.mrf.mxu1  ;;  %v4426_v35 = vpop.f32.mrf.mxu0 }
 0x25b   : > { %v4476_v21 = vadd.f32 %v4426_v35, %v4218_v4 }
 0x25c   : > { %v4428_v45 = vpop.f32.mrf.mxu0  ;;  %v4465_v7 = vpop.f32.mrf.mxu1 }
 0x25d   : > { %v4477_v38 = vadd.f32 %v4465_v7, %v4219_v47 }
 0x25e   : > { %v4429_v43 = vpop.f32.mrf.mxu0  ;;  %v7498_v49 = vpop.f32.mrf.mxu1 }
 0x260   : > { %v4468_v48 = vpop.f32.mrf.mxu1  ;;  %v4600_v52 = vpop.f32.mrf.mxu0 }
 0x261   : > { %v4729_v18 = vadd.f32 %v4600_v52, %v4471_v39 }
 0x262   : > { %v7499_v42 = vpop.f32.mrf.mxu1  ;;  %v4602_v17 = vpop.f32.mrf.mxu0 }
 0x263   : > { %v4730_v0 = vadd.f32 %v4602_v17, %v4472_v23 }
 0x264   : > { %v4604_v63 = vpop.f32.mrf.mxu0  ;;  %v4641_v36 = vpop.f32.mrf.mxu1 }
 0x265   : > { %v4731_v31 = vadd.f32 %v4641_v36, %v4473_v11 }
 0x266   : > { %v4605_v5 = vpop.f32.mrf.mxu0  ;;  %v4643_v15 = vpop.f32.mrf.mxu1 }
 0x267   : > { %v4732_v26 = vadd.f32 %v4643_v15, %v4474_v55 }
 0x268   : > { %v4645_v53 = vpop.f32.mrf.mxu1  ;;  %v4682_v2 = vpop.f32.mrf.mxu0 }
 0x269   : > { %v4733_v10 = vadd.f32 %v4682_v2, %v4475_v25 }
 0x26a   : > { %v4646_v56 = vpop.f32.mrf.mxu1  ;;  %v4684_v41 = vpop.f32.mrf.mxu0 }
 0x26b   : > { %v4734_v9 = vadd.f32 %v4684_v41, %v4476_v21 }
 0x26c   : > { %v4686_v29 = vpop.f32.mrf.mxu0  ;;  %v4723_v19 = vpop.f32.mrf.mxu1 }
 0x26d   : > { %v4735_v37 = vadd.f32 %v4723_v19, %v4477_v38 }
 0x26e   : > { %v4687_v44 = vpop.f32.mrf.mxu0  ;;  %v7504_v6 = vpop.f32.mrf.mxu1 }
 0x270   : > { %v4726_v13 = vpop.f32.mrf.mxu1  ;;  %v4854_v1 = vpop.f32.mrf.mxu0 }
 0x271   : > { %v4983_v62 = vadd.f32 %v4854_v1, %v4729_v18 }
 0x272   : > { %v7505_v33 = vpop.f32.mrf.mxu1  ;;  %v4856_v8 = vpop.f32.mrf.mxu0 }
 0x273   : > { %v4984_v57 = vadd.f32 %v4856_v8, %v4730_v0 }
 0x274   : > { %v4858_v60 = vpop.f32.mrf.mxu0  ;;  %v4895_v40 = vpop.f32.mrf.mxu1 }
 0x275   : > { %v4985_v14 = vadd.f32 %v4895_v40, %v4731_v31 }
 0x276   : > { %v4859_v59 = vpop.f32.mrf.mxu0  ;;  %v4897_v3 = vpop.f32.mrf.mxu1 }
 0x277   : > { %v4986_v30 = vadd.f32 %v4897_v3, %v4732_v26 }
 0x278   : > { %v4899_v4 = vpop.f32.mrf.mxu1  ;;  %v4936_v16 = vpop.f32.mrf.mxu0 }
 0x279   : > { %v4987_v20 = vadd.f32 %v4936_v16, %v4733_v10 }
 0x27a   : > { %v4900_v47 = vpop.f32.mrf.mxu1  ;;  %v4938_v27 = vpop.f32.mrf.mxu0 }
 0x27b   : > { %v4988_v24 = vadd.f32 %v4938_v27, %v4734_v9 }
 0x27c   : > { %v4940_v34 = vpop.f32.mrf.mxu0  ;;  %v4977_v32 = vpop.f32.mrf.mxu1 }
 0x27d   : > { %v4989_v39 = vadd.f32 %v4977_v32, %v4735_v37 }
 0x27e   : > { %v4941_v12 = vpop.f32.mrf.mxu0  ;;  %v7510_v22 = vpop.f32.mrf.mxu1 }
 0x280   : > { %v4980_v23 = vpop.f32.mrf.mxu1  ;;  %v5108_v54 = vpop.f32.mrf.mxu0 }
 0x281   : > { %v5237_v50 = vadd.f32 %v5108_v54, %v4983_v62 }
 0x282   : > { %v7511_v11 = vpop.f32.mrf.mxu1  ;;  %v5110_v28 = vpop.f32.mrf.mxu0 }
 0x283   : > { %v5238_v58 = vadd.f32 %v5110_v28, %v4984_v57 }
 0x284   : > { %v5112_v55 = vpop.f32.mrf.mxu0  ;;  %v5149_v46 = vpop.f32.mrf.mxu1 }
 0x285   : > { %v5239_v51 = vadd.f32 %v5149_v46, %v4985_v14 }
 0x286   : > { %v5113_v25 = vpop.f32.mrf.mxu0  ;;  %v5151_v61 = vpop.f32.mrf.mxu1 }
 0x287   : > { %v5240_v35 = vadd.f32 %v5151_v61, %v4986_v30 }
 0x288   : > { %v5153_v21 = vpop.f32.mrf.mxu1  ;;  %v5190_v45 = vpop.f32.mrf.mxu0 }
 0x289   : > { %v5241_v7 = vadd.f32 %v5190_v45, %v4987_v20 }
 0x28a   : > { %v5154_v38 = vpop.f32.mrf.mxu1  ;;  %v5192_v43 = vpop.f32.mrf.mxu0 }
 0x28b   : > { %v5242_v49 = vadd.f32 %v5192_v43, %v4988_v24 }
 0x28c   : > { %v5194_v48 = vpop.f32.mrf.mxu0  ;;  %v5231_v52 = vpop.f32.mrf.mxu1 }
 0x28d   : > { %v5243_v18 = vadd.f32 %v5231_v52, %v4989_v39 }
 0x28e   : > { %v5195_v42 = vpop.f32.mrf.mxu0  ;;  %v7516_v17 = vpop.f32.mrf.mxu1 }
 0x290   : > { %v5234_v0 = vpop.f32.mrf.mxu1  ;;  %v5362_v63 = vpop.f32.mrf.mxu0 }
 0x291   : > { %v5491_v36 = vadd.f32 %v5362_v63, %v5237_v50 }
 0x292   : > { %v7517_v31 = vpop.f32.mrf.mxu1  ;;  %v5364_v5 = vpop.f32.mrf.mxu0 }
 0x293   : > { %v5492_v15 = vadd.f32 %v5364_v5, %v5238_v58 }
 0x294   : > { %v5366_v26 = vpop.f32.mrf.mxu0  ;;  %v5403_v53 = vpop.f32.mrf.mxu1 }
 0x295   : > { %v5493_v2 = vadd.f32 %v5403_v53, %v5239_v51 }
 0x296   : > { %v5367_v10 = vpop.f32.mrf.mxu0  ;;  %v5405_v56 = vpop.f32.mrf.mxu1 }
 0x297   : > { %v5494_v41 = vadd.f32 %v5405_v56, %v5240_v35 }
 0x298   : > { %v5407_v9 = vpop.f32.mrf.mxu1  ;;  %v5444_v29 = vpop.f32.mrf.mxu0 }
 0x299   : > { %v5495_v19 = vadd.f32 %v5444_v29, %v5241_v7 }
 0x29a   : > { %v5408_v37 = vpop.f32.mrf.mxu1  ;;  %v5446_v44 = vpop.f32.mrf.mxu0 }
 0x29b   : > { %v5496_v6 = vadd.f32 %v5446_v44, %v5242_v49 }
 0x29c   : > { %v5448_v13 = vpop.f32.mrf.mxu0  ;;  %v5485_v1 = vpop.f32.mrf.mxu1 }
 0x29d   : > { %v5497_v62 = vadd.f32 %v5485_v1, %v5243_v18 }
 0x29e   : > { %v5449_v33 = vpop.f32.mrf.mxu0  ;;  %v7522_v8 = vpop.f32.mrf.mxu1 }
 0x2a0   : > { %v5488_v57 = vpop.f32.mrf.mxu1  ;;  %v5616_v60 = vpop.f32.mrf.mxu0 }
 0x2a1   : > { %v9472_v40 = vadd.f32 %v5616_v60, %v5491_v36 }
 0x2a2   : > { %v7523_v14 = vpop.f32.mrf.mxu1  ;;  %v5618_v59 = vpop.f32.mrf.mxu0 }
 0x2a3   : > { %v9474_v3 = vadd.f32 %v5618_v59, %v5492_v15 }
 0x2a4   : > { %v5620_v30 = vpop.f32.mrf.mxu0  ;;  %v5657_v4 = vpop.f32.mrf.mxu1 }
 0x2a5   : > { %v9476_v16 = vadd.f32 %v5657_v4, %v5493_v2 }
 0x2a6   : > { %v5621_v20 = vpop.f32.mrf.mxu0  ;;  %v5659_v47 = vpop.f32.mrf.mxu1 }
 0x2a7   : > { %v9478_v27 = vadd.f32 %v5659_v47, %v5494_v41 }
 0x2a8   : > { %v5661_v24 = vpop.f32.mrf.mxu1  ;;  %v5698_v34 = vpop.f32.mrf.mxu0 }
 0x2a9   : > { %v9480_v32 = vadd.f32 %v5698_v34, %v5495_v19 }
 0x2aa   : > { %v5662_v39 = vpop.f32.mrf.mxu1  ;;  %v5700_v12 = vpop.f32.mrf.mxu0 }
 0x2ab   : > { %v9482_v22 = vadd.f32 %v5700_v12, %v5496_v6 }
 0x2ac   : > { %v5702_v23 = vpop.f32.mrf.mxu0  ;;  %v5739_v54 = vpop.f32.mrf.mxu1 }
 0x2ad   : > { %v9484_v50 = vadd.f32 %v5739_v54, %v5497_v62 }
 0x2ae   : > { %v5703_v11 = vpop.f32.mrf.mxu0  ;;  %v7528_v28 = vpop.f32.mrf.mxu1 }
 0x2b0   : > { %v5742_v58 = vpop.f32.mrf.mxu1  ;;  %v5870_v55 = vpop.f32.mrf.mxu0 }
 0x2b2   : > { %v7529_v46 = vpop.f32.mrf.mxu1  ;;  %v5872_v51 = vpop.f32.mrf.mxu0 }
 0x2b3   : > { %v5999_v46 = vadd.f32 %v5870_v55, %v9472_v40  ;;  %v9505_v55 = vpop.permute.xlu1 %7025 }
 0x2b4   : > { %v5874_v25 = vpop.f32.mrf.mxu0  ;;  %v5911_v61 = vpop.f32.mrf.mxu1 }
 0x2b6   : > { %v5875_v35 = vpop.f32.mrf.mxu0  ;;  %v9486_v21 = vpop.f32.mrf.mxu1 }
 0x2b8   : > { %v5915_v45 = vpop.f32.mrf.mxu1  ;;  %v9488_v7 = vpop.f32.mrf.mxu0 }
 0x2b9   : > { %v6000_v45 = vadd.f32 %v5872_v51, %v9474_v3  ;;  %v6003_v3 = vadd.f32 %v9488_v7, %v9480_v32 }
 0x2ba   : > { %v5916_v38 = vpop.f32.mrf.mxu1  ;;  %v9490_v43 = vpop.f32.mrf.mxu0 }
 0x2bc   : > { %v5956_v49 = vpop.f32.mrf.mxu0  ;;  %v9492_v48 = vpop.f32.mrf.mxu1 }
 0x2bd   : > { %v6005_v32 = vadd.f32 %v9492_v48, %v9484_v50 }
 0x2be   : > { %v5957_v52 = vpop.f32.mrf.mxu0  ;;  %v7534_v18 = vpop.f32.mrf.mxu1 }
 0x2bf   : > { %v6001_v18 = vadd.f32 %v5911_v61, %v9476_v16 }
 0x2c0   : > { %v5996_v42 = vpop.f32.mrf.mxu1  ;;  %v6124_v17 = vpop.f32.mrf.mxu0 }
 0x2c1   : > { %v6253_v38 = vadd.f32 %v6124_v17, %v5999_v46 }
 0x2c2   : > { %v7535_v0 = vpop.f32.mrf.mxu1  ;;  %v6126_v63 = vpop.f32.mrf.mxu0 }
 0x2c3   : > { %v6254_v42 = vadd.f32 %v6126_v63, %v6000_v45 }
 0x2c4   : > { %v6128_v36 = vpop.f32.mrf.mxu0  ;;  %v6165_v31 = vpop.f32.mrf.mxu1 }
 0x2c6   : > { %v6129_v5 = vpop.f32.mrf.mxu0  ;;  %v6167_v15 = vpop.f32.mrf.mxu1 }
 0x2c8   : > { %v6169_v26 = vpop.f32.mrf.mxu1  ;;  %v6206_v53 = vpop.f32.mrf.mxu0 }
 0x2c9   : > { %v6002_v26 = vadd.f32 %v9486_v21, %v9478_v27  ;;  %v6257_v27 = vadd.f32 %v6206_v53, %v6003_v3 }
 0x2ca   : > { %v6170_v2 = vpop.f32.mrf.mxu1  ;;  %v9494_v10 = vpop.f32.mrf.mxu0 }
 0x2cb   : > { %v6255_v2 = vadd.f32 %v6165_v31, %v6001_v18 }
 0x2cc   : > { %v6210_v56 = vpop.f32.mrf.mxu0  ;;  %v9496_v41 = vpop.f32.mrf.mxu1 }
 0x2ce   : > { %v6211_v9 = vpop.f32.mrf.mxu0  ;;  %v7540_v29 = vpop.f32.mrf.mxu1 }
 0x2cf   : > { %v6256_v9 = vadd.f32 %v6167_v15, %v6002_v26  ;;  %v7039_v29 = vpop.permute.xlu0 %7038 }
 0x2d0   : > { %v6250_v19 = vpop.f32.mrf.mxu1  ;;  %v6378_v37 = vpop.f32.mrf.mxu0 }
 0x2d1   : > { %v6507_v0 = vadd.f32 %v6378_v37, %v6253_v38  ;;  %v6004_v19 = vadd.f32 %v9490_v43, %v9482_v22 }
 0x2d2   : > { %v7541_v44 = vpop.f32.mrf.mxu1  ;;  %v6380_v6 = vpop.f32.mrf.mxu0 }
 0x2d3   : > { %v6508_v56 = vadd.f32 %v6380_v6, %v6254_v42  ;;  %v6258_v7 = vadd.f32 %v9494_v10, %v6004_v19 }
 0x2d4   : > { %v6382_v13 = vpop.f32.mrf.mxu0  ;;  %v6419_v1 = vpop.f32.mrf.mxu1 }
 0x2d5   : > { %v6509_v16 = vadd.f32 %v6419_v1, %v6255_v2 }
 0x2d6   : > { %v6383_v62 = vpop.f32.mrf.mxu0  ;;  %v6421_v33 = vpop.f32.mrf.mxu1 }
 0x2d7   : > { %v6510_v37 = vadd.f32 %v6421_v33, %v6256_v9 }
 0x2d8   : > { %v6423_v8 = vpop.f32.mrf.mxu1  ;;  %v6460_v57 = vpop.f32.mrf.mxu0 }
 0x2d9   : > { %v6511_v15 = vadd.f32 %v6460_v57, %v6257_v27 }
 0x2da   : > { %v6424_v60 = vpop.f32.mrf.mxu1  ;;  %v6462_v14 = vpop.f32.mrf.mxu0 }
 0x2db   : > { %v6259_v60 = vadd.f32 %v9496_v41, %v6005_v32  ;;  %v6512_v33 = vadd.f32 %v6462_v14, %v6258_v7 }
 0x2dc   : > { %v6464_v59 = vpop.f32.mrf.mxu0  ;;  %v9498_v30 = vpop.f32.mrf.mxu1 }
 0x2de   : > { %v6465_v4 = vpop.f32.mrf.mxu0  ;;  %v7546_v20 = vpop.f32.mrf.mxu1 }
 0x2e0   : > { %v6504_v47 = vpop.f32.mrf.mxu1  ;;  %v6632_v24 = vpop.f32.mrf.mxu0 }
 0x2e1   : > { %v6761_v40 = vadd.f32 %v6632_v24, %v6507_v0  ;;  %v6513_v47 = vadd.f32 %v9498_v30, %v6259_v60 }
 0x2e2   : > { %v7547_v34 = vpop.f32.mrf.mxu1  ;;  %v6634_v39 = vpop.f32.mrf.mxu0 }
 0x2e3   : > { %v6762_v61 = vadd.f32 %v6634_v39, %v6508_v56 }
 0x2e4   : > { %v6636_v12 = vpop.f32.mrf.mxu0  ;;  %v6673_v23 = vpop.f32.mrf.mxu1 }
 0x2e5   : > { %v6763_v44 = vadd.f32 %v6673_v23, %v6509_v16 }
 0x2e6   : > { %v6637_v54 = vpop.f32.mrf.mxu0  ;;  %v6675_v11 = vpop.f32.mrf.mxu1 }
 0x2e7   : > { %v6764_v8 = vadd.f32 %v6675_v11, %v6510_v37 }
 0x2e8   : > { %v6677_v28 = vpop.f32.mrf.mxu1  ;;  %v6714_v58 = vpop.f32.mrf.mxu0 }
 0x2e9   : > { %v6765_v59 = vadd.f32 %v6714_v58, %v6511_v15 }
 0x2ea   : > { %v6678_v25 = vpop.f32.mrf.mxu1  ;;  %v6716_v35 = vpop.f32.mrf.mxu0 }
 0x2eb   : > { %v6766_v24 = vadd.f32 %v6716_v35, %v6512_v33 }
 0x2ec   : > { %v6718_v49 = vpop.f32.mrf.mxu0  ;;  %v6755_v52 = vpop.f32.mrf.mxu1 }
 0x2ed   : > { %v6767_v54 = vadd.f32 %v6755_v52, %v6513_v47 }
 0x2ee   : > { %v6719_v36 = vpop.f32.mrf.mxu0  ;;  %v7552_v5 = vpop.f32.mrf.mxu1 }
 0x2f0   : > { %v6758_v51 = vpop.f32.mrf.mxu1  ;;  %v6886_v17 = vpop.f32.mrf.mxu0 }
 0x2f1   : > { %v7015_v63 = vadd.f32 %v6886_v17, %v6761_v40 }
 0x2f2   : > { %v7553_v21 = vpop.f32.mrf.mxu1  ;;  %v6888_v31 = vpop.f32.mrf.mxu0 }
 0x2f3   : > { %v7016_v6 = vadd.f32 %v6888_v31, %v6762_v61  ;;  %v7028_v13 = vmul.f32 %v9505_v55, %v7015_v63 }
 0x2f4   : > { %v6890_v1 = vpop.f32.mrf.mxu0  ;;  %v6927_v62 = vpop.f32.mrf.mxu1 }
 0x2f5   : > { %v7029_v22 = vmul.f32 %v9505_v55, %v7016_v6  ;;  %v7041_v43 = vadd.f32 %v7039_v29, %v7028_v13  ;;  %v7017_v53 = vadd.f32 %v6927_v62, %v6763_v44 }
 0x2f6   : > { %v6891_v50 = vpop.f32.mrf.mxu0  ;;  %v6929_v48 = vpop.f32.mrf.mxu1 }
 0x2f7   : > { %v7042_v10 = vadd.f32 %v7039_v29, %v7029_v22  ;;  %v7048_v57 = vmax.f32 %v7041_v43, 0.0  ;;  %v7030_v4 = vmul.f32 %v9505_v55, %v7017_v53  ;;  %v7018_v20 = vadd.f32 %v6929_v48, %v6764_v8 }
 0x2f8   : > { %v6931_v41 = vpop.f32.mrf.mxu1  ;;  %v6968_v14 = vpop.f32.mrf.mxu0 }
 0x2f9   : > { %v7049_v34 = vmax.f32 %v7042_v10, 0.0  ;;  %7055 = vst [vmem:[%s9521_s10] sm:$0xff] %v7048_v57  ;;  %v7043_v39 = vadd.f32 %v7039_v29, %v7030_v4  ;;  %v7031_v12 = vmul.f32 %v9505_v55, %v7018_v20  ;;  %v7019_v23 = vadd.f32 %v6968_v14, %v6765_v59 }
 0x2fa   : > { %v6932_v11 = vpop.f32.mrf.mxu1  ;;  %v6970_v28 = vpop.f32.mrf.mxu0 }
 0x2fb   : > { %7056 = vst [vmem:[%s9521_s10 + $0x8] sm:$0xff] %v7049_v34  ;;  %v7050_v58 = vmax.f32 %v7043_v39, 0.0  ;;  %v7044_v46 = vadd.f32 %v7039_v29, %v7031_v12  ;;  %v7032_v25 = vmul.f32 %v9505_v55, %v7019_v23  ;;  %v7020_v30 = vadd.f32 %v6970_v28, %v6766_v24 }
 0x2fc   : > { %v6972_v35 = vpop.f32.mrf.mxu0  ;;  %v7009_v45 = vpop.f32.mrf.mxu1 }
 0x2fd   : > { %7057 = vst [vmem:[%s9521_s10 + $0x10] sm:$0xff] %v7050_v58  ;;  %v7051_v38 = vmax.f32 %v7044_v46, 0.0  ;;  %v7045_v49 = vadd.f32 %v7039_v29, %v7032_v25  ;;  %v7033_v18 = vmul.f32 %v9505_v55, %v7020_v30  ;;  %v7021_v52 = vadd.f32 %v7009_v45, %v6767_v54 }
 0x2fe   : > { %v6973_v42 = vpop.f32.mrf.mxu0  ;;  %v7558_v0 = vpop.f32.mrf.mxu1 }
 0x2ff   : > { %7058 = vst [vmem:[%s9521_s10 + $0x18] sm:$0xff] %v7051_v38  ;;  %v7052_v36 = vmax.f32 %v7045_v49, 0.0  ;;  %v7046_v5 = vadd.f32 %v7039_v29, %v7033_v18  ;;  %v7034_v26 = vmul.f32 %v9505_v55, %v7021_v52 }
 0x300   : > { %v7012_v2 = vpop.f32.mrf.mxu1 }
 0x301   : > { %7059 = vst [vmem:[%s9521_s10 + $0x20] sm:$0xff] %v7052_v36  ;;  %v7053_v56 = vmax.f32 %v7046_v5, 0.0  ;;  %v7047_v40 = vadd.f32 %v7039_v29, %v7034_v26 }
 0x302   : > { %v7559_v3 = vpop.f32.mrf.mxu1 }
 0x303   : > { %7060 = vst [vmem:[%s9521_s10 + $0x28] sm:$0xff] %v7053_v56  ;;  %v7054_v51 = vmax.f32 %v7047_v40, 0.0 }
 0x305   : > { %7062 = vst.msk [vmem:[%s9521_s10 + $0x30] sm:$0xff] %vm7061_vm1, %v7054_v51 }
 0x306 PF: > { %s14_s15 = sadd.s32 1, %s7629_s15  }
 0x307   : > { %p11_p4 = scmp.ge.s32.totalorder %s14_s15, 4  }
 0x309   :  { %13 = sbr.rel (!%p11_p4) target bundleno = 1 (0x1), region = 92 }

</bundles_post_ra>
